<compile_context>
chip_gen: v5e
topology: v5e:2x2
jax: 0.10.0
libtpu: 0.0.40
codegen_flags: <defaults>
</compile_context>

<pallas_src>
import functools

import jax
import jax.numpy as jnp
import numpy as np
from jax.experimental import pallas as pl
from jax.experimental.pallas import tpu as pltpu

LN_EPS = 1e-5   # PyTorch nn.LayerNorm default
LANE = 128

PARAM_ORDER = (
    "ln_q_g", "ln_q_b", "ln_kv_g", "ln_kv_b",
    "wq", "bq", "wk", "bk", "wv", "bv", "wo", "bo",
    "ln_m_g", "ln_m_b", "w1", "b1", "w2", "b2",
)


def _round_up(x, m):
    return ((x + m - 1) // m) * m


# ----------------------------- shared math helpers -----------------------------

def _layernorm(x, g, b):
    # Reference-side LayerNorm (unpadded).
    mu = jnp.mean(x, axis=-1, keepdims=True)
    var = jnp.mean((x - mu) ** 2, axis=-1, keepdims=True)
    return (x - mu) * jax.lax.rsqrt(var + LN_EPS) * g + b


def _layernorm_padded(x, g, b, d_real):
    """LayerNorm over the last (lane-padded) axis; stats use only the first d_real lanes.

    Requires x == 0 in the padded lanes.  g/b are zero-padded, so the output is
    exactly zero in the padded lanes as well (keeps the padding invariant alive
    across residuals / layers)."""
    mean = jnp.sum(x, axis=-1, keepdims=True) * (1.0 / d_real)
    lane = jax.lax.broadcasted_iota(jnp.int32, x.shape, x.ndim - 1)
    xc = jnp.where(lane < d_real, x - mean, 0.0)
    var = jnp.sum(xc * xc, axis=-1, keepdims=True) * (1.0 / d_real)
    return xc * jax.lax.rsqrt(var + LN_EPS) * g + b


def _erf_approx(x):
    # Abramowitz & Stegun 7.1.26 polynomial (max abs err ~1.5e-7); exp/abs/where only,
    # lowers cleanly in Mosaic; matches exact erf to f32 noise.
    a1, a2, a3, a4, a5 = 0.254829592, -0.284496736, 1.421413741, -1.453152027, 1.061405429
    p = 0.3275911
    ax = jnp.abs(x)
    t = 1.0 / (1.0 + p * ax)
    y = 1.0 - (((((a5 * t + a4) * t + a3) * t + a2) * t + a1) * t) * jnp.exp(-ax * ax)
    return jnp.where(x >= 0, y, -y)


def _gelu_exact_kernel(x):
    # PyTorch nn.GELU() (exact, erf-based), polynomial erf inside the kernel.
    return 0.5 * x * (1.0 + _erf_approx(x * (1.0 / np.sqrt(2.0))))


def _gelu_exact_ref(x):
    return 0.5 * x * (1.0 + jax.lax.erf(x * (1.0 / np.sqrt(2.0))))


# ------------------------------- Pallas kernel ---------------------------------

def _perceiver_kernel(x_ref, lat_ref,
                      ln_q_g, ln_q_b, ln_kv_g, ln_kv_b,
                      wq, bq, wk, bk, wv, bv, wo, bo,
                      ln_m_g, ln_m_b, w1, b1, w2, b2,
                      out_ref, acc_ref,
                      *, e_real, c_real, cross_heads, self_heads,
                      hp_cross, hp_self, n_sub):
    layer = pl.program_id(1)   # encoder layer index (0 -> layer_1, >=1 -> layer_n weights)

    @pl.when(layer == 0)
    def _init():
        # Latent becomes VMEM-resident state for this batch chunk's full layer sweep.
        acc_ref[...] = lat_ref[...].astype(jnp.float32)

    def run_sublayer(s, kv_in, kv_real_dim, num_heads, hp, self_attn):
        q_in = acc_ref[...]                         # (Bc, N, P) f32, pad lanes == 0
        b_sz, n_q, p_dim = q_in.shape
        qw_used = num_heads * hp                    # head-tiled QKV width (mult. of 128)
        dh_real = e_real // num_heads
        scale = 1.0 / float(np.sqrt(dh_real))

        # Per-sub-layer weight views (static s -> static slices, loaded once).
        wq_s, wk_s, wv_s, wo_s = wq[0, s], wk[0, s], wv[0, s], wo[0, s]
        w1_s, w2_s = w1[0, s], w2[0, s]
        bq_s, bk_s, bv_s = bq[0, s], bk[0, s], bv[0, s]
        bo_s, b1_s, b2_s = bo[0, s], b1[0, s], b2[0, s]

        # Pre-norm(s).  SelfAttention in the reference module has a single pre-norm,
        # so it is computed once and reused for both Q and KV on the self path.
        ln_q = _layernorm_padded(q_in, ln_q_g[0, s], ln_q_b[0, s], e_real)
        if self_attn:
            ln_kv = ln_q
            kv_in = q_in
        else:
            ln_kv = _layernorm_padded(kv_in, ln_kv_g[0, s], ln_kv_b[0, s], kv_real_dim)
        m_kv = kv_in.shape[1]

        # bf16 MXU inputs, f32 accumulation (weights stored bf16; zero padding exact).
        ln_q_bf = ln_q.reshape(b_sz * n_q, p_dim).astype(jnp.bfloat16)
        ln_kv_bf = ln_kv.reshape(b_sz * m_kv, p_dim).astype(jnp.bfloat16)

        q = jnp.dot(ln_q_bf, wq_s, preferred_element_type=jnp.float32) + bq_s
        k = jnp.dot(ln_kv_bf, wk_s, preferred_element_type=jnp.float32) + bk_s
        v = jnp.dot(ln_kv_bf, wv_s, preferred_element_type=jnp.float32) + bv_s
        qb = q.reshape(b_sz, n_q, -1).astype(jnp.bfloat16)
        kb = k.reshape(b_sz, m_kv, -1).astype(jnp.bfloat16)
        vb = v.reshape(b_sz, m_kv, -1).astype(jnp.bfloat16)

        # Each head owns the 128-lane tile [h*hp, (h+1)*hp) -> aligned slices only.
        head_outs = []
        for h in range(num_heads):
            lo = h * hp
            qh = qb[:, :, lo:lo + hp]
            kh = kb[:, :, lo:lo + hp]
            vh = vb[:, :, lo:lo + hp]
            sc = jnp.einsum("bnd,bmd->bnm", qh, kh,
                            preferred_element_type=jnp.float32) * scale
            sc = sc - jnp.max(sc, axis=-1, keepdims=True)
            p = jnp.exp(sc)
            p = p * pl.reciprocal(jnp.sum(p, axis=-1, keepdims=True), approx=True)
            oh = jnp.einsum("bnm,bmd->bnd", p.astype(jnp.bfloat16), vh,
                            preferred_element_type=jnp.float32)
            head_outs.append(oh.astype(jnp.bfloat16))

        # Lane-aligned concat (each piece is a full 128-lane tile) followed by ONE
        # full-K out-projection matmul (no per-head K=dh folds).
        o_all = (head_outs[0] if num_heads == 1
                 else jnp.concatenate(head_outs, axis=-1))          # (Bc, N, qw_used)
        attn = jnp.dot(o_all.reshape(b_sz * n_q, qw_used), wo_s[:qw_used, :],
                       preferred_element_type=jnp.float32) + bo_s

        h1 = attn.reshape(b_sz, n_q, p_dim) + q_in      # residual 1 (dropout p=0)

        # MLP: LayerNorm -> Linear -> GELU -> Linear, + residual.
        ln_m = _layernorm_padded(h1, ln_m_g[0, s], ln_m_b[0, s], e_real)
        m = jnp.dot(ln_m.reshape(b_sz * n_q, p_dim).astype(jnp.bfloat16), w1_s,
                    preferred_element_type=jnp.float32) + b1_s
        m = _gelu_exact_kernel(m)
        m = jnp.dot(m.astype(jnp.bfloat16), w2_s,
                    preferred_element_type=jnp.float32) + b2_s

        acc_ref[...] = m.reshape(b_sz, n_q, p_dim) + h1  # residual 2 -> new latent state

    # Sub-layer 0: cross-attention against the (lane-padded, bf16) encoder input.
    # TODO(synk): for Perceiver-scale M the cross-attention KV should be flash-tiled
    # over a grid axis with an online-softmax accumulator; at these sizes the whole
    # (B, M, P) slab fits VMEM.
    run_sublayer(0, x_ref[...].astype(jnp.float32), c_real, cross_heads, hp_cross,
                 self_attn=False)
    # Sub-layers 1..n_sub-1: the self-attention block (unrolled, no grid axis).
    for s in range(1, n_sub):
        run_sublayer(s, None, e_real, self_heads, hp_self, self_attn=True)

    @pl.when(layer == pl.num_programs(1) - 1)
    def _finalize():
        out_ref[...] = acc_ref[...].astype(out_ref.dtype)


# --------------------------- padding / weight packing ---------------------------

def _pad2(a, rows, cols, dtype):
    return jnp.pad(a, ((0, rows - a.shape[0]), (0, cols - a.shape[1]))).astype(dtype)


def _pad_qkv_weight(w, num_heads, p_in, hp, qw_max):
    """(in_dim, E) -> (p_in, qw_max) bf16; head h's dh real cols at lane offset h*hp."""
    in_dim, e = w.shape
    dh = e // num_heads
    w3 = jnp.pad(w.reshape(in_dim, num_heads, dh),
                 ((0, p_in - in_dim), (0, 0), (0, hp - dh)))
    w2d = w3.reshape(p_in, num_heads * hp)
    return jnp.pad(w2d, ((0, 0), (0, qw_max - num_heads * hp))).astype(jnp.bfloat16)


def _pad_qkv_bias(b, num_heads, hp, qw_max):
    e = b.shape[-1]
    dh = e // num_heads
    b3 = jnp.pad(b.reshape(1, num_heads, dh), ((0, 0), (0, 0), (0, hp - dh)))
    b2d = b3.reshape(1, num_heads * hp)
    return jnp.pad(b2d, ((0, 0), (0, qw_max - num_heads * hp))).astype(jnp.float32)


def _pad_out_weight(w, num_heads, p, hp, qw_max):
    """(E, E) -> (qw_max, p) bf16; head h's dh real rows at sublane offset h*hp."""
    e_in, e_out = w.shape
    dh = e_in // num_heads
    w3 = jnp.pad(w.reshape(num_heads, dh, e_out),
                 ((0, 0), (0, hp - dh), (0, p - e_out)))
    w2d = w3.reshape(num_heads * hp, p)
    return jnp.pad(w2d, ((0, qw_max - num_heads * hp), (0, 0))).astype(jnp.bfloat16)


def _pad_layer_params(p, num_heads, pad_dim, hp, qw_max):
    f32, bf16 = jnp.float32, jnp.bfloat16
    return {
        "ln_q_g": _pad2(p["ln_q_g"], 1, pad_dim, f32),
        "ln_q_b": _pad2(p["ln_q_b"], 1, pad_dim, f32),
        "ln_kv_g": _pad2(p["ln_kv_g"], 1, pad_dim, f32),
        "ln_kv_b": _pad2(p["ln_kv_b"], 1, pad_dim, f32),
        "wq": _pad_qkv_weight(p["wq"], num_heads, pad_dim, hp, qw_max),
        "bq": _pad_qkv_bias(p["bq"], num_heads, hp, qw_max),
        "wk": _pad_qkv_weight(p["wk"], num_heads, pad_dim, hp, qw_max),
        "bk": _pad_qkv_bias(p["bk"], num_heads, hp, qw_max),
        "wv": _pad_qkv_weight(p["wv"], num_heads, pad_dim, hp, qw_max),
        "bv": _pad_qkv_bias(p["bv"], num_heads, hp, qw_max),
        "wo": _pad_out_weight(p["wo"], num_heads, pad_dim, hp, qw_max),
        "bo": _pad2(p["bo"], 1, pad_dim, f32),
        "ln_m_g": _pad2(p["ln_m_g"], 1, pad_dim, f32),
        "ln_m_b": _pad2(p["ln_m_b"], 1, pad_dim, f32),
        "w1": _pad2(p["w1"], pad_dim, pad_dim, bf16),
        "b1": _pad2(p["b1"], 1, pad_dim, f32),
        "w2": _pad2(p["w2"], pad_dim, pad_dim, bf16),
        "b2": _pad2(p["b2"], 1, pad_dim, f32),
    }


def _pack_padded_params(variants, pad_dim, cross_heads, self_heads,
                        hp_cross, hp_self, qw_max):
    """Stack params into shape (n_variants, n_sub, *padded_shape) per name."""
    per_variant = []
    for lp in variants:
        subs = [_pad_layer_params(lp["cross"], cross_heads, pad_dim, hp_cross, qw_max)]
        subs += [_pad_layer_params(sp, self_heads, pad_dim, hp_self, qw_max)
                 for sp in lp["self"]]
        per_variant.append(subs)
    return [jnp.stack([jnp.stack([s[name] for s in subs]) for subs in per_variant])
            for name in PARAM_ORDER]


# ------------------------------ full encoder -------------------------------------

def perceiver_encoder(x, latent, layer_1, layer_n, num_layers,
                      num_cross_heads, num_self_heads, *, batch_chunks=1):
    """Fused Perceiver encoder forward. x: (B, M, C), latent: (N, E)."""
    # TODO(synk): InputAdapter is abstract in the reference; modeled as identity here.
    # TODO(synk): pad_mask / attn_mask are not supported (None in this synthetic setup).
    b, m, c = x.shape
    n_lat, e = latent.shape
    assert b % batch_chunks == 0
    b_blk = b // batch_chunks
    pad_dim = _round_up(max(e, c), LANE)
    hp_cross = _round_up(max(1, e // num_cross_heads), LANE)   # per-head lane tile
    hp_self = _round_up(max(1, e // num_self_heads), LANE)
    qw_max = max(num_cross_heads * hp_cross, num_self_heads * hp_self)
    n_sub = 1 + len(layer_1["self"])

    variants = [layer_1] if num_layers == 1 else [layer_1, layer_n]
    n_var = len(variants)
    weights = _pack_padded_params(variants, pad_dim, num_cross_heads, num_self_heads,
                                  hp_cross, hp_self, qw_max)

    # Encoder input kept bf16 in HBM (halves the dominant DMA); latent stays f32.
    x_pad = jnp.pad(x, ((0, 0), (0, 0), (0, pad_dim - c))).astype(jnp.bfloat16)
    lat_pad = jnp.broadcast_to(
        jnp.pad(latent, ((0, 0), (0, pad_dim - e)))[None],
        (b, n_lat, pad_dim)).astype(jnp.float32)

    def w_index_map(bi, l):
        # layer 0 -> layer_1 weights, layers >= 1 -> layer_n weights; constant for
        # l >= 1, so layer_n weights are not re-DMA'd every layer.
        return (jnp.minimum(l, n_var - 1), 0, 0, 0)

    w_specs = [pl.BlockSpec((1,) + w.shape[1:], w_index_map) for w in weights]

    kernel = functools.partial(
        _perceiver_kernel, e_real=e, c_real=c,
        cross_heads=num_cross_heads, self_heads=num_self_heads,
        hp_cross=hp_cross, hp_self=hp_self, n_sub=n_sub)

    out = pl.pallas_call(
        kernel,
        out_shape=jax.ShapeDtypeStruct((b, n_lat, pad_dim), jnp.float32),
        grid_spec=pltpu.PrefetchScalarGridSpec(
            num_scalar_prefetch=0,
            grid=(batch_chunks, num_layers),
            in_specs=[pl.BlockSpec((b_blk, m, pad_dim), lambda bi, l: (bi, 0, 0)),
                      pl.BlockSpec((b_blk, n_lat, pad_dim), lambda bi, l: (bi, 0, 0))]
                     + w_specs,
            out_specs=pl.BlockSpec((b_blk, n_lat, pad_dim), lambda bi, l: (bi, 0, 0)),
            scratch_shapes=[pltpu.VMEM((b_blk, n_lat, pad_dim), jnp.float32)],
        ),
        compiler_params=pltpu.CompilerParams(
            # Batch chunks are independent (usable by the 2nd TensorCore on v7x);
            # the layer axis carries the VMEM-resident latent state -> sequential.
            dimension_semantics=("parallel", "arbitrary"),
        ),
    )(x_pad, lat_pad, *weights)

    return out[:, :, :e]


# ------------------------------ parameter setup ---------------------------------

def _init_attn_mlp_params(key, e, c):
    ks = jax.random.split(key, 10)
    s = 0.02

    def w(k, shape):
        return jax.random.normal(k, shape, jnp.float32) * s

    return {
        "ln_q_g": jnp.ones((1, e), jnp.float32),
        "ln_q_b": jnp.zeros((1, e), jnp.float32),
        "ln_kv_g": jnp.ones((1, c), jnp.float32),
        "ln_kv_b": jnp.zeros((1, c), jnp.float32),
        "wq": w(ks[0], (e, e)), "bq": w(ks[1], (1, e)),
        "wk": w(ks[2], (c, e)), "bk": w(ks[3], (1, e)),
        "wv": w(ks[4], (c, e)), "bv": w(ks[5], (1, e)),
        "wo": w(ks[6], (e, e)), "bo": jnp.zeros((1, e), jnp.float32),
        "ln_m_g": jnp.ones((1, e), jnp.float32),
        "ln_m_b": jnp.zeros((1, e), jnp.float32),
        "w1": w(ks[7], (e, e)), "b1": w(ks[8], (1, e)),
        "w2": w(ks[9], (e, e)), "b2": jnp.zeros((1, e), jnp.float32),
    }


def _init_perceiver_layer(key, e, c, num_self_layers):
    keys = jax.random.split(key, 1 + num_self_layers)
    return {
        "cross": _init_attn_mlp_params(keys[0], e, c),
        "self": [_init_attn_mlp_params(k, e, e) for k in keys[1:]],
    }


# ------------------------------ pure-JAX reference -------------------------------

def _ref_attn_mlp_layer(q_in, kv_in, params, num_heads, self_attn):
    ln_q = _layernorm(q_in, params["ln_q_g"][0], params["ln_q_b"][0])
    if self_attn:
        ln_kv = ln_q    # SelfAttention has a single pre-norm in the PyTorch module
    else:
        ln_kv = _layernorm(kv_in, params["ln_kv_g"][0], params["ln_kv_b"][0])
    q = ln_q @ params["wq"] + params["bq"][0]
    k = ln_kv @ params["wk"] + params["bk"][0]
    v = ln_kv @ params["wv"] + params["bv"][0]
    B, N, E = q.shape
    M = k.shape[1]
    dh = E // num_heads
    qh = q.reshape(B, N, num_heads, dh).transpose(0, 2, 1, 3)
    kh = k.reshape(B, M, num_heads, dh).transpose(0, 2, 1, 3)
    vh = v.reshape(B, M, num_heads, dh).transpose(0, 2, 1, 3)
    s = jnp.einsum("bhnd,bhmd->bhnm", qh, kh) / jnp.sqrt(jnp.float32(dh))
    p = jax.nn.softmax(s, axis=-1)
    o = jnp.einsum("bhnm,bhmd->bhnd", p, vh).transpose(0, 2, 1, 3).reshape(B, N, E)
    attn = o @ params["wo"] + params["bo"][0]
    h1 = attn + q_in
    ln_m = _layernorm(h1, params["ln_m_g"][0], params["ln_m_b"][0])
    mm = _gelu_exact_ref(ln_m @ params["w1"] + params["b1"][0])
    mm = mm @ params["w2"] + params["b2"][0]
    return mm + h1


def _ref_perceiver_encoder(x, latent, layer_1, layer_n, num_layers,
                           num_cross_heads, num_self_heads):
    b = x.shape[0]
    lat = jnp.broadcast_to(latent[None], (b,) + latent.shape)

    def apply_layer(lat, lp):
        lat = _ref_attn_mlp_layer(lat, x, lp["cross"], num_cross_heads, False)
        for sp in lp["self"]:
            lat = _ref_attn_mlp_layer(lat, lat, sp, num_self_heads, True)
        return lat

    lat = apply_layer(lat, layer_1)
    for _ in range(num_layers - 1):
        lat = apply_layer(lat, layer_n)
    return lat


# ------------------------------------ main ----------------------------------------

if __name__ == "__main__":
    B, M, C_IN = 2, 16, 32          # batch, input seq len, input channels
    N_LAT, E = 8, 32                # latent_shape = (N, C_latent)
    NUM_LAYERS = 2
    CROSS_HEADS = 4
    SELF_HEADS = 4
    SELF_PER_BLOCK = 2

    root = jax.random.PRNGKey(0)
    kx, klat, kl1, kln = jax.random.split(root, 4)

    x = jax.random.normal(kx, (B, M, C_IN), jnp.float32)
    # latent ~ N(0, 0.02) clamped to [-2, 2] (matches _init_parameters).
    latent = jnp.clip(jax.random.normal(klat, (N_LAT, E), jnp.float32) * 0.02, -2.0, 2.0)

    layer_1 = _init_perceiver_layer(kl1, E, C_IN, SELF_PER_BLOCK)
    layer_n = _init_perceiver_layer(kln, E, C_IN, SELF_PER_BLOCK)

    out = perceiver_encoder(x, latent, layer_1, layer_n,
                            NUM_LAYERS, CROSS_HEADS, SELF_HEADS)
    out = jax.block_until_ready(out)

    ref = _ref_perceiver_encoder(x, latent, layer_1, layer_n,
                                 NUM_LAYERS, CROSS_HEADS, SELF_HEADS)
    ref = jax.block_until_ready(ref)

    # bf16 MXU inputs -> f32 reference parity within mixed-precision tolerance.
    np.testing.assert_allclose(np.asarray(out), np.asarray(ref), rtol=2e-2, atol=5e-3)
    print("KERNEL_OK")
</pallas_src>

<mosaic_0001>
module attributes {stable_mosaic.version = 11 : i64} {
  func.func @_perceiver_kernel(%arg0: i32, %arg1: i32, %arg2: memref<2x16x128xbf16, #tpu.memory_space<vmem>>, %arg3: memref<2x8x128xf32, #tpu.memory_space<vmem>>, %arg4: memref<1x3x1x128xf32, #tpu.memory_space<vmem>>, %arg5: memref<1x3x1x128xf32, #tpu.memory_space<vmem>>, %arg6: memref<1x3x1x128xf32, #tpu.memory_space<vmem>>, %arg7: memref<1x3x1x128xf32, #tpu.memory_space<vmem>>, %arg8: memref<1x3x128x512xbf16, #tpu.memory_space<vmem>>, %arg9: memref<1x3x1x512xf32, #tpu.memory_space<vmem>>, %arg10: memref<1x3x128x512xbf16, #tpu.memory_space<vmem>>, %arg11: memref<1x3x1x512xf32, #tpu.memory_space<vmem>>, %arg12: memref<1x3x128x512xbf16, #tpu.memory_space<vmem>>, %arg13: memref<1x3x1x512xf32, #tpu.memory_space<vmem>>, %arg14: memref<1x3x512x128xbf16, #tpu.memory_space<vmem>>, %arg15: memref<1x3x1x128xf32, #tpu.memory_space<vmem>>, %arg16: memref<1x3x1x128xf32, #tpu.memory_space<vmem>>, %arg17: memref<1x3x1x128xf32, #tpu.memory_space<vmem>>, %arg18: memref<1x3x128x128xbf16, #tpu.memory_space<vmem>>, %arg19: memref<1x3x1x128xf32, #tpu.memory_space<vmem>>, %arg20: memref<1x3x128x128xbf16, #tpu.memory_space<vmem>>, %arg21: memref<1x3x1x128xf32, #tpu.memory_space<vmem>>, %arg22: memref<2x8x128xf32, #tpu.memory_space<vmem>>, %arg23: memref<2x8x128xf32, #tpu.memory_space<vmem>>) attributes {dimension_semantics = [#tpu.dimension_semantics<parallel>, #tpu.dimension_semantics<arbitrary>], iteration_bounds = array<i64: 1, 2>, scalar_prefetch = 0 : i64, scratch_operands = 1 : i64, tpu.core_type = #tpu.core_type<tc>, window_params = [{transform_indices = @transform_0, window_bounds = array<i64: 2, 16, 128>}, {transform_indices = @transform_1, window_bounds = array<i64: 2, 8, 128>}, {transform_indices = @transform_2, window_bounds = array<i64: 1, 3, 1, 128>}, {transform_indices = @transform_3, window_bounds = array<i64: 1, 3, 1, 128>}, {transform_indices = @transform_4, window_bounds = array<i64: 1, 3, 1, 128>}, {transform_indices = @transform_5, window_bounds = array<i64: 1, 3, 1, 128>}, {transform_indices = @transform_6, window_bounds = array<i64: 1, 3, 128, 512>}, {transform_indices = @transform_7, window_bounds = array<i64: 1, 3, 1, 512>}, {transform_indices = @transform_8, window_bounds = array<i64: 1, 3, 128, 512>}, {transform_indices = @transform_9, window_bounds = array<i64: 1, 3, 1, 512>}, {transform_indices = @transform_10, window_bounds = array<i64: 1, 3, 128, 512>}, {transform_indices = @transform_11, window_bounds = array<i64: 1, 3, 1, 512>}, {transform_indices = @transform_12, window_bounds = array<i64: 1, 3, 512, 128>}, {transform_indices = @transform_13, window_bounds = array<i64: 1, 3, 1, 128>}, {transform_indices = @transform_14, window_bounds = array<i64: 1, 3, 1, 128>}, {transform_indices = @transform_15, window_bounds = array<i64: 1, 3, 1, 128>}, {transform_indices = @transform_16, window_bounds = array<i64: 1, 3, 128, 128>}, {transform_indices = @transform_17, window_bounds = array<i64: 1, 3, 1, 128>}, {transform_indices = @transform_18, window_bounds = array<i64: 1, 3, 128, 128>}, {transform_indices = @transform_19, window_bounds = array<i64: 1, 3, 1, 128>}, {transform_indices = @transform_20, window_bounds = array<i64: 2, 8, 128>}]} {
    %c0_i32 = arith.constant 0 : i32
    %0 = arith.cmpi eq, %arg1, %c0_i32 : i32
    %1 = arith.extui %0 : i1 to i32
    %c0_i32_0 = arith.constant 0 : i32
    %2 = arith.cmpi ne, %1, %c0_i32_0 : i32
    scf.if %2 {
      %c0_390 = arith.constant 0 : index
      %c0_391 = arith.constant 0 : index
      %c0_392 = arith.constant 0 : index
      %762 = vector.load %arg3[%c0_390, %c0_391, %c0_392] : memref<2x8x128xf32, #tpu.memory_space<vmem>>, vector<2x8x128xf32>
      %c0_393 = arith.constant 0 : index
      %c0_394 = arith.constant 0 : index
      %c0_395 = arith.constant 0 : index
      %763 = vector.load %arg23[%c0_393, %c0_394, %c0_395] : memref<2x8x128xf32, #tpu.memory_space<vmem>>, vector<2x8x128xf32>
      tpu.vector_store %arg23[%c0_393, %c0_394, %c0_395], %762 {strides = array<i32>} : memref<2x8x128xf32, #tpu.memory_space<vmem>>, vector<2x8x128xf32>,
    } else {
    }
    %c0 = arith.constant 0 : index
    %c0_1 = arith.constant 0 : index
    %c0_2 = arith.constant 0 : index
    %3 = vector.load %arg2[%c0, %c0_1, %c0_2] : memref<2x16x128xbf16, #tpu.memory_space<vmem>>, vector<2x16x128xbf16>
    %4 = arith.extf %3 : vector<2x16x128xbf16> to vector<2x16x128xf32>
    %c0_3 = arith.constant 0 : index
    %c0_4 = arith.constant 0 : index
    %c0_5 = arith.constant 0 : index
    %5 = vector.load %arg23[%c0_3, %c0_4, %c0_5] : memref<2x8x128xf32, #tpu.memory_space<vmem>>, vector<2x8x128xf32>
    %c0_6 = arith.constant 0 : index
    %c0_7 = arith.constant 0 : index
    %c0_8 = arith.constant 0 : index
    %c0_9 = arith.constant 0 : index
    %6 = vector.load %arg8[%c0_6, %c0_7, %c0_8, %c0_9] : memref<1x3x128x512xbf16, #tpu.memory_space<vmem>>, vector<1x1x128x512xbf16>
    %7 = vector.shape_cast %6 : vector<1x1x128x512xbf16> to vector<128x512xbf16>
    %c0_10 = arith.constant 0 : index
    %c0_11 = arith.constant 0 : index
    %c0_12 = arith.constant 0 : index
    %c0_13 = arith.constant 0 : index
    %8 = vector.load %arg10[%c0_10, %c0_11, %c0_12, %c0_13] : memref<1x3x128x512xbf16, #tpu.memory_space<vmem>>, vector<1x1x128x512xbf16>
    %9 = vector.shape_cast %8 : vector<1x1x128x512xbf16> to vector<128x512xbf16>
    %c0_14 = arith.constant 0 : index
    %c0_15 = arith.constant 0 : index
    %c0_16 = arith.constant 0 : index
    %c0_17 = arith.constant 0 : index
    %10 = vector.load %arg12[%c0_14, %c0_15, %c0_16, %c0_17] : memref<1x3x128x512xbf16, #tpu.memory_space<vmem>>, vector<1x1x128x512xbf16>
    %11 = vector.shape_cast %10 : vector<1x1x128x512xbf16> to vector<128x512xbf16>
    %c0_18 = arith.constant 0 : index
    %c0_19 = arith.constant 0 : index
    %c0_20 = arith.constant 0 : index
    %c0_21 = arith.constant 0 : index
    %12 = vector.load %arg14[%c0_18, %c0_19, %c0_20, %c0_21] : memref<1x3x512x128xbf16, #tpu.memory_space<vmem>>, vector<1x1x512x128xbf16>
    %13 = vector.shape_cast %12 : vector<1x1x512x128xbf16> to vector<512x128xbf16>
    %c0_22 = arith.constant 0 : index
    %c0_23 = arith.constant 0 : index
    %c0_24 = arith.constant 0 : index
    %c0_25 = arith.constant 0 : index
    %14 = vector.load %arg18[%c0_22, %c0_23, %c0_24, %c0_25] : memref<1x3x128x128xbf16, #tpu.memory_space<vmem>>, vector<1x1x128x128xbf16>
    %15 = vector.shape_cast %14 : vector<1x1x128x128xbf16> to vector<128x128xbf16>
    %c0_26 = arith.constant 0 : index
    %c0_27 = arith.constant 0 : index
    %c0_28 = arith.constant 0 : index
    %c0_29 = arith.constant 0 : index
    %16 = vector.load %arg20[%c0_26, %c0_27, %c0_28, %c0_29] : memref<1x3x128x128xbf16, #tpu.memory_space<vmem>>, vector<1x1x128x128xbf16>
    %17 = vector.shape_cast %16 : vector<1x1x128x128xbf16> to vector<128x128xbf16>
    %c0_30 = arith.constant 0 : index
    %c0_31 = arith.constant 0 : index
    %c0_32 = arith.constant 0 : index
    %c0_33 = arith.constant 0 : index
    %18 = vector.load %arg9[%c0_30, %c0_31, %c0_32, %c0_33] : memref<1x3x1x512xf32, #tpu.memory_space<vmem>>, vector<1x1x1x512xf32>
    %19 = vector.shape_cast %18 : vector<1x1x1x512xf32> to vector<1x512xf32>
    %c0_34 = arith.constant 0 : index
    %c0_35 = arith.constant 0 : index
    %c0_36 = arith.constant 0 : index
    %c0_37 = arith.constant 0 : index
    %20 = vector.load %arg11[%c0_34, %c0_35, %c0_36, %c0_37] : memref<1x3x1x512xf32, #tpu.memory_space<vmem>>, vector<1x1x1x512xf32>
    %21 = vector.shape_cast %20 : vector<1x1x1x512xf32> to vector<1x512xf32>
    %c0_38 = arith.constant 0 : index
    %c0_39 = arith.constant 0 : index
    %c0_40 = arith.constant 0 : index
    %c0_41 = arith.constant 0 : index
    %22 = vector.load %arg13[%c0_38, %c0_39, %c0_40, %c0_41] : memref<1x3x1x512xf32, #tpu.memory_space<vmem>>, vector<1x1x1x512xf32>
    %23 = vector.shape_cast %22 : vector<1x1x1x512xf32> to vector<1x512xf32>
    %c0_42 = arith.constant 0 : index
    %c0_43 = arith.constant 0 : index
    %c0_44 = arith.constant 0 : index
    %c0_45 = arith.constant 0 : index
    %24 = vector.load %arg15[%c0_42, %c0_43, %c0_44, %c0_45] : memref<1x3x1x128xf32, #tpu.memory_space<vmem>>, vector<1x1x1x128xf32>
    %25 = vector.shape_cast %24 : vector<1x1x1x128xf32> to vector<1x128xf32>
    %c0_46 = arith.constant 0 : index
    %c0_47 = arith.constant 0 : index
    %c0_48 = arith.constant 0 : index
    %c0_49 = arith.constant 0 : index
    %26 = vector.load %arg19[%c0_46, %c0_47, %c0_48, %c0_49] : memref<1x3x1x128xf32, #tpu.memory_space<vmem>>, vector<1x1x1x128xf32>
    %27 = vector.shape_cast %26 : vector<1x1x1x128xf32> to vector<1x128xf32>
    %c0_50 = arith.constant 0 : index
    %c0_51 = arith.constant 0 : index
    %c0_52 = arith.constant 0 : index
    %c0_53 = arith.constant 0 : index
    %28 = vector.load %arg21[%c0_50, %c0_51, %c0_52, %c0_53] : memref<1x3x1x128xf32, #tpu.memory_space<vmem>>, vector<1x1x1x128xf32>
    %29 = vector.shape_cast %28 : vector<1x1x1x128xf32> to vector<1x128xf32>
    %c0_54 = arith.constant 0 : index
    %c0_55 = arith.constant 0 : index
    %c0_56 = arith.constant 0 : index
    %c0_57 = arith.constant 0 : index
    %30 = vector.load %arg4[%c0_54, %c0_55, %c0_56, %c0_57] : memref<1x3x1x128xf32, #tpu.memory_space<vmem>>, vector<1x1x1x128xf32>
    %31 = vector.shape_cast %30 : vector<1x1x1x128xf32> to vector<1x128xf32>
    %c0_58 = arith.constant 0 : index
    %c0_59 = arith.constant 0 : index
    %c0_60 = arith.constant 0 : index
    %c0_61 = arith.constant 0 : index
    %32 = vector.load %arg5[%c0_58, %c0_59, %c0_60, %c0_61] : memref<1x3x1x128xf32, #tpu.memory_space<vmem>>, vector<1x1x1x128xf32>
    %33 = vector.shape_cast %32 : vector<1x1x1x128xf32> to vector<1x128xf32>
    %cst = arith.constant dense<0.000000e+00> : vector<2x8xf32>
    %34 = vector.multi_reduction <add>, %5, %cst [2] : vector<2x8x128xf32> to vector<2x8xf32>
    %35 = vector.shape_cast %34 : vector<2x8xf32> to vector<2x8x1xf32>
    %cst_62 = arith.constant 3.125000e-02 : f32
    %36 = vector.broadcast %cst_62 : f32 to vector<2x8x1xf32>
    %37 = arith.mulf %35, %36 : vector<2x8x1xf32>
    %38 = tpu.iota {dimensions = array<i32: 2>} : vector<2x8x128xi32>
    %c32_i32 = arith.constant 32 : i32
    %39 = vector.broadcast %c32_i32 : i32 to vector<2x8x128xi32>
    %40 = arith.cmpi slt, %38, %39 : vector<2x8x128xi32>
    %41 = vector.broadcast %37 : vector<2x8x1xf32> to vector<2x8x128xf32>
    %42 = arith.subf %5, %41 : vector<2x8x128xf32>
    %cst_63 = arith.constant 0.000000e+00 : f32
    %43 = vector.broadcast %cst_63 : f32 to vector<2x8x128xf32>
    %44 = arith.select %40, %42, %43 : vector<2x8x128xi1>, vector<2x8x128xf32>
    %45 = arith.mulf %44, %44 : vector<2x8x128xf32>
    %cst_64 = arith.constant dense<0.000000e+00> : vector<2x8xf32>
    %46 = vector.multi_reduction <add>, %45, %cst_64 [2] : vector<2x8x128xf32> to vector<2x8xf32>
    %47 = vector.shape_cast %46 : vector<2x8xf32> to vector<2x8x1xf32>
    %cst_65 = arith.constant 3.125000e-02 : f32
    %48 = vector.broadcast %cst_65 : f32 to vector<2x8x1xf32>
    %49 = arith.mulf %47, %48 : vector<2x8x1xf32>
    %cst_66 = arith.constant 9.99999974E-6 : f32
    %50 = vector.broadcast %cst_66 : f32 to vector<2x8x1xf32>
    %51 = arith.addf %49, %50 : vector<2x8x1xf32>
    %52 = math.rsqrt %51 : vector<2x8x1xf32>
    %53 = vector.broadcast %52 : vector<2x8x1xf32> to vector<2x8x128xf32>
    %54 = arith.mulf %44, %53 : vector<2x8x128xf32>
    %55 = vector.shape_cast %31 : vector<1x128xf32> to vector<1x1x128xf32>
    %56 = vector.broadcast %55 : vector<1x1x128xf32> to vector<2x8x128xf32>
    %57 = arith.mulf %54, %56 : vector<2x8x128xf32>
    %58 = vector.shape_cast %33 : vector<1x128xf32> to vector<1x1x128xf32>
    %59 = vector.broadcast %58 : vector<1x1x128xf32> to vector<2x8x128xf32>
    %60 = arith.addf %57, %59 : vector<2x8x128xf32>
    %c0_67 = arith.constant 0 : index
    %c0_68 = arith.constant 0 : index
    %c0_69 = arith.constant 0 : index
    %c0_70 = arith.constant 0 : index
    %61 = vector.load %arg6[%c0_67, %c0_68, %c0_69, %c0_70] : memref<1x3x1x128xf32, #tpu.memory_space<vmem>>, vector<1x1x1x128xf32>
    %62 = vector.shape_cast %61 : vector<1x1x1x128xf32> to vector<1x128xf32>
    %c0_71 = arith.constant 0 : index
    %c0_72 = arith.constant 0 : index
    %c0_73 = arith.constant 0 : index
    %c0_74 = arith.constant 0 : index
    %63 = vector.load %arg7[%c0_71, %c0_72, %c0_73, %c0_74] : memref<1x3x1x128xf32, #tpu.memory_space<vmem>>, vector<1x1x1x128xf32>
    %64 = vector.shape_cast %63 : vector<1x1x1x128xf32> to vector<1x128xf32>
    %cst_75 = arith.constant dense<0.000000e+00> : vector<2x16xf32>
    %65 = vector.multi_reduction <add>, %4, %cst_75 [2] : vector<2x16x128xf32> to vector<2x16xf32>
    %66 = vector.shape_cast %65 : vector<2x16xf32> to vector<2x16x1xf32>
    %cst_76 = arith.constant 3.125000e-02 : f32
    %67 = vector.broadcast %cst_76 : f32 to vector<2x16x1xf32>
    %68 = arith.mulf %66, %67 : vector<2x16x1xf32>
    %69 = tpu.iota {dimensions = array<i32: 2>} : vector<2x16x128xi32>
    %c32_i32_77 = arith.constant 32 : i32
    %70 = vector.broadcast %c32_i32_77 : i32 to vector<2x16x128xi32>
    %71 = arith.cmpi slt, %69, %70 : vector<2x16x128xi32>
    %72 = vector.broadcast %68 : vector<2x16x1xf32> to vector<2x16x128xf32>
    %73 = arith.subf %4, %72 : vector<2x16x128xf32>
    %cst_78 = arith.constant 0.000000e+00 : f32
    %74 = vector.broadcast %cst_78 : f32 to vector<2x16x128xf32>
    %75 = arith.select %71, %73, %74 : vector<2x16x128xi1>, vector<2x16x128xf32>
    %76 = arith.mulf %75, %75 : vector<2x16x128xf32>
    %cst_79 = arith.constant dense<0.000000e+00> : vector<2x16xf32>
    %77 = vector.multi_reduction <add>, %76, %cst_79 [2] : vector<2x16x128xf32> to vector<2x16xf32>
    %78 = vector.shape_cast %77 : vector<2x16xf32> to vector<2x16x1xf32>
    %cst_80 = arith.constant 3.125000e-02 : f32
    %79 = vector.broadcast %cst_80 : f32 to vector<2x16x1xf32>
    %80 = arith.mulf %78, %79 : vector<2x16x1xf32>
    %cst_81 = arith.constant 9.99999974E-6 : f32
    %81 = vector.broadcast %cst_81 : f32 to vector<2x16x1xf32>
    %82 = arith.addf %80, %81 : vector<2x16x1xf32>
    %83 = math.rsqrt %82 : vector<2x16x1xf32>
    %84 = vector.broadcast %83 : vector<2x16x1xf32> to vector<2x16x128xf32>
    %85 = arith.mulf %75, %84 : vector<2x16x128xf32>
    %86 = vector.shape_cast %62 : vector<1x128xf32> to vector<1x1x128xf32>
    %87 = vector.broadcast %86 : vector<1x1x128xf32> to vector<2x16x128xf32>
    %88 = arith.mulf %85, %87 : vector<2x16x128xf32>
    %89 = vector.shape_cast %64 : vector<1x128xf32> to vector<1x1x128xf32>
    %90 = vector.broadcast %89 : vector<1x1x128xf32> to vector<2x16x128xf32>
    %91 = arith.addf %88, %90 : vector<2x16x128xf32>
    %92 = vector.shape_cast %60 : vector<2x8x128xf32> to vector<16x128xf32>
    %93 = arith.truncf %92 : vector<16x128xf32> to vector<16x128xbf16>
    %94 = vector.shape_cast %91 : vector<2x16x128xf32> to vector<32x128xf32>
    %95 = arith.truncf %94 : vector<32x128xf32> to vector<32x128xbf16>
    %cst_82 = arith.constant dense<0.000000e+00> : vector<16x512xf32>
    %96 = tpu.matmul %93, %7, %cst_82 {dimension_numbers = #tpu.dot_dimension_numbers<[1], [0], [0], [1], [0, 0, 1, 1], [], []>} : vector<16x128xbf16>, vector<128x512xbf16>, vector<16x512xf32> -> vector<16x512xf32>
    %97 = vector.broadcast %19 : vector<1x512xf32> to vector<16x512xf32>
    %98 = arith.addf %96, %97 : vector<16x512xf32>
    %cst_83 = arith.constant dense<0.000000e+00> : vector<32x512xf32>
    %99 = tpu.matmul %95, %9, %cst_83 {dimension_numbers = #tpu.dot_dimension_numbers<[1], [0], [0], [1], [0, 0, 1, 1], [], []>} : vector<32x128xbf16>, vector<128x512xbf16>, vector<32x512xf32> -> vector<32x512xf32>
    %100 = vector.broadcast %21 : vector<1x512xf32> to vector<32x512xf32>
    %101 = arith.addf %99, %100 : vector<32x512xf32>
    %cst_84 = arith.constant dense<0.000000e+00> : vector<32x512xf32>
    %102 = tpu.matmul %95, %11, %cst_84 {dimension_numbers = #tpu.dot_dimension_numbers<[1], [0], [0], [1], [0, 0, 1, 1], [], []>} : vector<32x128xbf16>, vector<128x512xbf16>, vector<32x512xf32> -> vector<32x512xf32>
    %103 = vector.broadcast %23 : vector<1x512xf32> to vector<32x512xf32>
    %104 = arith.addf %102, %103 : vector<32x512xf32>
    %105 = vector.shape_cast %98 : vector<16x512xf32> to vector<2x8x512xf32>
    %106 = arith.truncf %105 : vector<2x8x512xf32> to vector<2x8x512xbf16>
    %107 = vector.shape_cast %101 : vector<32x512xf32> to vector<2x16x512xf32>
    %108 = arith.truncf %107 : vector<2x16x512xf32> to vector<2x16x512xbf16>
    %109 = vector.shape_cast %104 : vector<32x512xf32> to vector<2x16x512xf32>
    %110 = arith.truncf %109 : vector<2x16x512xf32> to vector<2x16x512xbf16>
    %111 = vector.extract_strided_slice %106 {offsets = [0, 0, 0], sizes = [2, 8, 128], strides = [1, 1, 1]} : vector<2x8x512xbf16> to vector<2x8x128xbf16>
    %112 = vector.extract_strided_slice %108 {offsets = [0, 0, 0], sizes = [2, 16, 128], strides = [1, 1, 1]} : vector<2x16x512xbf16> to vector<2x16x128xbf16>
    %113 = vector.extract_strided_slice %110 {offsets = [0, 0, 0], sizes = [2, 16, 128], strides = [1, 1, 1]} : vector<2x16x512xbf16> to vector<2x16x128xbf16>
    "tpu.trace_start"() <{level = 10 : i32, message = "bnd,bmd->bnm"}> : () -> ()
    %cst_85 = arith.constant dense<0.000000e+00> : vector<2x8x16xf32>
    %114 = tpu.matmul %111, %112, %cst_85 {dimension_numbers = #tpu.dot_dimension_numbers<[2], [2], [1], [1], [0, 0, 0, 1, 1, 1], [0], [0]>} : vector<2x8x128xbf16>, vector<2x16x128xbf16>, vector<2x8x16xf32> -> vector<2x8x16xf32>
    "tpu.trace_stop"() : () -> ()
    %cst_86 = arith.constant 0.353553385 : f32
    %115 = vector.broadcast %cst_86 : f32 to vector<2x8x16xf32>
    %116 = arith.mulf %114, %115 : vector<2x8x16xf32>
    %cst_87 = arith.constant dense<0xFF800000> : vector<2x8xf32>
    %117 = vector.multi_reduction <maximumf>, %116, %cst_87 [2] : vector<2x8x16xf32> to vector<2x8xf32>
    %118 = vector.shape_cast %117 : vector<2x8xf32> to vector<2x8x1xf32>
    %119 = vector.broadcast %118 : vector<2x8x1xf32> to vector<2x8x16xf32>
    %120 = arith.subf %116, %119 : vector<2x8x16xf32>
    %121 = math.exp %120 : vector<2x8x16xf32>
    %cst_88 = arith.constant dense<0.000000e+00> : vector<2x8xf32>
    %122 = vector.multi_reduction <add>, %121, %cst_88 [2] : vector<2x8x16xf32> to vector<2x8xf32>
    %123 = vector.shape_cast %122 : vector<2x8xf32> to vector<2x8x1xf32>
    %124 = tpu.reciprocal %123 {approx = true} : vector<2x8x1xf32> -> vector<2x8x1xf32>
    %125 = vector.broadcast %124 : vector<2x8x1xf32> to vector<2x8x16xf32>
    %126 = arith.mulf %121, %125 : vector<2x8x16xf32>
    %127 = arith.truncf %126 : vector<2x8x16xf32> to vector<2x8x16xbf16>
    "tpu.trace_start"() <{level = 10 : i32, message = "bnm,bmd->bnd"}> : () -> ()
    %cst_89 = arith.constant dense<0.000000e+00> : vector<2x8x128xf32>
    %128 = tpu.matmul %127, %113, %cst_89 {dimension_numbers = #tpu.dot_dimension_numbers<[2], [1], [1], [2], [0, 0, 0, 1, 1, 2], [0], [0]>} : vector<2x8x16xbf16>, vector<2x16x128xbf16>, vector<2x8x128xf32> -> vector<2x8x128xf32>
    "tpu.trace_stop"() : () -> ()
    %129 = arith.truncf %128 : vector<2x8x128xf32> to vector<2x8x128xbf16>
    %130 = vector.extract_strided_slice %106 {offsets = [0, 0, 128], sizes = [2, 8, 128], strides = [1, 1, 1]} : vector<2x8x512xbf16> to vector<2x8x128xbf16>
    %131 = vector.extract_strided_slice %108 {offsets = [0, 0, 128], sizes = [2, 16, 128], strides = [1, 1, 1]} : vector<2x16x512xbf16> to vector<2x16x128xbf16>
    %132 = vector.extract_strided_slice %110 {offsets = [0, 0, 128], sizes = [2, 16, 128], strides = [1, 1, 1]} : vector<2x16x512xbf16> to vector<2x16x128xbf16>
    "tpu.trace_start"() <{level = 10 : i32, message = "bnd,bmd->bnm"}> : () -> ()
    %cst_90 = arith.constant dense<0.000000e+00> : vector<2x8x16xf32>
    %133 = tpu.matmul %130, %131, %cst_90 {dimension_numbers = #tpu.dot_dimension_numbers<[2], [2], [1], [1], [0, 0, 0, 1, 1, 1], [0], [0]>} : vector<2x8x128xbf16>, vector<2x16x128xbf16>, vector<2x8x16xf32> -> vector<2x8x16xf32>
    "tpu.trace_stop"() : () -> ()
    %cst_91 = arith.constant 0.353553385 : f32
    %134 = vector.broadcast %cst_91 : f32 to vector<2x8x16xf32>
    %135 = arith.mulf %133, %134 : vector<2x8x16xf32>
    %cst_92 = arith.constant dense<0xFF800000> : vector<2x8xf32>
    %136 = vector.multi_reduction <maximumf>, %135, %cst_92 [2] : vector<2x8x16xf32> to vector<2x8xf32>
    %137 = vector.shape_cast %136 : vector<2x8xf32> to vector<2x8x1xf32>
    %138 = vector.broadcast %137 : vector<2x8x1xf32> to vector<2x8x16xf32>
    %139 = arith.subf %135, %138 : vector<2x8x16xf32>
    %140 = math.exp %139 : vector<2x8x16xf32>
    %cst_93 = arith.constant dense<0.000000e+00> : vector<2x8xf32>
    %141 = vector.multi_reduction <add>, %140, %cst_93 [2] : vector<2x8x16xf32> to vector<2x8xf32>
    %142 = vector.shape_cast %141 : vector<2x8xf32> to vector<2x8x1xf32>
    %143 = tpu.reciprocal %142 {approx = true} : vector<2x8x1xf32> -> vector<2x8x1xf32>
    %144 = vector.broadcast %143 : vector<2x8x1xf32> to vector<2x8x16xf32>
    %145 = arith.mulf %140, %144 : vector<2x8x16xf32>
    %146 = arith.truncf %145 : vector<2x8x16xf32> to vector<2x8x16xbf16>
    "tpu.trace_start"() <{level = 10 : i32, message = "bnm,bmd->bnd"}> : () -> ()
    %cst_94 = arith.constant dense<0.000000e+00> : vector<2x8x128xf32>
    %147 = tpu.matmul %146, %132, %cst_94 {dimension_numbers = #tpu.dot_dimension_numbers<[2], [1], [1], [2], [0, 0, 0, 1, 1, 2], [0], [0]>} : vector<2x8x16xbf16>, vector<2x16x128xbf16>, vector<2x8x128xf32> -> vector<2x8x128xf32>
    "tpu.trace_stop"() : () -> ()
    %148 = arith.truncf %147 : vector<2x8x128xf32> to vector<2x8x128xbf16>
    %149 = vector.extract_strided_slice %106 {offsets = [0, 0, 256], sizes = [2, 8, 128], strides = [1, 1, 1]} : vector<2x8x512xbf16> to vector<2x8x128xbf16>
    %150 = vector.extract_strided_slice %108 {offsets = [0, 0, 256], sizes = [2, 16, 128], strides = [1, 1, 1]} : vector<2x16x512xbf16> to vector<2x16x128xbf16>
    %151 = vector.extract_strided_slice %110 {offsets = [0, 0, 256], sizes = [2, 16, 128], strides = [1, 1, 1]} : vector<2x16x512xbf16> to vector<2x16x128xbf16>
    "tpu.trace_start"() <{level = 10 : i32, message = "bnd,bmd->bnm"}> : () -> ()
    %cst_95 = arith.constant dense<0.000000e+00> : vector<2x8x16xf32>
    %152 = tpu.matmul %149, %150, %cst_95 {dimension_numbers = #tpu.dot_dimension_numbers<[2], [2], [1], [1], [0, 0, 0, 1, 1, 1], [0], [0]>} : vector<2x8x128xbf16>, vector<2x16x128xbf16>, vector<2x8x16xf32> -> vector<2x8x16xf32>
    "tpu.trace_stop"() : () -> ()
    %cst_96 = arith.constant 0.353553385 : f32
    %153 = vector.broadcast %cst_96 : f32 to vector<2x8x16xf32>
    %154 = arith.mulf %152, %153 : vector<2x8x16xf32>
    %cst_97 = arith.constant dense<0xFF800000> : vector<2x8xf32>
    %155 = vector.multi_reduction <maximumf>, %154, %cst_97 [2] : vector<2x8x16xf32> to vector<2x8xf32>
    %156 = vector.shape_cast %155 : vector<2x8xf32> to vector<2x8x1xf32>
    %157 = vector.broadcast %156 : vector<2x8x1xf32> to vector<2x8x16xf32>
    %158 = arith.subf %154, %157 : vector<2x8x16xf32>
    %159 = math.exp %158 : vector<2x8x16xf32>
    %cst_98 = arith.constant dense<0.000000e+00> : vector<2x8xf32>
    %160 = vector.multi_reduction <add>, %159, %cst_98 [2] : vector<2x8x16xf32> to vector<2x8xf32>
    %161 = vector.shape_cast %160 : vector<2x8xf32> to vector<2x8x1xf32>
    %162 = tpu.reciprocal %161 {approx = true} : vector<2x8x1xf32> -> vector<2x8x1xf32>
    %163 = vector.broadcast %162 : vector<2x8x1xf32> to vector<2x8x16xf32>
    %164 = arith.mulf %159, %163 : vector<2x8x16xf32>
    %165 = arith.truncf %164 : vector<2x8x16xf32> to vector<2x8x16xbf16>
    "tpu.trace_start"() <{level = 10 : i32, message = "bnm,bmd->bnd"}> : () -> ()
    %cst_99 = arith.constant dense<0.000000e+00> : vector<2x8x128xf32>
    %166 = tpu.matmul %165, %151, %cst_99 {dimension_numbers = #tpu.dot_dimension_numbers<[2], [1], [1], [2], [0, 0, 0, 1, 1, 2], [0], [0]>} : vector<2x8x16xbf16>, vector<2x16x128xbf16>, vector<2x8x128xf32> -> vector<2x8x128xf32>
    "tpu.trace_stop"() : () -> ()
    %167 = arith.truncf %166 : vector<2x8x128xf32> to vector<2x8x128xbf16>
    %168 = vector.extract_strided_slice %106 {offsets = [0, 0, 384], sizes = [2, 8, 128], strides = [1, 1, 1]} : vector<2x8x512xbf16> to vector<2x8x128xbf16>
    %169 = vector.extract_strided_slice %108 {offsets = [0, 0, 384], sizes = [2, 16, 128], strides = [1, 1, 1]} : vector<2x16x512xbf16> to vector<2x16x128xbf16>
    %170 = vector.extract_strided_slice %110 {offsets = [0, 0, 384], sizes = [2, 16, 128], strides = [1, 1, 1]} : vector<2x16x512xbf16> to vector<2x16x128xbf16>
    "tpu.trace_start"() <{level = 10 : i32, message = "bnd,bmd->bnm"}> : () -> ()
    %cst_100 = arith.constant dense<0.000000e+00> : vector<2x8x16xf32>
    %171 = tpu.matmul %168, %169, %cst_100 {dimension_numbers = #tpu.dot_dimension_numbers<[2], [2], [1], [1], [0, 0, 0, 1, 1, 1], [0], [0]>} : vector<2x8x128xbf16>, vector<2x16x128xbf16>, vector<2x8x16xf32> -> vector<2x8x16xf32>
    "tpu.trace_stop"() : () -> ()
    %cst_101 = arith.constant 0.353553385 : f32
    %172 = vector.broadcast %cst_101 : f32 to vector<2x8x16xf32>
    %173 = arith.mulf %171, %172 : vector<2x8x16xf32>
    %cst_102 = arith.constant dense<0xFF800000> : vector<2x8xf32>
    %174 = vector.multi_reduction <maximumf>, %173, %cst_102 [2] : vector<2x8x16xf32> to vector<2x8xf32>
    %175 = vector.shape_cast %174 : vector<2x8xf32> to vector<2x8x1xf32>
    %176 = vector.broadcast %175 : vector<2x8x1xf32> to vector<2x8x16xf32>
    %177 = arith.subf %173, %176 : vector<2x8x16xf32>
    %178 = math.exp %177 : vector<2x8x16xf32>
    %cst_103 = arith.constant dense<0.000000e+00> : vector<2x8xf32>
    %179 = vector.multi_reduction <add>, %178, %cst_103 [2] : vector<2x8x16xf32> to vector<2x8xf32>
    %180 = vector.shape_cast %179 : vector<2x8xf32> to vector<2x8x1xf32>
    %181 = tpu.reciprocal %180 {approx = true} : vector<2x8x1xf32> -> vector<2x8x1xf32>
    %182 = vector.broadcast %181 : vector<2x8x1xf32> to vector<2x8x16xf32>
    %183 = arith.mulf %178, %182 : vector<2x8x16xf32>
    %184 = arith.truncf %183 : vector<2x8x16xf32> to vector<2x8x16xbf16>
    "tpu.trace_start"() <{level = 10 : i32, message = "bnm,bmd->bnd"}> : () -> ()
    %cst_104 = arith.constant dense<0.000000e+00> : vector<2x8x128xf32>
    %185 = tpu.matmul %184, %170, %cst_104 {dimension_numbers = #tpu.dot_dimension_numbers<[2], [1], [1], [2], [0, 0, 0, 1, 1, 2], [0], [0]>} : vector<2x8x16xbf16>, vector<2x16x128xbf16>, vector<2x8x128xf32> -> vector<2x8x128xf32>
    "tpu.trace_stop"() : () -> ()
    %186 = arith.truncf %185 : vector<2x8x128xf32> to vector<2x8x128xbf16>
    %187 = tpu.concatenate %129, %148, %167, %186 in 2 : vector<2x8x128xbf16>, vector<2x8x128xbf16>, vector<2x8x128xbf16>, vector<2x8x128xbf16> -> vector<2x8x512xbf16>
    %188 = vector.shape_cast %187 : vector<2x8x512xbf16> to vector<16x512xbf16>
    %cst_105 = arith.constant dense<0.000000e+00> : vector<16x128xf32>
    %189 = tpu.matmul %188, %13, %cst_105 {dimension_numbers = #tpu.dot_dimension_numbers<[1], [0], [0], [1], [0, 0, 1, 1], [], []>} : vector<16x512xbf16>, vector<512x128xbf16>, vector<16x128xf32> -> vector<16x128xf32>
    %190 = vector.broadcast %25 : vector<1x128xf32> to vector<16x128xf32>
    %191 = arith.addf %189, %190 : vector<16x128xf32>
    %192 = vector.shape_cast %191 : vector<16x128xf32> to vector<2x8x128xf32>
    %193 = arith.addf %192, %5 : vector<2x8x128xf32>
    %c0_106 = arith.constant 0 : index
    %c0_107 = arith.constant 0 : index
    %c0_108 = arith.constant 0 : index
    %c0_109 = arith.constant 0 : index
    %194 = vector.load %arg16[%c0_106, %c0_107, %c0_108, %c0_109] : memref<1x3x1x128xf32, #tpu.memory_space<vmem>>, vector<1x1x1x128xf32>
    %195 = vector.shape_cast %194 : vector<1x1x1x128xf32> to vector<1x128xf32>
    %c0_110 = arith.constant 0 : index
    %c0_111 = arith.constant 0 : index
    %c0_112 = arith.constant 0 : index
    %c0_113 = arith.constant 0 : index
    %196 = vector.load %arg17[%c0_110, %c0_111, %c0_112, %c0_113] : memref<1x3x1x128xf32, #tpu.memory_space<vmem>>, vector<1x1x1x128xf32>
    %197 = vector.shape_cast %196 : vector<1x1x1x128xf32> to vector<1x128xf32>
    %cst_114 = arith.constant dense<0.000000e+00> : vector<2x8xf32>
    %198 = vector.multi_reduction <add>, %193, %cst_114 [2] : vector<2x8x128xf32> to vector<2x8xf32>
    %199 = vector.shape_cast %198 : vector<2x8xf32> to vector<2x8x1xf32>
    %cst_115 = arith.constant 3.125000e-02 : f32
    %200 = vector.broadcast %cst_115 : f32 to vector<2x8x1xf32>
    %201 = arith.mulf %199, %200 : vector<2x8x1xf32>
    %202 = tpu.iota {dimensions = array<i32: 2>} : vector<2x8x128xi32>
    %c32_i32_116 = arith.constant 32 : i32
    %203 = vector.broadcast %c32_i32_116 : i32 to vector<2x8x128xi32>
    %204 = arith.cmpi slt, %202, %203 : vector<2x8x128xi32>
    %205 = vector.broadcast %201 : vector<2x8x1xf32> to vector<2x8x128xf32>
    %206 = arith.subf %193, %205 : vector<2x8x128xf32>
    %cst_117 = arith.constant 0.000000e+00 : f32
    %207 = vector.broadcast %cst_117 : f32 to vector<2x8x128xf32>
    %208 = arith.select %204, %206, %207 : vector<2x8x128xi1>, vector<2x8x128xf32>
    %209 = arith.mulf %208, %208 : vector<2x8x128xf32>
    %cst_118 = arith.constant dense<0.000000e+00> : vector<2x8xf32>
    %210 = vector.multi_reduction <add>, %209, %cst_118 [2] : vector<2x8x128xf32> to vector<2x8xf32>
    %211 = vector.shape_cast %210 : vector<2x8xf32> to vector<2x8x1xf32>
    %cst_119 = arith.constant 3.125000e-02 : f32
    %212 = vector.broadcast %cst_119 : f32 to vector<2x8x1xf32>
    %213 = arith.mulf %211, %212 : vector<2x8x1xf32>
    %cst_120 = arith.constant 9.99999974E-6 : f32
    %214 = vector.broadcast %cst_120 : f32 to vector<2x8x1xf32>
    %215 = arith.addf %213, %214 : vector<2x8x1xf32>
    %216 = math.rsqrt %215 : vector<2x8x1xf32>
    %217 = vector.broadcast %216 : vector<2x8x1xf32> to vector<2x8x128xf32>
    %218 = arith.mulf %208, %217 : vector<2x8x128xf32>
    %219 = vector.shape_cast %195 : vector<1x128xf32> to vector<1x1x128xf32>
    %220 = vector.broadcast %219 : vector<1x1x128xf32> to vector<2x8x128xf32>
    %221 = arith.mulf %218, %220 : vector<2x8x128xf32>
    %222 = vector.shape_cast %197 : vector<1x128xf32> to vector<1x1x128xf32>
    %223 = vector.broadcast %222 : vector<1x1x128xf32> to vector<2x8x128xf32>
    %224 = arith.addf %221, %223 : vector<2x8x128xf32>
    %225 = vector.shape_cast %224 : vector<2x8x128xf32> to vector<16x128xf32>
    %226 = arith.truncf %225 : vector<16x128xf32> to vector<16x128xbf16>
    %cst_121 = arith.constant dense<0.000000e+00> : vector<16x128xf32>
    %227 = tpu.matmul %226, %15, %cst_121 {dimension_numbers = #tpu.dot_dimension_numbers<[1], [0], [0], [1], [0, 0, 1, 1], [], []>} : vector<16x128xbf16>, vector<128x128xbf16>, vector<16x128xf32> -> vector<16x128xf32>
    %228 = vector.broadcast %27 : vector<1x128xf32> to vector<16x128xf32>
    %229 = arith.addf %227, %228 : vector<16x128xf32>
    %cst_122 = arith.constant 5.000000e-01 : f32
    %230 = vector.broadcast %cst_122 : f32 to vector<16x128xf32>
    %231 = arith.mulf %230, %229 : vector<16x128xf32>
    %cst_123 = arith.constant 0.707106769 : f32
    %232 = vector.broadcast %cst_123 : f32 to vector<16x128xf32>
    %233 = arith.mulf %229, %232 : vector<16x128xf32>
    %234 = math.absf %233 : vector<16x128xf32>
    %cst_124 = arith.constant 0.327591091 : f32
    %235 = vector.broadcast %cst_124 : f32 to vector<16x128xf32>
    %236 = arith.mulf %235, %234 : vector<16x128xf32>
    %cst_125 = arith.constant 1.000000e+00 : f32
    %237 = vector.broadcast %cst_125 : f32 to vector<16x128xf32>
    %238 = arith.addf %237, %236 : vector<16x128xf32>
    %cst_126 = arith.constant 1.000000e+00 : f32
    %239 = vector.broadcast %cst_126 : f32 to vector<16x128xf32>
    %240 = arith.divf %239, %238 : vector<16x128xf32>
    %cst_127 = arith.constant 1.06140542 : f32
    %241 = vector.broadcast %cst_127 : f32 to vector<16x128xf32>
    %242 = arith.mulf %241, %240 : vector<16x128xf32>
    %cst_128 = arith.constant -1.45315206 : f32
    %243 = vector.broadcast %cst_128 : f32 to vector<16x128xf32>
    %244 = arith.addf %242, %243 : vector<16x128xf32>
    %245 = arith.mulf %244, %240 : vector<16x128xf32>
    %cst_129 = arith.constant 1.42141378 : f32
    %246 = vector.broadcast %cst_129 : f32 to vector<16x128xf32>
    %247 = arith.addf %245, %246 : vector<16x128xf32>
    %248 = arith.mulf %247, %240 : vector<16x128xf32>
    %cst_130 = arith.constant -0.284496725 : f32
    %249 = vector.broadcast %cst_130 : f32 to vector<16x128xf32>
    %250 = arith.addf %248, %249 : vector<16x128xf32>
    %251 = arith.mulf %250, %240 : vector<16x128xf32>
    %cst_131 = arith.constant 0.254829586 : f32
    %252 = vector.broadcast %cst_131 : f32 to vector<16x128xf32>
    %253 = arith.addf %251, %252 : vector<16x128xf32>
    %254 = arith.mulf %253, %240 : vector<16x128xf32>
    %cst_132 = arith.constant 0.000000e+00 : f32
    %255 = vector.broadcast %cst_132 : f32 to vector<16x128xf32>
    %256 = arith.subf %255, %234 : vector<16x128xf32>
    %257 = arith.mulf %256, %234 : vector<16x128xf32>
    %258 = math.exp %257 : vector<16x128xf32>
    %259 = arith.mulf %254, %258 : vector<16x128xf32>
    %cst_133 = arith.constant 1.000000e+00 : f32
    %260 = vector.broadcast %cst_133 : f32 to vector<16x128xf32>
    %261 = arith.subf %260, %259 : vector<16x128xf32>
    %cst_134 = arith.constant 0.000000e+00 : f32
    %262 = vector.broadcast %cst_134 : f32 to vector<16x128xf32>
    %263 = arith.cmpf oge, %233, %262 : vector<16x128xf32>
    %cst_135 = arith.constant 0.000000e+00 : f32
    %264 = vector.broadcast %cst_135 : f32 to vector<16x128xf32>
    %265 = arith.subf %264, %261 : vector<16x128xf32>
    %266 = arith.select %263, %261, %265 : vector<16x128xi1>, vector<16x128xf32>
    %cst_136 = arith.constant 1.000000e+00 : f32
    %267 = vector.broadcast %cst_136 : f32 to vector<16x128xf32>
    %268 = arith.addf %267, %266 : vector<16x128xf32>
    %269 = arith.mulf %231, %268 : vector<16x128xf32>
    %270 = arith.truncf %269 : vector<16x128xf32> to vector<16x128xbf16>
    %cst_137 = arith.constant dense<0.000000e+00> : vector<16x128xf32>
    %271 = tpu.matmul %270, %17, %cst_137 {dimension_numbers = #tpu.dot_dimension_numbers<[1], [0], [0], [1], [0, 0, 1, 1], [], []>} : vector<16x128xbf16>, vector<128x128xbf16>, vector<16x128xf32> -> vector<16x128xf32>
    %272 = vector.broadcast %29 : vector<1x128xf32> to vector<16x128xf32>
    %273 = arith.addf %271, %272 : vector<16x128xf32>
    %274 = vector.shape_cast %273 : vector<16x128xf32> to vector<2x8x128xf32>
    %275 = arith.addf %274, %193 : vector<2x8x128xf32>
    %c0_138 = arith.constant 0 : index
    %c0_139 = arith.constant 0 : index
    %c0_140 = arith.constant 0 : index
    %276 = vector.load %arg23[%c0_138, %c0_139, %c0_140] : memref<2x8x128xf32, #tpu.memory_space<vmem>>, vector<2x8x128xf32>
    tpu.vector_store %arg23[%c0_138, %c0_139, %c0_140], %275 {strides = array<i32>} : memref<2x8x128xf32, #tpu.memory_space<vmem>>, vector<2x8x128xf32>,
    %c0_141 = arith.constant 0 : index
    %c0_142 = arith.constant 0 : index
    %c0_143 = arith.constant 0 : index
    %277 = vector.load %arg23[%c0_141, %c0_142, %c0_143] : memref<2x8x128xf32, #tpu.memory_space<vmem>>, vector<2x8x128xf32>
    %c0_144 = arith.constant 0 : index
    %c1 = arith.constant 1 : index
    %c0_145 = arith.constant 0 : index
    %c0_146 = arith.constant 0 : index
    %278 = vector.load %arg8[%c0_144, %c1, %c0_145, %c0_146] : memref<1x3x128x512xbf16, #tpu.memory_space<vmem>>, vector<1x1x128x512xbf16>
    %279 = vector.shape_cast %278 : vector<1x1x128x512xbf16> to vector<128x512xbf16>
    %c0_147 = arith.constant 0 : index
    %c1_148 = arith.constant 1 : index
    %c0_149 = arith.constant 0 : index
    %c0_150 = arith.constant 0 : index
    %280 = vector.load %arg10[%c0_147, %c1_148, %c0_149, %c0_150] : memref<1x3x128x512xbf16, #tpu.memory_space<vmem>>, vector<1x1x128x512xbf16>
    %281 = vector.shape_cast %280 : vector<1x1x128x512xbf16> to vector<128x512xbf16>
    %c0_151 = arith.constant 0 : index
    %c1_152 = arith.constant 1 : index
    %c0_153 = arith.constant 0 : index
    %c0_154 = arith.constant 0 : index
    %282 = vector.load %arg12[%c0_151, %c1_152, %c0_153, %c0_154] : memref<1x3x128x512xbf16, #tpu.memory_space<vmem>>, vector<1x1x128x512xbf16>
    %283 = vector.shape_cast %282 : vector<1x1x128x512xbf16> to vector<128x512xbf16>
    %c0_155 = arith.constant 0 : index
    %c1_156 = arith.constant 1 : index
    %c0_157 = arith.constant 0 : index
    %c0_158 = arith.constant 0 : index
    %284 = vector.load %arg14[%c0_155, %c1_156, %c0_157, %c0_158] : memref<1x3x512x128xbf16, #tpu.memory_space<vmem>>, vector<1x1x512x128xbf16>
    %285 = vector.shape_cast %284 : vector<1x1x512x128xbf16> to vector<512x128xbf16>
    %c0_159 = arith.constant 0 : index
    %c1_160 = arith.constant 1 : index
    %c0_161 = arith.constant 0 : index
    %c0_162 = arith.constant 0 : index
    %286 = vector.load %arg18[%c0_159, %c1_160, %c0_161, %c0_162] : memref<1x3x128x128xbf16, #tpu.memory_space<vmem>>, vector<1x1x128x128xbf16>
    %287 = vector.shape_cast %286 : vector<1x1x128x128xbf16> to vector<128x128xbf16>
    %c0_163 = arith.constant 0 : index
    %c1_164 = arith.constant 1 : index
    %c0_165 = arith.constant 0 : index
    %c0_166 = arith.constant 0 : index
    %288 = vector.load %arg20[%c0_163, %c1_164, %c0_165, %c0_166] : memref<1x3x128x128xbf16, #tpu.memory_space<vmem>>, vector<1x1x128x128xbf16>
    %289 = vector.shape_cast %288 : vector<1x1x128x128xbf16> to vector<128x128xbf16>
    %c0_167 = arith.constant 0 : index
    %c1_168 = arith.constant 1 : index
    %c0_169 = arith.constant 0 : index
    %c0_170 = arith.constant 0 : index
    %290 = vector.load %arg9[%c0_167, %c1_168, %c0_169, %c0_170] : memref<1x3x1x512xf32, #tpu.memory_space<vmem>>, vector<1x1x1x512xf32>
    %291 = vector.shape_cast %290 : vector<1x1x1x512xf32> to vector<1x512xf32>
    %c0_171 = arith.constant 0 : index
    %c1_172 = arith.constant 1 : index
    %c0_173 = arith.constant 0 : index
    %c0_174 = arith.constant 0 : index
    %292 = vector.load %arg11[%c0_171, %c1_172, %c0_173, %c0_174] : memref<1x3x1x512xf32, #tpu.memory_space<vmem>>, vector<1x1x1x512xf32>
    %293 = vector.shape_cast %292 : vector<1x1x1x512xf32> to vector<1x512xf32>
    %c0_175 = arith.constant 0 : index
    %c1_176 = arith.constant 1 : index
    %c0_177 = arith.constant 0 : index
    %c0_178 = arith.constant 0 : index
    %294 = vector.load %arg13[%c0_175, %c1_176, %c0_177, %c0_178] : memref<1x3x1x512xf32, #tpu.memory_space<vmem>>, vector<1x1x1x512xf32>
    %295 = vector.shape_cast %294 : vector<1x1x1x512xf32> to vector<1x512xf32>
    %c0_179 = arith.constant 0 : index
    %c1_180 = arith.constant 1 : index
    %c0_181 = arith.constant 0 : index
    %c0_182 = arith.constant 0 : index
    %296 = vector.load %arg15[%c0_179, %c1_180, %c0_181, %c0_182] : memref<1x3x1x128xf32, #tpu.memory_space<vmem>>, vector<1x1x1x128xf32>
    %297 = vector.shape_cast %296 : vector<1x1x1x128xf32> to vector<1x128xf32>
    %c0_183 = arith.constant 0 : index
    %c1_184 = arith.constant 1 : index
    %c0_185 = arith.constant 0 : index
    %c0_186 = arith.constant 0 : index
    %298 = vector.load %arg19[%c0_183, %c1_184, %c0_185, %c0_186] : memref<1x3x1x128xf32, #tpu.memory_space<vmem>>, vector<1x1x1x128xf32>
    %299 = vector.shape_cast %298 : vector<1x1x1x128xf32> to vector<1x128xf32>
    %c0_187 = arith.constant 0 : index
    %c1_188 = arith.constant 1 : index
    %c0_189 = arith.constant 0 : index
    %c0_190 = arith.constant 0 : index
    %300 = vector.load %arg21[%c0_187, %c1_188, %c0_189, %c0_190] : memref<1x3x1x128xf32, #tpu.memory_space<vmem>>, vector<1x1x1x128xf32>
    %301 = vector.shape_cast %300 : vector<1x1x1x128xf32> to vector<1x128xf32>
    %c0_191 = arith.constant 0 : index
    %c1_192 = arith.constant 1 : index
    %c0_193 = arith.constant 0 : index
    %c0_194 = arith.constant 0 : index
    %302 = vector.load %arg4[%c0_191, %c1_192, %c0_193, %c0_194] : memref<1x3x1x128xf32, #tpu.memory_space<vmem>>, vector<1x1x1x128xf32>
    %303 = vector.shape_cast %302 : vector<1x1x1x128xf32> to vector<1x128xf32>
    %c0_195 = arith.constant 0 : index
    %c1_196 = arith.constant 1 : index
    %c0_197 = arith.constant 0 : index
    %c0_198 = arith.constant 0 : index
    %304 = vector.load %arg5[%c0_195, %c1_196, %c0_197, %c0_198] : memref<1x3x1x128xf32, #tpu.memory_space<vmem>>, vector<1x1x1x128xf32>
    %305 = vector.shape_cast %304 : vector<1x1x1x128xf32> to vector<1x128xf32>
    %cst_199 = arith.constant dense<0.000000e+00> : vector<2x8xf32>
    %306 = vector.multi_reduction <add>, %277, %cst_199 [2] : vector<2x8x128xf32> to vector<2x8xf32>
    %307 = vector.shape_cast %306 : vector<2x8xf32> to vector<2x8x1xf32>
    %cst_200 = arith.constant 3.125000e-02 : f32
    %308 = vector.broadcast %cst_200 : f32 to vector<2x8x1xf32>
    %309 = arith.mulf %307, %308 : vector<2x8x1xf32>
    %310 = tpu.iota {dimensions = array<i32: 2>} : vector<2x8x128xi32>
    %c32_i32_201 = arith.constant 32 : i32
    %311 = vector.broadcast %c32_i32_201 : i32 to vector<2x8x128xi32>
    %312 = arith.cmpi slt, %310, %311 : vector<2x8x128xi32>
    %313 = vector.broadcast %309 : vector<2x8x1xf32> to vector<2x8x128xf32>
    %314 = arith.subf %277, %313 : vector<2x8x128xf32>
    %cst_202 = arith.constant 0.000000e+00 : f32
    %315 = vector.broadcast %cst_202 : f32 to vector<2x8x128xf32>
    %316 = arith.select %312, %314, %315 : vector<2x8x128xi1>, vector<2x8x128xf32>
    %317 = arith.mulf %316, %316 : vector<2x8x128xf32>
    %cst_203 = arith.constant dense<0.000000e+00> : vector<2x8xf32>
    %318 = vector.multi_reduction <add>, %317, %cst_203 [2] : vector<2x8x128xf32> to vector<2x8xf32>
    %319 = vector.shape_cast %318 : vector<2x8xf32> to vector<2x8x1xf32>
    %cst_204 = arith.constant 3.125000e-02 : f32
    %320 = vector.broadcast %cst_204 : f32 to vector<2x8x1xf32>
    %321 = arith.mulf %319, %320 : vector<2x8x1xf32>
    %cst_205 = arith.constant 9.99999974E-6 : f32
    %322 = vector.broadcast %cst_205 : f32 to vector<2x8x1xf32>
    %323 = arith.addf %321, %322 : vector<2x8x1xf32>
    %324 = math.rsqrt %323 : vector<2x8x1xf32>
    %325 = vector.broadcast %324 : vector<2x8x1xf32> to vector<2x8x128xf32>
    %326 = arith.mulf %316, %325 : vector<2x8x128xf32>
    %327 = vector.shape_cast %303 : vector<1x128xf32> to vector<1x1x128xf32>
    %328 = vector.broadcast %327 : vector<1x1x128xf32> to vector<2x8x128xf32>
    %329 = arith.mulf %326, %328 : vector<2x8x128xf32>
    %330 = vector.shape_cast %305 : vector<1x128xf32> to vector<1x1x128xf32>
    %331 = vector.broadcast %330 : vector<1x1x128xf32> to vector<2x8x128xf32>
    %332 = arith.addf %329, %331 : vector<2x8x128xf32>
    %333 = vector.shape_cast %332 : vector<2x8x128xf32> to vector<16x128xf32>
    %334 = arith.truncf %333 : vector<16x128xf32> to vector<16x128xbf16>
    %335 = vector.shape_cast %332 : vector<2x8x128xf32> to vector<16x128xf32>
    %336 = arith.truncf %335 : vector<16x128xf32> to vector<16x128xbf16>
    %cst_206 = arith.constant dense<0.000000e+00> : vector<16x512xf32>
    %337 = tpu.matmul %334, %279, %cst_206 {dimension_numbers = #tpu.dot_dimension_numbers<[1], [0], [0], [1], [0, 0, 1, 1], [], []>} : vector<16x128xbf16>, vector<128x512xbf16>, vector<16x512xf32> -> vector<16x512xf32>
    %338 = vector.broadcast %291 : vector<1x512xf32> to vector<16x512xf32>
    %339 = arith.addf %337, %338 : vector<16x512xf32>
    %cst_207 = arith.constant dense<0.000000e+00> : vector<16x512xf32>
    %340 = tpu.matmul %336, %281, %cst_207 {dimension_numbers = #tpu.dot_dimension_numbers<[1], [0], [0], [1], [0, 0, 1, 1], [], []>} : vector<16x128xbf16>, vector<128x512xbf16>, vector<16x512xf32> -> vector<16x512xf32>
    %341 = vector.broadcast %293 : vector<1x512xf32> to vector<16x512xf32>
    %342 = arith.addf %340, %341 : vector<16x512xf32>
    %cst_208 = arith.constant dense<0.000000e+00> : vector<16x512xf32>
    %343 = tpu.matmul %336, %283, %cst_208 {dimension_numbers = #tpu.dot_dimension_numbers<[1], [0], [0], [1], [0, 0, 1, 1], [], []>} : vector<16x128xbf16>, vector<128x512xbf16>, vector<16x512xf32> -> vector<16x512xf32>
    %344 = vector.broadcast %295 : vector<1x512xf32> to vector<16x512xf32>
    %345 = arith.addf %343, %344 : vector<16x512xf32>
    %346 = vector.shape_cast %339 : vector<16x512xf32> to vector<2x8x512xf32>
    %347 = arith.truncf %346 : vector<2x8x512xf32> to vector<2x8x512xbf16>
    %348 = vector.shape_cast %342 : vector<16x512xf32> to vector<2x8x512xf32>
    %349 = arith.truncf %348 : vector<2x8x512xf32> to vector<2x8x512xbf16>
    %350 = vector.shape_cast %345 : vector<16x512xf32> to vector<2x8x512xf32>
    %351 = arith.truncf %350 : vector<2x8x512xf32> to vector<2x8x512xbf16>
    %352 = vector.extract_strided_slice %347 {offsets = [0, 0, 0], sizes = [2, 8, 128], strides = [1, 1, 1]} : vector<2x8x512xbf16> to vector<2x8x128xbf16>
    %353 = vector.extract_strided_slice %349 {offsets = [0, 0, 0], sizes = [2, 8, 128], strides = [1, 1, 1]} : vector<2x8x512xbf16> to vector<2x8x128xbf16>
    %354 = vector.extract_strided_slice %351 {offsets = [0, 0, 0], sizes = [2, 8, 128], strides = [1, 1, 1]} : vector<2x8x512xbf16> to vector<2x8x128xbf16>
    "tpu.trace_start"() <{level = 10 : i32, message = "bnd,bmd->bnm"}> : () -> ()
    %cst_209 = arith.constant dense<0.000000e+00> : vector<2x8x8xf32>
    %355 = tpu.matmul %352, %353, %cst_209 {dimension_numbers = #tpu.dot_dimension_numbers<[2], [2], [1], [1], [0, 0, 0, 1, 1, 1], [0], [0]>} : vector<2x8x128xbf16>, vector<2x8x128xbf16>, vector<2x8x8xf32> -> vector<2x8x8xf32>
    "tpu.trace_stop"() : () -> ()
    %cst_210 = arith.constant 0.353553385 : f32
    %356 = vector.broadcast %cst_210 : f32 to vector<2x8x8xf32>
    %357 = arith.mulf %355, %356 : vector<2x8x8xf32>
    %cst_211 = arith.constant dense<0xFF800000> : vector<2x8xf32>
    %358 = vector.multi_reduction <maximumf>, %357, %cst_211 [2] : vector<2x8x8xf32> to vector<2x8xf32>
    %359 = vector.shape_cast %358 : vector<2x8xf32> to vector<2x8x1xf32>
    %360 = vector.broadcast %359 : vector<2x8x1xf32> to vector<2x8x8xf32>
    %361 = arith.subf %357, %360 : vector<2x8x8xf32>
    %362 = math.exp %361 : vector<2x8x8xf32>
    %cst_212 = arith.constant dense<0.000000e+00> : vector<2x8xf32>
    %363 = vector.multi_reduction <add>, %362, %cst_212 [2] : vector<2x8x8xf32> to vector<2x8xf32>
    %364 = vector.shape_cast %363 : vector<2x8xf32> to vector<2x8x1xf32>
    %365 = tpu.reciprocal %364 {approx = true} : vector<2x8x1xf32> -> vector<2x8x1xf32>
    %366 = vector.broadcast %365 : vector<2x8x1xf32> to vector<2x8x8xf32>
    %367 = arith.mulf %362, %366 : vector<2x8x8xf32>
    %368 = arith.truncf %367 : vector<2x8x8xf32> to vector<2x8x8xbf16>
    "tpu.trace_start"() <{level = 10 : i32, message = "bnm,bmd->bnd"}> : () -> ()
    %cst_213 = arith.constant dense<0.000000e+00> : vector<2x8x128xf32>
    %369 = tpu.matmul %368, %354, %cst_213 {dimension_numbers = #tpu.dot_dimension_numbers<[2], [1], [1], [2], [0, 0, 0, 1, 1, 2], [0], [0]>} : vector<2x8x8xbf16>, vector<2x8x128xbf16>, vector<2x8x128xf32> -> vector<2x8x128xf32>
    "tpu.trace_stop"() : () -> ()
    %370 = arith.truncf %369 : vector<2x8x128xf32> to vector<2x8x128xbf16>
    %371 = vector.extract_strided_slice %347 {offsets = [0, 0, 128], sizes = [2, 8, 128], strides = [1, 1, 1]} : vector<2x8x512xbf16> to vector<2x8x128xbf16>
    %372 = vector.extract_strided_slice %349 {offsets = [0, 0, 128], sizes = [2, 8, 128], strides = [1, 1, 1]} : vector<2x8x512xbf16> to vector<2x8x128xbf16>
    %373 = vector.extract_strided_slice %351 {offsets = [0, 0, 128], sizes = [2, 8, 128], strides = [1, 1, 1]} : vector<2x8x512xbf16> to vector<2x8x128xbf16>
    "tpu.trace_start"() <{level = 10 : i32, message = "bnd,bmd->bnm"}> : () -> ()
    %cst_214 = arith.constant dense<0.000000e+00> : vector<2x8x8xf32>
    %374 = tpu.matmul %371, %372, %cst_214 {dimension_numbers = #tpu.dot_dimension_numbers<[2], [2], [1], [1], [0, 0, 0, 1, 1, 1], [0], [0]>} : vector<2x8x128xbf16>, vector<2x8x128xbf16>, vector<2x8x8xf32> -> vector<2x8x8xf32>
    "tpu.trace_stop"() : () -> ()
    %cst_215 = arith.constant 0.353553385 : f32
    %375 = vector.broadcast %cst_215 : f32 to vector<2x8x8xf32>
    %376 = arith.mulf %374, %375 : vector<2x8x8xf32>
    %cst_216 = arith.constant dense<0xFF800000> : vector<2x8xf32>
    %377 = vector.multi_reduction <maximumf>, %376, %cst_216 [2] : vector<2x8x8xf32> to vector<2x8xf32>
    %378 = vector.shape_cast %377 : vector<2x8xf32> to vector<2x8x1xf32>
    %379 = vector.broadcast %378 : vector<2x8x1xf32> to vector<2x8x8xf32>
    %380 = arith.subf %376, %379 : vector<2x8x8xf32>
    %381 = math.exp %380 : vector<2x8x8xf32>
    %cst_217 = arith.constant dense<0.000000e+00> : vector<2x8xf32>
    %382 = vector.multi_reduction <add>, %381, %cst_217 [2] : vector<2x8x8xf32> to vector<2x8xf32>
    %383 = vector.shape_cast %382 : vector<2x8xf32> to vector<2x8x1xf32>
    %384 = tpu.reciprocal %383 {approx = true} : vector<2x8x1xf32> -> vector<2x8x1xf32>
    %385 = vector.broadcast %384 : vector<2x8x1xf32> to vector<2x8x8xf32>
    %386 = arith.mulf %381, %385 : vector<2x8x8xf32>
    %387 = arith.truncf %386 : vector<2x8x8xf32> to vector<2x8x8xbf16>
    "tpu.trace_start"() <{level = 10 : i32, message = "bnm,bmd->bnd"}> : () -> ()
    %cst_218 = arith.constant dense<0.000000e+00> : vector<2x8x128xf32>
    %388 = tpu.matmul %387, %373, %cst_218 {dimension_numbers = #tpu.dot_dimension_numbers<[2], [1], [1], [2], [0, 0, 0, 1, 1, 2], [0], [0]>} : vector<2x8x8xbf16>, vector<2x8x128xbf16>, vector<2x8x128xf32> -> vector<2x8x128xf32>
    "tpu.trace_stop"() : () -> ()
    %389 = arith.truncf %388 : vector<2x8x128xf32> to vector<2x8x128xbf16>
    %390 = vector.extract_strided_slice %347 {offsets = [0, 0, 256], sizes = [2, 8, 128], strides = [1, 1, 1]} : vector<2x8x512xbf16> to vector<2x8x128xbf16>
    %391 = vector.extract_strided_slice %349 {offsets = [0, 0, 256], sizes = [2, 8, 128], strides = [1, 1, 1]} : vector<2x8x512xbf16> to vector<2x8x128xbf16>
    %392 = vector.extract_strided_slice %351 {offsets = [0, 0, 256], sizes = [2, 8, 128], strides = [1, 1, 1]} : vector<2x8x512xbf16> to vector<2x8x128xbf16>
    "tpu.trace_start"() <{level = 10 : i32, message = "bnd,bmd->bnm"}> : () -> ()
    %cst_219 = arith.constant dense<0.000000e+00> : vector<2x8x8xf32>
    %393 = tpu.matmul %390, %391, %cst_219 {dimension_numbers = #tpu.dot_dimension_numbers<[2], [2], [1], [1], [0, 0, 0, 1, 1, 1], [0], [0]>} : vector<2x8x128xbf16>, vector<2x8x128xbf16>, vector<2x8x8xf32> -> vector<2x8x8xf32>
    "tpu.trace_stop"() : () -> ()
    %cst_220 = arith.constant 0.353553385 : f32
    %394 = vector.broadcast %cst_220 : f32 to vector<2x8x8xf32>
    %395 = arith.mulf %393, %394 : vector<2x8x8xf32>
    %cst_221 = arith.constant dense<0xFF800000> : vector<2x8xf32>
    %396 = vector.multi_reduction <maximumf>, %395, %cst_221 [2] : vector<2x8x8xf32> to vector<2x8xf32>
    %397 = vector.shape_cast %396 : vector<2x8xf32> to vector<2x8x1xf32>
    %398 = vector.broadcast %397 : vector<2x8x1xf32> to vector<2x8x8xf32>
    %399 = arith.subf %395, %398 : vector<2x8x8xf32>
    %400 = math.exp %399 : vector<2x8x8xf32>
    %cst_222 = arith.constant dense<0.000000e+00> : vector<2x8xf32>
    %401 = vector.multi_reduction <add>, %400, %cst_222 [2] : vector<2x8x8xf32> to vector<2x8xf32>
    %402 = vector.shape_cast %401 : vector<2x8xf32> to vector<2x8x1xf32>
    %403 = tpu.reciprocal %402 {approx = true} : vector<2x8x1xf32> -> vector<2x8x1xf32>
    %404 = vector.broadcast %403 : vector<2x8x1xf32> to vector<2x8x8xf32>
    %405 = arith.mulf %400, %404 : vector<2x8x8xf32>
    %406 = arith.truncf %405 : vector<2x8x8xf32> to vector<2x8x8xbf16>
    "tpu.trace_start"() <{level = 10 : i32, message = "bnm,bmd->bnd"}> : () -> ()
    %cst_223 = arith.constant dense<0.000000e+00> : vector<2x8x128xf32>
    %407 = tpu.matmul %406, %392, %cst_223 {dimension_numbers = #tpu.dot_dimension_numbers<[2], [1], [1], [2], [0, 0, 0, 1, 1, 2], [0], [0]>} : vector<2x8x8xbf16>, vector<2x8x128xbf16>, vector<2x8x128xf32> -> vector<2x8x128xf32>
    "tpu.trace_stop"() : () -> ()
    %408 = arith.truncf %407 : vector<2x8x128xf32> to vector<2x8x128xbf16>
    %409 = vector.extract_strided_slice %347 {offsets = [0, 0, 384], sizes = [2, 8, 128], strides = [1, 1, 1]} : vector<2x8x512xbf16> to vector<2x8x128xbf16>
    %410 = vector.extract_strided_slice %349 {offsets = [0, 0, 384], sizes = [2, 8, 128], strides = [1, 1, 1]} : vector<2x8x512xbf16> to vector<2x8x128xbf16>
    %411 = vector.extract_strided_slice %351 {offsets = [0, 0, 384], sizes = [2, 8, 128], strides = [1, 1, 1]} : vector<2x8x512xbf16> to vector<2x8x128xbf16>
    "tpu.trace_start"() <{level = 10 : i32, message = "bnd,bmd->bnm"}> : () -> ()
    %cst_224 = arith.constant dense<0.000000e+00> : vector<2x8x8xf32>
    %412 = tpu.matmul %409, %410, %cst_224 {dimension_numbers = #tpu.dot_dimension_numbers<[2], [2], [1], [1], [0, 0, 0, 1, 1, 1], [0], [0]>} : vector<2x8x128xbf16>, vector<2x8x128xbf16>, vector<2x8x8xf32> -> vector<2x8x8xf32>
    "tpu.trace_stop"() : () -> ()
    %cst_225 = arith.constant 0.353553385 : f32
    %413 = vector.broadcast %cst_225 : f32 to vector<2x8x8xf32>
    %414 = arith.mulf %412, %413 : vector<2x8x8xf32>
    %cst_226 = arith.constant dense<0xFF800000> : vector<2x8xf32>
    %415 = vector.multi_reduction <maximumf>, %414, %cst_226 [2] : vector<2x8x8xf32> to vector<2x8xf32>
    %416 = vector.shape_cast %415 : vector<2x8xf32> to vector<2x8x1xf32>
    %417 = vector.broadcast %416 : vector<2x8x1xf32> to vector<2x8x8xf32>
    %418 = arith.subf %414, %417 : vector<2x8x8xf32>
    %419 = math.exp %418 : vector<2x8x8xf32>
    %cst_227 = arith.constant dense<0.000000e+00> : vector<2x8xf32>
    %420 = vector.multi_reduction <add>, %419, %cst_227 [2] : vector<2x8x8xf32> to vector<2x8xf32>
    %421 = vector.shape_cast %420 : vector<2x8xf32> to vector<2x8x1xf32>
    %422 = tpu.reciprocal %421 {approx = true} : vector<2x8x1xf32> -> vector<2x8x1xf32>
    %423 = vector.broadcast %422 : vector<2x8x1xf32> to vector<2x8x8xf32>
    %424 = arith.mulf %419, %423 : vector<2x8x8xf32>
    %425 = arith.truncf %424 : vector<2x8x8xf32> to vector<2x8x8xbf16>
    "tpu.trace_start"() <{level = 10 : i32, message = "bnm,bmd->bnd"}> : () -> ()
    %cst_228 = arith.constant dense<0.000000e+00> : vector<2x8x128xf32>
    %426 = tpu.matmul %425, %411, %cst_228 {dimension_numbers = #tpu.dot_dimension_numbers<[2], [1], [1], [2], [0, 0, 0, 1, 1, 2], [0], [0]>} : vector<2x8x8xbf16>, vector<2x8x128xbf16>, vector<2x8x128xf32> -> vector<2x8x128xf32>
    "tpu.trace_stop"() : () -> ()
    %427 = arith.truncf %426 : vector<2x8x128xf32> to vector<2x8x128xbf16>
    %428 = tpu.concatenate %370, %389, %408, %427 in 2 : vector<2x8x128xbf16>, vector<2x8x128xbf16>, vector<2x8x128xbf16>, vector<2x8x128xbf16> -> vector<2x8x512xbf16>
    %429 = vector.shape_cast %428 : vector<2x8x512xbf16> to vector<16x512xbf16>
    %cst_229 = arith.constant dense<0.000000e+00> : vector<16x128xf32>
    %430 = tpu.matmul %429, %285, %cst_229 {dimension_numbers = #tpu.dot_dimension_numbers<[1], [0], [0], [1], [0, 0, 1, 1], [], []>} : vector<16x512xbf16>, vector<512x128xbf16>, vector<16x128xf32> -> vector<16x128xf32>
    %431 = vector.broadcast %297 : vector<1x128xf32> to vector<16x128xf32>
    %432 = arith.addf %430, %431 : vector<16x128xf32>
    %433 = vector.shape_cast %432 : vector<16x128xf32> to vector<2x8x128xf32>
    %434 = arith.addf %433, %277 : vector<2x8x128xf32>
    %c0_230 = arith.constant 0 : index
    %c1_231 = arith.constant 1 : index
    %c0_232 = arith.constant 0 : index
    %c0_233 = arith.constant 0 : index
    %435 = vector.load %arg16[%c0_230, %c1_231, %c0_232, %c0_233] : memref<1x3x1x128xf32, #tpu.memory_space<vmem>>, vector<1x1x1x128xf32>
    %436 = vector.shape_cast %435 : vector<1x1x1x128xf32> to vector<1x128xf32>
    %c0_234 = arith.constant 0 : index
    %c1_235 = arith.constant 1 : index
    %c0_236 = arith.constant 0 : index
    %c0_237 = arith.constant 0 : index
    %437 = vector.load %arg17[%c0_234, %c1_235, %c0_236, %c0_237] : memref<1x3x1x128xf32, #tpu.memory_space<vmem>>, vector<1x1x1x128xf32>
    %438 = vector.shape_cast %437 : vector<1x1x1x128xf32> to vector<1x128xf32>
    %cst_238 = arith.constant dense<0.000000e+00> : vector<2x8xf32>
    %439 = vector.multi_reduction <add>, %434, %cst_238 [2] : vector<2x8x128xf32> to vector<2x8xf32>
    %440 = vector.shape_cast %439 : vector<2x8xf32> to vector<2x8x1xf32>
    %cst_239 = arith.constant 3.125000e-02 : f32
    %441 = vector.broadcast %cst_239 : f32 to vector<2x8x1xf32>
    %442 = arith.mulf %440, %441 : vector<2x8x1xf32>
    %443 = tpu.iota {dimensions = array<i32: 2>} : vector<2x8x128xi32>
    %c32_i32_240 = arith.constant 32 : i32
    %444 = vector.broadcast %c32_i32_240 : i32 to vector<2x8x128xi32>
    %445 = arith.cmpi slt, %443, %444 : vector<2x8x128xi32>
    %446 = vector.broadcast %442 : vector<2x8x1xf32> to vector<2x8x128xf32>
    %447 = arith.subf %434, %446 : vector<2x8x128xf32>
    %cst_241 = arith.constant 0.000000e+00 : f32
    %448 = vector.broadcast %cst_241 : f32 to vector<2x8x128xf32>
    %449 = arith.select %445, %447, %448 : vector<2x8x128xi1>, vector<2x8x128xf32>
    %450 = arith.mulf %449, %449 : vector<2x8x128xf32>
    %cst_242 = arith.constant dense<0.000000e+00> : vector<2x8xf32>
    %451 = vector.multi_reduction <add>, %450, %cst_242 [2] : vector<2x8x128xf32> to vector<2x8xf32>
    %452 = vector.shape_cast %451 : vector<2x8xf32> to vector<2x8x1xf32>
    %cst_243 = arith.constant 3.125000e-02 : f32
    %453 = vector.broadcast %cst_243 : f32 to vector<2x8x1xf32>
    %454 = arith.mulf %452, %453 : vector<2x8x1xf32>
    %cst_244 = arith.constant 9.99999974E-6 : f32
    %455 = vector.broadcast %cst_244 : f32 to vector<2x8x1xf32>
    %456 = arith.addf %454, %455 : vector<2x8x1xf32>
    %457 = math.rsqrt %456 : vector<2x8x1xf32>
    %458 = vector.broadcast %457 : vector<2x8x1xf32> to vector<2x8x128xf32>
    %459 = arith.mulf %449, %458 : vector<2x8x128xf32>
    %460 = vector.shape_cast %436 : vector<1x128xf32> to vector<1x1x128xf32>
    %461 = vector.broadcast %460 : vector<1x1x128xf32> to vector<2x8x128xf32>
    %462 = arith.mulf %459, %461 : vector<2x8x128xf32>
    %463 = vector.shape_cast %438 : vector<1x128xf32> to vector<1x1x128xf32>
    %464 = vector.broadcast %463 : vector<1x1x128xf32> to vector<2x8x128xf32>
    %465 = arith.addf %462, %464 : vector<2x8x128xf32>
    %466 = vector.shape_cast %465 : vector<2x8x128xf32> to vector<16x128xf32>
    %467 = arith.truncf %466 : vector<16x128xf32> to vector<16x128xbf16>
    %cst_245 = arith.constant dense<0.000000e+00> : vector<16x128xf32>
    %468 = tpu.matmul %467, %287, %cst_245 {dimension_numbers = #tpu.dot_dimension_numbers<[1], [0], [0], [1], [0, 0, 1, 1], [], []>} : vector<16x128xbf16>, vector<128x128xbf16>, vector<16x128xf32> -> vector<16x128xf32>
    %469 = vector.broadcast %299 : vector<1x128xf32> to vector<16x128xf32>
    %470 = arith.addf %468, %469 : vector<16x128xf32>
    %cst_246 = arith.constant 5.000000e-01 : f32
    %471 = vector.broadcast %cst_246 : f32 to vector<16x128xf32>
    %472 = arith.mulf %471, %470 : vector<16x128xf32>
    %cst_247 = arith.constant 0.707106769 : f32
    %473 = vector.broadcast %cst_247 : f32 to vector<16x128xf32>
    %474 = arith.mulf %470, %473 : vector<16x128xf32>
    %475 = math.absf %474 : vector<16x128xf32>
    %cst_248 = arith.constant 0.327591091 : f32
    %476 = vector.broadcast %cst_248 : f32 to vector<16x128xf32>
    %477 = arith.mulf %476, %475 : vector<16x128xf32>
    %cst_249 = arith.constant 1.000000e+00 : f32
    %478 = vector.broadcast %cst_249 : f32 to vector<16x128xf32>
    %479 = arith.addf %478, %477 : vector<16x128xf32>
    %cst_250 = arith.constant 1.000000e+00 : f32
    %480 = vector.broadcast %cst_250 : f32 to vector<16x128xf32>
    %481 = arith.divf %480, %479 : vector<16x128xf32>
    %cst_251 = arith.constant 1.06140542 : f32
    %482 = vector.broadcast %cst_251 : f32 to vector<16x128xf32>
    %483 = arith.mulf %482, %481 : vector<16x128xf32>
    %cst_252 = arith.constant -1.45315206 : f32
    %484 = vector.broadcast %cst_252 : f32 to vector<16x128xf32>
    %485 = arith.addf %483, %484 : vector<16x128xf32>
    %486 = arith.mulf %485, %481 : vector<16x128xf32>
    %cst_253 = arith.constant 1.42141378 : f32
    %487 = vector.broadcast %cst_253 : f32 to vector<16x128xf32>
    %488 = arith.addf %486, %487 : vector<16x128xf32>
    %489 = arith.mulf %488, %481 : vector<16x128xf32>
    %cst_254 = arith.constant -0.284496725 : f32
    %490 = vector.broadcast %cst_254 : f32 to vector<16x128xf32>
    %491 = arith.addf %489, %490 : vector<16x128xf32>
    %492 = arith.mulf %491, %481 : vector<16x128xf32>
    %cst_255 = arith.constant 0.254829586 : f32
    %493 = vector.broadcast %cst_255 : f32 to vector<16x128xf32>
    %494 = arith.addf %492, %493 : vector<16x128xf32>
    %495 = arith.mulf %494, %481 : vector<16x128xf32>
    %cst_256 = arith.constant 0.000000e+00 : f32
    %496 = vector.broadcast %cst_256 : f32 to vector<16x128xf32>
    %497 = arith.subf %496, %475 : vector<16x128xf32>
    %498 = arith.mulf %497, %475 : vector<16x128xf32>
    %499 = math.exp %498 : vector<16x128xf32>
    %500 = arith.mulf %495, %499 : vector<16x128xf32>
    %cst_257 = arith.constant 1.000000e+00 : f32
    %501 = vector.broadcast %cst_257 : f32 to vector<16x128xf32>
    %502 = arith.subf %501, %500 : vector<16x128xf32>
    %cst_258 = arith.constant 0.000000e+00 : f32
    %503 = vector.broadcast %cst_258 : f32 to vector<16x128xf32>
    %504 = arith.cmpf oge, %474, %503 : vector<16x128xf32>
    %cst_259 = arith.constant 0.000000e+00 : f32
    %505 = vector.broadcast %cst_259 : f32 to vector<16x128xf32>
    %506 = arith.subf %505, %502 : vector<16x128xf32>
    %507 = arith.select %504, %502, %506 : vector<16x128xi1>, vector<16x128xf32>
    %cst_260 = arith.constant 1.000000e+00 : f32
    %508 = vector.broadcast %cst_260 : f32 to vector<16x128xf32>
    %509 = arith.addf %508, %507 : vector<16x128xf32>
    %510 = arith.mulf %472, %509 : vector<16x128xf32>
    %511 = arith.truncf %510 : vector<16x128xf32> to vector<16x128xbf16>
    %cst_261 = arith.constant dense<0.000000e+00> : vector<16x128xf32>
    %512 = tpu.matmul %511, %289, %cst_261 {dimension_numbers = #tpu.dot_dimension_numbers<[1], [0], [0], [1], [0, 0, 1, 1], [], []>} : vector<16x128xbf16>, vector<128x128xbf16>, vector<16x128xf32> -> vector<16x128xf32>
    %513 = vector.broadcast %301 : vector<1x128xf32> to vector<16x128xf32>
    %514 = arith.addf %512, %513 : vector<16x128xf32>
    %515 = vector.shape_cast %514 : vector<16x128xf32> to vector<2x8x128xf32>
    %516 = arith.addf %515, %434 : vector<2x8x128xf32>
    %c0_262 = arith.constant 0 : index
    %c0_263 = arith.constant 0 : index
    %c0_264 = arith.constant 0 : index
    %517 = vector.load %arg23[%c0_262, %c0_263, %c0_264] : memref<2x8x128xf32, #tpu.memory_space<vmem>>, vector<2x8x128xf32>
    tpu.vector_store %arg23[%c0_262, %c0_263, %c0_264], %516 {strides = array<i32>} : memref<2x8x128xf32, #tpu.memory_space<vmem>>, vector<2x8x128xf32>,
    %c0_265 = arith.constant 0 : index
    %c0_266 = arith.constant 0 : index
    %c0_267 = arith.constant 0 : index
    %518 = vector.load %arg23[%c0_265, %c0_266, %c0_267] : memref<2x8x128xf32, #tpu.memory_space<vmem>>, vector<2x8x128xf32>
    %c0_268 = arith.constant 0 : index
    %c2 = arith.constant 2 : index
    %c0_269 = arith.constant 0 : index
    %c0_270 = arith.constant 0 : index
    %519 = vector.load %arg8[%c0_268, %c2, %c0_269, %c0_270] : memref<1x3x128x512xbf16, #tpu.memory_space<vmem>>, vector<1x1x128x512xbf16>
    %520 = vector.shape_cast %519 : vector<1x1x128x512xbf16> to vector<128x512xbf16>
    %c0_271 = arith.constant 0 : index
    %c2_272 = arith.constant 2 : index
    %c0_273 = arith.constant 0 : index
    %c0_274 = arith.constant 0 : index
    %521 = vector.load %arg10[%c0_271, %c2_272, %c0_273, %c0_274] : memref<1x3x128x512xbf16, #tpu.memory_space<vmem>>, vector<1x1x128x512xbf16>
    %522 = vector.shape_cast %521 : vector<1x1x128x512xbf16> to vector<128x512xbf16>
    %c0_275 = arith.constant 0 : index
    %c2_276 = arith.constant 2 : index
    %c0_277 = arith.constant 0 : index
    %c0_278 = arith.constant 0 : index
    %523 = vector.load %arg12[%c0_275, %c2_276, %c0_277, %c0_278] : memref<1x3x128x512xbf16, #tpu.memory_space<vmem>>, vector<1x1x128x512xbf16>
    %524 = vector.shape_cast %523 : vector<1x1x128x512xbf16> to vector<128x512xbf16>
    %c0_279 = arith.constant 0 : index
    %c2_280 = arith.constant 2 : index
    %c0_281 = arith.constant 0 : index
    %c0_282 = arith.constant 0 : index
    %525 = vector.load %arg14[%c0_279, %c2_280, %c0_281, %c0_282] : memref<1x3x512x128xbf16, #tpu.memory_space<vmem>>, vector<1x1x512x128xbf16>
    %526 = vector.shape_cast %525 : vector<1x1x512x128xbf16> to vector<512x128xbf16>
    %c0_283 = arith.constant 0 : index
    %c2_284 = arith.constant 2 : index
    %c0_285 = arith.constant 0 : index
    %c0_286 = arith.constant 0 : index
    %527 = vector.load %arg18[%c0_283, %c2_284, %c0_285, %c0_286] : memref<1x3x128x128xbf16, #tpu.memory_space<vmem>>, vector<1x1x128x128xbf16>
    %528 = vector.shape_cast %527 : vector<1x1x128x128xbf16> to vector<128x128xbf16>
    %c0_287 = arith.constant 0 : index
    %c2_288 = arith.constant 2 : index
    %c0_289 = arith.constant 0 : index
    %c0_290 = arith.constant 0 : index
    %529 = vector.load %arg20[%c0_287, %c2_288, %c0_289, %c0_290] : memref<1x3x128x128xbf16, #tpu.memory_space<vmem>>, vector<1x1x128x128xbf16>
    %530 = vector.shape_cast %529 : vector<1x1x128x128xbf16> to vector<128x128xbf16>
    %c0_291 = arith.constant 0 : index
    %c2_292 = arith.constant 2 : index
    %c0_293 = arith.constant 0 : index
    %c0_294 = arith.constant 0 : index
    %531 = vector.load %arg9[%c0_291, %c2_292, %c0_293, %c0_294] : memref<1x3x1x512xf32, #tpu.memory_space<vmem>>, vector<1x1x1x512xf32>
    %532 = vector.shape_cast %531 : vector<1x1x1x512xf32> to vector<1x512xf32>
    %c0_295 = arith.constant 0 : index
    %c2_296 = arith.constant 2 : index
    %c0_297 = arith.constant 0 : index
    %c0_298 = arith.constant 0 : index
    %533 = vector.load %arg11[%c0_295, %c2_296, %c0_297, %c0_298] : memref<1x3x1x512xf32, #tpu.memory_space<vmem>>, vector<1x1x1x512xf32>
    %534 = vector.shape_cast %533 : vector<1x1x1x512xf32> to vector<1x512xf32>
    %c0_299 = arith.constant 0 : index
    %c2_300 = arith.constant 2 : index
    %c0_301 = arith.constant 0 : index
    %c0_302 = arith.constant 0 : index
    %535 = vector.load %arg13[%c0_299, %c2_300, %c0_301, %c0_302] : memref<1x3x1x512xf32, #tpu.memory_space<vmem>>, vector<1x1x1x512xf32>
    %536 = vector.shape_cast %535 : vector<1x1x1x512xf32> to vector<1x512xf32>
    %c0_303 = arith.constant 0 : index
    %c2_304 = arith.constant 2 : index
    %c0_305 = arith.constant 0 : index
    %c0_306 = arith.constant 0 : index
    %537 = vector.load %arg15[%c0_303, %c2_304, %c0_305, %c0_306] : memref<1x3x1x128xf32, #tpu.memory_space<vmem>>, vector<1x1x1x128xf32>
    %538 = vector.shape_cast %537 : vector<1x1x1x128xf32> to vector<1x128xf32>
    %c0_307 = arith.constant 0 : index
    %c2_308 = arith.constant 2 : index
    %c0_309 = arith.constant 0 : index
    %c0_310 = arith.constant 0 : index
    %539 = vector.load %arg19[%c0_307, %c2_308, %c0_309, %c0_310] : memref<1x3x1x128xf32, #tpu.memory_space<vmem>>, vector<1x1x1x128xf32>
    %540 = vector.shape_cast %539 : vector<1x1x1x128xf32> to vector<1x128xf32>
    %c0_311 = arith.constant 0 : index
    %c2_312 = arith.constant 2 : index
    %c0_313 = arith.constant 0 : index
    %c0_314 = arith.constant 0 : index
    %541 = vector.load %arg21[%c0_311, %c2_312, %c0_313, %c0_314] : memref<1x3x1x128xf32, #tpu.memory_space<vmem>>, vector<1x1x1x128xf32>
    %542 = vector.shape_cast %541 : vector<1x1x1x128xf32> to vector<1x128xf32>
    %c0_315 = arith.constant 0 : index
    %c2_316 = arith.constant 2 : index
    %c0_317 = arith.constant 0 : index
    %c0_318 = arith.constant 0 : index
    %543 = vector.load %arg4[%c0_315, %c2_316, %c0_317, %c0_318] : memref<1x3x1x128xf32, #tpu.memory_space<vmem>>, vector<1x1x1x128xf32>
    %544 = vector.shape_cast %543 : vector<1x1x1x128xf32> to vector<1x128xf32>
    %c0_319 = arith.constant 0 : index
    %c2_320 = arith.constant 2 : index
    %c0_321 = arith.constant 0 : index
    %c0_322 = arith.constant 0 : index
    %545 = vector.load %arg5[%c0_319, %c2_320, %c0_321, %c0_322] : memref<1x3x1x128xf32, #tpu.memory_space<vmem>>, vector<1x1x1x128xf32>
    %546 = vector.shape_cast %545 : vector<1x1x1x128xf32> to vector<1x128xf32>
    %cst_323 = arith.constant dense<0.000000e+00> : vector<2x8xf32>
    %547 = vector.multi_reduction <add>, %518, %cst_323 [2] : vector<2x8x128xf32> to vector<2x8xf32>
    %548 = vector.shape_cast %547 : vector<2x8xf32> to vector<2x8x1xf32>
    %cst_324 = arith.constant 3.125000e-02 : f32
    %549 = vector.broadcast %cst_324 : f32 to vector<2x8x1xf32>
    %550 = arith.mulf %548, %549 : vector<2x8x1xf32>
    %551 = tpu.iota {dimensions = array<i32: 2>} : vector<2x8x128xi32>
    %c32_i32_325 = arith.constant 32 : i32
    %552 = vector.broadcast %c32_i32_325 : i32 to vector<2x8x128xi32>
    %553 = arith.cmpi slt, %551, %552 : vector<2x8x128xi32>
    %554 = vector.broadcast %550 : vector<2x8x1xf32> to vector<2x8x128xf32>
    %555 = arith.subf %518, %554 : vector<2x8x128xf32>
    %cst_326 = arith.constant 0.000000e+00 : f32
    %556 = vector.broadcast %cst_326 : f32 to vector<2x8x128xf32>
    %557 = arith.select %553, %555, %556 : vector<2x8x128xi1>, vector<2x8x128xf32>
    %558 = arith.mulf %557, %557 : vector<2x8x128xf32>
    %cst_327 = arith.constant dense<0.000000e+00> : vector<2x8xf32>
    %559 = vector.multi_reduction <add>, %558, %cst_327 [2] : vector<2x8x128xf32> to vector<2x8xf32>
    %560 = vector.shape_cast %559 : vector<2x8xf32> to vector<2x8x1xf32>
    %cst_328 = arith.constant 3.125000e-02 : f32
    %561 = vector.broadcast %cst_328 : f32 to vector<2x8x1xf32>
    %562 = arith.mulf %560, %561 : vector<2x8x1xf32>
    %cst_329 = arith.constant 9.99999974E-6 : f32
    %563 = vector.broadcast %cst_329 : f32 to vector<2x8x1xf32>
    %564 = arith.addf %562, %563 : vector<2x8x1xf32>
    %565 = math.rsqrt %564 : vector<2x8x1xf32>
    %566 = vector.broadcast %565 : vector<2x8x1xf32> to vector<2x8x128xf32>
    %567 = arith.mulf %557, %566 : vector<2x8x128xf32>
    %568 = vector.shape_cast %544 : vector<1x128xf32> to vector<1x1x128xf32>
    %569 = vector.broadcast %568 : vector<1x1x128xf32> to vector<2x8x128xf32>
    %570 = arith.mulf %567, %569 : vector<2x8x128xf32>
    %571 = vector.shape_cast %546 : vector<1x128xf32> to vector<1x1x128xf32>
    %572 = vector.broadcast %571 : vector<1x1x128xf32> to vector<2x8x128xf32>
    %573 = arith.addf %570, %572 : vector<2x8x128xf32>
    %574 = vector.shape_cast %573 : vector<2x8x128xf32> to vector<16x128xf32>
    %575 = arith.truncf %574 : vector<16x128xf32> to vector<16x128xbf16>
    %576 = vector.shape_cast %573 : vector<2x8x128xf32> to vector<16x128xf32>
    %577 = arith.truncf %576 : vector<16x128xf32> to vector<16x128xbf16>
    %cst_330 = arith.constant dense<0.000000e+00> : vector<16x512xf32>
    %578 = tpu.matmul %575, %520, %cst_330 {dimension_numbers = #tpu.dot_dimension_numbers<[1], [0], [0], [1], [0, 0, 1, 1], [], []>} : vector<16x128xbf16>, vector<128x512xbf16>, vector<16x512xf32> -> vector<16x512xf32>
    %579 = vector.broadcast %532 : vector<1x512xf32> to vector<16x512xf32>
    %580 = arith.addf %578, %579 : vector<16x512xf32>
    %cst_331 = arith.constant dense<0.000000e+00> : vector<16x512xf32>
    %581 = tpu.matmul %577, %522, %cst_331 {dimension_numbers = #tpu.dot_dimension_numbers<[1], [0], [0], [1], [0, 0, 1, 1], [], []>} : vector<16x128xbf16>, vector<128x512xbf16>, vector<16x512xf32> -> vector<16x512xf32>
    %582 = vector.broadcast %534 : vector<1x512xf32> to vector<16x512xf32>
    %583 = arith.addf %581, %582 : vector<16x512xf32>
    %cst_332 = arith.constant dense<0.000000e+00> : vector<16x512xf32>
    %584 = tpu.matmul %577, %524, %cst_332 {dimension_numbers = #tpu.dot_dimension_numbers<[1], [0], [0], [1], [0, 0, 1, 1], [], []>} : vector<16x128xbf16>, vector<128x512xbf16>, vector<16x512xf32> -> vector<16x512xf32>
    %585 = vector.broadcast %536 : vector<1x512xf32> to vector<16x512xf32>
    %586 = arith.addf %584, %585 : vector<16x512xf32>
    %587 = vector.shape_cast %580 : vector<16x512xf32> to vector<2x8x512xf32>
    %588 = arith.truncf %587 : vector<2x8x512xf32> to vector<2x8x512xbf16>
    %589 = vector.shape_cast %583 : vector<16x512xf32> to vector<2x8x512xf32>
    %590 = arith.truncf %589 : vector<2x8x512xf32> to vector<2x8x512xbf16>
    %591 = vector.shape_cast %586 : vector<16x512xf32> to vector<2x8x512xf32>
    %592 = arith.truncf %591 : vector<2x8x512xf32> to vector<2x8x512xbf16>
    %593 = vector.extract_strided_slice %588 {offsets = [0, 0, 0], sizes = [2, 8, 128], strides = [1, 1, 1]} : vector<2x8x512xbf16> to vector<2x8x128xbf16>
    %594 = vector.extract_strided_slice %590 {offsets = [0, 0, 0], sizes = [2, 8, 128], strides = [1, 1, 1]} : vector<2x8x512xbf16> to vector<2x8x128xbf16>
    %595 = vector.extract_strided_slice %592 {offsets = [0, 0, 0], sizes = [2, 8, 128], strides = [1, 1, 1]} : vector<2x8x512xbf16> to vector<2x8x128xbf16>
    "tpu.trace_start"() <{level = 10 : i32, message = "bnd,bmd->bnm"}> : () -> ()
    %cst_333 = arith.constant dense<0.000000e+00> : vector<2x8x8xf32>
    %596 = tpu.matmul %593, %594, %cst_333 {dimension_numbers = #tpu.dot_dimension_numbers<[2], [2], [1], [1], [0, 0, 0, 1, 1, 1], [0], [0]>} : vector<2x8x128xbf16>, vector<2x8x128xbf16>, vector<2x8x8xf32> -> vector<2x8x8xf32>
    "tpu.trace_stop"() : () -> ()
    %cst_334 = arith.constant 0.353553385 : f32
    %597 = vector.broadcast %cst_334 : f32 to vector<2x8x8xf32>
    %598 = arith.mulf %596, %597 : vector<2x8x8xf32>
    %cst_335 = arith.constant dense<0xFF800000> : vector<2x8xf32>
    %599 = vector.multi_reduction <maximumf>, %598, %cst_335 [2] : vector<2x8x8xf32> to vector<2x8xf32>
    %600 = vector.shape_cast %599 : vector<2x8xf32> to vector<2x8x1xf32>
    %601 = vector.broadcast %600 : vector<2x8x1xf32> to vector<2x8x8xf32>
    %602 = arith.subf %598, %601 : vector<2x8x8xf32>
    %603 = math.exp %602 : vector<2x8x8xf32>
    %cst_336 = arith.constant dense<0.000000e+00> : vector<2x8xf32>
    %604 = vector.multi_reduction <add>, %603, %cst_336 [2] : vector<2x8x8xf32> to vector<2x8xf32>
    %605 = vector.shape_cast %604 : vector<2x8xf32> to vector<2x8x1xf32>
    %606 = tpu.reciprocal %605 {approx = true} : vector<2x8x1xf32> -> vector<2x8x1xf32>
    %607 = vector.broadcast %606 : vector<2x8x1xf32> to vector<2x8x8xf32>
    %608 = arith.mulf %603, %607 : vector<2x8x8xf32>
    %609 = arith.truncf %608 : vector<2x8x8xf32> to vector<2x8x8xbf16>
    "tpu.trace_start"() <{level = 10 : i32, message = "bnm,bmd->bnd"}> : () -> ()
    %cst_337 = arith.constant dense<0.000000e+00> : vector<2x8x128xf32>
    %610 = tpu.matmul %609, %595, %cst_337 {dimension_numbers = #tpu.dot_dimension_numbers<[2], [1], [1], [2], [0, 0, 0, 1, 1, 2], [0], [0]>} : vector<2x8x8xbf16>, vector<2x8x128xbf16>, vector<2x8x128xf32> -> vector<2x8x128xf32>
    "tpu.trace_stop"() : () -> ()
    %611 = arith.truncf %610 : vector<2x8x128xf32> to vector<2x8x128xbf16>
    %612 = vector.extract_strided_slice %588 {offsets = [0, 0, 128], sizes = [2, 8, 128], strides = [1, 1, 1]} : vector<2x8x512xbf16> to vector<2x8x128xbf16>
    %613 = vector.extract_strided_slice %590 {offsets = [0, 0, 128], sizes = [2, 8, 128], strides = [1, 1, 1]} : vector<2x8x512xbf16> to vector<2x8x128xbf16>
    %614 = vector.extract_strided_slice %592 {offsets = [0, 0, 128], sizes = [2, 8, 128], strides = [1, 1, 1]} : vector<2x8x512xbf16> to vector<2x8x128xbf16>
    "tpu.trace_start"() <{level = 10 : i32, message = "bnd,bmd->bnm"}> : () -> ()
    %cst_338 = arith.constant dense<0.000000e+00> : vector<2x8x8xf32>
    %615 = tpu.matmul %612, %613, %cst_338 {dimension_numbers = #tpu.dot_dimension_numbers<[2], [2], [1], [1], [0, 0, 0, 1, 1, 1], [0], [0]>} : vector<2x8x128xbf16>, vector<2x8x128xbf16>, vector<2x8x8xf32> -> vector<2x8x8xf32>
    "tpu.trace_stop"() : () -> ()
    %cst_339 = arith.constant 0.353553385 : f32
    %616 = vector.broadcast %cst_339 : f32 to vector<2x8x8xf32>
    %617 = arith.mulf %615, %616 : vector<2x8x8xf32>
    %cst_340 = arith.constant dense<0xFF800000> : vector<2x8xf32>
    %618 = vector.multi_reduction <maximumf>, %617, %cst_340 [2] : vector<2x8x8xf32> to vector<2x8xf32>
    %619 = vector.shape_cast %618 : vector<2x8xf32> to vector<2x8x1xf32>
    %620 = vector.broadcast %619 : vector<2x8x1xf32> to vector<2x8x8xf32>
    %621 = arith.subf %617, %620 : vector<2x8x8xf32>
    %622 = math.exp %621 : vector<2x8x8xf32>
    %cst_341 = arith.constant dense<0.000000e+00> : vector<2x8xf32>
    %623 = vector.multi_reduction <add>, %622, %cst_341 [2] : vector<2x8x8xf32> to vector<2x8xf32>
    %624 = vector.shape_cast %623 : vector<2x8xf32> to vector<2x8x1xf32>
    %625 = tpu.reciprocal %624 {approx = true} : vector<2x8x1xf32> -> vector<2x8x1xf32>
    %626 = vector.broadcast %625 : vector<2x8x1xf32> to vector<2x8x8xf32>
    %627 = arith.mulf %622, %626 : vector<2x8x8xf32>
    %628 = arith.truncf %627 : vector<2x8x8xf32> to vector<2x8x8xbf16>
    "tpu.trace_start"() <{level = 10 : i32, message = "bnm,bmd->bnd"}> : () -> ()
    %cst_342 = arith.constant dense<0.000000e+00> : vector<2x8x128xf32>
    %629 = tpu.matmul %628, %614, %cst_342 {dimension_numbers = #tpu.dot_dimension_numbers<[2], [1], [1], [2], [0, 0, 0, 1, 1, 2], [0], [0]>} : vector<2x8x8xbf16>, vector<2x8x128xbf16>, vector<2x8x128xf32> -> vector<2x8x128xf32>
    "tpu.trace_stop"() : () -> ()
    %630 = arith.truncf %629 : vector<2x8x128xf32> to vector<2x8x128xbf16>
    %631 = vector.extract_strided_slice %588 {offsets = [0, 0, 256], sizes = [2, 8, 128], strides = [1, 1, 1]} : vector<2x8x512xbf16> to vector<2x8x128xbf16>
    %632 = vector.extract_strided_slice %590 {offsets = [0, 0, 256], sizes = [2, 8, 128], strides = [1, 1, 1]} : vector<2x8x512xbf16> to vector<2x8x128xbf16>
    %633 = vector.extract_strided_slice %592 {offsets = [0, 0, 256], sizes = [2, 8, 128], strides = [1, 1, 1]} : vector<2x8x512xbf16> to vector<2x8x128xbf16>
    "tpu.trace_start"() <{level = 10 : i32, message = "bnd,bmd->bnm"}> : () -> ()
    %cst_343 = arith.constant dense<0.000000e+00> : vector<2x8x8xf32>
    %634 = tpu.matmul %631, %632, %cst_343 {dimension_numbers = #tpu.dot_dimension_numbers<[2], [2], [1], [1], [0, 0, 0, 1, 1, 1], [0], [0]>} : vector<2x8x128xbf16>, vector<2x8x128xbf16>, vector<2x8x8xf32> -> vector<2x8x8xf32>
    "tpu.trace_stop"() : () -> ()
    %cst_344 = arith.constant 0.353553385 : f32
    %635 = vector.broadcast %cst_344 : f32 to vector<2x8x8xf32>
    %636 = arith.mulf %634, %635 : vector<2x8x8xf32>
    %cst_345 = arith.constant dense<0xFF800000> : vector<2x8xf32>
    %637 = vector.multi_reduction <maximumf>, %636, %cst_345 [2] : vector<2x8x8xf32> to vector<2x8xf32>
    %638 = vector.shape_cast %637 : vector<2x8xf32> to vector<2x8x1xf32>
    %639 = vector.broadcast %638 : vector<2x8x1xf32> to vector<2x8x8xf32>
    %640 = arith.subf %636, %639 : vector<2x8x8xf32>
    %641 = math.exp %640 : vector<2x8x8xf32>
    %cst_346 = arith.constant dense<0.000000e+00> : vector<2x8xf32>
    %642 = vector.multi_reduction <add>, %641, %cst_346 [2] : vector<2x8x8xf32> to vector<2x8xf32>
    %643 = vector.shape_cast %642 : vector<2x8xf32> to vector<2x8x1xf32>
    %644 = tpu.reciprocal %643 {approx = true} : vector<2x8x1xf32> -> vector<2x8x1xf32>
    %645 = vector.broadcast %644 : vector<2x8x1xf32> to vector<2x8x8xf32>
    %646 = arith.mulf %641, %645 : vector<2x8x8xf32>
    %647 = arith.truncf %646 : vector<2x8x8xf32> to vector<2x8x8xbf16>
    "tpu.trace_start"() <{level = 10 : i32, message = "bnm,bmd->bnd"}> : () -> ()
    %cst_347 = arith.constant dense<0.000000e+00> : vector<2x8x128xf32>
    %648 = tpu.matmul %647, %633, %cst_347 {dimension_numbers = #tpu.dot_dimension_numbers<[2], [1], [1], [2], [0, 0, 0, 1, 1, 2], [0], [0]>} : vector<2x8x8xbf16>, vector<2x8x128xbf16>, vector<2x8x128xf32> -> vector<2x8x128xf32>
    "tpu.trace_stop"() : () -> ()
    %649 = arith.truncf %648 : vector<2x8x128xf32> to vector<2x8x128xbf16>
    %650 = vector.extract_strided_slice %588 {offsets = [0, 0, 384], sizes = [2, 8, 128], strides = [1, 1, 1]} : vector<2x8x512xbf16> to vector<2x8x128xbf16>
    %651 = vector.extract_strided_slice %590 {offsets = [0, 0, 384], sizes = [2, 8, 128], strides = [1, 1, 1]} : vector<2x8x512xbf16> to vector<2x8x128xbf16>
    %652 = vector.extract_strided_slice %592 {offsets = [0, 0, 384], sizes = [2, 8, 128], strides = [1, 1, 1]} : vector<2x8x512xbf16> to vector<2x8x128xbf16>
    "tpu.trace_start"() <{level = 10 : i32, message = "bnd,bmd->bnm"}> : () -> ()
    %cst_348 = arith.constant dense<0.000000e+00> : vector<2x8x8xf32>
    %653 = tpu.matmul %650, %651, %cst_348 {dimension_numbers = #tpu.dot_dimension_numbers<[2], [2], [1], [1], [0, 0, 0, 1, 1, 1], [0], [0]>} : vector<2x8x128xbf16>, vector<2x8x128xbf16>, vector<2x8x8xf32> -> vector<2x8x8xf32>
    "tpu.trace_stop"() : () -> ()
    %cst_349 = arith.constant 0.353553385 : f32
    %654 = vector.broadcast %cst_349 : f32 to vector<2x8x8xf32>
    %655 = arith.mulf %653, %654 : vector<2x8x8xf32>
    %cst_350 = arith.constant dense<0xFF800000> : vector<2x8xf32>
    %656 = vector.multi_reduction <maximumf>, %655, %cst_350 [2] : vector<2x8x8xf32> to vector<2x8xf32>
    %657 = vector.shape_cast %656 : vector<2x8xf32> to vector<2x8x1xf32>
    %658 = vector.broadcast %657 : vector<2x8x1xf32> to vector<2x8x8xf32>
    %659 = arith.subf %655, %658 : vector<2x8x8xf32>
    %660 = math.exp %659 : vector<2x8x8xf32>
    %cst_351 = arith.constant dense<0.000000e+00> : vector<2x8xf32>
    %661 = vector.multi_reduction <add>, %660, %cst_351 [2] : vector<2x8x8xf32> to vector<2x8xf32>
    %662 = vector.shape_cast %661 : vector<2x8xf32> to vector<2x8x1xf32>
    %663 = tpu.reciprocal %662 {approx = true} : vector<2x8x1xf32> -> vector<2x8x1xf32>
    %664 = vector.broadcast %663 : vector<2x8x1xf32> to vector<2x8x8xf32>
    %665 = arith.mulf %660, %664 : vector<2x8x8xf32>
    %666 = arith.truncf %665 : vector<2x8x8xf32> to vector<2x8x8xbf16>
    "tpu.trace_start"() <{level = 10 : i32, message = "bnm,bmd->bnd"}> : () -> ()
    %cst_352 = arith.constant dense<0.000000e+00> : vector<2x8x128xf32>
    %667 = tpu.matmul %666, %652, %cst_352 {dimension_numbers = #tpu.dot_dimension_numbers<[2], [1], [1], [2], [0, 0, 0, 1, 1, 2], [0], [0]>} : vector<2x8x8xbf16>, vector<2x8x128xbf16>, vector<2x8x128xf32> -> vector<2x8x128xf32>
    "tpu.trace_stop"() : () -> ()
    %668 = arith.truncf %667 : vector<2x8x128xf32> to vector<2x8x128xbf16>
    %669 = tpu.concatenate %611, %630, %649, %668 in 2 : vector<2x8x128xbf16>, vector<2x8x128xbf16>, vector<2x8x128xbf16>, vector<2x8x128xbf16> -> vector<2x8x512xbf16>
    %670 = vector.shape_cast %669 : vector<2x8x512xbf16> to vector<16x512xbf16>
    %cst_353 = arith.constant dense<0.000000e+00> : vector<16x128xf32>
    %671 = tpu.matmul %670, %526, %cst_353 {dimension_numbers = #tpu.dot_dimension_numbers<[1], [0], [0], [1], [0, 0, 1, 1], [], []>} : vector<16x512xbf16>, vector<512x128xbf16>, vector<16x128xf32> -> vector<16x128xf32>
    %672 = vector.broadcast %538 : vector<1x128xf32> to vector<16x128xf32>
    %673 = arith.addf %671, %672 : vector<16x128xf32>
    %674 = vector.shape_cast %673 : vector<16x128xf32> to vector<2x8x128xf32>
    %675 = arith.addf %674, %518 : vector<2x8x128xf32>
    %c0_354 = arith.constant 0 : index
    %c2_355 = arith.constant 2 : index
    %c0_356 = arith.constant 0 : index
    %c0_357 = arith.constant 0 : index
    %676 = vector.load %arg16[%c0_354, %c2_355, %c0_356, %c0_357] : memref<1x3x1x128xf32, #tpu.memory_space<vmem>>, vector<1x1x1x128xf32>
    %677 = vector.shape_cast %676 : vector<1x1x1x128xf32> to vector<1x128xf32>
    %c0_358 = arith.constant 0 : index
    %c2_359 = arith.constant 2 : index
    %c0_360 = arith.constant 0 : index
    %c0_361 = arith.constant 0 : index
    %678 = vector.load %arg17[%c0_358, %c2_359, %c0_360, %c0_361] : memref<1x3x1x128xf32, #tpu.memory_space<vmem>>, vector<1x1x1x128xf32>
    %679 = vector.shape_cast %678 : vector<1x1x1x128xf32> to vector<1x128xf32>
    %cst_362 = arith.constant dense<0.000000e+00> : vector<2x8xf32>
    %680 = vector.multi_reduction <add>, %675, %cst_362 [2] : vector<2x8x128xf32> to vector<2x8xf32>
    %681 = vector.shape_cast %680 : vector<2x8xf32> to vector<2x8x1xf32>
    %cst_363 = arith.constant 3.125000e-02 : f32
    %682 = vector.broadcast %cst_363 : f32 to vector<2x8x1xf32>
    %683 = arith.mulf %681, %682 : vector<2x8x1xf32>
    %684 = tpu.iota {dimensions = array<i32: 2>} : vector<2x8x128xi32>
    %c32_i32_364 = arith.constant 32 : i32
    %685 = vector.broadcast %c32_i32_364 : i32 to vector<2x8x128xi32>
    %686 = arith.cmpi slt, %684, %685 : vector<2x8x128xi32>
    %687 = vector.broadcast %683 : vector<2x8x1xf32> to vector<2x8x128xf32>
    %688 = arith.subf %675, %687 : vector<2x8x128xf32>
    %cst_365 = arith.constant 0.000000e+00 : f32
    %689 = vector.broadcast %cst_365 : f32 to vector<2x8x128xf32>
    %690 = arith.select %686, %688, %689 : vector<2x8x128xi1>, vector<2x8x128xf32>
    %691 = arith.mulf %690, %690 : vector<2x8x128xf32>
    %cst_366 = arith.constant dense<0.000000e+00> : vector<2x8xf32>
    %692 = vector.multi_reduction <add>, %691, %cst_366 [2] : vector<2x8x128xf32> to vector<2x8xf32>
    %693 = vector.shape_cast %692 : vector<2x8xf32> to vector<2x8x1xf32>
    %cst_367 = arith.constant 3.125000e-02 : f32
    %694 = vector.broadcast %cst_367 : f32 to vector<2x8x1xf32>
    %695 = arith.mulf %693, %694 : vector<2x8x1xf32>
    %cst_368 = arith.constant 9.99999974E-6 : f32
    %696 = vector.broadcast %cst_368 : f32 to vector<2x8x1xf32>
    %697 = arith.addf %695, %696 : vector<2x8x1xf32>
    %698 = math.rsqrt %697 : vector<2x8x1xf32>
    %699 = vector.broadcast %698 : vector<2x8x1xf32> to vector<2x8x128xf32>
    %700 = arith.mulf %690, %699 : vector<2x8x128xf32>
    %701 = vector.shape_cast %677 : vector<1x128xf32> to vector<1x1x128xf32>
    %702 = vector.broadcast %701 : vector<1x1x128xf32> to vector<2x8x128xf32>
    %703 = arith.mulf %700, %702 : vector<2x8x128xf32>
    %704 = vector.shape_cast %679 : vector<1x128xf32> to vector<1x1x128xf32>
    %705 = vector.broadcast %704 : vector<1x1x128xf32> to vector<2x8x128xf32>
    %706 = arith.addf %703, %705 : vector<2x8x128xf32>
    %707 = vector.shape_cast %706 : vector<2x8x128xf32> to vector<16x128xf32>
    %708 = arith.truncf %707 : vector<16x128xf32> to vector<16x128xbf16>
    %cst_369 = arith.constant dense<0.000000e+00> : vector<16x128xf32>
    %709 = tpu.matmul %708, %528, %cst_369 {dimension_numbers = #tpu.dot_dimension_numbers<[1], [0], [0], [1], [0, 0, 1, 1], [], []>} : vector<16x128xbf16>, vector<128x128xbf16>, vector<16x128xf32> -> vector<16x128xf32>
    %710 = vector.broadcast %540 : vector<1x128xf32> to vector<16x128xf32>
    %711 = arith.addf %709, %710 : vector<16x128xf32>
    %cst_370 = arith.constant 5.000000e-01 : f32
    %712 = vector.broadcast %cst_370 : f32 to vector<16x128xf32>
    %713 = arith.mulf %712, %711 : vector<16x128xf32>
    %cst_371 = arith.constant 0.707106769 : f32
    %714 = vector.broadcast %cst_371 : f32 to vector<16x128xf32>
    %715 = arith.mulf %711, %714 : vector<16x128xf32>
    %716 = math.absf %715 : vector<16x128xf32>
    %cst_372 = arith.constant 0.327591091 : f32
    %717 = vector.broadcast %cst_372 : f32 to vector<16x128xf32>
    %718 = arith.mulf %717, %716 : vector<16x128xf32>
    %cst_373 = arith.constant 1.000000e+00 : f32
    %719 = vector.broadcast %cst_373 : f32 to vector<16x128xf32>
    %720 = arith.addf %719, %718 : vector<16x128xf32>
    %cst_374 = arith.constant 1.000000e+00 : f32
    %721 = vector.broadcast %cst_374 : f32 to vector<16x128xf32>
    %722 = arith.divf %721, %720 : vector<16x128xf32>
    %cst_375 = arith.constant 1.06140542 : f32
    %723 = vector.broadcast %cst_375 : f32 to vector<16x128xf32>
    %724 = arith.mulf %723, %722 : vector<16x128xf32>
    %cst_376 = arith.constant -1.45315206 : f32
    %725 = vector.broadcast %cst_376 : f32 to vector<16x128xf32>
    %726 = arith.addf %724, %725 : vector<16x128xf32>
    %727 = arith.mulf %726, %722 : vector<16x128xf32>
    %cst_377 = arith.constant 1.42141378 : f32
    %728 = vector.broadcast %cst_377 : f32 to vector<16x128xf32>
    %729 = arith.addf %727, %728 : vector<16x128xf32>
    %730 = arith.mulf %729, %722 : vector<16x128xf32>
    %cst_378 = arith.constant -0.284496725 : f32
    %731 = vector.broadcast %cst_378 : f32 to vector<16x128xf32>
    %732 = arith.addf %730, %731 : vector<16x128xf32>
    %733 = arith.mulf %732, %722 : vector<16x128xf32>
    %cst_379 = arith.constant 0.254829586 : f32
    %734 = vector.broadcast %cst_379 : f32 to vector<16x128xf32>
    %735 = arith.addf %733, %734 : vector<16x128xf32>
    %736 = arith.mulf %735, %722 : vector<16x128xf32>
    %cst_380 = arith.constant 0.000000e+00 : f32
    %737 = vector.broadcast %cst_380 : f32 to vector<16x128xf32>
    %738 = arith.subf %737, %716 : vector<16x128xf32>
    %739 = arith.mulf %738, %716 : vector<16x128xf32>
    %740 = math.exp %739 : vector<16x128xf32>
    %741 = arith.mulf %736, %740 : vector<16x128xf32>
    %cst_381 = arith.constant 1.000000e+00 : f32
    %742 = vector.broadcast %cst_381 : f32 to vector<16x128xf32>
    %743 = arith.subf %742, %741 : vector<16x128xf32>
    %cst_382 = arith.constant 0.000000e+00 : f32
    %744 = vector.broadcast %cst_382 : f32 to vector<16x128xf32>
    %745 = arith.cmpf oge, %715, %744 : vector<16x128xf32>
    %cst_383 = arith.constant 0.000000e+00 : f32
    %746 = vector.broadcast %cst_383 : f32 to vector<16x128xf32>
    %747 = arith.subf %746, %743 : vector<16x128xf32>
    %748 = arith.select %745, %743, %747 : vector<16x128xi1>, vector<16x128xf32>
    %cst_384 = arith.constant 1.000000e+00 : f32
    %749 = vector.broadcast %cst_384 : f32 to vector<16x128xf32>
    %750 = arith.addf %749, %748 : vector<16x128xf32>
    %751 = arith.mulf %713, %750 : vector<16x128xf32>
    %752 = arith.truncf %751 : vector<16x128xf32> to vector<16x128xbf16>
    %cst_385 = arith.constant dense<0.000000e+00> : vector<16x128xf32>
    %753 = tpu.matmul %752, %530, %cst_385 {dimension_numbers = #tpu.dot_dimension_numbers<[1], [0], [0], [1], [0, 0, 1, 1], [], []>} : vector<16x128xbf16>, vector<128x128xbf16>, vector<16x128xf32> -> vector<16x128xf32>
    %754 = vector.broadcast %542 : vector<1x128xf32> to vector<16x128xf32>
    %755 = arith.addf %753, %754 : vector<16x128xf32>
    %756 = vector.shape_cast %755 : vector<16x128xf32> to vector<2x8x128xf32>
    %757 = arith.addf %756, %675 : vector<2x8x128xf32>
    %c0_386 = arith.constant 0 : index
    %c0_387 = arith.constant 0 : index
    %c0_388 = arith.constant 0 : index
    %758 = vector.load %arg23[%c0_386, %c0_387, %c0_388] : memref<2x8x128xf32, #tpu.memory_space<vmem>>, vector<2x8x128xf32>
    tpu.vector_store %arg23[%c0_386, %c0_387, %c0_388], %757 {strides = array<i32>} : memref<2x8x128xf32, #tpu.memory_space<vmem>>, vector<2x8x128xf32>,
    %c1_i32 = arith.constant 1 : i32
    %759 = arith.cmpi eq, %arg1, %c1_i32 : i32
    %760 = arith.extui %759 : i1 to i32
    %c0_i32_389 = arith.constant 0 : i32
    %761 = arith.cmpi ne, %760, %c0_i32_389 : i32
    scf.if %761 {
      %c0_390 = arith.constant 0 : index
      %c0_391 = arith.constant 0 : index
      %c0_392 = arith.constant 0 : index
      %762 = vector.load %arg23[%c0_390, %c0_391, %c0_392] : memref<2x8x128xf32, #tpu.memory_space<vmem>>, vector<2x8x128xf32>
      %c0_393 = arith.constant 0 : index
      %c0_394 = arith.constant 0 : index
      %c0_395 = arith.constant 0 : index
      %763 = vector.load %arg22[%c0_393, %c0_394, %c0_395] : memref<2x8x128xf32, #tpu.memory_space<vmem>>, vector<2x8x128xf32>
      tpu.vector_store %arg22[%c0_393, %c0_394, %c0_395], %762 {strides = array<i32>} : memref<2x8x128xf32, #tpu.memory_space<vmem>>, vector<2x8x128xf32>,
    } else {
    }
    return
  }
  func.func @transform_0(%arg0: i32, %arg1: i32) -> (i32, i32, i32) {
    %c0_i32 = arith.constant 0 : i32
    %c0_i32_0 = arith.constant 0 : i32
    %c0_i32_1 = arith.constant 0 : i32
    return %arg0, %c0_i32, %c0_i32_0 : i32, i32, i32
  }
  func.func @transform_1(%arg0: i32, %arg1: i32) -> (i32, i32, i32) {
    %c0_i32 = arith.constant 0 : i32
    %c0_i32_0 = arith.constant 0 : i32
    %c0_i32_1 = arith.constant 0 : i32
    return %arg0, %c0_i32, %c0_i32_0 : i32, i32, i32
  }
  func.func @transform_2(%arg0: i32, %arg1: i32) -> (i32, i32, i32, i32) {
    %c1_i32 = arith.constant 1 : i32
    %0 = arith.minsi %arg1, %c1_i32 : i32
    %c0_i32 = arith.constant 0 : i32
    %c0_i32_0 = arith.constant 0 : i32
    %c0_i32_1 = arith.constant 0 : i32
    %c0_i32_2 = arith.constant 0 : i32
    return %0, %c0_i32, %c0_i32_0, %c0_i32_1 : i32, i32, i32, i32
  }
  func.func @transform_3(%arg0: i32, %arg1: i32) -> (i32, i32, i32, i32) {
    %c1_i32 = arith.constant 1 : i32
    %0 = arith.minsi %arg1, %c1_i32 : i32
    %c0_i32 = arith.constant 0 : i32
    %c0_i32_0 = arith.constant 0 : i32
    %c0_i32_1 = arith.constant 0 : i32
    %c0_i32_2 = arith.constant 0 : i32
    return %0, %c0_i32, %c0_i32_0, %c0_i32_1 : i32, i32, i32, i32
  }
  func.func @transform_4(%arg0: i32, %arg1: i32) -> (i32, i32, i32, i32) {
    %c1_i32 = arith.constant 1 : i32
    %0 = arith.minsi %arg1, %c1_i32 : i32
    %c0_i32 = arith.constant 0 : i32
    %c0_i32_0 = arith.constant 0 : i32
    %c0_i32_1 = arith.constant 0 : i32
    %c0_i32_2 = arith.constant 0 : i32
    return %0, %c0_i32, %c0_i32_0, %c0_i32_1 : i32, i32, i32, i32
  }
  func.func @transform_5(%arg0: i32, %arg1: i32) -> (i32, i32, i32, i32) {
    %c1_i32 = arith.constant 1 : i32
    %0 = arith.minsi %arg1, %c1_i32 : i32
    %c0_i32 = arith.constant 0 : i32
    %c0_i32_0 = arith.constant 0 : i32
    %c0_i32_1 = arith.constant 0 : i32
    %c0_i32_2 = arith.constant 0 : i32
    return %0, %c0_i32, %c0_i32_0, %c0_i32_1 : i32, i32, i32, i32
  }
  func.func @transform_6(%arg0: i32, %arg1: i32) -> (i32, i32, i32, i32) {
    %c1_i32 = arith.constant 1 : i32
    %0 = arith.minsi %arg1, %c1_i32 : i32
    %c0_i32 = arith.constant 0 : i32
    %c0_i32_0 = arith.constant 0 : i32
    %c0_i32_1 = arith.constant 0 : i32
    %c0_i32_2 = arith.constant 0 : i32
    return %0, %c0_i32, %c0_i32_0, %c0_i32_1 : i32, i32, i32, i32
  }
  func.func @transform_7(%arg0: i32, %arg1: i32) -> (i32, i32, i32, i32) {
    %c1_i32 = arith.constant 1 : i32
    %0 = arith.minsi %arg1, %c1_i32 : i32
    %c0_i32 = arith.constant 0 : i32
    %c0_i32_0 = arith.constant 0 : i32
    %c0_i32_1 = arith.constant 0 : i32
    %c0_i32_2 = arith.constant 0 : i32
    return %0, %c0_i32, %c0_i32_0, %c0_i32_1 : i32, i32, i32, i32
  }
  func.func @transform_8(%arg0: i32, %arg1: i32) -> (i32, i32, i32, i32) {
    %c1_i32 = arith.constant 1 : i32
    %0 = arith.minsi %arg1, %c1_i32 : i32
    %c0_i32 = arith.constant 0 : i32
    %c0_i32_0 = arith.constant 0 : i32
    %c0_i32_1 = arith.constant 0 : i32
    %c0_i32_2 = arith.constant 0 : i32
    return %0, %c0_i32, %c0_i32_0, %c0_i32_1 : i32, i32, i32, i32
  }
  func.func @transform_9(%arg0: i32, %arg1: i32) -> (i32, i32, i32, i32) {
    %c1_i32 = arith.constant 1 : i32
    %0 = arith.minsi %arg1, %c1_i32 : i32
    %c0_i32 = arith.constant 0 : i32
    %c0_i32_0 = arith.constant 0 : i32
    %c0_i32_1 = arith.constant 0 : i32
    %c0_i32_2 = arith.constant 0 : i32
    return %0, %c0_i32, %c0_i32_0, %c0_i32_1 : i32, i32, i32, i32
  }
  func.func @transform_10(%arg0: i32, %arg1: i32) -> (i32, i32, i32, i32) {
    %c1_i32 = arith.constant 1 : i32
    %0 = arith.minsi %arg1, %c1_i32 : i32
    %c0_i32 = arith.constant 0 : i32
    %c0_i32_0 = arith.constant 0 : i32
    %c0_i32_1 = arith.constant 0 : i32
    %c0_i32_2 = arith.constant 0 : i32
    return %0, %c0_i32, %c0_i32_0, %c0_i32_1 : i32, i32, i32, i32
  }
  func.func @transform_11(%arg0: i32, %arg1: i32) -> (i32, i32, i32, i32) {
    %c1_i32 = arith.constant 1 : i32
    %0 = arith.minsi %arg1, %c1_i32 : i32
    %c0_i32 = arith.constant 0 : i32
    %c0_i32_0 = arith.constant 0 : i32
    %c0_i32_1 = arith.constant 0 : i32
    %c0_i32_2 = arith.constant 0 : i32
    return %0, %c0_i32, %c0_i32_0, %c0_i32_1 : i32, i32, i32, i32
  }
  func.func @transform_12(%arg0: i32, %arg1: i32) -> (i32, i32, i32, i32) {
    %c1_i32 = arith.constant 1 : i32
    %0 = arith.minsi %arg1, %c1_i32 : i32
    %c0_i32 = arith.constant 0 : i32
    %c0_i32_0 = arith.constant 0 : i32
    %c0_i32_1 = arith.constant 0 : i32
    %c0_i32_2 = arith.constant 0 : i32
    return %0, %c0_i32, %c0_i32_0, %c0_i32_1 : i32, i32, i32, i32
  }
  func.func @transform_13(%arg0: i32, %arg1: i32) -> (i32, i32, i32, i32) {
    %c1_i32 = arith.constant 1 : i32
    %0 = arith.minsi %arg1, %c1_i32 : i32
    %c0_i32 = arith.constant 0 : i32
    %c0_i32_0 = arith.constant 0 : i32
    %c0_i32_1 = arith.constant 0 : i32
    %c0_i32_2 = arith.constant 0 : i32
    return %0, %c0_i32, %c0_i32_0, %c0_i32_1 : i32, i32, i32, i32
  }
  func.func @transform_14(%arg0: i32, %arg1: i32) -> (i32, i32, i32, i32) {
    %c1_i32 = arith.constant 1 : i32
    %0 = arith.minsi %arg1, %c1_i32 : i32
    %c0_i32 = arith.constant 0 : i32
    %c0_i32_0 = arith.constant 0 : i32
    %c0_i32_1 = arith.constant 0 : i32
    %c0_i32_2 = arith.constant 0 : i32
    return %0, %c0_i32, %c0_i32_0, %c0_i32_1 : i32, i32, i32, i32
  }
  func.func @transform_15(%arg0: i32, %arg1: i32) -> (i32, i32, i32, i32) {
    %c1_i32 = arith.constant 1 : i32
    %0 = arith.minsi %arg1, %c1_i32 : i32
    %c0_i32 = arith.constant 0 : i32
    %c0_i32_0 = arith.constant 0 : i32
    %c0_i32_1 = arith.constant 0 : i32
    %c0_i32_2 = arith.constant 0 : i32
    return %0, %c0_i32, %c0_i32_0, %c0_i32_1 : i32, i32, i32, i32
  }
  func.func @transform_16(%arg0: i32, %arg1: i32) -> (i32, i32, i32, i32) {
    %c1_i32 = arith.constant 1 : i32
    %0 = arith.minsi %arg1, %c1_i32 : i32
    %c0_i32 = arith.constant 0 : i32
    %c0_i32_0 = arith.constant 0 : i32
    %c0_i32_1 = arith.constant 0 : i32
    %c0_i32_2 = arith.constant 0 : i32
    return %0, %c0_i32, %c0_i32_0, %c0_i32_1 : i32, i32, i32, i32
  }
  func.func @transform_17(%arg0: i32, %arg1: i32) -> (i32, i32, i32, i32) {
    %c1_i32 = arith.constant 1 : i32
    %0 = arith.minsi %arg1, %c1_i32 : i32
    %c0_i32 = arith.constant 0 : i32
    %c0_i32_0 = arith.constant 0 : i32
    %c0_i32_1 = arith.constant 0 : i32
    %c0_i32_2 = arith.constant 0 : i32
    return %0, %c0_i32, %c0_i32_0, %c0_i32_1 : i32, i32, i32, i32
  }
  func.func @transform_18(%arg0: i32, %arg1: i32) -> (i32, i32, i32, i32) {
    %c1_i32 = arith.constant 1 : i32
    %0 = arith.minsi %arg1, %c1_i32 : i32
    %c0_i32 = arith.constant 0 : i32
    %c0_i32_0 = arith.constant 0 : i32
    %c0_i32_1 = arith.constant 0 : i32
    %c0_i32_2 = arith.constant 0 : i32
    return %0, %c0_i32, %c0_i32_0, %c0_i32_1 : i32, i32, i32, i32
  }
  func.func @transform_19(%arg0: i32, %arg1: i32) -> (i32, i32, i32, i32) {
    %c1_i32 = arith.constant 1 : i32
    %0 = arith.minsi %arg1, %c1_i32 : i32
    %c0_i32 = arith.constant 0 : i32
    %c0_i32_0 = arith.constant 0 : i32
    %c0_i32_1 = arith.constant 0 : i32
    %c0_i32_2 = arith.constant 0 : i32
    return %0, %c0_i32, %c0_i32_0, %c0_i32_1 : i32, i32, i32, i32
  }
  func.func @transform_20(%arg0: i32, %arg1: i32) -> (i32, i32, i32) {
    %c0_i32 = arith.constant 0 : i32
    %c0_i32_0 = arith.constant 0 : i32
    %c0_i32_1 = arith.constant 0 : i32
    return %arg0, %c0_i32, %c0_i32_0 : i32, i32, i32
  }
}

</mosaic_0001>

<bundles_post_ra>
// kernel: tpu_custom_call.1
= control target key start
LH: loop header
LB: loop body
LE: loop exit
PB: predicated region body
PF: predicated region fallthrough
CT: control target
= control target key end

     0   :  { %s13219_s0 = inlined_call_operand.hbm [shape: bf16[2,16,128], index: 0, kind: input, shape index: {}]   ;;  %s13220_s1 = inlined_call_operand.hbm [shape: f32[2,8,128], index: 1, kind: input, shape index: {}]   ;;  %s13221_s2 = inlined_call_operand.hbm [shape: f32[2,3,1,128], index: 2, kind: input, shape index: {}]   ;;  %s13222_s3 = inlined_call_operand.hbm [shape: f32[2,3,1,128], index: 3, kind: input, shape index: {}]   ;;  %s13223_s4 = inlined_call_operand.hbm [shape: f32[2,3,1,128], index: 4, kind: input, shape index: {}]   ;;  %s13224_s5 = inlined_call_operand.hbm [shape: f32[2,3,1,128], index: 5, kind: input, shape index: {}]   ;;  %s13225_s6 = inlined_call_operand.hbm [shape: bf16[2,3,128,512], index: 6, kind: input, shape index: {}]   ;;  %s13226_s7 = inlined_call_operand.hbm [shape: f32[2,3,1,512], index: 7, kind: input, shape index: {}]   ;;  %s13227_s8 = inlined_call_operand.hbm [shape: bf16[2,3,128,512], index: 8, kind: input, shape index: {}]   ;;  %s13228_s9 = inlined_call_operand.hbm [shape: f32[2,3,1,512], index: 9, kind: input, shape index: {}]   ;;  %s13229_s10 = inlined_call_operand.hbm [shape: bf16[2,3,128,512], index: 10, kind: input, shape index: {}]   ;;  %s13230_s11 = inlined_call_operand.hbm [shape: f32[2,3,1,512], index: 11, kind: input, shape index: {}]   ;;  %s13231_s12 = inlined_call_operand.hbm [shape: bf16[2,3,512,128], index: 12, kind: input, shape index: {}]   ;;  %s13232_s13 = inlined_call_operand.vmem [shape: f32[2,3,1,128], index: 13, kind: input, shape index: {}]   ;;  %s13233_s14 = inlined_call_operand.vmem [shape: f32[2,3,1,128], index: 14, kind: input, shape index: {}]   ;;  %s13234_s15 = inlined_call_operand.hbm [shape: f32[2,3,1,128], index: 15, kind: input, shape index: {}]   ;;  %s13235_s16 = inlined_call_operand.hbm [shape: bf16[2,3,128,128], index: 16, kind: input, shape index: {}]   ;;  %s13236_s17 = inlined_call_operand.hbm [shape: f32[2,3,1,128], index: 17, kind: input, shape index: {}]   ;;  %s13237_s18 = inlined_call_operand.hbm [shape: bf16[2,3,128,128], index: 18, kind: input, shape index: {}]   ;;  %s13238_s19 = inlined_call_operand.vmem [shape: f32[2,3,1,128], index: 19, kind: input, shape index: {}]   ;;  %s13239_s20 = inlined_call_operand.hbm [shape: f32[2,8,128], index: 20, kind: output, shape index: {}]  }
   0x1   :  { %13255 = sst [smem:[#allocation38_spill]] %s13219_s0 }
   0x2   :  { %13256 = sst [smem:[#allocation39_spill]] %s13220_s1 }
   0x3   :  { %13257 = sst [smem:[#allocation40_spill]] %s13221_s2 }
   0x4   :  { %13258 = sst [smem:[#allocation41_spill]] %s13222_s3 }
   0x5   :  { %13259 = sst [smem:[#allocation42_spill]] %s13223_s4 }
   0x6   :  { %13260 = sst [smem:[#allocation43_spill]] %s13224_s5 }
   0x7   :  { %13261 = sst [smem:[#allocation44_spill]] %s13225_s6 }
   0x8   :  { %13262 = sst [smem:[#allocation45_spill]] %s13226_s7 }
   0x9   :  { %13263 = sst [smem:[#allocation46_spill]] %s13232_s13 }
   0xa   :  { %13264 = sst [smem:[#allocation47_spill]] %s13233_s14 }
   0xb   :  { %13265 = sst [smem:[#allocation48_spill]] %s13237_s18 }
   0xc   :  { %13266 = sst [smem:[#allocation49_spill]] %s13238_s19 }
   0xd   :  { %13267 = sst [smem:[#allocation50_spill]] %s13239_s20 }
   0xe   :  { %25 = vsyncpa [#allocation4], 0 }
   0xf   :  { %26 = vsyncpa [#allocation7], 0 }
  0x10   :  { %27 = vsyncpa [#allocation5], 0  ;;  %s11448_s1 = smov 0   ;;  %s11450_s22 = smov 0  }
  0x11   :  { %s11452_s23 = smov 0   ;;  %s11454_s24 = smov 0  }
  0x12   :  { %s11456_s2 = smov 0   ;;  %s11458_s25 = smov 0  }
  0x13 LB: > { %13268 = sst [smem:[#allocation28_spill]] %s11311_s22  ;;  %s11477_s3 = sadd.s32 4294967295, %s11327_s25   ;;  %s11327_s25 = sphi %s11458_s25, %s33_s25   ;;  %s11323_s2 = sphi %s11456_s2, %s13316_s2   ;;  %s11319_s24 = sphi %s11454_s24, %s13315_s24   ;;  %s11315_s23 = sphi %s11452_s23, %s13314_s23   ;;  %s11311_s22 = sphi %s11450_s22, %s13313_s22   ;;  %s11307_s1 = sphi %s11448_s1, %s13312_s1  }
  0x14   : > { %13269 = sst [smem:[#allocation29_spill]] %s11315_s23  ;;  %s42_s26 = sadd.s32 1, %s11323_s2 }
  0x15   : > { %13270 = sst [smem:[#allocation30_spill]] %s11319_s24  ;;  %p43_p0 = scmp.ge.s32.totalorder %s42_s26, 2 }
  0x16   : > { %13271 = sst [smem:[#allocation31_spill]] %s11323_s2  ;;  %p101_p1 = scmp.lt.s32.totalorder %s11323_s2, 1 }
  0x17   : > { %13272 = sst [smem:[#allocation32_spill]] %s11327_s25  ;;  %s108_s27 = sadd.s32 1, %s11315_s23 }
  0x18   : > { %13273 = sst [smem:[#allocation33_spill]] %s11477_s3  ;;  %p115_p2 = scmp.ne.s32.totalorder %s11315_s23, %s11311_s22 }
  0x19   : > { %s13318_s26 = smov (%p43_p0, %s42_s26), 0  ;;  %p116_p4 = scmp.eq.s32.totalorder %s11327_s25, 0 }
  0x1a   : > { %13274 = sst [smem:[#allocation34_spill]] %s13318_s26  ;;  %p103_p3 = scmp.lt.s32.totalorder %s13318_s26, 1 }
  0x1b   : > { %s11487_s28 = scalar_select %p101_p1, %s11323_s2, 1 }
  0x1c   : > { %p121_p5 = scmp.ne.s32.totalorder %s11311_s22, %s11307_s1  ;;  %p122_p6 = scmp.eq.s32.totalorder %s11477_s3, 0 }
  0x1d   : > { %s104_s4 = scalar_select %p103_p3, %s13318_s26, 1 }
  0x1e   : > { %p11494_p7 = por %p116_p4, %p115_p2  ;;  %p11500_p8 = por %p122_p6, %p121_p5 }
  0x1f   : > { %s105_s0 = ssub.s32 %s11487_s28, %s104_s4  ;;  %p7803_p9 = scmp.ge.s32.totalorder %s11327_s25, 1 }
  0x20   : > { %s13276_s30 = scalar_select %p11500_p8, 1, 0 }
  0x21   : > { %p106_p10 = scmp.eq.s32.totalorder %s105_s0, 0  ;;  %p668_p11 = scmp.lt.s32.totalorder %s11327_s25, 3 }
  0x22   : > { %13277 = sst [smem:[#allocation35_spill]] %s13276_s30  ;;  %s11329_s14 = smov [#allocation3]  }
  0x23   : > { %s13278_s20 = sld [smem:[#allocation38_spill]]  ;;  %p11513_p12 = pnand %p7803_p9, %p668_p11 }
  0x24   : > { %s11511_s19 = scalar_select %p106_p10, %s11315_s23, %s108_s27  }
  0x25   : > { %s13280_s26 = scalar_select %p11513_p12, 1, 0 }
  0x26   : > { %13279 = sst [smem:[#allocation36_spill]] %s11511_s19  ;;  %p10505_p13 = pneg %p11513_p12 }
  0x27   : > { %13281 = sst [smem:[#allocation37_spill]] %s13280_s26  ;;  %s685_s13 = sshll.u32 %s11329_s14, 4  ;;  %s686_s13 = int_to_ptr.vmem [resolvable:$true] %s685_s13 }
  0x28   : > { %p10506_p0 = pnand %p10505_p13, %p122_p6  ;;  %s13282_s24 = sld [smem:[#allocation39_spill]] }
  0x29   : > { %s683_s1 = sshll.u32 %s13278_s20, 4  ;;  %s11330_s20 = smov [#allocation6]   ;;  %s684_s1 = int_to_ptr.hbm [resolvable:$true] %s683_s1 }
  0x2a   : > { %s702_s27 = sshll.u32 %s11330_s20, 4  ;;  %s11331_s21 = smov 64   ;;  %s703_s27 = int_to_ptr.vmem [resolvable:$true] %s702_s27 }
  0x2b   : > { %s11332_s19 = smov 4   ;;  %s11333_s30 = smov 128  }
  0x2c   : > { %10508 = dma.hbm_to_vmem [thread:$0]  (!%p10506_p0), %s684_s1, 256, %s686_s13, [#allocation4], %s11331_s21, %s11331_s21, %s11332_s19  }
  0x2d   : > { %s11334_s22 = smov 8   ;;  %p7806_p1 = scmp.ge.s32.totalorder %s11327_s25, 2 }
  0x2e   : > { %s700_s2 = sshll.u32 %s13282_s24, 4  ;;  %s716_s14 = sand.u32 (!%p7806_p1), 1, %s11327_s25   ;;  %s701_s2 = int_to_ptr.hbm [resolvable:$true] %s700_s2 }
  0x2f   : > { %10511 = dma.hbm_to_vmem [thread:$0]  (!%p10506_p0), %s701_s2, 256, %s703_s27, [#allocation7], %s11333_s30, %s11333_s30, %s11334_s22  }
  0x30   : > { %712 = sbr.rel (%p7806_p1) target bundleno = 112 (0x70), region = 24  ;;  %s11527_s4 = sand.u32 (!%p7806_p1), 1, %s11315_s23  }
  0x31   : > { %s11530_s24 = smul.u32 (!%p7806_p1), 3, %s11527_s4  ;;  %s13283_s30 = sld [smem:[#allocation40_spill]] (!%p7806_p1) }
  0x32   : > { %s11533_s13 = smul.u32 (!%p7806_p1), 3, %s11487_s28  ;;  %s11540_s27 = scalar_lea.sflag (!%p7806_p1), [#allocation4], %s716_s14 }
  0x33   : > { %s720_s0 = scalar_lea.vmem (!%p7806_p1), [#allocation8], %s11530_s24  ;;  %s11335_s21 = smov (!%p7806_p1), 16  }
  0x34   : > { %s729_s2 = sshll.u32 (!%p7806_p1), %s720_s0, 4  ;;  %s13251_s23 = smov (!%p7806_p1), 1   ;;  %s730_s2 = int_to_ptr.vmem [resolvable:$true] %s729_s2 }
  0x35   : > { %s743_s0 = scalar_lea.vmem [#allocation9], %s11530_s24  ;;  %s766_s22 = scalar_lea.vmem [#allocation10], %s11530_s24 }
  0x36   : > { %s752_s14 = sshll.u32 %s743_s0, 4  ;;  %s13286_s5 = sld [smem:[#allocation43_spill]]  ;;  %s753_s14 = int_to_ptr.vmem [resolvable:$true] %s752_s14 }
  0x37   : > { %s726_s1 = scalar_lea.hbm %s13283_s30, %s11533_s13  ;;  %s13284_s30 = sld [smem:[#allocation41_spill]] }
  0x38   : > { %s727_s20 = sshll.u32 %s726_s1, 4  ;;  %s13287_s6 = sld [smem:[#allocation44_spill]]  ;;  %s728_s20 = int_to_ptr.hbm [resolvable:$true] %s727_s20 }
  0x39   : > { %10467 = dma.hbm_to_vmem [thread:$0]  (%p11494_p7), %s728_s20, 48, %s730_s2, %s11540_s27, %s11335_s21, %s11335_s21, %s13251_s23  }
  0x3a   : > { %s13285_s20 = sld [smem:[#allocation42_spill]]  ;;  %s11339_s18 = smov 4  }
  0x3b   : > { %s13288_s7 = sld [smem:[#allocation45_spill]] }
  0x3d   : > { %s749_s1 = scalar_lea.hbm %s13284_s30, %s11533_s13  ;;  %s775_s30 = sshll.u32 %s766_s22, 4  ;;  %s776_s30 = int_to_ptr.vmem [resolvable:$true] %s775_s30 }
  0x3e   : > { %s750_s25 = sshll.u32 %s749_s1, 4  ;;  %s751_s25 = int_to_ptr.hbm [resolvable:$true] %s750_s25 }
  0x3f   : > { %10468 = dma.hbm_to_vmem [thread:$0]  (%p11494_p7), %s751_s25, 48, %s753_s14, %s11540_s27, %s11335_s21, %s11335_s21, %s13251_s23  }
  0x40   : > { %s772_s19 = scalar_lea.hbm %s13285_s20, %s11533_s13  ;;  %s795_s25 = scalar_lea.hbm %s13286_s5, %s11533_s13 }
  0x41   : > { %s773_s26 = sshll.u32 %s772_s19, 4  ;;  %s789_s14 = scalar_lea.vmem [#allocation11], %s11530_s24  ;;  %s774_s26 = int_to_ptr.hbm [resolvable:$true] %s773_s26 }
  0x42   : > { %10469 = dma.hbm_to_vmem [thread:$0]  (%p11494_p7), %s774_s26, 48, %s776_s30, %s11540_s27, %s11335_s21, %s11335_s21, %s13251_s23  }
  0x43   : > { %s798_s3 = sshll.u32 %s789_s14, 4  ;;  %s796_s2 = sshll.u32 %s795_s25, 4  ;;  %s799_s3 = int_to_ptr.vmem [resolvable:$true] %s798_s3  ;;  %s797_s2 = int_to_ptr.hbm [resolvable:$true] %s796_s2 }
  0x44   : > { %s11576_s20 = smul.u32 768, %s11527_s4 }
  0x45   : > { %10470 = dma.hbm_to_vmem [thread:$0]  (%p11494_p7), %s797_s2, 48, %s799_s3, %s11540_s27, %s11335_s21, %s11335_s21, %s13251_s23  }
  0x46   : > { %s11585_s26 = smul.u32 768, %s11487_s28  ;;  %s812_s19 = scalar_lea.vmem [#allocation12], %s11576_s20 }
  0x47   : > { %s822_s22 = sshll.u32 %s812_s19, 4  ;;  %s11593_s14 = smul.u32 12, %s11527_s4  ;;  %s823_s22 = int_to_ptr.vmem [resolvable:$true] %s822_s22 }
  0x48   : > { %s819_s0 = scalar_lea.hbm %s13287_s6, %s11585_s26  ;;  %s11596_s3 = smul.u32 12, %s11487_s28 }
  0x49   : > { %s820_s25 = sshll.u32 %s819_s0, 4  ;;  %s11337_s2 = smov 256   ;;  %s821_s25 = int_to_ptr.hbm [resolvable:$true] %s820_s25 }
  0x4a   : > { %10471 = dma.hbm_to_vmem [thread:$0]  (%p11494_p7), %s821_s25, 12288, %s823_s22, %s11540_s27, %s11337_s2, %s11337_s2, %s11335_s21  }
  0x4b   : > { %s842_s1 = scalar_lea.hbm %s13288_s7, %s11596_s3  ;;  %s836_s23 = scalar_lea.vmem [#allocation13], %s11593_s14 }
  0x4c   : > { %s843_s0 = sshll.u32 %s842_s1, 4  ;;  %s845_s5 = sshll.u32 %s836_s23, 4  ;;  %s844_s0 = int_to_ptr.hbm [resolvable:$true] %s843_s0  ;;  %s846_s5 = int_to_ptr.vmem [resolvable:$true] %s845_s5 }
  0x4d   : > { %s13253_s6 = smov 64   ;;  %s866_s19 = scalar_lea.hbm %s13227_s8, %s11585_s26 }
  0x4e   : > { %10472 = dma.hbm_to_vmem [thread:$0]  (%p11494_p7), %s844_s0, 192, %s846_s5, %s11540_s27, %s13253_s6, %s13253_s6, %s11339_s18  }
  0x4f   : > { %s867_s30 = sshll.u32 %s866_s19, 4  ;;  %s859_s1 = scalar_lea.vmem [#allocation14], %s11576_s20  ;;  %s868_s30 = int_to_ptr.hbm [resolvable:$true] %s867_s30 }
  0x50   : > { %s869_s23 = sshll.u32 %s859_s1, 4  ;;  %s889_s0 = scalar_lea.hbm %s13228_s9, %s11596_s3  ;;  %s870_s23 = int_to_ptr.vmem [resolvable:$true] %s869_s23 }
  0x51   : > { %10473 = dma.hbm_to_vmem [thread:$0]  (%p11494_p7), %s868_s30, 12288, %s870_s23, %s11540_s27, %s11337_s2, %s11337_s2, %s11335_s21  }
  0x52   : > { %s890_s22 = sshll.u32 %s889_s0, 4  ;;  %s883_s25 = scalar_lea.vmem [#allocation15], %s11593_s14  ;;  %s891_s22 = int_to_ptr.hbm [resolvable:$true] %s890_s22 }
  0x53   : > { %s892_s19 = sshll.u32 %s883_s25, 4  ;;  %s913_s23 = scalar_lea.hbm %s13229_s10, %s11585_s26  ;;  %s893_s19 = int_to_ptr.vmem [resolvable:$true] %s892_s19 }
  0x54   : > { %10474 = dma.hbm_to_vmem [thread:$0]  (%p11494_p7), %s891_s22, 192, %s893_s19, %s11540_s27, %s13253_s6, %s13253_s6, %s11339_s18  }
  0x55   : > { %s914_s7 = sshll.u32 %s913_s23, 4  ;;  %s906_s5 = scalar_lea.vmem [#allocation16], %s11576_s20  ;;  %s915_s7 = int_to_ptr.hbm [resolvable:$true] %s914_s7 }
  0x56   : > { %s916_s0 = sshll.u32 %s906_s5, 4  ;;  %s936_s19 = scalar_lea.hbm %s13230_s11, %s11596_s3  ;;  %s917_s0 = int_to_ptr.vmem [resolvable:$true] %s916_s0 }
  0x57   : > { %10475 = dma.hbm_to_vmem [thread:$0]  (%p11494_p7), %s915_s7, 12288, %s917_s0, %s11540_s27, %s11337_s2, %s11337_s2, %s11335_s21  }
  0x58   : > { %s937_s1 = sshll.u32 %s936_s19, 4  ;;  %s930_s30 = scalar_lea.vmem [#allocation17], %s11593_s14  ;;  %s938_s1 = int_to_ptr.hbm [resolvable:$true] %s937_s1 }
  0x59   : > { %s939_s23 = sshll.u32 %s930_s30, 4  ;;  %s960_s7 = scalar_lea.hbm %s13231_s12, %s11585_s26  ;;  %s940_s23 = int_to_ptr.vmem [resolvable:$true] %s939_s23 }
  0x5a   : > { %10476 = dma.hbm_to_vmem [thread:$0]  (%p11494_p7), %s938_s1, 192, %s940_s23, %s11540_s27, %s13253_s6, %s13253_s6, %s11339_s18  }
  0x5b   : > { %s961_s3 = sshll.u32 %s960_s7, 4  ;;  %s953_s0 = scalar_lea.vmem [#allocation18], %s11576_s20  ;;  %s962_s3 = int_to_ptr.hbm [resolvable:$true] %s961_s3 }
  0x5c   : > { %s963_s14 = sshll.u32 %s953_s0, 4  ;;  %s1005_s19 = scalar_lea.hbm %s13234_s15, %s11533_s13  ;;  %s964_s14 = int_to_ptr.vmem [resolvable:$true] %s963_s14 }
  0x5d   : > { %10477 = dma.hbm_to_vmem [thread:$0]  (%p11494_p7), %s962_s3, 12288, %s964_s14, %s11540_s27, %s13253_s6, %s13253_s6, %s11339_s18  }
  0x5e   : > { %s1006_s1 = sshll.u32 %s1005_s19, 4  ;;  %s999_s30 = scalar_lea.vmem [#allocation19], %s11530_s24  ;;  %s1007_s1 = int_to_ptr.hbm [resolvable:$true] %s1006_s1 }
  0x5f   : > { %s1008_s26 = sshll.u32 %s999_s30, 4  ;;  %s13289_s20 = smov 1   ;;  %s1009_s26 = int_to_ptr.vmem [resolvable:$true] %s1008_s26 }
  0x60   : > { %10478 = dma.hbm_to_vmem [thread:$0]  (%p11494_p7), %s1007_s1, 48, %s1009_s26, %s11540_s27, %s11335_s21, %s11335_s21, %s13289_s20  }
  0x61   : > { %s10452_s23 = smul.u32 192, %s11527_s4  ;;  %s1052_s3 = scalar_lea.hbm %s13236_s17, %s11533_s13 }
  0x62   : > { %s10453_s5 = smul.u32 192, %s11487_s28  ;;  %s1053_s0 = sshll.u32 %s1052_s3, 4  ;;  %s1054_s0 = int_to_ptr.hbm [resolvable:$true] %s1053_s0 }
  0x63   : > { %s1022_s19 = scalar_lea.vmem [#allocation20], %s10452_s23  ;;  %s13290_s28 = smov 64  }
  0x64   : > { %s1029_s22 = scalar_lea.hbm %s13235_s16, %s10453_s5  ;;  %s1032_s30 = sshll.u32 %s1022_s19, 4  ;;  %s1033_s30 = int_to_ptr.vmem [resolvable:$true] %s1032_s30 }
  0x65   : > { %s1030_s6 = sshll.u32 %s1029_s22, 4  ;;  %s1046_s4 = scalar_lea.vmem [#allocation21], %s11530_s24  ;;  %s1031_s6 = int_to_ptr.hbm [resolvable:$true] %s1030_s6 }
  0x66   : > { %10479 = dma.hbm_to_vmem [thread:$0]  (%p11494_p7), %s1031_s6, 3072, %s1033_s30, %s11540_s27, %s13290_s28, %s13290_s28, %s11339_s18  }
  0x67   : > { %s1055_s13 = sshll.u32 %s1046_s4, 4  ;;  %s13291_s2 = sld [smem:[#allocation48_spill]]  ;;  %s1056_s13 = int_to_ptr.vmem [resolvable:$true] %s1055_s13 }
  0x68   : > { %10480 = dma.hbm_to_vmem [thread:$0]  (%p11494_p7), %s1054_s0, 48, %s1056_s13, %s11540_s27, %s11335_s21, %s11335_s21, %s13289_s20  }
  0x69   : > { %s1069_s14 = scalar_lea.vmem [#allocation22], %s10452_s23 }
  0x6a   : > { %s1079_s25 = sshll.u32 %s1069_s14, 4  ;;  %s1080_s25 = int_to_ptr.vmem [resolvable:$true] %s1079_s25 }
  0x6d   : > { %s1076_s7 = scalar_lea.hbm %s13291_s2, %s10453_s5 }
  0x6e   : > { %s1077_s3 = sshll.u32 %s1076_s7, 4  ;;  %s1078_s3 = int_to_ptr.hbm [resolvable:$true] %s1077_s3 }
  0x6f   : > { %10481 = dma.hbm_to_vmem [thread:$0]  (%p11494_p7), %s1078_s3, 3072, %s1080_s25, %s11540_s27, %s13290_s28, %s13290_s28, %s11339_s18  }
  0x70 PF: > { %1102 = sbr.rel (%p11513_p12) target bundleno = 5464 (0x1558), region = 100  ;;  %s13293_s24 = sld [smem:[#allocation33_spill]] (!%p11513_p12) }
  0x75   : > { %11290 = dma.done.wait (%p122_p6), [#allocation4], 256  }
  0x76   : > { %11292 = vsyncadd (%p122_p6), [#allocation4], 4294967040 }
  0x77   : > { %11294 = dma.done.wait (%p122_p6), [#allocation7], 256  }
  0x78   : > { %11296 = vsyncadd (%p122_p6), [#allocation7], 4294967040  ;;  %s13294_s29 = sld [smem:[#allocation28_spill]]  ;;  %s1114_s18 = sand.u32 1, %s13293_s24  }
  0x79   : > { %s1115_s23 = scalar_lea.sflag [#allocation4], %s1114_s18 }
  0x7e   : > { %s11724_s27 = sand.u32 1, %s13294_s29  }
  0x7f   : > { %s11727_s20 = smul.u32 3, %s11724_s27 }
  0x81   : > { %s11730_s5 = scalar_lea.vmem [#allocation8], %s11727_s20 }
  0x82   : > { %11298 = dma.done.wait (%p11500_p8), %s1115_s23, 56160  }
  0x83   : > { %11300 = vsyncadd (%p11500_p8), %s1115_s23, 4294911136  ;;  %s13296_s0 = sld [smem:[#allocation30_spill]]  ;;  %s10459_s22 = smul.u32 768, %s11724_s27 }
  0x84   : > { %s10460_s19 = smul.u32 12, %s11724_s27  ;;  %s13297_s26 = sld [smem:[#allocation46_spill]] }
  0x85   : > { %s10461_s30 = smul.u32 192, %s11724_s27  ;;  %s13298_s14 = sld [smem:[#allocation47_spill]] }
  0x86   : > { %s13299_s29 = sld [smem:[#allocation49_spill]]  ;;  %s11757_s18 = scalar_lea.vmem [#allocation9], %s11727_s20 }
  0x87   : > { %s1138_s27 = scalar_lea.vmem [#allocation10], %s11727_s20  ;;  %s1148_s23 = scalar_lea.vmem [#allocation11], %s11727_s20 }
  0x88   : > { %s11763_s13 = scalar_lea.vmem [#allocation13], %s10460_s19  ;;  %s11765_s1 = scalar_lea.vmem [#allocation14], %s10459_s22 }
  0x89   : > { %p1423_p2 = scmp.lt.s32.totalorder %s13296_s0, 1  ;;  %s11769_s7 = scalar_lea.vmem [#allocation16], %s10459_s22 }
  0x8a   : > { %s11771_s3 = scalar_lea.vmem [#allocation17], %s10460_s19  ;;  %s11778_s6 = scalar_lea.vmem [#allocation20], %s10461_s30 }
  0x8b   : > { %s1424_s28 = scalar_select %p1423_p2, %s13296_s0, 1 }
  0x8c   : > { %s11781_s24 = scalar_lea.vmem [#allocation21], %s11727_s20  ;;  %p7825_p3 = scmp.ne.s32.totalorder %s13296_s0, 0 }
  0x8d   : > { %s13320_s28 = smov (!%p1423_p2, %s1424_s28), 1 }
  0x8e   : > { %s10462_s4 = smul.u32 3, %s13320_s28  ;;  %s11761_s28 = scalar_lea.vmem [#allocation12], %s10459_s22 }
  0x8f   : > { %1460 = sbr.rel (%p7825_p3) target bundleno = 151 (0x97), region = 172 }
  0x90   : > { %s11744_s2 = scalar_lea.vmem %s13297_s26, %s10462_s4  ;;  %s11749_s25 = scalar_lea.vmem %s13298_s14, %s10462_s4 }
  0x91   : > { %s11754_s21 = scalar_lea.vmem %s13299_s29, %s10462_s4  ;;  %s11767_s26 = scalar_lea.vmem [#allocation15], %s10460_s19 }
  0x92   : > { %s11773_s14 = scalar_lea.vmem [#allocation18], %s10459_s22  ;;  %s11776_s4 = scalar_lea.vmem [#allocation19], %s11727_s20 }
  0x93   : > { %s11783_s29 = scalar_lea.vmem [#allocation22], %s10461_s30 }
  0x94   : > { %v1461_v0 = vld [vmem:[#allocation6] sm:$0xff]  ;;  %v1462_v1 = vld [vmem:[#allocation6 + $0x8] sm:$0xff] }
  0x95   : > { %1463 = vst [vmem:[#allocation2] sm:$0xff] %v1461_v0 }
  0x96   : > { %1464 = vst [vmem:[#allocation2 + $0x8] sm:$0xff] %v1462_v1 }
  0x97 PF: > { %v11786_v3 = vld [vmem:[#allocation3 + $0x8] sm:$0xff]   ;;  %v11788_v4 = vld [vmem:[#allocation3] sm:$0xff]   ;;  %v7940_v10 = vld [vmem:[%s11761_s28 + $0xe0] sm:$0xf]  ;;  %v1681_v17 = vlaneseq  ;;  %s13308_s20 = sld [smem:[#allocation30_spill]] }
  0x98   : > { %v10425_v5 = vunpack.c.l.bf16 %v11786_v3  ;;  %v10421_v6 = vunpack.c.l.bf16 %v11788_v4  ;;  %v10426_v8 = vunpack.c.h.bf16 %v11786_v3  ;;  %v10422_v9 = vunpack.c.h.bf16 %v11788_v4  ;;  %v10017_v11 = vld [vmem:[%s11761_s28 + $0xec] sm:$0xf0]  ;;  %v10015_v12 = vld [vmem:[%s11761_s28 + $0xe4] sm:$0xf]  ;;  %v7942_v14 = vld [vmem:[%s11761_s28 + $0xf0] sm:$0xf0] }
  0x99   : > { %v7941_v13 = vor.u32 %v10017_v11, %v7940_v10  ;;  %v7948_v15 = vld [vmem:[%s11761_s28 + $0xe8] sm:$0xf]  ;;  %v10018_v16 = vld [vmem:[%s11761_s28 + $0xf4] sm:$0xf0]  ;;  %v7945_v18 = vor.u32 %v10015_v12, %v7942_v14  ;;  %v10016_v20 = vld [vmem:[%s11761_s28 + $0xec] sm:$0xf] }
  0x9a   : > { %1736 = vadd.xlane.f32.xlu2 %v10425_v5  ;;  %1732 = vadd.xlane.f32.xlu1 %v10421_v6  ;;  %v7949_v19 = vor.u32 %v10018_v16, %v7948_v15  ;;  %v7950_v21 = vld [vmem:[%s11761_s28 + $0xf8] sm:$0xf0]  ;;  %v7924_v22 = vld [vmem:[%s11761_s28 + $0xc0] sm:$0xf]  ;;  %v10013_v24 = vld [vmem:[%s11761_s28 + $0xcc] sm:$0xf0] }
  0x9b   : > { %2002 = vmatpush.bf16.msra.mxu0 %v7941_v13  ;;  %v7953_v23 = vor.u32 %v10016_v20, %v7950_v21  ;;  %v10011_v25 = vld [vmem:[%s11761_s28 + $0xc4] sm:$0xf]  ;;  %v7926_v26 = vld [vmem:[%s11761_s28 + $0xd0] sm:$0xf0]  ;;  %2016 = vmatpush.bf16.msra.mxu1 %v7945_v18  ;;  %v7925_v27 = vor.u32 %v10013_v24, %v7924_v22  ;;  %v7932_v29 = vld [vmem:[%s11761_s28 + $0xc8] sm:$0xf] }
  0x9c   : > { %v1473_v2 = vld [vmem:[#allocation2] sm:$0xff]  ;;  %2030 = vmatpush.bf16.msra.mxu2 %v7949_v19  ;;  %v7929_v28 = vor.u32 %v10011_v25, %v7926_v26  ;;  %v10012_v31 = vld [vmem:[%s11761_s28 + $0xcc] sm:$0xf]  ;;  %v11815_v34 = vand.u32 127, %v1681_v17  ;;  %v10009_v3 = vld [vmem:[%s11761_s28 + $0xac] sm:$0xf0] }
  0x9d   : > { %1675 = vadd.xlane.f32.xlu0 %v1473_v2  ;;  %v11794_v7 = vld [vmem:[#allocation2 + $0x8] sm:$0xff]  ;;  %v10014_v30 = vld [vmem:[%s11761_s28 + $0xd4] sm:$0xf0]  ;;  %2044 = vmatpush.bf16.msra.mxu3 %v7953_v23  ;;  %v7934_v33 = vld [vmem:[%s11761_s28 + $0xd8] sm:$0xf0]  ;;  %p9982_p4 = scmp.ne.s32.totalorder %s13308_s20, 1 }
  0x9e   : > { %v7933_v32 = vor.u32 %v10014_v30, %v7932_v29  ;;  %v7937_v35 = vor.u32 %v10012_v31, %v7934_v33  ;;  %vm1683_vm0 = vcmp.lt.s32.totalorder %v11815_v34, 32  ;;  %v10007_v4 = vld [vmem:[%s11761_s28 + $0xa4] sm:$0xf]  ;;  %v10008_v11 = vld [vmem:[%s11761_s28 + $0xac] sm:$0xf] }
  0x9f   : > { %2003 = vmatpush.bf16.msra.mxu0 %v7925_v27  ;;  %2017 = vmatpush.bf16.msra.mxu1 %v7929_v28  ;;  %v7918_v12 = vld [vmem:[%s11761_s28 + $0xb8] sm:$0xf0]  ;;  %v7892_v14 = vld [vmem:[%s11761_s28 + $0x80] sm:$0xf]  ;;  %v10005_v15 = vld [vmem:[%s11761_s28 + $0x8c] sm:$0xf0] }
  0xa0   : > { %2031 = vmatpush.bf16.msra.mxu2 %v7933_v32  ;;  %v7921_v13 = vor.u32 %v10008_v11, %v7918_v12  ;;  %v10003_v16 = vld [vmem:[%s11761_s28 + $0x84] sm:$0xf]  ;;  %v7893_v17 = vor.u32 %v10005_v15, %v7892_v14  ;;  %v7894_v18 = vld [vmem:[%s11761_s28 + $0x90] sm:$0xf0]  ;;  %v7900_v19 = vld [vmem:[%s11761_s28 + $0x88] sm:$0xf] }
  0xa1   : > { %2045 = vmatpush.bf16.msra.mxu3 %v7937_v35  ;;  %v10006_v20 = vld [vmem:[%s11761_s28 + $0x94] sm:$0xf0]  ;;  %v7897_v21 = vor.u32 %v10003_v16, %v7894_v18  ;;  %v10004_v23 = vld [vmem:[%s11761_s28 + $0x8c] sm:$0xf]  ;;  %v7902_v24 = vld [vmem:[%s11761_s28 + $0x98] sm:$0xf0] }
  0xa2   : > { %1738 = vadd.xlane.f32.xlu2 %v10426_v8  ;;  %1734 = vadd.xlane.f32.xlu1 %v10422_v9  ;;  %v7901_v22 = vor.u32 %v10006_v20, %v7900_v19  ;;  %v7905_v25 = vor.u32 %v10004_v23, %v7902_v24  ;;  %v7876_v26 = vld [vmem:[%s11761_s28 + $0x60] sm:$0xf]  ;;  %v10001_v27 = vld [vmem:[%s11761_s28 + $0x6c] sm:$0xf0]  ;;  %v9999_v28 = vld [vmem:[%s11761_s28 + $0x64] sm:$0xf] }
  0xa3   : > { %v7877_v29 = vor.u32 %v10001_v27, %v7876_v26  ;;  %v7878_v30 = vld [vmem:[%s11761_s28 + $0x70] sm:$0xf0]  ;;  %v7884_v31 = vld [vmem:[%s11761_s28 + $0x68] sm:$0xf]  ;;  %v10002_v32 = vld [vmem:[%s11761_s28 + $0x74] sm:$0xf0] }
  0xa4   : > { %v7881_v33 = vor.u32 %v9999_v28, %v7878_v30  ;;  %v7885_v35 = vor.u32 %v10002_v32, %v7884_v31  ;;  %v9990_v11 = vld [vmem:[%s11761_s28 + $0x14] sm:$0xf0]  ;;  %v9988_v14 = vld [vmem:[%s11761_s28 + $0xc] sm:$0xf]  ;;  %v7838_v15 = vld [vmem:[%s11761_s28 + $0x18] sm:$0xf0] }
  0xa5   : > { %1677 = vadd.xlane.f32.xlu0 %v11794_v7  ;;  %2046 = vmatpush.bf16.msra.mxu3 %v7921_v13  ;;  %v8068_v16 = vld [vmem:[%s11765_s1 + $0xe0] sm:$0xf]  ;;  %v7841_v18 = vor.u32 %v9988_v14, %v7838_v15  ;;  %v10047_v20 = vld [vmem:[%s11765_s1 + $0xe4] sm:$0xf]  ;;  %v10050_v24 = vld [vmem:[%s11765_s1 + $0xf4] sm:$0xf0] }
  0xa6   : > { %v8078_v26 = vld [vmem:[%s11765_s1 + $0xf8] sm:$0xf0]  ;;  %v10045_v30 = vld [vmem:[%s11765_s1 + $0xcc] sm:$0xf0]  ;;  %v10043_v31 = vld [vmem:[%s11765_s1 + $0xc4] sm:$0xf] }
  0xa7   : > { %v8004_v14 = vld [vmem:[%s11765_s1 + $0x60] sm:$0xf]  ;;  %v10033_v15 = vld [vmem:[%s11765_s1 + $0x6c] sm:$0xf0] }
  0xa9   : > { %2047 = vmatpush.bf16.msra.mxu3 %v7905_v25  ;;  %v10048_v25 = vld [vmem:[%s11765_s1 + $0xec] sm:$0xf] }
  0xaa   : > { %v8081_v28 = vor.u32 %v10048_v25, %v8078_v26 }
 0x10d   : > { %v1737_v38 = vpop.xlane.xlu2 %1736  ;;  %v1733_v39 = vpop.xlane.xlu1 %1732 }
 0x10e   : > { %v1740_v41 = vmul.f32 0.03125, %v1733_v39  ;;  %v1742_v48 = vmul.f32 0.03125, %v1737_v38  ;;  %v7860_v39 = vld [vmem:[%s11761_s28 + $0x40] sm:$0xf] }
 0x110   : > { %v1676_v36 = vpop.xlane.xlu0 %1675  ;;  %v1744_v42 = vsub.f32 %v10421_v6, %v1740_v41  ;;  %v1746_v55 = vsub.f32 %v10425_v5, %v1742_v48  ;;  %v7910_v6 = vld [vmem:[%s11761_s28 + $0xb0] sm:$0xf0]  ;;  %v9995_v41 = vld [vmem:[%s11761_s28 + $0x44] sm:$0xf] }
 0x111   : > { %v1679_v37 = vmul.f32 0.03125, %v1676_v36  ;;  %v10000_v36 = vld [vmem:[%s11761_s28 + $0x6c] sm:$0xf] }
 0x112   : > { %v11826_v45 = vsel %vm1683_vm0, %v1744_v42, 0.0  ;;  %v11853_v0 = vsel %vm1683_vm0, %v1746_v55, 0.0  ;;  %v9991_v55 = vld [vmem:[%s11761_s28 + $0x24] sm:$0xf] }
 0x113   : > { %v1684_v40 = vsub.f32 %v1473_v2, %v1679_v37  ;;  %v1752_v47 = vmul.f32 %v11826_v45, %v11826_v45  ;;  %v1754_v1 = vmul.f32 %v11853_v0, %v11853_v0  ;;  %v7908_v2 = vld [vmem:[%s11761_s28 + $0xa0] sm:$0xf]  ;;  %v7886_v37 = vld [vmem:[%s11761_s28 + $0x78] sm:$0xf0] }
 0x114   : > { %v7909_v5 = vor.u32 %v10009_v3, %v7908_v2  ;;  %v7889_v38 = vor.u32 %v10000_v36, %v7886_v37  ;;  %v9992_v2 = vld [vmem:[%s11761_s28 + $0x2c] sm:$0xf]  ;;  %v7854_v3 = vld [vmem:[%s11761_s28 + $0x38] sm:$0xf0]  ;;  %v10046_v36 = vld [vmem:[%s11765_s1 + $0xd4] sm:$0xf0] }
 0x115   : > { %v11820_v43 = vsel %vm1683_vm0, %v1684_v40, 0.0  ;;  %v1739_v50 = vpop.xlane.xlu2 %1738  ;;  %1756 = vadd.xlane.f32.xlu2 %v1752_v47  ;;  %v1735_v51 = vpop.xlane.xlu1 %1734  ;;  %v9997_v40 = vld [vmem:[%s11761_s28 + $0x4c] sm:$0xf0]  ;;  %v9998_v47 = vld [vmem:[%s11761_s28 + $0x54] sm:$0xf0] }
 0x116   : > { %v1688_v44 = vmul.f32 %v11820_v43, %v11820_v43  ;;  %v1743_v53 = vmul.f32 0.03125, %v1739_v50  ;;  %v1741_v54 = vmul.f32 0.03125, %v1735_v51  ;;  %2004 = vmatpush.bf16.msra.mxu0 %v7909_v5  ;;  %2048 = vmatpush.bf16.msra.mxu3 %v7889_v38  ;;  %v7861_v42 = vor.u32 %v9997_v40, %v7860_v39  ;;  %v9996_v50 = vld [vmem:[%s11761_s28 + $0x4c] sm:$0xf]  ;;  %v7870_v51 = vld [vmem:[%s11761_s28 + $0x58] sm:$0xf0] }
 0x117   : > { %v7828_v5 = vld [vmem:[%s11761_s28] sm:$0xf]  ;;  %v10044_v39 = vld [vmem:[%s11765_s1 + $0xcc] sm:$0xf]  ;;  %v8062_v40 = vld [vmem:[%s11765_s1 + $0xd8] sm:$0xf0] }
 0x118   : > { %1690 = vadd.xlane.f32.xlu0 %v1688_v44  ;;  %v1678_v46 = vpop.xlane.xlu0 %1677  ;;  %v1747_v56 = vsub.f32 %v10426_v8, %v1743_v53  ;;  %v1745_v57 = vsub.f32 %v10422_v9, %v1741_v54  ;;  %v10010_v8 = vld [vmem:[%s11761_s28 + $0xb4] sm:$0xf0]  ;;  %v7913_v9 = vor.u32 %v10007_v4, %v7910_v6  ;;  %v7862_v44 = vld [vmem:[%s11761_s28 + $0x50] sm:$0xf0]  ;;  %v7844_v53 = vld [vmem:[%s11761_s28 + $0x20] sm:$0xf]  ;;  %v7857_v4 = vor.u32 %v9992_v2, %v7854_v3 }
 0x119   : > { %v1680_v49 = vmul.f32 0.03125, %v1678_v46  ;;  %v7868_v46 = vld [vmem:[%s11761_s28 + $0x48] sm:$0xf]  ;;  %v7865_v48 = vor.u32 %v9995_v41, %v7862_v44  ;;  %v9993_v54 = vld [vmem:[%s11761_s28 + $0x2c] sm:$0xf0]  ;;  %v8065_v41 = vor.u32 %v10044_v39, %v8062_v40 }
 0x11a   : > { %v11841_v60 = vsel %vm1683_vm0, %v1747_v56, 0.0  ;;  %v11845_v61 = vsel %vm1683_vm0, %v1745_v57, 0.0  ;;  %2018 = vmatpush.bf16.msra.mxu1 %v7913_v9  ;;  %2005 = vmatpush.bf16.msra.mxu0 %v7893_v17  ;;  %v7845_v56 = vor.u32 %v9993_v54, %v7844_v53  ;;  %v7846_v57 = vld [vmem:[%s11761_s28 + $0x30] sm:$0xf0]  ;;  %v9989_v6 = vld [vmem:[%s11761_s28 + $0xc] sm:$0xf0] }
 0x11b   : > { %v1685_v52 = vsub.f32 %v11794_v7, %v1680_v49  ;;  %v1755_v62 = vmul.f32 %v11841_v60, %v11841_v60  ;;  %v1753_v63 = vmul.f32 %v11845_v61, %v11845_v61  ;;  %v7916_v7 = vld [vmem:[%s11761_s28 + $0xa8] sm:$0xf]  ;;  %v7869_v49 = vor.u32 %v9998_v47, %v7868_v46  ;;  %v7830_v9 = vld [vmem:[%s11761_s28 + $0x10] sm:$0xf0]  ;;  %v10039_v46 = vld [vmem:[%s11765_s1 + $0xa4] sm:$0xf] }
 0x11c   : > { %v7917_v10 = vor.u32 %v10010_v8, %v7916_v7  ;;  %v9987_v7 = vld [vmem:[%s11761_s28 + $0x4] sm:$0xf]  ;;  %v7829_v8 = vor.u32 %v9989_v6, %v7828_v5  ;;  %v10049_v17 = vld [vmem:[%s11765_s1 + $0xec] sm:$0xf0]  ;;  %v8046_v54 = vld [vmem:[%s11765_s1 + $0xb8] sm:$0xf0] }
 0x11d   : > { %v11835_v58 = vsel %vm1683_vm0, %v1685_v52, 0.0  ;;  %1762 = vadd.xlane.f32.xlu2 %v1755_v62  ;;  %v7873_v52 = vor.u32 %v9996_v50, %v7870_v51  ;;  %v9994_v62 = vld [vmem:[%s11761_s28 + $0x34] sm:$0xf0]  ;;  %v7833_v12 = vor.u32 %v9987_v7, %v7830_v9  ;;  %v8069_v19 = vor.u32 %v10049_v17, %v8068_v16  ;;  %v10041_v44 = vld [vmem:[%s11765_s1 + $0xac] sm:$0xf0] }
 0x11e   : > { %v1689_v59 = vmul.f32 %v11835_v58, %v11835_v58  ;;  %2032 = vmatpush.bf16.msra.mxu2 %v7917_v10  ;;  %2019 = vmatpush.bf16.msra.mxu1 %v7897_v21  ;;  %v7836_v10 = vld [vmem:[%s11761_s28 + $0x8] sm:$0xf]  ;;  %v8070_v21 = vld [vmem:[%s11765_s1 + $0xf0] sm:$0xf0]  ;;  %v10042_v50 = vld [vmem:[%s11765_s1 + $0xb4] sm:$0xf0]  ;;  %v8005_v17 = vor.u32 %v10033_v15, %v8004_v14 }
 0x11f   : > { %2006 = vmatpush.bf16.msra.mxu0 %v7877_v29  ;;  %2049 = vmatpush.bf16.msra.mxu3 %v7873_v52  ;;  %v7837_v13 = vor.u32 %v9990_v11, %v7836_v10  ;;  %v8073_v23 = vor.u32 %v10047_v20, %v8070_v21  ;;  %v8052_v29 = vld [vmem:[%s11765_s1 + $0xc0] sm:$0xf]  ;;  %v10040_v53 = vld [vmem:[%s11765_s1 + $0xac] sm:$0xf]  ;;  %v8022_v5 = vld [vmem:[%s11765_s1 + $0x90] sm:$0xf0] }
 0x120   : > { %1692 = vadd.xlane.f32.xlu1 %v1689_v59  ;;  %1758 = vadd.xlane.f32.xlu0 %v1753_v63  ;;  %v7852_v59 = vld [vmem:[%s11761_s28 + $0x28] sm:$0xf]  ;;  %v7849_v63 = vor.u32 %v9991_v55, %v7846_v57  ;;  %v8053_v32 = vor.u32 %v10045_v30, %v8052_v29  ;;  %v8049_v57 = vor.u32 %v10040_v53, %v8046_v54  ;;  %v8028_v7 = vld [vmem:[%s11765_s1 + $0x88] sm:$0xf]  ;;  %v10036_v9 = vld [vmem:[%s11765_s1 + $0x8c] sm:$0xf] }
 0x121   : > { %v10031_v16 = vld [vmem:[%s11765_s1 + $0x64] sm:$0xf]  ;;  %v10034_v20 = vld [vmem:[%s11765_s1 + $0x74] sm:$0xf0]  ;;  %v7988_v29 = vld [vmem:[%s11765_s1 + $0x40] sm:$0xf] }
 0x122   : > { %2033 = vmatpush.bf16.msra.mxu2 %v7901_v22  ;;  %2020 = vmatpush.bf16.msra.mxu1 %v7881_v33  ;;  %v8076_v22 = vld [vmem:[%s11765_s1 + $0xe8] sm:$0xf]  ;;  %v8054_v33 = vld [vmem:[%s11765_s1 + $0xd0] sm:$0xf0]  ;;  %v10029_v30 = vld [vmem:[%s11765_s1 + $0x4c] sm:$0xf0] }
 0x123   : > { %2007 = vmatpush.bf16.msra.mxu0 %v7861_v42  ;;  %2050 = vmatpush.bf16.msra.mxu3 %v7857_v4  ;;  %v8077_v27 = vor.u32 %v10050_v24, %v8076_v22  ;;  %v8057_v37 = vor.u32 %v10043_v31, %v8054_v33  ;;  %v8036_v42 = vld [vmem:[%s11765_s1 + $0xa0] sm:$0xf]  ;;  %v8014_v24 = vld [vmem:[%s11765_s1 + $0x78] sm:$0xf0]  ;;  %v10027_v31 = vld [vmem:[%s11765_s1 + $0x44] sm:$0xf] }
 0x124   : > { %v8037_v47 = vor.u32 %v10041_v44, %v8036_v42  ;;  %v7996_v40 = vld [vmem:[%s11765_s1 + $0x48] sm:$0xf]  ;;  %v10028_v42 = vld [vmem:[%s11765_s1 + $0x4c] sm:$0xf]  ;;  %v7974_v53 = vld [vmem:[%s11765_s1 + $0x30] sm:$0xf0] }
 0x125   : > { %v7980_v54 = vld [vmem:[%s11765_s1 + $0x28] sm:$0xf] }
 0x126   : > { %2034 = vmatpush.bf16.msra.mxu2 %v7885_v35  ;;  %2021 = vmatpush.bf16.msra.mxu1 %v7865_v48  ;;  %v8060_v35 = vld [vmem:[%s11765_s1 + $0xc8] sm:$0xf]  ;;  %v8038_v48 = vld [vmem:[%s11765_s1 + $0xb0] sm:$0xf0] }
 0x127   : > { %2008 = vmatpush.bf16.msra.mxu0 %v7845_v56  ;;  %2051 = vmatpush.bf16.msra.mxu3 %v7841_v18  ;;  %v8061_v38 = vor.u32 %v10046_v36, %v8060_v35  ;;  %v8041_v52 = vor.u32 %v10039_v46, %v8038_v48  ;;  %v8006_v18 = vld [vmem:[%s11765_s1 + $0x70] sm:$0xf0]  ;;  %v7989_v36 = vor.u32 %v10029_v30, %v7988_v29  ;;  %v7998_v46 = vld [vmem:[%s11765_s1 + $0x58] sm:$0xf0] }
 0x128   : > { %1760 = vadd.xlane.f32.xlu1 %v1754_v1  ;;  %v7853_v1 = vor.u32 %v9994_v62, %v7852_v59  ;;  %v8020_v62 = vld [vmem:[%s11765_s1 + $0x80] sm:$0xf]  ;;  %v8009_v22 = vor.u32 %v10031_v16, %v8006_v18  ;;  %v7958_v16 = vld [vmem:[%s11765_s1 + $0x10] sm:$0xf0] }
 0x12a   : > { %2035 = vmatpush.bf16.msra.mxu2 %v7869_v49  ;;  %2022 = vmatpush.bf16.msra.mxu1 %v7849_v63  ;;  %v8044_v49 = vld [vmem:[%s11765_s1 + $0xa8] sm:$0xf]  ;;  %v10037_v63 = vld [vmem:[%s11765_s1 + $0x8c] sm:$0xf0] }
 0x12b   : > { %2009 = vmatpush.bf16.msra.mxu0 %v7829_v8  ;;  %2284 = vmatpush.bf16.msrb.mxu3 %v8081_v28  ;;  %v8045_v56 = vor.u32 %v10042_v50, %v8044_v49  ;;  %v8021_v4 = vor.u32 %v10037_v63, %v8020_v62  ;;  %v10038_v8 = vld [vmem:[%s11765_s1 + $0x94] sm:$0xf0]  ;;  %v7972_v49 = vld [vmem:[%s11765_s1 + $0x20] sm:$0xf]  ;;  %v10025_v50 = vld [vmem:[%s11765_s1 + $0x2c] sm:$0xf0] }
 0x12c   : > { %v8029_v11 = vor.u32 %v10038_v8, %v8028_v7  ;;  %v10026_v62 = vld [vmem:[%s11765_s1 + $0x34] sm:$0xf0]  ;;  %v10024_v63 = vld [vmem:[%s11765_s1 + $0x2c] sm:$0xf]  ;;  %v7956_v7 = vld [vmem:[%s11765_s1] sm:$0xf] }
 0x12e   : > { %2036 = vmatpush.bf16.msra.mxu2 %v7853_v1  ;;  %2023 = vmatpush.bf16.msra.mxu1 %v7833_v12  ;;  %v10035_v1 = vld [vmem:[%s11765_s1 + $0x84] sm:$0xf]  ;;  %v8030_v12 = vld [vmem:[%s11765_s1 + $0x98] sm:$0xf0] }
 0x12f   : > { %2227 = vmatpush.bf16.msrb.mxu0 %v8069_v19  ;;  %2285 = vmatpush.bf16.msrb.mxu3 %v8065_v41  ;;  %v8025_v6 = vor.u32 %v10035_v1, %v8022_v5  ;;  %v8012_v19 = vld [vmem:[%s11765_s1 + $0x68] sm:$0xf]  ;;  %v10030_v41 = vld [vmem:[%s11765_s1 + $0x54] sm:$0xf0]  ;;  %v7981_v5 = vor.u32 %v10026_v62, %v7980_v54  ;;  %v8158_v62 = vld [vmem:[%s11769_s7 + $0x98] sm:$0xf0] }
 0x130   : > { %v8013_v26 = vor.u32 %v10034_v20, %v8012_v19  ;;  %v7997_v48 = vor.u32 %v10030_v41, %v7996_v40  ;;  %v10081_v54 = vld [vmem:[%s11769_s7 + $0xec] sm:$0xf0] }
 0x132   : > { %2037 = vmatpush.bf16.msra.mxu2 %v7837_v13  ;;  %2246 = vmatpush.bf16.msrb.mxu1 %v8073_v23  ;;  %v8033_v13 = vor.u32 %v10036_v9, %v8030_v12  ;;  %v10032_v23 = vld [vmem:[%s11765_s1 + $0x6c] sm:$0xf]  ;;  %v10019_v12 = vld [vmem:[%s11765_s1 + $0x4] sm:$0xf] }
 0x133   : > { %2228 = vmatpush.bf16.msrb.mxu0 %v8053_v32  ;;  %2286 = vmatpush.bf16.msrb.mxu3 %v8049_v57 }
 0x136   : > { %2265 = vmatpush.bf16.msrb.mxu2 %v8077_v27  ;;  %2247 = vmatpush.bf16.msrb.mxu1 %v8057_v37  ;;  %v8017_v27 = vor.u32 %v10032_v23, %v8014_v24  ;;  %v7990_v37 = vld [vmem:[%s11765_s1 + $0x50] sm:$0xf0]  ;;  %v7961_v23 = vor.u32 %v10019_v12, %v7958_v16  ;;  %v8180_v12 = vld [vmem:[%s11769_s7 + $0xc0] sm:$0xf] }
 0x137   : > { %2229 = vmatpush.bf16.msrb.mxu0 %v8037_v47  ;;  %2287 = vmatpush.bf16.msrb.mxu3 %v8033_v13  ;;  %v7993_v39 = vor.u32 %v10027_v31, %v7990_v37 }
 0x13a   : > { %2266 = vmatpush.bf16.msrb.mxu2 %v8061_v38  ;;  %2248 = vmatpush.bf16.msrb.mxu1 %v8041_v52  ;;  %v8001_v52 = vor.u32 %v10028_v42, %v7998_v46 }
 0x13b   : > { %2230 = vmatpush.bf16.msrb.mxu0 %v8021_v4  ;;  %2288 = vmatpush.bf16.msrb.mxu3 %v8017_v27 }
 0x13e   : > { %2267 = vmatpush.bf16.msrb.mxu2 %v8045_v56  ;;  %2249 = vmatpush.bf16.msrb.mxu1 %v8025_v6  ;;  %v7982_v6 = vld [vmem:[%s11765_s1 + $0x38] sm:$0xf0] }
 0x13f   : > { %2231 = vmatpush.bf16.msrb.mxu0 %v8005_v17  ;;  %2289 = vmatpush.bf16.msrb.mxu3 %v8001_v52  ;;  %v7985_v9 = vor.u32 %v10024_v63, %v7982_v6  ;;  %v7964_v17 = vld [vmem:[%s11765_s1 + $0x8] sm:$0xf] }
 0x142   : > { %2268 = vmatpush.bf16.msrb.mxu2 %v8029_v11  ;;  %2250 = vmatpush.bf16.msrb.mxu1 %v8009_v22  ;;  %v10021_v11 = vld [vmem:[%s11765_s1 + $0xc] sm:$0xf0] }
 0x143   : > { %2232 = vmatpush.bf16.msrb.mxu0 %v7989_v36  ;;  %v7957_v15 = vor.u32 %v10021_v11, %v7956_v7  ;;  %2290 = vmatpush.bf16.msrb.mxu3 %v7985_v9  ;;  %v10065_v7 = vld [vmem:[%s11769_s7 + $0x6c] sm:$0xf0] }
 0x146   : > { %2269 = vmatpush.bf16.msrb.mxu2 %v8013_v26  ;;  %2251 = vmatpush.bf16.msrb.mxu1 %v7993_v39  ;;  %v7966_v26 = vld [vmem:[%s11765_s1 + $0x18] sm:$0xf0] }
 0x14a   : > { %2270 = vmatpush.bf16.msrb.mxu2 %v7997_v48 }
 0x14e   : > { %2271 = vmatpush.bf16.msrb.mxu2 %v7981_v5 }
 0x188   : > { %v1757_v59 = vpop.xlane.xlu2 %1756 }
 0x189   : > { %v1764_v3 = vmul.f32 0.03125, %v1757_v59  ;;  %v7973_v59 = vor.u32 %v10025_v50, %v7972_v49  ;;  %v10583_v50 = vld [vmem:[%s11757_s18] ss:$0 sm:$0xff] }
 0x18b   : > { %v1691_v51 = vpop.xlane.xlu0 %1690  ;;  %v11939_v10 = vadd.f32 1e-05, %v1764_v3  ;;  %2233 = vmatpush.bf16.msrb.mxu0 %v7973_v59  ;;  %v10082_v59 = vld [vmem:[%s11769_s7 + $0xf4] sm:$0xf0] }
 0x18c   : > { %v1694_v55 = vmul.f32 0.03125, %v1691_v51  ;;  %v10023_v51 = vld [vmem:[%s11765_s1 + $0x24] sm:$0xf] }
 0x18d   : > { %v7977_v4 = vor.u32 %v10023_v51, %v7974_v53  ;;  %v8196_v53 = vld [vmem:[%s11769_s7 + $0xe0] sm:$0xf]  ;;  %vm1778_vm9 = vweird.f32 %v11939_v10 }
 0x18e   : > { %v11932_v2 = vadd.f32 1e-05, %v1694_v55  ;;  %v8197_v9 = vor.u32 %v10081_v54, %v8196_v53 }
 0x18f   : > { %2252 = vmatpush.bf16.msrb.mxu1 %v7977_v4  ;;  %2234 = vmatpush.bf16.msrb.mxu0 %v7957_v15  ;;  %v8206_v4 = vld [vmem:[%s11769_s7 + $0xf8] sm:$0xf0] }
 0x190   : > { %10603 = vrsqrt.f32 %v11932_v2  ;;  %v1763_v56 = vpop.xlane.xlu2 %1762  ;;  %vm1704_vm2 = vweird.f32 %v11932_v2 }
 0x191   : > { %10605 = vrsqrt.f32 %v11939_v10  ;;  %v1767_v14 = vmul.f32 0.03125, %v1763_v56  ;;  %v8198_v56 = vld [vmem:[%s11769_s7 + $0xf0] sm:$0xf0] }
 0x193   : > { %v1693_v21 = vpop.xlane.xlu1 %1692  ;;  %v1759_v28 = vpop.xlane.xlu0 %1758  ;;  %v12000_v29 = vadd.f32 1e-05, %v1767_v14  ;;  %2253 = vmatpush.bf16.msrb.mxu1 %v7961_v23  ;;  %v10076_v23 = vld [vmem:[%s11769_s7 + $0xcc] sm:$0xf] }
 0x194   : > { %v1695_v25 = vmul.f32 0.03125, %v1693_v21  ;;  %v1765_v35 = vmul.f32 0.03125, %v1759_v28  ;;  %v10022_v21 = vld [vmem:[%s11765_s1 + $0x14] sm:$0xf0] }
 0x195   : > { %v7965_v24 = vor.u32 %v10022_v21, %v7964_v17  ;;  %v10078_v21 = vld [vmem:[%s11769_s7 + $0xd4] sm:$0xf0]  ;;  %vm1808_vm15 = vweird.f32 %v12000_v29 }
 0x196   : > { %v11953_v32 = vpop.eup %10603  ;;  %v11956_v33 = vadd.f32 1e-05, %v1695_v25  ;;  %v11965_v44 = vadd.f32 1e-05, %v1765_v35  ;;  %v10020_v25 = vld [vmem:[%s11765_s1 + $0xc] sm:$0xf] }
 0x197   : > { %v1699_v38 = vmul.f32 %v11953_v32, %v11932_v2  ;;  %v11977_v1 = vpop.eup %10605  ;;  %vm1705_vm1 = vweird.f32 %v11953_v32  ;;  %v7969_v37 = vor.u32 %v10020_v25, %v7966_v26  ;;  %2272 = vmatpush.bf16.msrb.mxu2 %v7965_v24  ;;  %v8190_v24 = vld [vmem:[%s11769_s7 + $0xd8] sm:$0xf0] }
 0x198   : > { %10607 = vrsqrt.f32 %v11956_v33  ;;  %v1773_v19 = vmul.f32 %v11977_v1, %v11939_v10  ;;  %vm1706_vm3 = vmor %vm1704_vm2, %vm1705_vm1  ;;  %vm1714_vm5 = vweird.f32 %v11956_v33  ;;  %vm1788_vm7 = vweird.f32 %v11965_v44  ;;  %v10080_v10 = vld [vmem:[%s11769_s7 + $0xec] sm:$0xf] }
 0x199   : > { %v1700_v47 = vmul.f32 %v11953_v32, %v1699_v38  ;;  %10609 = vrsqrt.f32 %v11965_v44  ;;  %2291 = vmatpush.bf16.msrb.mxu3 %v7969_v37  ;;  %vm1779_vm10 = vweird.f32 %v11977_v1  ;;  %v8209_v17 = vor.u32 %v10080_v10, %v8206_v4 }
 0x19a   : > { %v1774_v35 = vmul.f32 %v11977_v1, %v1773_v19  ;;  %vm12040_vm12 = vmor %vm1778_vm9, %vm1779_vm10  ;;  %v8182_v19 = vld [vmem:[%s11769_s7 + $0xd0] sm:$0xf0] }
 0x19b   : > { %v1701_v55 = vmul.f32 0.5, %v1700_v47  ;;  %v1761_v57 = vpop.xlane.xlu1 %1760 }
 0x19c   : > { %v1766_v3 = vmul.f32 0.03125, %v1761_v57  ;;  %v1775_v41 = vmul.f32 0.5, %v1774_v35  ;;  %v8204_v57 = vld [vmem:[%s11769_s7 + $0xe8] sm:$0xf]  ;;  %v10073_v35 = vld [vmem:[%s11769_s7 + $0xac] sm:$0xf0] }
 0x19d   : > { %v1702_v8 = vsub.f32 1.5, %v1701_v55  ;;  %v10079_v55 = vld [vmem:[%s11769_s7 + $0xe4] sm:$0xf]  ;;  %v8205_v16 = vor.u32 %v10082_v59, %v8204_v57  ;;  %v10070_v57 = vld [vmem:[%s11769_s7 + $0x94] sm:$0xf0] }
 0x19e   : > { %v10608_v13 = vpop.eup %10607  ;;  %v11991_v22 = vadd.f32 1e-05, %v1766_v3  ;;  %v1776_v51 = vsub.f32 1.5, %v1775_v41  ;;  %v8201_v11 = vor.u32 %v10079_v55, %v8198_v56  ;;  %v10072_v41 = vld [vmem:[%s11769_s7 + $0xac] sm:$0xf] }
 0x19f   : > { %v1703_v18 = vmul.f32 %v11953_v32, %v1702_v8  ;;  %v1709_v20 = vmul.f32 %v10608_v13, %v11956_v33  ;;  %v11995_v27 = vpop.eup %10609  ;;  %vm1715_vm4 = vweird.f32 %v10608_v13  ;;  %v10068_v59 = vld [vmem:[%s11769_s7 + $0x8c] sm:$0xf] }
 0x1a0   : > { %v1783_v30 = vmul.f32 %v11995_v27, %v11965_v44  ;;  %10611 = vrsqrt.f32 %v11991_v22  ;;  %vm1716_vm6 = vmor %vm1714_vm5, %vm1715_vm4  ;;  %vm1789_vm8 = vweird.f32 %v11995_v27  ;;  %v1777_v5 = vmul.f32 %v11977_v1, %v1776_v51  ;;  %v10069_v51 = vld [vmem:[%s11769_s7 + $0x8c] sm:$0xf0] }
 0x1a1   : > { %v1710_v28 = vmul.f32 %v10608_v13, %v1709_v20  ;;  %v1707_v31 = vsel %vm1706_vm3, %v11953_v32, %v1703_v18  ;;  %10613 = vrsqrt.f32 %v12000_v29  ;;  %v10582_v32 = vld [vmem:[%s11730_s5] ss:$0 sm:$0xff]  ;;  %vm12031_vm11 = vmor %vm1788_vm7, %vm1789_vm8  ;;  %v10075_v18 = vld [vmem:[%s11769_s7 + $0xc4] sm:$0xf]  ;;  %vm1798_vm13 = vweird.f32 %v11991_v22 }
 0x1a2   : > { %v1784_v2 = vmul.f32 %v11995_v27, %v1783_v30  ;;  %v1718_v39 = vmul.f32 %v1707_v31, %v11820_v43  ;;  %v8188_v20 = vld [vmem:[%s11769_s7 + $0xc8] sm:$0xf]  ;;  %v1781_v25 = vsel %vm12040_vm12, %v11977_v1, %v1777_v5  ;;  %v8185_v31 = vor.u32 %v10075_v18, %v8182_v19  ;;  %v8164_v1 = vld [vmem:[%s11769_s7 + $0xa0] sm:$0xf] }
 0x1a3   : > { %v1711_v36 = vmul.f32 0.5, %v1710_v28  ;;  %vm2608_vm4 = vcmask 130048  }
 0x1a4   : > { %v1785_v40 = vmul.f32 0.5, %v1784_v2  ;;  %v1723_v43 = vmul.f32 %v10582_v32, %v1718_v39  ;;  %v8189_v2 = vor.u32 %v10078_v21, %v8188_v20  ;;  %v8166_v39 = vld [vmem:[%s11769_s7 + $0xb0] sm:$0xf0] }
 0x1a5   : > { %v1712_v38 = vsub.f32 1.5, %v1711_v36  ;;  %v10071_v36 = vld [vmem:[%s11769_s7 + $0xa4] sm:$0xf] }
 0x1a6   : > { %v1786_v47 = vsub.f32 1.5, %v1785_v40  ;;  %v12012_v48 = vpop.eup %10611  ;;  %v1728_v63 = vadd.f32 %v10583_v50, %v1723_v43  ;;  %v1812_v40 = vmul.f32 %v1781_v25, %v11826_v45  ;;  %v8165_v43 = vor.u32 %v10073_v35, %v8164_v1  ;;  %v10061_v25 = vld [vmem:[%s11769_s7 + $0x4c] sm:$0xf0]  ;;  %v8124_v1 = vld [vmem:[%s11769_s7 + $0x48] sm:$0xf] }
 0x1a7   : > { %v1713_v42 = vmul.f32 %v10608_v13, %v1712_v38  ;;  %v12018_v52 = vpop.eup %10613  ;;  %v1793_v44 = vmul.f32 %v12012_v48, %v11991_v22  ;;  %v8193_v38 = vor.u32 %v10076_v23, %v8190_v24  ;;  %v8169_v45 = vor.u32 %v10071_v36, %v8166_v39  ;;  %v8116_v24 = vld [vmem:[%s11769_s7 + $0x40] sm:$0xf]  ;;  %v10062_v35 = vld [vmem:[%s11769_s7 + $0x54] sm:$0xf0]  ;;  %v10060_v36 = vld [vmem:[%s11769_s7 + $0x4c] sm:$0xf] }
 0x1a8   : > { %v1803_v6 = vmul.f32 %v12018_v52, %v12000_v29  ;;  %vm1799_vm14 = vweird.f32 %v12012_v48  ;;  %vm1809_vm2 = vweird.f32 %v12018_v52 }
 0x1a9   : > { %v1717_v46 = vsel %vm1716_vm6, %v10608_v13, %v1713_v42  ;;  %v10077_v13 = vld [vmem:[%s11769_s7 + $0xcc] sm:$0xf0]  ;;  %v1794_v15 = vmul.f32 %v12012_v48, %v1793_v44  ;;  %v8174_v42 = vld [vmem:[%s11769_s7 + $0xb8] sm:$0xf0]  ;;  %v8156_v44 = vld [vmem:[%s11769_s7 + $0x88] sm:$0xf] }
 0x1aa   : > { %v1719_v49 = vmul.f32 %v1717_v46, %v11835_v58  ;;  %v1787_v58 = vmul.f32 %v11995_v27, %v1786_v47  ;;  %v1804_v26 = vmul.f32 %v12018_v52, %v1803_v6  ;;  %v8181_v30 = vor.u32 %v10077_v13, %v8180_v12  ;;  %v12076_v47 = vld [vmem:[%s1148_s23] ss:$0 sm:$0xff]  ;;  %vm12094_vm1 = vmor %vm1798_vm13, %vm1799_vm14  ;;  %v8132_v6 = vld [vmem:[%s11769_s7 + $0x60] sm:$0xf] }
 0x1ab   : > { %v1795_v37 = vmul.f32 0.5, %v1794_v15  ;;  %v8177_v55 = vor.u32 %v10072_v41, %v8174_v42  ;;  %v8157_v22 = vor.u32 %v10070_v57, %v8156_v44  ;;  %v8134_v12 = vld [vmem:[%s11769_s7 + $0x70] sm:$0xf0]  ;;  %v8140_v13 = vld [vmem:[%s11769_s7 + $0x68] sm:$0xf]  ;;  %vm12112_vm3 = vmor %vm1808_vm15, %vm1809_vm2  ;;  %v8133_v21 = vor.u32 %v10065_v7, %v8132_v6 }
 0x1ac   : > { %v1724_v33 = vmul.f32 %v10582_v32, %v1719_v49  ;;  %v1791_v14 = vsel %vm12031_vm11, %v11995_v27, %v1787_v58  ;;  %v12062_v27 = vld [vmem:[%s1138_s27] ss:$0 sm:$0xff]  ;;  %v10074_v32 = vld [vmem:[%s11769_s7 + $0xb4] sm:$0xf0]  ;;  %v1805_v46 = vmul.f32 0.5, %v1804_v26 }
 0x1ad   : > { %v1813_v28 = vmul.f32 %v1791_v14, %v11845_v61  ;;  %v8172_v61 = vld [vmem:[%s11769_s7 + $0xa8] sm:$0xf]  ;;  %v1796_v53 = vsub.f32 1.5, %v1795_v37  ;;  %v8150_v58 = vld [vmem:[%s11769_s7 + $0x90] sm:$0xf0]  ;;  %v1819_v56 = vmul.f32 %v12062_v27, %v1812_v40 }
 0x1ae   : > { %v1729_v3 = vadd.f32 %v10583_v50, %v1724_v33  ;;  %v8148_v50 = vld [vmem:[%s11769_s7 + $0x80] sm:$0xf]  ;;  %v10067_v33 = vld [vmem:[%s11769_s7 + $0x84] sm:$0xf]  ;;  %v8173_v54 = vor.u32 %v10074_v32, %v8172_v61  ;;  %v10066_v15 = vld [vmem:[%s11769_s7 + $0x74] sm:$0xf0] }
 0x1af   : > { %v1820_v49 = vmul.f32 %v12062_v27, %v1813_v28  ;;  %v8149_v4 = vor.u32 %v10069_v51, %v8148_v50  ;;  %v8153_v5 = vor.u32 %v10067_v33, %v8150_v58  ;;  %v1826_v14 = vadd.f32 %v12076_v47, %v1819_v56  ;;  %v8126_v37 = vld [vmem:[%s11769_s7 + $0x58] sm:$0xf0]  ;;  %v8100_v61 = vld [vmem:[%s11769_s7 + $0x20] sm:$0xf]  ;;  %v10057_v40 = vld [vmem:[%s11769_s7 + $0x2c] sm:$0xf0] }
 0x1b0   : > { %v1830_v8 = vpack.c.bf16 %v1729_v3, %v1728_v63  ;;  %v1806_v63 = vsub.f32 1.5, %v1805_v46  ;;  %v8141_v26 = vor.u32 %v10066_v15, %v8140_v13  ;;  %v8129_v32 = vor.u32 %v10060_v36, %v8126_v37  ;;  %v10055_v41 = vld [vmem:[%s11769_s7 + $0x24] sm:$0xf]  ;;  %v8102_v42 = vld [vmem:[%s11769_s7 + $0x30] sm:$0xf0] }
 0x1b1   : > { %v1827_v3 = vadd.f32 %v12076_v47, %v1820_v49  ;;  %v8108_v46 = vld [vmem:[%s11769_s7 + $0x28] sm:$0xf]  ;;  %v10058_v49 = vld [vmem:[%s11769_s7 + $0x34] sm:$0xf0]  ;;  %v8101_v51 = vor.u32 %v10057_v40, %v8100_v61  ;;  %v8105_v33 = vor.u32 %v10055_v41, %v8102_v42  ;;  %v10051_v58 = vld [vmem:[%s11769_s7 + $0x4] sm:$0xf] }
 0x1b2   : > { %2010 = vmatmul.bf16.vlgmr.msra.gmra.mxu0 %v1830_v8  ;;  %2024 = vmatmul.bf16.vlgmr.msra.gmra.mxu1 %v1830_v8  ;;  %v1807_v18 = vmul.f32 %v12018_v52, %v1806_v63  ;;  %v8086_v44 = vld [vmem:[%s11769_s7 + $0x10] sm:$0xf0]  ;;  %v8092_v56 = vld [vmem:[%s11769_s7 + $0x8] sm:$0xf]  ;;  %v8094_v63 = vld [vmem:[%s11769_s7 + $0x18] sm:$0xf0] }
 0x1b3   : > { %2038 = vmatmul.bf16.vlgmr.msra.gmra.mxu2 %v1830_v8  ;;  %2052 = vmatmul.bf16.vlgmr.msra.gmra.mxu3 %v1830_v8  ;;  %v1797_v8 = vmul.f32 %v12012_v48, %v1796_v53  ;;  %v12116_v20 = vpack.c.bf16 %v1827_v3, %v1826_v14  ;;  %v8084_v53 = vld [vmem:[%s11769_s7] sm:$0xf]  ;;  %v1668_v13 = vld [vmem:[%s11767_s26] sm:$0xf] }
 0x1b4   : > { %2472 = vmatpush.bf16.msra.mxu0 %v8197_v9  ;;  %2491 = vmatpush.bf16.msra.mxu1 %v8201_v11  ;;  %v8161_v9 = vor.u32 %v10068_v59, %v8158_v62  ;;  %v10063_v11 = vld [vmem:[%s11769_s7 + $0x64] sm:$0xf]  ;;  %v10054_v59 = vld [vmem:[%s11769_s7 + $0x14] sm:$0xf0]  ;;  %v10052_v62 = vld [vmem:[%s11769_s7 + $0xc] sm:$0xf] }
 0x1b5   : > { %2510 = vmatpush.bf16.msra.mxu2 %v8205_v16  ;;  %2529 = vmatpush.bf16.msra.mxu3 %v8209_v17  ;;  %v10064_v16 = vld [vmem:[%s11769_s7 + $0x6c] sm:$0xf]  ;;  %v8142_v17 = vld [vmem:[%s11769_s7 + $0x78] sm:$0xf0]  ;;  %v8137_v23 = vor.u32 %v10063_v11, %v8134_v12  ;;  %v1801_v29 = vsel %vm12094_vm1, %v12012_v48, %v1797_v8  ;;  %v1811_v48 = vsel %vm12112_vm3, %v12018_v52, %v1807_v18 }
 0x1b6   : > { %v8145_v28 = vor.u32 %v10064_v16, %v8142_v17  ;;  %v8125_v52 = vor.u32 %v10062_v35, %v8124_v1  ;;  %v8097_v6 = vor.u32 %v10052_v62, %v8094_v63  ;;  %v2059_v16 = vperm.slane %v1668_v13, 0 }
 0x1b7   : > { %v2060_v17 = vperm.slane %v1668_v13, 1 }
 0x1b8   : > { %2473 = vmatpush.bf16.msra.mxu0 %v8181_v30  ;;  %2492 = vmatpush.bf16.msra.mxu1 %v8185_v31  ;;  %v10059_v30 = vld [vmem:[%s11769_s7 + $0x44] sm:$0xf]  ;;  %v8118_v31 = vld [vmem:[%s11769_s7 + $0x50] sm:$0xf0] }
 0x1b9   : > { %2511 = vmatpush.bf16.msra.mxu2 %v8189_v2  ;;  %2530 = vmatpush.bf16.msra.mxu3 %v8193_v38  ;;  %v1814_v2 = vmul.f32 %v1801_v29, %v11853_v0  ;;  %v8117_v38 = vor.u32 %v10061_v25, %v8116_v24  ;;  %v8121_v39 = vor.u32 %v10059_v30, %v8118_v31  ;;  %v12175_v24 = vperm.slane %v1668_v13, 2  ;;  %v12180_v31 = vld [vmem:[%s11763_s13] sm:$0xf] }
 0x1ba   : > { %v1815_v0 = vmul.f32 %v1811_v48, %v11841_v60  ;;  %v12177_v29 = vperm.slane %v1668_v13, 3 }
 0x1bb   : > { %v1821_v50 = vmul.f32 %v12062_v27, %v1814_v2 }
 0x1bc   : > { %2474 = vmatpush.bf16.msra.mxu0 %v8165_v43  ;;  %2493 = vmatpush.bf16.msra.mxu1 %v8169_v45  ;;  %v10056_v43 = vld [vmem:[%s11769_s7 + $0x2c] sm:$0xf]  ;;  %v8110_v45 = vld [vmem:[%s11769_s7 + $0x38] sm:$0xf0]  ;;  %v1822_v57 = vmul.f32 %v12062_v27, %v1815_v0 }
 0x1bd   : > { %2512 = vmatpush.bf16.msra.mxu2 %v8173_v54  ;;  %2531 = vmatpush.bf16.msra.mxu3 %v8177_v55  ;;  %v10053_v54 = vld [vmem:[%s11769_s7 + $0xc] sm:$0xf0]  ;;  %v8109_v55 = vor.u32 %v10058_v49, %v8108_v46  ;;  %v8113_v60 = vor.u32 %v10056_v43, %v8110_v45  ;;  %v1828_v3 = vadd.f32 %v12076_v47, %v1821_v50 }
 0x1be   : > { %v8085_v10 = vor.u32 %v10053_v54, %v8084_v53  ;;  %v1829_v7 = vadd.f32 %v12076_v47, %v1822_v57 }
 0x1c0   : > { %2475 = vmatpush.bf16.msra.mxu0 %v8149_v4  ;;  %2494 = vmatpush.bf16.msra.mxu1 %v8153_v5  ;;  %v8089_v4 = vor.u32 %v10051_v58, %v8086_v44  ;;  %v8093_v5 = vor.u32 %v10054_v59, %v8092_v56  ;;  %v1832_v8 = vpack.c.bf16 %v1829_v7, %v1828_v3 }
 0x1c1   : > { %2513 = vmatpush.bf16.msra.mxu2 %v8157_v22  ;;  %2532 = vmatpush.bf16.msra.mxu3 %v8161_v9 }
 0x1c2   : > { %2235 = vmatmul.bf16.vlgmr.msrb.gmra.mxu0 %v12116_v20  ;;  %2254 = vmatmul.bf16.vlgmr.msrb.gmra.mxu1 %v12116_v20 }
 0x1c3   : > { %2273 = vmatmul.bf16.vlgmr.msrb.gmra.mxu2 %v12116_v20  ;;  %2292 = vmatmul.bf16.vlgmr.msrb.gmra.mxu3 %v12116_v20 }
 0x1c4   : > { %2476 = vmatpush.bf16.msra.mxu0 %v8133_v21  ;;  %2495 = vmatpush.bf16.msra.mxu1 %v8137_v23 }
 0x1c5   : > { %2514 = vmatpush.bf16.msra.mxu2 %v8141_v26  ;;  %2533 = vmatpush.bf16.msra.mxu3 %v8145_v28 }
 0x1c8   : > { %2477 = vmatpush.bf16.msra.mxu0 %v8117_v38  ;;  %2496 = vmatpush.bf16.msra.mxu1 %v8121_v39  ;;  %v1834_v38 = vperm.slane %v12180_v31, 0  ;;  %v1835_v39 = vperm.slane %v12180_v31, 1 }
 0x1c9   : > { %2515 = vmatpush.bf16.msra.mxu2 %v8125_v52  ;;  %2534 = vmatpush.bf16.msra.mxu3 %v8129_v32 }
 0x1cc   : > { %2478 = vmatpush.bf16.msra.mxu0 %v8101_v51  ;;  %2497 = vmatpush.bf16.msra.mxu1 %v8105_v33 }
 0x1cd   : > { %2516 = vmatpush.bf16.msra.mxu2 %v8109_v55  ;;  %2535 = vmatpush.bf16.msra.mxu3 %v8113_v60 }
 0x1d0   : > { %2479 = vmatpush.bf16.msra.mxu0 %v8085_v10  ;;  %2498 = vmatpush.bf16.msra.mxu1 %v8089_v4 }
 0x1d1   : > { %2517 = vmatpush.bf16.msra.mxu2 %v8093_v5  ;;  %2536 = vmatpush.bf16.msra.mxu3 %v8097_v6 }
 0x1d2   : > { %2240 = vmatmul.bf16.gmra.mxu0 %v1832_v8  ;;  %2259 = vmatmul.bf16.gmra.mxu1 %v1832_v8 }
 0x1d3   : > { %2278 = vmatmul.bf16.gmra.mxu2 %v1832_v8  ;;  %2297 = vmatmul.bf16.gmra.mxu3 %v1832_v8 }
 0x1e2   : > { %2480 = vmatmul.bf16.vlgmr.msra.gmra.mxu0 %v12116_v20  ;;  %2499 = vmatmul.bf16.vlgmr.msra.gmra.mxu1 %v12116_v20 }
 0x1e3   : > { %2518 = vmatmul.bf16.vlgmr.msra.gmra.mxu2 %v12116_v20  ;;  %2537 = vmatmul.bf16.vlgmr.msra.gmra.mxu3 %v12116_v20 }
 0x1f2   : > { %2485 = vmatmul.bf16.gmra.mxu0 %v1832_v8  ;;  %2504 = vmatmul.bf16.gmra.mxu1 %v1832_v8 }
 0x1f3   : > { %2523 = vmatmul.bf16.gmra.mxu2 %v1832_v8  ;;  %2542 = vmatmul.bf16.gmra.mxu3 %v1832_v8 }
 0x22f   : > { %v2011_v27 = vpop.f32.mrf.mxu0  ;;  %v2025_v47 = vpop.f32.mrf.mxu1 }
 0x230   : > { %v2012_v43 = vadd.f32 %v2011_v27, %v1834_v38  ;;  %v2026_v45 = vadd.f32 %v2025_v47, %v1835_v39 }
 0x232   : > { %v2548_v56 = vpack.c.bf16 %v2026_v45, %v2012_v43 }
 0x234   : > { %v2680_v7 = vrot.slane %v2548_v56, 4 }
 0x236   : > { %v12162_v22 = vpop.f32.mrf.mxu2  ;;  %v12164_v9 = vpop.f32.mrf.mxu3 }
 0x237   : > { %v12166_v11 = vpop.f32.mrf.mxu0  ;;  %v12168_v12 = vpop.f32.mrf.mxu1 }
 0x23e   : > { %v12171_v14 = vpop.f32.mrf.mxu2  ;;  %v12173_v15 = vpop.f32.mrf.mxu3 }
 0x23f   : > { %v2236_v18 = vpop.f32.mrf.mxu0  ;;  %v2255_v19 = vpop.f32.mrf.mxu1 }
 0x240   : > { %v2237_v20 = vadd.f32 %v2236_v18, %v2059_v16  ;;  %v2256_v21 = vadd.f32 %v2255_v19, %v2060_v17 }
 0x242   : > { %v2552_v23 = vpack.c.bf16 %v2256_v21, %v2237_v20 }
 0x244   : > { %v2682_v36 = vrot.slane %v2552_v23, 4  ;;  %v2570_v61 = vunpack.c.l.b16 %v2552_v23 }
 0x246   : > { %v2274_v25 = vpop.f32.mrf.mxu2  ;;  %v2293_v26 = vpop.f32.mrf.mxu3  ;;  %v2684_v32 = vunpack.c.l.b16 %v2682_v36 }
 0x247   : > { %v2238_v28 = vpop.f32.mrf.mxu0  ;;  %v2257_v30 = vpop.f32.mrf.mxu1  ;;  %v2275_v37 = vadd.f32 %v2274_v25, %v12175_v24  ;;  %v2294_v48 = vadd.f32 %v2293_v26, %v12177_v29  ;;  %v1669_v25 = vld [vmem:[%s11771_s3] sm:$0xf]  ;;  %v1836_v26 = vperm.slane %v12180_v31, 2 }
 0x248   : > { %v2239_v1 = vadd.f32 %v2238_v28, %v2059_v16  ;;  %v2258_v35 = vadd.f32 %v2257_v30, %v2060_v17  ;;  %v1837_v28 = vperm.slane %v12180_v31, 3  ;;  %v12195_v36 = vperm.slane %v1669_v25, 0 }
 0x249   : > { %v2553_v41 = vpack.c.bf16 %v2294_v48, %v2275_v37  ;;  %v12197_v37 = vperm.slane %v1669_v25, 1 }
 0x24a   : > { %v2554_v2 = vpack.c.bf16 %v2258_v35, %v2239_v1 }
 0x24b   : > { %v2908_v60 = vrot.slane %v2553_v41, 4  ;;  %v2797_v57 = vunpack.c.l.b16 %v2553_v41 }
 0x24c   : > { %v2571_v40 = vunpack.c.l.b16 %v2554_v2  ;;  %v2683_v52 = vrot.slane %v2554_v2, 4 }
 0x24d   : > { %v2910_v10 = vunpack.c.l.b16 %v2908_v60 }
 0x24e   : > { %v2685_v42 = vunpack.c.l.b16 %v2683_v52  ;;  %v2276_v46 = vpop.f32.mrf.mxu2  ;;  %v2295_v0 = vpop.f32.mrf.mxu3  ;;  %v2572_v49 = vpack.c.b16 %v2571_v40, %v2570_v61 }
 0x24f   : > { %v2277_v50 = vadd.f32 %v2276_v46, %v12175_v24  ;;  %v2296_v51 = vadd.f32 %v2295_v0, %v12177_v29  ;;  %v2241_v33 = vpop.f32.mrf.mxu0  ;;  %v2260_v53 = vpop.f32.mrf.mxu1 }
 0x250   : > { %2581 = vmatpush.bf16.xpose.msrb.mxu2 %v2572_v49  ;;  %v2686_v54 = vpack.c.b16 %v2685_v42, %v2684_v32  ;;  %v2242_v58 = vadd.f32 %v2241_v33, %v2059_v16  ;;  %v2261_v44 = vadd.f32 %v2260_v53, %v2060_v17  ;;  %v12211_v53 = vperm.slane %v1669_v25, 3 }
 0x251   : > { %v2555_v55 = vpack.c.bf16 %v2296_v51, %v2277_v50 }
 0x252   : > { %2695 = vmatpush.bf16.xpose.msrb.mxu0 %v2686_v54  ;;  %v2556_v4 = vpack.c.bf16 %v2261_v44, %v2242_v58 }
 0x253   : > { %v2798_v59 = vunpack.c.l.b16 %v2555_v55  ;;  %v2909_v62 = vrot.slane %v2555_v55, 4 }
 0x254   : > { %v2704_v19 = vrot.slane %v2556_v4, 4  ;;  %v2589_v30 = vunpack.c.l.b16 %v2556_v4 }
 0x255   : > { %v2911_v63 = vunpack.c.l.b16 %v2909_v62  ;;  %v2799_v3 = vpack.c.b16 %v2798_v59, %v2797_v57 }
 0x256   : > { %v2279_v5 = vpop.f32.mrf.mxu2  ;;  %v2298_v6 = vpop.f32.mrf.mxu3  ;;  %v2706_v48 = vunpack.c.l.b16 %v2704_v19 }
 0x257   : > { %v2243_v8 = vpop.f32.mrf.mxu0  ;;  %v2262_v27 = vpop.f32.mrf.mxu1  ;;  %2582 = vmatmul.bf16.vlgmr.msrb.gmra.mxu2 %v2548_v56  ;;  %v2912_v18 = vpack.c.b16 %v2911_v63, %v2910_v10  ;;  %v2280_v20 = vadd.f32 %v2279_v5, %v12175_v24  ;;  %v2299_v21 = vadd.f32 %v2298_v6, %v12177_v29 }
 0x258   : > { %v2244_v47 = vadd.f32 %v2243_v8, %v2059_v16  ;;  %v2263_v13 = vadd.f32 %v2262_v27, %v2060_v17  ;;  %v2014_v16 = vadd.f32 %v12166_v11, %v1834_v38  ;;  %v2028_v17 = vadd.f32 %v12168_v12, %v1835_v39 }
 0x259   : > { %2696 = vmatmul.bf16.vlgmr.msrb.gmra.mxu0 %v2680_v7  ;;  %v2557_v2 = vpack.c.bf16 %v2299_v21, %v2280_v20  ;;  %v2040_v12 = vadd.f32 %v12162_v22, %v1836_v26  ;;  %v2054_v38 = vadd.f32 %v12164_v9, %v1837_v28 }
 0x25a   : > { %2808 = vmatpush.bf16.xpose.msra.mxu0 %v2799_v3  ;;  %v2558_v23 = vpack.c.bf16 %v2263_v13, %v2244_v47  ;;  %v2550_v39 = vpack.c.bf16 %v2028_v17, %v2014_v16 }
 0x25b   : > { %v2930_v43 = vrot.slane %v2557_v2, 4  ;;  %v2816_v50 = vunpack.c.l.b16 %v2557_v2  ;;  %v2549_v44 = vpack.c.bf16 %v2054_v38, %v2040_v12 }
 0x25c   : > { %v2590_v1 = vunpack.c.l.b16 %v2558_v23  ;;  %v2705_v35 = vrot.slane %v2558_v23, 4  ;;  %v2702_v56 = vrot.slane %v2550_v39, 4 }
 0x25d   : > { %v2932_v55 = vunpack.c.l.b16 %v2930_v43 }
 0x25e   : > { %v2707_v61 = vunpack.c.l.b16 %v2705_v35  ;;  %v2281_v40 = vpop.f32.mrf.mxu2  ;;  %v2300_v52 = vpop.f32.mrf.mxu3  ;;  %v2591_v32 = vpack.c.b16 %v2590_v1, %v2589_v30 }
 0x25f   : > { %v2282_v41 = vadd.f32 %v2281_v40, %v12175_v24  ;;  %v2301_v42 = vadd.f32 %v2300_v52, %v12177_v29  ;;  %v2481_v46 = vpop.f32.mrf.mxu0  ;;  %v2500_v0 = vpop.f32.mrf.mxu1  ;;  %v12209_v29 = vperm.slane %v1669_v25, 2  ;;  %v2056_v40 = vadd.f32 %v12173_v15, %v1837_v28 }
 0x260   : > { %2600 = vmatpush.bf16.xpose.msrb.mxu3 %v2591_v32  ;;  %v2708_v11 = vpack.c.b16 %v2707_v61, %v2706_v48  ;;  %v2482_v45 = vadd.f32 %v2481_v46, %v12195_v36  ;;  %v2501_v24 = vadd.f32 %v2500_v0, %v12197_v37  ;;  %v2042_v48 = vadd.f32 %v12171_v14, %v1836_v26 }
 0x261   : > { %v2559_v49 = vpack.c.bf16 %v2301_v42, %v2282_v41 }
 0x262   : > { %2921 = vmatpush.bf16.xpose.msrb.mxu0 %v2912_v18  ;;  %2717 = vmatpush.bf16.xpose.msrb.mxu1 %v2708_v11  ;;  %v2560_v60 = vpack.c.bf16 %v2501_v24, %v2482_v45  ;;  %v2906_v11 = vrot.slane %v2549_v44, 4  ;;  %v2551_v38 = vpack.c.bf16 %v2056_v40, %v2042_v48 }
 0x263   : > { %v2817_v51 = vunpack.c.l.b16 %v2559_v49  ;;  %v2931_v33 = vrot.slane %v2559_v49, 4 }
 0x264   : > { %v2749_v6 = vrot.slane %v2560_v60, 4  ;;  %v2635_v8 = vunpack.c.l.b16 %v2560_v60 }
 0x265   : > { %v2933_v22 = vunpack.c.l.b16 %v2931_v33  ;;  %v2818_v54 = vpack.c.b16 %v2817_v51, %v2816_v50 }
 0x266   : > { %v2519_v9 = vpop.f32.mrf.mxu2  ;;  %v2538_v58 = vpop.f32.mrf.mxu3  ;;  %v2751_v13 = vunpack.c.l.b16 %v2749_v6  ;;  %v2928_v6 = vrot.slane %v2551_v38, 4 }
 0x267   : > { %v2520_v57 = vadd.f32 %v2519_v9, %v12209_v29  ;;  %v2539_v59 = vadd.f32 %v2538_v58, %v12211_v53  ;;  %v2483_v62 = vpop.f32.mrf.mxu0  ;;  %v2502_v63 = vpop.f32.mrf.mxu1  ;;  %2601 = vmatmul.bf16.vlgmr.msrb.gmra.mxu3 %v2550_v39  ;;  %v2934_v4 = vpack.c.b16 %v2933_v22, %v2932_v55 }
 0x268   : > { %v2484_v3 = vadd.f32 %v2483_v62, %v12195_v36  ;;  %v2503_v10 = vadd.f32 %v2502_v63, %v12197_v37 }
 0x269   : > { %v2561_v5 = vpack.c.bf16 %v2539_v59, %v2520_v57  ;;  %2718 = vmatmul.bf16.vlgmr.msrb.gmra.mxu1 %v2702_v56  ;;  %2809 = vmatmul.bf16.vlgmr.msra.gmra.mxu0 %v2549_v44 }
 0x26a   : > { %2827 = vmatpush.bf16.xpose.msra.mxu1 %v2818_v54  ;;  %v2562_v7 = vpack.c.bf16 %v2503_v10, %v2484_v3 }
 0x26b   : > { %v2975_v16 = vrot.slane %v2561_v5, 4  ;;  %v2861_v52 = vunpack.c.l.b16 %v2561_v5 }
 0x26c   : > { %v2636_v27 = vunpack.c.l.b16 %v2562_v7  ;;  %v2750_v47 = vrot.slane %v2562_v7, 4 }
 0x26d   : > { %v12227_v42 = vunpack.c.l.b16 %v2975_v16 }
 0x26e   : > { %v2752_v18 = vunpack.c.l.b16 %v2750_v47  ;;  %v2521_v19 = vpop.f32.mrf.mxu2  ;;  %v2540_v20 = vpop.f32.mrf.mxu3  ;;  %v2637_v21 = vpack.c.b16 %v2636_v27, %v2635_v8 }
 0x26f   : > { %v2522_v23 = vadd.f32 %v2521_v19, %v12209_v29  ;;  %v2541_v25 = vadd.f32 %v2540_v20, %v12211_v53  ;;  %v2486_v30 = vpop.f32.mrf.mxu0  ;;  %v2505_v1 = vpop.f32.mrf.mxu1 }
 0x270   : > { %2649 = vmatpush.bf16.msra.mxu2 %v2637_v21  ;;  %v2753_v35 = vpack.c.b16 %v2752_v18, %v2751_v13  ;;  %v2487_v2 = vadd.f32 %v2486_v30, %v12195_v36  ;;  %v2506_v61 = vadd.f32 %v2505_v1, %v12197_v37 }
 0x271   : > { %v2563_v17 = vpack.c.bf16 %v2541_v25, %v2522_v23 }
 0x272   : > { %2943 = vmatpush.bf16.xpose.msrb.mxu1 %v2934_v4  ;;  %v2564_v14 = vpack.c.bf16 %v2506_v61, %v2487_v2 }
 0x273   : > { %v2862_v32 = vunpack.c.l.b16 %v2563_v17  ;;  %v2976_v41 = vrot.slane %v2563_v17, 4 }
 0x274   : > { %2765 = vmatpush.bf16.msrb.mxu2 %v2753_v35  ;;  %v2771_v50 = vrot.slane %v2564_v14, 4  ;;  %v2657_v33 = vunpack.c.l.b16 %v2564_v14 }
 0x275   : > { %v12229_v46 = vunpack.c.l.b16 %v2976_v41  ;;  %v12231_v0 = vpack.c.b16 %v2862_v32, %v2861_v52 }
 0x276   : > { %v2524_v26 = vpop.f32.mrf.mxu2  ;;  %v2543_v12 = vpop.f32.mrf.mxu3  ;;  %v2773_v55 = vunpack.c.l.b16 %v2771_v50 }
 0x277   : > { %v2525_v39 = vadd.f32 %v2524_v26, %v12209_v29  ;;  %v2544_v31 = vadd.f32 %v2543_v12, %v12211_v53  ;;  %v2488_v49 = vpop.f32.mrf.mxu0  ;;  %v2507_v15 = vpop.f32.mrf.mxu1  ;;  %v2979_v28 = vpack.c.b16 %v12229_v46, %v12227_v42  ;;  %v10089_v42 = vld [vmem:[%s11773_s14 + $0x30] sm:$0xff] }
 0x278   : > { %v2489_v43 = vadd.f32 %v2488_v49, %v12195_v36  ;;  %v2508_v45 = vadd.f32 %v2507_v15, %v12197_v37 }
 0x279   : > { %v2565_v24 = vpack.c.bf16 %v2544_v31, %v2525_v39  ;;  %2828 = vmatmul.bf16.vlgmr.msra.gmra.mxu1 %v2551_v38  ;;  %2922 = vmatmul.bf16.vlgmr.msrb.gmra.mxu0 %v2906_v11 }
 0x27a   : > { %v2566_v51 = vpack.c.bf16 %v2508_v45, %v2489_v43 }
 0x27b   : > { %v2997_v37 = vrot.slane %v2565_v24, 4  ;;  %v2883_v62 = vunpack.c.l.b16 %v2565_v24 }
 0x27c   : > { %v2658_v22 = vunpack.c.l.b16 %v2566_v51  ;;  %v2772_v54 = vrot.slane %v2566_v51, 4 }
 0x27d   : > { %v12241_v10 = vunpack.c.l.b16 %v2997_v37 }
 0x27e   : > { %v2774_v60 = vunpack.c.l.b16 %v2772_v54  ;;  %v2526_v9 = vpop.f32.mrf.mxu2  ;;  %v2545_v58 = vpop.f32.mrf.mxu3  ;;  %v2659_v44 = vpack.c.b16 %v2658_v22, %v2657_v33 }
 0x27f   : > { %v2527_v56 = vadd.f32 %v2526_v9, %v12209_v29  ;;  %v2546_v57 = vadd.f32 %v2545_v58, %v12211_v53 }
 0x280   : > { %2671 = vmatpush.bf16.msra.mxu3 %v2659_v44  ;;  %v2775_v36 = vpack.c.b16 %v2774_v60, %v2773_v55 }
 0x281   : > { %v2567_v59 = vpack.c.bf16 %v2546_v57, %v2527_v56 }
 0x283   : > { %v2884_v63 = vunpack.c.l.b16 %v2567_v59  ;;  %v2998_v3 = vrot.slane %v2567_v59, 4 }
 0x284   : > { %2787 = vmatpush.bf16.msrb.mxu3 %v2775_v36 }
 0x285   : > { %v12243_v4 = vunpack.c.l.b16 %v2998_v3  ;;  %v12245_v5 = vpack.c.b16 %v2884_v63, %v2883_v62 }
 0x287   : > { %v3001_v29 = vpack.c.b16 %v12243_v4, %v12241_v10 }
 0x289   : > { %2944 = vmatmul.bf16.vlgmr.msrb.gmra.mxu1 %v2928_v6 }
 0x2d6   : > { %v2697_v53 = vpop.f32.mrf.mxu0 }
 0x2d7   : > { %v2723_v7 = vmul.f32 0.35355338, %v2697_v53 }
 0x2d9   : > { %v2725_v8 = vsel %vm2608_vm4, %v2723_v7, -inf }
 0x2da   : > { %v2583_v27 = vpop.f32.mrf.mxu2  ;;  %2726 = vmax.xlane.f32.xlu2 %v2725_v8 }
 0x2db   : > { %v2606_v47 = vmul.f32 0.35355338, %v2583_v27 }
 0x2dd   : > { %v2609_v13 = vsel %vm2608_vm4, %v2606_v47, -inf }
 0x2de   : > { %2610 = vmax.xlane.f32.xlu0 %v2609_v13  ;;  %v2699_v18 = vpop.f32.mrf.mxu0 }
 0x2e2   : > { %v2585_v19 = vpop.f32.mrf.mxu2 }
 0x2e6   : > { %v2719_v20 = vpop.f32.mrf.mxu1  ;;  %v2810_v21 = vpop.f32.mrf.mxu0 }
 0x2e7   : > { %v2724_v23 = vmul.f32 0.35355338, %v2719_v20  ;;  %v2833_v48 = vmul.f32 0.35355338, %v2810_v21 }
 0x2e9   : > { %v2728_v25 = vsel %vm2608_vm4, %v2724_v23, -inf  ;;  %v2835_v61 = vsel %vm2608_vm4, %v2833_v48, -inf }
 0x2ea   : > { %2729 = vmax.xlane.f32.xlu0 %v2728_v25  ;;  %v2602_v30 = vpop.f32.mrf.mxu3 }
 0x2eb   : > { %v2607_v1 = vmul.f32 0.35355338, %v2602_v30 }
 0x2ed   : > { %v2612_v35 = vsel %vm2608_vm4, %v2607_v1, -inf }
 0x2ee   : > { %v2721_v16 = vpop.f32.mrf.mxu1  ;;  %v2812_v17 = vpop.f32.mrf.mxu0  ;;  %2613 = vmax.xlane.f32.xlu1 %v2612_v35 }
 0x2f2   : > { %v2604_v2 = vpop.f32.mrf.mxu3 }
 0x2f6   : > { %v2829_v40 = vpop.f32.mrf.mxu1  ;;  %v2923_v52 = vpop.f32.mrf.mxu0  ;;  %2836 = vmax.xlane.f32.xlu1 %v2835_v61 }
 0x2f7   : > { %v2834_v32 = vmul.f32 0.35355338, %v2829_v40  ;;  %v2949_v41 = vmul.f32 0.35355338, %v2923_v52 }
 0x2f9   : > { %v2951_v11 = vsel %vm2608_vm4, %v2949_v41, -inf  ;;  %v2838_v14 = vsel %vm2608_vm4, %v2834_v32, -inf }
 0x2fa   : > { %2952 = vmax.xlane.f32.xlu0 %v2951_v11  ;;  %2839 = vmax.xlane.f32.xlu2 %v2838_v14 }
 0x2fe   : > { %v2831_v26 = vpop.f32.mrf.mxu1  ;;  %v2925_v12 = vpop.f32.mrf.mxu0 }
 0x306   : > { %v2945_v38 = vpop.f32.mrf.mxu1 }
 0x307   : > { %v2950_v39 = vmul.f32 0.35355338, %v2945_v38 }
 0x309   : > { %v2954_v31 = vsel %vm2608_vm4, %v2950_v39, -inf }
 0x30a   : > { %2955 = vmax.xlane.f32.xlu1 %v2954_v31 }
 0x30e   : > { %v2947_v49 = vpop.f32.mrf.mxu1 }
 0x34d   : > { %v2727_v15 = vpop.xlane.xlu2 %2726 }
 0x34e   : > { %v2731_v43 = vsub.f32 %v2723_v7, %v2727_v15 }
 0x350   : > { %v2733_v45 = vmul.f32 1.442695, %v2731_v43 }
 0x351   : > { %v2611_v24 = vpop.xlane.xlu0 %2610 }
 0x352   : > { %10615 = vpow2.f32 %v2733_v45  ;;  %v2615_v50 = vsub.f32 %v2606_v47, %v2611_v24 }
 0x354   : > { %v2617_v51 = vmul.f32 1.442695, %v2615_v50 }
 0x356   : > { %10617 = vpow2.f32 %v2617_v51 }
 0x358   : > { %v10616_v33 = vpop.eup %10615 }
 0x359   : > { %v2737_v22 = vsel %vm2608_vm4, %v10616_v33, 0.0 }
 0x35a   : > { %2738 = vadd.xlane.f32.xlu1 %v2737_v22 }
 0x35c   : > { %v10618_v54 = vpop.eup %10617 }
 0x35d   : > { %v2730_v55 = vpop.xlane.xlu0 %2729  ;;  %v2621_v60 = vsel %vm2608_vm4, %v10618_v54, 0.0 }
 0x35e   : > { %v2732_v9 = vsub.f32 %v2724_v23, %v2730_v55  ;;  %2622 = vadd.xlane.f32.xlu2 %v2621_v60 }
 0x360   : > { %v2735_v58 = vmul.f32 1.442695, %v2732_v9  ;;  %v10088_v9 = vld [vmem:[%s11773_s14 + $0x28] sm:$0xff] }
 0x361   : > { %v2614_v44 = vpop.xlane.xlu1 %2613 }
 0x362   : > { %10619 = vpow2.f32 %v2735_v58  ;;  %v2616_v56 = vsub.f32 %v2607_v1, %v2614_v44  ;;  %v10087_v58 = vld [vmem:[%s11773_s14 + $0x20] sm:$0xff]  ;;  %v10086_v44 = vld [vmem:[%s11773_s14 + $0x18] sm:$0xff] }
 0x364   : > { %v2619_v57 = vmul.f32 1.442695, %v2616_v56  ;;  %v10098_v56 = vld [vmem:[%s11773_s14 + $0x78] sm:$0xff] }
 0x365   : > { %3254 = vmatpush.bf16.msra.mxu1 %v10098_v56 }
 0x366   : > { %10621 = vpow2.f32 %v2619_v57  ;;  %v10085_v57 = vld [vmem:[%s11773_s14 + $0x10] sm:$0xff] }
 0x368   : > { %v10620_v36 = vpop.eup %10619 }
 0x369   : > { %v2837_v37 = vpop.xlane.xlu1 %2836  ;;  %v2740_v59 = vsel %vm2608_vm4, %v10620_v36, 0.0 }
 0x36a   : > { %v2841_v62 = vsub.f32 %v2833_v48, %v2837_v37  ;;  %2741 = vadd.xlane.f32.xlu2 %v2740_v59  ;;  %v10084_v37 = vld [vmem:[%s11773_s14 + $0x8] sm:$0xff] }
 0x36b   : > { %v10096_v59 = vld [vmem:[%s11773_s14 + $0x68] sm:$0xff] }
 0x36c   : > { %v10622_v63 = vpop.eup %10621  ;;  %v2843_v3 = vmul.f32 1.442695, %v2841_v62  ;;  %v10083_v62 = vld [vmem:[%s11773_s14] sm:$0xff] }
 0x36d   : > { %v2953_v6 = vpop.xlane.xlu0 %2952  ;;  %v2840_v53 = vpop.xlane.xlu2 %2839  ;;  %v2624_v7 = vsel %vm2608_vm4, %v10622_v63, 0.0 }
 0x36e   : > { %10623 = vpow2.f32 %v2843_v3  ;;  %v2957_v8 = vsub.f32 %v2949_v41, %v2953_v6  ;;  %v2842_v27 = vsub.f32 %v2834_v32, %v2840_v53  ;;  %2625 = vadd.xlane.f32.xlu0 %v2624_v7  ;;  %v10094_v3 = vld [vmem:[%s11773_s14 + $0x58] sm:$0xff]  ;;  %v10093_v53 = vld [vmem:[%s11773_s14 + $0x50] sm:$0xff] }
 0x36f   : > { %v10106_v6 = vld [vmem:[%s11773_s14 + $0xb8] sm:$0xff]  ;;  %v10105_v7 = vld [vmem:[%s11773_s14 + $0xb0] sm:$0xff] }
 0x370   : > { %v2959_v47 = vmul.f32 1.442695, %v2957_v8  ;;  %v2845_v13 = vmul.f32 1.442695, %v2842_v27  ;;  %v10092_v8 = vld [vmem:[%s11773_s14 + $0x48] sm:$0xff] }
 0x371   : > { %v10104_v27 = vld [vmem:[%s11773_s14 + $0xa8] sm:$0xff] }
 0x372   : > { %10625 = vpow2.f32 %v2959_v47 }
 0x373   : > { %10627 = vpow2.f32 %v2845_v13  ;;  %v10091_v13 = vld [vmem:[%s11773_s14 + $0x40] sm:$0xff] }
 0x374   : > { %v10624_v18 = vpop.eup %10623 }
 0x375   : > { %v2847_v19 = vsel %vm2608_vm4, %v10624_v18, 0.0 }
 0x376   : > { %2848 = vadd.xlane.f32.xlu0 %v2847_v19  ;;  %v10102_v19 = vld [vmem:[%s11773_s14 + $0x98] sm:$0xff] }
 0x378   : > { %v10626_v20 = vpop.eup %10625 }
 0x379   : > { %v10628_v21 = vpop.eup %10627  ;;  %v2963_v23 = vsel %vm2608_vm4, %v10626_v20, 0.0 }
 0x37a   : > { %2964 = vadd.xlane.f32.xlu2 %v2963_v23  ;;  %v2850_v25 = vsel %vm2608_vm4, %v10628_v21, 0.0  ;;  %v10101_v23 = vld [vmem:[%s11773_s14 + $0x90] sm:$0xff] }
 0x37b   : > { %2851 = vadd.xlane.f32.xlu1 %v2850_v25  ;;  %v10113_v25 = vld [vmem:[%s11773_s14 + $0xf0] sm:$0xff] }
 0x37d   : > { %v2956_v30 = vpop.xlane.xlu1 %2955 }
 0x37e   : > { %v2958_v1 = vsub.f32 %v2950_v39, %v2956_v30 }
 0x380   : > { %v2961_v35 = vmul.f32 1.442695, %v2958_v1  ;;  %v10100_v1 = vld [vmem:[%s11773_s14 + $0x88] sm:$0xff] }
 0x382   : > { %10629 = vpow2.f32 %v2961_v35  ;;  %v10112_v35 = vld [vmem:[%s11773_s14 + $0xe8] sm:$0xff] }
 0x388   : > { %v10630_v16 = vpop.eup %10629 }
 0x389   : > { %v2966_v17 = vsel %vm2608_vm4, %v10630_v16, 0.0 }
 0x38a   : > { %2967 = vadd.xlane.f32.xlu0 %v2966_v17 }
 0x3cd   : > { %v2739_v40 = vpop.xlane.xlu1 %2738 }
 0x3d1   : > { %v2623_v48 = vpop.xlane.xlu2 %2622 }
 0x3d2   : > { %10631 = vrcp.f32 %v2623_v48 }
 0x3d3   : > { %10633 = vrcp.f32 %v2739_v40  ;;  %v10099_v40 = vld [vmem:[%s11773_s14 + $0x80] sm:$0xff] }
 0x3d8   : > { %v10632_v2 = vpop.eup %10631 }
 0x3d9   : > { %v2629_v61 = vmul.f32 %v10632_v2, %v10618_v54  ;;  %v10634_v41 = vpop.eup %10633 }
 0x3da   : > { %v2745_v11 = vmul.f32 %v10634_v41, %v10616_v33  ;;  %v10090_v33 = vld [vmem:[%s11773_s14 + $0x38] sm:$0xff] }
 0x3db   : > { %v2631_v52 = vpack.c.bf16 %v2629_v61, %v2629_v61  ;;  %3240 = vmatpush.bf16.msra.mxu0 %v10090_v33  ;;  %v10110_v41 = vld [vmem:[%s11773_s14 + $0xd8] sm:$0xff] }
 0x3dc   : > { %v2747_v38 = vpack.c.bf16 %v2745_v11, %v2745_v11 }
 0x3dd   : > { %8210 = vmatmul.msk.bf16.vlgmr.msra.gmra.mxu2 %vm2608_vm4, %v2631_v52  ;;  %v2742_v12 = vpop.xlane.xlu2 %2741  ;;  %v10111_v52 = vld [vmem:[%s11773_s14 + $0xe0] sm:$0xff] }
 0x3de   : > { %2875 = vmatpush.bf16.msra.mxu2 %v12231_v0 }
 0x3df   : > { %3241 = vmatpush.bf16.msra.mxu0 %v10089_v42 }
 0x3e1   : > { %v2626_v32 = vpop.xlane.xlu0 %2625 }
 0x3e2   : > { %10635 = vrcp.f32 %v2626_v32 }
 0x3e3   : > { %10637 = vrcp.f32 %v2742_v12  ;;  %3242 = vmatpush.bf16.msra.mxu0 %v10088_v9 }
 0x3e7   : > { %3243 = vmatpush.bf16.msra.mxu0 %v10087_v58 }
 0x3e8   : > { %v10636_v14 = vpop.eup %10635 }
 0x3e9   : > { %v2630_v26 = vmul.f32 %v10636_v14, %v10622_v63  ;;  %v2849_v31 = vpop.xlane.xlu0 %2848  ;;  %v10638_v0 = vpop.eup %10637  ;;  %v10095_v63 = vld [vmem:[%s11773_s14 + $0x60] sm:$0xff] }
 0x3ea   : > { %10639 = vrcp.f32 %v2849_v31  ;;  %v2746_v15 = vmul.f32 %v10638_v0, %v10620_v36  ;;  %v10097_v36 = vld [vmem:[%s11773_s14 + $0x70] sm:$0xff] }
 0x3eb   : > { %v2632_v39 = vpack.c.bf16 %v2630_v26, %v2630_v26  ;;  %3244 = vmatpush.bf16.msra.mxu0 %v10086_v44  ;;  %3255 = vmatpush.bf16.msra.mxu1 %v10097_v36  ;;  %v10109_v26 = vld [vmem:[%s11773_s14 + $0xd0] sm:$0xff] }
 0x3ec   : > { %v2748_v24 = vpack.c.bf16 %v2746_v15, %v2746_v15 }
 0x3ed   : > { %8211 = vmatmul.msk.bf16.vlgmr.msra.gmra.mxu3 %vm2608_vm4, %v2632_v39  ;;  %8212 = vmatmul.msk.bf16.vlgmr.msrb.gmra.mxu2 %vm2608_vm4, %v2747_v38  ;;  %v2965_v45 = vpop.xlane.xlu2 %2964  ;;  %v10108_v38 = vld [vmem:[%s11773_s14 + $0xc8] sm:$0xff] }
 0x3ee   : > { %2897 = vmatpush.bf16.msra.mxu3 %v12245_v5  ;;  %2991 = vmatpush.bf16.msrb.mxu2 %v2979_v28  ;;  %v2852_v51 = vpop.xlane.xlu1 %2851  ;;  %10641 = vrcp.f32 %v2965_v45 }
 0x3ef   : > { %10643 = vrcp.f32 %v2852_v51  ;;  %3245 = vmatpush.bf16.msra.mxu0 %v10085_v57  ;;  %3256 = vmatpush.bf16.msra.mxu1 %v10096_v59  ;;  %v10584_v57 = vld [vmem:[%s11744_s2] ss:$0 sm:$0xff] }
 0x3f0   : > { %v10640_v49 = vpop.eup %10639 }
 0x3f1   : > { %v2855_v43 = vmul.f32 %v10640_v49, %v10624_v18  ;;  %v10103_v18 = vld [vmem:[%s11773_s14 + $0xa0] sm:$0xff] }
 0x3f3   : > { %v2857_v50 = vpack.c.bf16 %v2855_v43, %v2855_v43  ;;  %3246 = vmatpush.bf16.msra.mxu0 %v10084_v37  ;;  %3257 = vmatpush.bf16.msra.mxu1 %v10095_v63  ;;  %v10107_v43 = vld [vmem:[%s11773_s14 + $0xc0] sm:$0xff] }
 0x3f4   : > { %v10642_v46 = vpop.eup %10641 }
 0x3f5   : > { %v10644_v28 = vpop.eup %10643  ;;  %v2971_v5 = vmul.f32 %v10642_v46, %v10626_v20  ;;  %v10114_v20 = vld [vmem:[%s11773_s14 + $0xf8] sm:$0xff] }
 0x3f6   : > { %v2856_v22 = vmul.f32 %v10644_v28, %v10628_v21 }
 0x3f7   : > { %v2973_v54 = vpack.c.bf16 %v2971_v5, %v2971_v5  ;;  %3247 = vmatpush.bf16.msra.mxu0 %v10083_v62  ;;  %3258 = vmatpush.bf16.msra.mxu1 %v10094_v3 }
 0x3f8   : > { %v2858_v55 = vpack.c.bf16 %v2856_v22, %v2856_v22 }
 0x3fb   : > { %3259 = vmatpush.bf16.msra.mxu1 %v10093_v53 }
 0x3fd   : > { %8213 = vmatmul.msk.bf16.vlgmr.msrb.gmra.mxu3 %vm2608_vm4, %v2748_v24  ;;  %8214 = vmatmul.msk.bf16.vlgmr.msra.gmra.mxu2 %vm2608_vm4, %v2857_v50  ;;  %v2968_v60 = vpop.xlane.xlu0 %2967 }
 0x3fe   : > { %3013 = vmatpush.bf16.msrb.mxu3 %v3001_v29  ;;  %10645 = vrcp.f32 %v2968_v60  ;;  %3268 = vmatpush.bf16.msra.mxu2 %v10106_v6 }
 0x3ff   : > { %3260 = vmatpush.bf16.msra.mxu1 %v10092_v8 }
 0x402   : > { %3269 = vmatpush.bf16.msra.mxu2 %v10105_v7 }
 0x403   : > { %3261 = vmatpush.bf16.msra.mxu1 %v10091_v13 }
 0x404   : > { %v10646_v10 = vpop.eup %10645 }
 0x405   : > { %v2972_v4 = vmul.f32 %v10646_v10, %v10630_v16 }
 0x406   : > { %3270 = vmatpush.bf16.msra.mxu2 %v10104_v27  ;;  %v10755_v27 = vld [vmem:[#allocation2] sm:$0xff] }
 0x407   : > { %v2974_v29 = vpack.c.bf16 %v2972_v4, %v2972_v4 }
 0x40a   : > { %3271 = vmatpush.bf16.msra.mxu2 %v10103_v18 }
 0x40d   : > { %8215 = vmatmul.msk.bf16.vlgmr.msra.gmra.mxu3 %vm2608_vm4, %v2858_v55  ;;  %8216 = vmatmul.msk.bf16.vlgmr.msrb.gmra.mxu2 %vm2608_vm4, %v2973_v54 }
 0x40e   : > { %3272 = vmatpush.bf16.msra.mxu2 %v10102_v19  ;;  %3282 = vmatpush.bf16.msra.mxu3 %v10114_v20 }
 0x412   : > { %3273 = vmatpush.bf16.msra.mxu2 %v10101_v23  ;;  %3283 = vmatpush.bf16.msra.mxu3 %v10113_v25  ;;  %v10756_v23 = vld [vmem:[#allocation2 + $0x8] sm:$0xff] }
 0x416   : > { %3274 = vmatpush.bf16.msra.mxu2 %v10100_v1  ;;  %3284 = vmatpush.bf16.msra.mxu3 %v10112_v35 }
 0x41a   : > { %3275 = vmatpush.bf16.msra.mxu2 %v10099_v40  ;;  %3285 = vmatpush.bf16.msra.mxu3 %v10111_v52 }
 0x41d   : > { %8217 = vmatmul.msk.bf16.vlgmr.msrb.gmra.mxu3 %vm2608_vm4, %v2974_v29 }
 0x41e   : > { %3286 = vmatpush.bf16.msra.mxu3 %v10110_v41  ;;  %v10121_v41 = vld [vmem:[%s11778_s6 + $0x30] sm:$0xff] }
 0x422   : > { %3287 = vmatpush.bf16.msra.mxu3 %v10109_v26  ;;  %v10118_v26 = vld [vmem:[%s11778_s6 + $0x18] sm:$0xff] }
 0x426   : > { %3288 = vmatpush.bf16.msra.mxu3 %v10108_v38  ;;  %v10116_v38 = vld [vmem:[%s11778_s6 + $0x8] sm:$0xff] }
 0x42a   : > { %3289 = vmatpush.bf16.msra.mxu3 %v10107_v43 }
 0x460   : > { %v2651_v47 = vpop.f32.mrf.mxu2 }
 0x461   : > { %v2677_v30 = vpack.c.bf16 %v2651_v47, %v2651_v47 }
 0x463   : > { %v3029_v2 = vunpack.c.l.b16 %v2677_v30 }
 0x468   : > { %v2653_v21 = vpop.f32.mrf.mxu2 }
 0x470   : > { %v2673_v16 = vpop.f32.mrf.mxu3  ;;  %v2767_v17 = vpop.f32.mrf.mxu2 }
 0x471   : > { %v2678_v48 = vpack.c.bf16 %v2673_v16, %v2673_v16  ;;  %v2793_v12 = vpack.c.bf16 %v2767_v17, %v2767_v17 }
 0x473   : > { %v3033_v61 = vunpack.c.l.b16 %v2678_v48  ;;  %v3030_v49 = vunpack.c.l.b16 %v2793_v12  ;;  %v10117_v12 = vld [vmem:[%s11778_s6 + $0x10] sm:$0xff] }
 0x475   : > { %v3040_v32 = vpack.c.b16 %v3033_v61, %v3029_v2 }
 0x477   : > { %3248 = vmatmul.bf16.vlgmr.msra.gmra.mxu0 %v3040_v32  ;;  %v10122_v32 = vld [vmem:[%s11778_s6 + $0x38] sm:$0xff] }
 0x478   : > { %v2675_v11 = vpop.f32.mrf.mxu3  ;;  %v2769_v14 = vpop.f32.mrf.mxu2  ;;  %3404 = vmatpush.bf16.msrb.mxu0 %v10122_v32 }
 0x479   : > { %v10120_v11 = vld [vmem:[%s11778_s6 + $0x28] sm:$0xff]  ;;  %v10119_v14 = vld [vmem:[%s11778_s6 + $0x20] sm:$0xff] }
 0x47c   : > { %3405 = vmatpush.bf16.msrb.mxu0 %v10121_v41  ;;  %v10125_v41 = vld [vmem:[%s11783_s29 + $0x10] sm:$0xff] }
 0x480   : > { %v2789_v39 = vpop.f32.mrf.mxu3  ;;  %v2877_v31 = vpop.f32.mrf.mxu2  ;;  %3406 = vmatpush.bf16.msrb.mxu0 %v10120_v11 }
 0x481   : > { %v2794_v0 = vpack.c.bf16 %v2789_v39, %v2789_v39  ;;  %v2903_v51 = vpack.c.bf16 %v2877_v31, %v2877_v31 }
 0x483   : > { %v3034_v15 = vunpack.c.l.b16 %v2794_v0  ;;  %v3031_v28 = vunpack.c.l.b16 %v2903_v51  ;;  %v10115_v0 = vld [vmem:[%s11778_s6] sm:$0xff] }
 0x484   : > { %3407 = vmatpush.bf16.msrb.mxu0 %v10119_v14 }
 0x485   : > { %v3041_v45 = vpack.c.b16 %v3034_v15, %v3030_v49 }
 0x487   : > { %3262 = vmatmul.bf16.vlgmr.msra.gmra.mxu1 %v3041_v45 }
 0x488   : > { %v2791_v24 = vpop.f32.mrf.mxu3  ;;  %v2879_v50 = vpop.f32.mrf.mxu2  ;;  %3408 = vmatpush.bf16.msrb.mxu0 %v10118_v26 }
 0x48c   : > { %3409 = vmatpush.bf16.msrb.mxu0 %v10117_v12 }
 0x490   : > { %v2899_v33 = vpop.f32.mrf.mxu3  ;;  %v2993_v42 = vpop.f32.mrf.mxu2  ;;  %3410 = vmatpush.bf16.msrb.mxu0 %v10116_v38 }
 0x491   : > { %v2904_v46 = vpack.c.bf16 %v2899_v33, %v2899_v33  ;;  %v3019_v60 = vpack.c.bf16 %v2993_v42, %v2993_v42 }
 0x493   : > { %v3035_v5 = vunpack.c.l.b16 %v2904_v46  ;;  %v3032_v29 = vunpack.c.l.b16 %v3019_v60 }
 0x494   : > { %3411 = vmatpush.bf16.msrb.mxu0 %v10115_v0  ;;  %v10124_v0 = vld [vmem:[%s11783_s29 + $0x8] sm:$0xff] }
 0x495   : > { %v3042_v22 = vpack.c.b16 %v3035_v5, %v3031_v28 }
 0x497   : > { %3276 = vmatmul.bf16.vlgmr.msra.gmra.mxu2 %v3042_v22 }
 0x498   : > { %v2901_v54 = vpop.f32.mrf.mxu3  ;;  %v2995_v55 = vpop.f32.mrf.mxu2 }
 0x4a0   : > { %v3015_v10 = vpop.f32.mrf.mxu3 }
 0x4a1   : > { %v3020_v4 = vpack.c.bf16 %v3015_v10, %v3015_v10 }
 0x4a3   : > { %v3036_v9 = vunpack.c.l.b16 %v3020_v4  ;;  %v10585_v4 = vld [vmem:[%s11749_s25] ss:$0 sm:$0xff] }
 0x4a5   : > { %v3043_v58 = vpack.c.b16 %v3036_v9, %v3032_v29 }
 0x4a7   : > { %3290 = vmatmul.bf16.vlgmr.msra.gmra.mxu3 %v3043_v58 }
 0x4a8   : > { %v3017_v44 = vpop.f32.mrf.mxu3 }
 0x4f4   : > { %v3249_v56 = vpop.f32.mrf.mxu0 }
 0x4f5   : > { %v3250_v59 = vadd.f32 %v10584_v57, %v3249_v56  ;;  %v10586_v56 = vld [vmem:[%s11776_s4] ss:$0 sm:$0xff] }
 0x4fc   : > { %v3251_v3 = vpop.f32.mrf.mxu0 }
 0x4fd   : > { %v3252_v8 = vadd.f32 %v10584_v57, %v3251_v3 }
 0x504   : > { %v3263_v36 = vpop.f32.mrf.mxu1 }
 0x505   : > { %v3264_v62 = vadd.f32 %v3263_v36, %v3250_v59 }
 0x50c   : > { %v3265_v7 = vpop.f32.mrf.mxu1 }
 0x50d   : > { %v3266_v18 = vadd.f32 %v3265_v7, %v3252_v8 }
 0x51a   : > { %v3277_v37 = vpop.f32.mrf.mxu2 }
 0x51b   : > { %v3278_v63 = vadd.f32 %v3277_v37, %v3264_v62  ;;  %v10587_v62 = vld [vmem:[%s11781_s24] ss:$0 sm:$0xff] }
 0x522   : > { %v3279_v13 = vpop.f32.mrf.mxu2 }
 0x523   : > { %v3280_v19 = vadd.f32 %v3279_v13, %v3266_v18  ;;  %v10129_v13 = vld [vmem:[%s11783_s29 + $0x30] sm:$0xff] }
 0x52a   : > { %v3291_v6 = vpop.f32.mrf.mxu3 }
 0x52b   : > { %v3292_v53 = vadd.f32 %v3291_v6, %v3278_v63 }
 0x52d   : > { %v12314_v47 = vadd.f32 %v10755_v27, %v3292_v53  ;;  %v10130_v53 = vld [vmem:[%s11783_s29 + $0x38] sm:$0xff] }
 0x52e   : > { %3550 = vmatpush.bf16.msrb.mxu1 %v10130_v53 }
 0x52f   : > { %3300 = vadd.xlane.f32.xlu1 %v12314_v47 }
 0x532   : > { %v3293_v20 = vpop.f32.mrf.mxu3  ;;  %3551 = vmatpush.bf16.msrb.mxu1 %v10129_v13 }
 0x533   : > { %v3294_v21 = vadd.f32 %v3293_v20, %v3280_v19 }
 0x535   : > { %v12317_v25 = vadd.f32 %v10756_v23, %v3294_v21  ;;  %v10128_v21 = vld [vmem:[%s11783_s29 + $0x28] sm:$0xff] }
 0x536   : > { %3552 = vmatpush.bf16.msrb.mxu1 %v10128_v21 }
 0x537   : > { %3302 = vadd.xlane.f32.xlu2 %v12317_v25 }
 0x5a2   : > { %v3301_v30 = vpop.xlane.xlu1 %3300 }
 0x5a3   : > { %v3304_v1 = vmul.f32 0.03125, %v3301_v30 }
 0x5a5   : > { %v3306_v35 = vsub.f32 %v12314_v47, %v3304_v1  ;;  %v10127_v1 = vld [vmem:[%s11783_s29 + $0x20] sm:$0xff] }
 0x5a6   : > { %3553 = vmatpush.bf16.msrb.mxu1 %v10127_v1 }
 0x5a7   : > { %v3308_v16 = vsel %vm1683_vm0, %v3306_v35, 0.0 }
 0x5a8   : > { %v3310_v17 = vmul.f32 %v3308_v16, %v3308_v16 }
 0x5aa   : > { %v3303_v48 = vpop.xlane.xlu2 %3302  ;;  %3312 = vadd.xlane.f32.xlu0 %v3310_v17 }
 0x5ab   : > { %v3305_v2 = vmul.f32 0.03125, %v3303_v48 }
 0x5ad   : > { %v3307_v61 = vsub.f32 %v12317_v25, %v3305_v2  ;;  %v10126_v2 = vld [vmem:[%s11783_s29 + $0x18] sm:$0xff] }
 0x5ae   : > { %3554 = vmatpush.bf16.msrb.mxu1 %v10126_v2 }
 0x5af   : > { %v3309_v40 = vsel %vm1683_vm0, %v3307_v61, 0.0 }
 0x5b0   : > { %v3311_v52 = vmul.f32 %v3309_v40, %v3309_v40 }
 0x5b2   : > { %3314 = vadd.xlane.f32.xlu1 %v3311_v52  ;;  %3555 = vmatpush.bf16.msrb.mxu1 %v10125_v41 }
 0x5b6   : > { %3556 = vmatpush.bf16.msrb.mxu1 %v10124_v0  ;;  %v10162_v0 = vld [vmem:[%s11761_s28 + $0x1f4] sm:$0xf0] }
 0x61d   : > { %v3313_v39 = vpop.xlane.xlu0 %3312 }
 0x61e   : > { %v3316_v31 = vmul.f32 0.03125, %v3313_v39 }
 0x620   : > { %v3318_v49 = vadd.f32 1e-05, %v3316_v31 }
 0x622   : > { %10647 = vrsqrt.f32 %v3318_v49  ;;  %vm3326_vm6 = vweird.f32 %v3318_v49 }
 0x625   : > { %v3315_v15 = vpop.xlane.xlu1 %3314 }
 0x626   : > { %v3317_v43 = vmul.f32 0.03125, %v3315_v15 }
 0x628   : > { %v10648_v45 = vpop.eup %10647  ;;  %v3319_v24 = vadd.f32 1e-05, %v3317_v43 }
 0x629   : > { %v3321_v50 = vmul.f32 %v10648_v45, %v3318_v49  ;;  %vm3327_vm5 = vweird.f32 %v10648_v45 }
 0x62a   : > { %10649 = vrsqrt.f32 %v3319_v24  ;;  %vm3328_vm7 = vmor %vm3326_vm6, %vm3327_vm5  ;;  %vm3336_vm9 = vweird.f32 %v3319_v24 }
 0x62b   : > { %v3322_v51 = vmul.f32 %v10648_v45, %v3321_v50 }
 0x62d   : > { %v3323_v33 = vmul.f32 0.5, %v3322_v51 }
 0x62f   : > { %v3324_v42 = vsub.f32 1.5, %v3323_v33  ;;  %v10123_v33 = vld [vmem:[%s11783_s29] sm:$0xff] }
 0x630   : > { %v10650_v46 = vpop.eup %10649  ;;  %3557 = vmatpush.bf16.msrb.mxu1 %v10123_v33  ;;  %v8710_v33 = vld [vmem:[%s11761_s28 + $0x1d0] sm:$0xf0] }
 0x631   : > { %v3325_v28 = vmul.f32 %v10648_v45, %v3324_v42  ;;  %v3331_v5 = vmul.f32 %v10650_v46, %v3319_v24  ;;  %vm3337_vm8 = vweird.f32 %v10650_v46 }
 0x632   : > { %vm3338_vm10 = vmor %vm3336_vm9, %vm3337_vm8 }
 0x633   : > { %v3332_v22 = vmul.f32 %v10650_v46, %v3331_v5  ;;  %v3329_v54 = vsel %vm3328_vm7, %v10648_v45, %v3325_v28 }
 0x634   : > { %v3340_v10 = vmul.f32 %v3329_v54, %v3308_v16 }
 0x635   : > { %v3333_v55 = vmul.f32 0.5, %v3332_v22 }
 0x636   : > { %v3345_v44 = vmul.f32 %v10585_v4, %v3340_v10 }
 0x637   : > { %v3334_v60 = vsub.f32 1.5, %v3333_v55 }
 0x638   : > { %v3350_v36 = vadd.f32 %v10586_v56, %v3345_v44 }
 0x639   : > { %v3335_v29 = vmul.f32 %v10650_v46, %v3334_v60 }
 0x63b   : > { %v3339_v9 = vsel %vm3338_vm10, %v10650_v46, %v3335_v29 }
 0x63c   : > { %v3341_v58 = vmul.f32 %v3339_v9, %v3309_v40 }
 0x63e   : > { %v3346_v57 = vmul.f32 %v10585_v4, %v3341_v58 }
 0x640   : > { %v3351_v37 = vadd.f32 %v10586_v56, %v3346_v57 }
 0x642   : > { %v3352_v59 = vpack.c.bf16 %v3351_v37, %v3350_v36 }
 0x644   : > { %3412 = vmatmul.bf16.vlgmr.msrb.gmra.mxu0 %v3352_v59 }
 0x6c1   : > { %v3413_v63 = vpop.f32.mrf.mxu0 }
 0x6c2   : > { %v12337_v3 = vadd.f32 %v10587_v62, %v3413_v63 }
 0x6c4   : > { %v12340_v6 = vmul.f32 0.70710677, %v12337_v3 }
 0x6c6   : > { %v3422_v7 = vand.u32 2147483647, %v12340_v6  ;;  %vm3488_vm4 = vcmp.ge.f32.partialorder %v12340_v6, 0.0  ;;  %v10588_v6 = vld [vmem:[%s11754_s21] ss:$0 sm:$0xff] }
 0x6c8   : > { %v3424_v8 = vmul.f32 0.3275911, %v3422_v7  ;;  %v3476_v38 = vsub.f32 0.0, %v3422_v7 }
 0x6c9   : > { %v3415_v27 = vpop.f32.mrf.mxu0 }
 0x6ca   : > { %v3426_v18 = vadd.f32 1.0, %v3424_v8  ;;  %v12345_v19 = vadd.f32 %v10587_v62, %v3415_v27  ;;  %v3478_v45 = vmul.f32 %v3476_v38, %v3422_v7  ;;  %v10159_v38 = vld [vmem:[%s11761_s28 + $0x1e4] sm:$0xf] }
 0x6cc   : > { %10651 = vrcp.f32 %v3426_v18  ;;  %v12348_v20 = vmul.f32 0.70710677, %v12345_v19  ;;  %v3439_v61 = vand.u32 2147483648, %v3426_v18  ;;  %v3437_v52 = vand.u32 2147483647, %v3426_v18 }
 0x6cd   : > { %vm3433_vm12 = vweird.f32 %v3426_v18  ;;  %v3480_v5 = vmul.f32 1.442695, %v3478_v45  ;;  %v3419_v2 = vmul.f32 0.5, %v12345_v19  ;;  %v8708_v45 = vld [vmem:[%s11761_s28 + $0x1c0] sm:$0xf] }
 0x6ce   : > { %v3423_v23 = vand.u32 2147483647, %v12348_v20  ;;  %v3440_v11 = vor.u32 1.1754944e-38, %v3439_v61  ;;  %vm3438_vm14 = vcmp.eq.f32.partialorder %v3437_v52, 8.507059e+37  ;;  %vm3489_vm5 = vcmp.ge.f32.partialorder %v12348_v20, 0.0 }
 0x6d0   : > { %v3425_v30 = vmul.f32 0.3275911, %v3423_v23  ;;  %v3477_v60 = vsub.f32 0.0, %v3423_v23 }
 0x6d2   : > { %v10652_v35 = vpop.eup %10651  ;;  %v3427_v17 = vadd.f32 1.0, %v3425_v30  ;;  %v3479_v58 = vmul.f32 %v3477_v60, %v3423_v23  ;;  %v8692_v60 = vld [vmem:[%s11761_s28 + $0x1a0] sm:$0xf] }
 0x6d3   : > { %v3429_v16 = vmul.f32 %v10652_v35, %v3426_v18  ;;  %vm3434_vm11 = vweird.f32 %v10652_v35 }
 0x6d4   : > { %10653 = vrcp.f32 %v3427_v17  ;;  %vm3435_vm13 = vmor %vm3433_vm12, %vm3434_vm11  ;;  %v3454_v43 = vand.u32 2147483648, %v3427_v17  ;;  %v3452_v50 = vand.u32 2147483647, %v3427_v17  ;;  %vm3448_vm1 = vweird.f32 %v3427_v17 }
 0x6d5   : > { %v3430_v48 = vsub.f32 1.0, %v3429_v16  ;;  %10655 = vpow2.f32 %v3480_v5  ;;  %v3482_v37 = vmul.f32 1.442695, %v3479_v58  ;;  %v10158_v5 = vld [vmem:[%s11761_s28 + $0x1d4] sm:$0xf0]  ;;  %vm4580_vm12 = vcmask 1043456  }
 0x6d6   : > { %v3455_v28 = vor.u32 1.1754944e-38, %v3454_v43  ;;  %vm3453_vm3 = vcmp.eq.f32.partialorder %v3452_v50, 8.507059e+37  ;;  %v10160_v43 = vld [vmem:[%s11761_s28 + $0x1ec] sm:$0xf]  ;;  %v10157_v50 = vld [vmem:[%s11761_s28 + $0x1cc] sm:$0xf0] }
 0x6d7   : > { %v3431_v40 = vmul.f32 %v10652_v35, %v3430_v48  ;;  %10657 = vpow2.f32 %v3482_v37  ;;  %v3418_v48 = vmul.f32 0.5, %v12337_v3  ;;  %v8700_v58 = vld [vmem:[%s11761_s28 + $0x1a8] sm:$0xf] }
 0x6d9   : > { %v3432_v32 = vadd.f32 %v10652_v35, %v3431_v40 }
 0x6da   : > { %v10654_v14 = vpop.eup %10653 }
 0x6db   : > { %v3436_v26 = vsel %vm3435_vm13, %v10652_v35, %v3432_v32  ;;  %v3444_v39 = vmul.f32 %v10654_v14, %v3427_v17  ;;  %vm3449_vm15 = vweird.f32 %v10654_v14  ;;  %v10656_v59 = vpop.eup %10655  ;;  %vm4552_vm13 = vcmask 64512  }
 0x6dc   : > { %v3441_v12 = vsel %vm3438_vm14, %v3440_v11, %v3436_v26  ;;  %vm3450_vm2 = vmor %vm3448_vm1, %vm3449_vm15  ;;  %v8724_v26 = vld [vmem:[%s11761_s28 + $0x1e0] sm:$0xf] }
 0x6dd   : > { %v3458_v31 = vmul.f32 1.0614054, %v3441_v12  ;;  %v3445_v49 = vsub.f32 1.0, %v3444_v39  ;;  %v10658_v21 = vpop.eup %10657 }
 0x6df   : > { %v3460_v15 = vadd.f32 -1.4531521, %v3458_v31  ;;  %v3446_v24 = vmul.f32 %v10654_v14, %v3445_v49  ;;  %v8732_v31 = vld [vmem:[%s11761_s28 + $0x1e8] sm:$0xf] }
 0x6e1   : > { %v3462_v51 = vmul.f32 %v3460_v15, %v3441_v12  ;;  %v3447_v42 = vadd.f32 %v10654_v14, %v3446_v24  ;;  %v8733_v15 = vor.u32 %v10162_v0, %v8732_v31 }
 0x6e3   : > { %v3464_v46 = vadd.f32 1.4214138, %v3462_v51  ;;  %v3451_v22 = vsel %vm3450_vm2, %v10654_v14, %v3447_v42  ;;  %v10155_v51 = vld [vmem:[%s11761_s28 + $0x1c4] sm:$0xf]  ;;  %4034 = vmatpush.bf16.msra.mxu0 %v8733_v15  ;;  %v8709_v42 = vor.u32 %v10157_v50, %v8708_v45  ;;  %v8646_v50 = vld [vmem:[%s11761_s28 + $0x150] sm:$0xf0] }
 0x6e4   : > { %v3456_v55 = vsel %vm3453_vm3, %v3455_v28, %v3451_v22  ;;  %v8716_v28 = vld [vmem:[%s11761_s28 + $0x1c8] sm:$0xf]  ;;  %v10156_v22 = vld [vmem:[%s11761_s28 + $0x1cc] sm:$0xf]  ;;  %v10139_v45 = vld [vmem:[%s11761_s28 + $0x144] sm:$0xf] }
 0x6e5   : > { %v3466_v54 = vmul.f32 %v3464_v46, %v3441_v12  ;;  %v3459_v10 = vmul.f32 1.0614054, %v3456_v55  ;;  %v8713_v46 = vor.u32 %v10155_v51, %v8710_v33  ;;  %v8652_v51 = vld [vmem:[%s11761_s28 + $0x148] sm:$0xf]  ;;  %v10142_v33 = vld [vmem:[%s11761_s28 + $0x154] sm:$0xf0] }
 0x6e7   : > { %v3468_v4 = vadd.f32 -0.28449672, %v3466_v54  ;;  %v3461_v29 = vadd.f32 -1.4531521, %v3459_v10  ;;  %v8717_v54 = vor.u32 %v10158_v5, %v8716_v28  ;;  %v10153_v10 = vld [vmem:[%s11761_s28 + $0x1ac] sm:$0xf0] }
 0x6e8   : > { %v10140_v28 = vld [vmem:[%s11761_s28 + $0x14c] sm:$0xf]  ;;  %v8654_v5 = vld [vmem:[%s11761_s28 + $0x158] sm:$0xf0] }
 0x6e9   : > { %v3470_v9 = vmul.f32 %v3468_v4, %v3441_v12  ;;  %v3463_v44 = vmul.f32 %v3461_v29, %v3456_v55  ;;  %v10151_v29 = vld [vmem:[%s11761_s28 + $0x1a4] sm:$0xf]  ;;  %4035 = vmatpush.bf16.msra.mxu0 %v8717_v54  ;;  %v8628_v54 = vld [vmem:[%s11761_s28 + $0x120] sm:$0xf] }
 0x6eb   : > { %v3472_v56 = vadd.f32 0.2548296, %v3470_v9  ;;  %v3465_v57 = vadd.f32 1.4214138, %v3463_v44  ;;  %v8694_v9 = vld [vmem:[%s11761_s28 + $0x1b0] sm:$0xf0]  ;;  %v8693_v44 = vor.u32 %v10153_v10, %v8692_v60 }
 0x6ec   : > { %v8697_v37 = vor.u32 %v10151_v29, %v8694_v9  ;;  %v10135_v60 = vld [vmem:[%s11761_s28 + $0x124] sm:$0xf]  ;;  %v8636_v29 = vld [vmem:[%s11761_s28 + $0x128] sm:$0xf]  ;;  %v10138_v9 = vld [vmem:[%s11761_s28 + $0x134] sm:$0xf0] }
 0x6ed   : > { %v3474_v36 = vmul.f32 %v3472_v56, %v3441_v12  ;;  %v3467_v62 = vmul.f32 %v3465_v57, %v3456_v55  ;;  %v10161_v12 = vld [vmem:[%s11761_s28 + $0x1ec] sm:$0xf0]  ;;  %v10154_v56 = vld [vmem:[%s11761_s28 + $0x1b4] sm:$0xf0]  ;;  %v10152_v57 = vld [vmem:[%s11761_s28 + $0x1ac] sm:$0xf] }
 0x6ee   : > { %v8725_v39 = vor.u32 %v10161_v12, %v8724_v26 }
 0x6ef   : > { %v3484_v63 = vmul.f32 %v10656_v59, %v3474_v36  ;;  %v3469_v53 = vadd.f32 -0.28449672, %v3467_v62  ;;  %v8702_v36 = vld [vmem:[%s11761_s28 + $0x1b8] sm:$0xf0]  ;;  %v8701_v59 = vor.u32 %v10154_v56, %v8700_v58  ;;  %v8676_v62 = vld [vmem:[%s11761_s28 + $0x180] sm:$0xf] }
 0x6f0   : > { %4006 = vmatpush.bf16.msrb.mxu2 %v8725_v39  ;;  %v10136_v56 = vld [vmem:[%s11761_s28 + $0x12c] sm:$0xf] }
 0x6f1   : > { %v3486_v7 = vsub.f32 1.0, %v3484_v63  ;;  %v3471_v8 = vmul.f32 %v3469_v53, %v3456_v55  ;;  %v10149_v63 = vld [vmem:[%s11761_s28 + $0x18c] sm:$0xf0]  ;;  %v10147_v53 = vld [vmem:[%s11761_s28 + $0x184] sm:$0xf]  ;;  %4036 = vmatpush.bf16.msra.mxu0 %v8701_v59 }
 0x6f2   : > { %v10133_v59 = vld [vmem:[%s11761_s28 + $0x10c] sm:$0xf0] }
 0x6f3   : > { %v3473_v27 = vadd.f32 0.2548296, %v3471_v8  ;;  %v3490_v13 = vsub.f32 0.0, %v3486_v7  ;;  %v8678_v8 = vld [vmem:[%s11761_s28 + $0x190] sm:$0xf0] }
 0x6f4   : > { %4007 = vmatpush.bf16.msrb.mxu2 %v8709_v42  ;;  %v8649_v42 = vor.u32 %v10139_v45, %v8646_v50  ;;  %v10185_v45 = vld [vmem:[%s11765_s1 + $0x1ac] sm:$0xf0] }
 0x6f5   : > { %v3475_v18 = vmul.f32 %v3473_v27, %v3456_v55  ;;  %v3492_v23 = vsel %vm3488_vm4, %v3486_v7, %v3490_v13  ;;  %v8718_v55 = vld [vmem:[%s11761_s28 + $0x1d8] sm:$0xf0]  ;;  %v8705_v7 = vor.u32 %v10152_v57, %v8702_v36  ;;  %v8684_v27 = vld [vmem:[%s11761_s28 + $0x188] sm:$0xf]  ;;  %v10150_v13 = vld [vmem:[%s11761_s28 + $0x194] sm:$0xf0] }
 0x6f6   : > { %v3494_v16 = vadd.f32 1.0, %v3492_v23  ;;  %v8721_v4 = vor.u32 %v10156_v22, %v8718_v55  ;;  %v8681_v23 = vor.u32 %v10147_v53, %v8678_v8  ;;  %v8657_v22 = vor.u32 %v10140_v28, %v8654_v5  ;;  %v10137_v55 = vld [vmem:[%s11761_s28 + $0x12c] sm:$0xf0]  ;;  %v8638_v57 = vld [vmem:[%s11761_s28 + $0x138] sm:$0xf0] }
 0x6f7   : > { %v3485_v30 = vmul.f32 %v10658_v21, %v3475_v18  ;;  %v10148_v18 = vld [vmem:[%s11761_s28 + $0x18c] sm:$0xf]  ;;  %v8686_v21 = vld [vmem:[%s11761_s28 + $0x198] sm:$0xf0]  ;;  %v8629_v10 = vor.u32 %v10137_v55, %v8628_v54  ;;  %v8641_v36 = vor.u32 %v10136_v56, %v8638_v57  ;;  %v8614_v53 = vld [vmem:[%s11761_s28 + $0x110] sm:$0xf0] }
 0x6f8   : > { %v3496_v40 = vmul.f32 %v3494_v16, %v3418_v48  ;;  %4008 = vmatpush.bf16.msrb.mxu2 %v8693_v44  ;;  %v10145_v16 = vld [vmem:[%s11761_s28 + $0x16c] sm:$0xf0]  ;;  %v8689_v48 = vor.u32 %v10148_v18, %v8686_v21  ;;  %v8637_v44 = vor.u32 %v10138_v9, %v8636_v29  ;;  %v10134_v8 = vld [vmem:[%s11761_s28 + $0x114] sm:$0xf0]  ;;  %v10132_v18 = vld [vmem:[%s11761_s28 + $0x10c] sm:$0xf] }
 0x6f9   : > { %v3487_v1 = vsub.f32 1.0, %v3485_v30  ;;  %v8677_v30 = vor.u32 %v10149_v63, %v8676_v62  ;;  %v10131_v62 = vld [vmem:[%s11761_s28 + $0x104] sm:$0xf]  ;;  %v8622_v21 = vld [vmem:[%s11761_s28 + $0x118] sm:$0xf0] }
 0x6fa   : > { %v10184_v5 = vld [vmem:[%s11765_s1 + $0x1ac] sm:$0xf]  ;;  %v8804_v55 = vld [vmem:[%s11765_s1 + $0x180] sm:$0xf]  ;;  %v8806_v29 = vld [vmem:[%s11765_s1 + $0x190] sm:$0xf0] }
 0x6fb   : > { %v3491_v35 = vsub.f32 0.0, %v3487_v1  ;;  %v8812_v9 = vld [vmem:[%s11765_s1 + $0x188] sm:$0xf]  ;;  %v10180_v57 = vld [vmem:[%s11765_s1 + $0x18c] sm:$0xf] }
 0x6fc   : > { %4009 = vmatpush.bf16.msrb.mxu2 %v8677_v30  ;;  %v8852_v30 = vld [vmem:[%s11765_s1 + $0x1e0] sm:$0xf] }
 0x6fd   : > { %v3493_v17 = vsel %vm3489_vm5, %v3487_v1, %v3491_v35  ;;  %v8685_v1 = vor.u32 %v10150_v13, %v8684_v27  ;;  %v8660_v35 = vld [vmem:[%s11761_s28 + $0x160] sm:$0xf]  ;;  %v8617_v27 = vor.u32 %v10131_v62, %v8614_v53  ;;  %v10177_v62 = vld [vmem:[%s11765_s1 + $0x16c] sm:$0xf0] }
 0x6fe   : > { %v3495_v61 = vadd.f32 1.0, %v3493_v17  ;;  %v10143_v17 = vld [vmem:[%s11761_s28 + $0x164] sm:$0xf] }
 0x6ff   : > { %4037 = vmatpush.bf16.msra.mxu0 %v8685_v1  ;;  %v10193_v1 = vld [vmem:[%s11765_s1 + $0x1ec] sm:$0xf0] }
 0x700   : > { %v3497_v52 = vmul.f32 %v3495_v61, %v3419_v2  ;;  %v8662_v2 = vld [vmem:[%s11761_s28 + $0x170] sm:$0xf0]  ;;  %v8668_v61 = vld [vmem:[%s11761_s28 + $0x168] sm:$0xf] }
 0x702   : > { %v3498_v32 = vpack.c.bf16 %v3497_v52, %v3496_v40  ;;  %v10146_v40 = vld [vmem:[%s11761_s28 + $0x174] sm:$0xf0]  ;;  %v10144_v52 = vld [vmem:[%s11761_s28 + $0x16c] sm:$0xf] }
 0x704   : > { %3558 = vmatmul.bf16.vlgmr.msrb.gmra.mxu1 %v3498_v32  ;;  %v8670_v32 = vld [vmem:[%s11761_s28 + $0x178] sm:$0xf0] }
 0x705   : > { %v8673_v26 = vor.u32 %v10144_v52, %v8670_v32  ;;  %v8862_v32 = vld [vmem:[%s11765_s1 + $0x1f8] sm:$0xf0] }
 0x781   : > { %v3559_v41 = vpop.f32.mrf.mxu1 }
 0x782   : > { %v3560_v11 = vadd.f32 %v10588_v6, %v3559_v41 }
 0x784   : > { %v12363_v20 = vadd.f32 %v3560_v11, %v12314_v47  ;;  %v8726_v47 = vld [vmem:[%s11761_s28 + $0x1f0] sm:$0xf0]  ;;  %v8665_v11 = vor.u32 %v10143_v17, %v8662_v2  ;;  %v8853_v17 = vor.u32 %v10193_v1, %v8852_v30  ;;  %v8860_v2 = vld [vmem:[%s11765_s1 + $0x1e8] sm:$0xf]  ;;  %v8772_v1 = vld [vmem:[%s11765_s1 + $0x140] sm:$0xf] }
 0x785   : > { %v8729_v49 = vor.u32 %v10159_v38, %v8726_v47  ;;  %v8798_v30 = vld [vmem:[%s11765_s1 + $0x178] sm:$0xf0] }
 0x786   : > { %3784 = vadd.xlane.f32.xlu2 %v12363_v20 }
 0x787   : > { %4020 = vmatpush.bf16.msrb.mxu3 %v8729_v49 }
 0x789   : > { %v3561_v3 = vpop.f32.mrf.mxu1 }
 0x78a   : > { %v3562_v19 = vadd.f32 %v10588_v6, %v3561_v3  ;;  %v8661_v6 = vor.u32 %v10145_v16, %v8660_v35  ;;  %v8669_v3 = vor.u32 %v10146_v40, %v8668_v61  ;;  %v10191_v35 = vld [vmem:[%s11765_s1 + $0x1e4] sm:$0xf]  ;;  %v8854_v16 = vld [vmem:[%s11765_s1 + $0x1f0] sm:$0xf0]  ;;  %v10194_v61 = vld [vmem:[%s11765_s1 + $0x1f4] sm:$0xf0] }
 0x78b   : > { %4021 = vmatpush.bf16.msrb.mxu3 %v8713_v46  ;;  %v8653_v46 = vor.u32 %v10142_v33, %v8652_v51  ;;  %v10192_v40 = vld [vmem:[%s11765_s1 + $0x1ec] sm:$0xf]  ;;  %v8861_v52 = vor.u32 %v10194_v61, %v8860_v2  ;;  %v8822_v51 = vld [vmem:[%s11765_s1 + $0x1b0] sm:$0xf0]  ;;  %v8828_v33 = vld [vmem:[%s11765_s1 + $0x1a8] sm:$0xf] }
 0x78c   : > { %v12367_v14 = vadd.f32 %v3562_v19, %v12317_v25  ;;  %v8734_v25 = vld [vmem:[%s11761_s28 + $0x1f8] sm:$0xf0]  ;;  %4010 = vmatpush.bf16.msrb.mxu2 %v8661_v6  ;;  %4038 = vmatpush.bf16.msra.mxu0 %v8669_v3  ;;  %v8836_v6 = vld [vmem:[%s11765_s1 + $0x1c0] sm:$0xf]  ;;  %v8780_v2 = vld [vmem:[%s11765_s1 + $0x148] sm:$0xf] }
 0x78d   : > { %v8737_v24 = vor.u32 %v10160_v43, %v8734_v25  ;;  %v8644_v43 = vld [vmem:[%s11761_s28 + $0x140] sm:$0xf]  ;;  %v10141_v25 = vld [vmem:[%s11761_s28 + $0x14c] sm:$0xf0] }
 0x78e   : > { %3786 = vadd.xlane.f32.xlu0 %v12367_v14  ;;  %v10174_v61 = vld [vmem:[%s11765_s1 + $0x154] sm:$0xf0] }
 0x78f   : > { %4048 = vmatpush.bf16.msra.mxu1 %v8737_v24  ;;  %4022 = vmatpush.bf16.msrb.mxu3 %v8697_v37  ;;  %v8645_v24 = vor.u32 %v10141_v25, %v8644_v43  ;;  %v8612_v37 = vld [vmem:[%s11761_s28 + $0x100] sm:$0xf]  ;;  %v8820_v25 = vld [vmem:[%s11765_s1 + $0x1a0] sm:$0xf] }
 0x790   : > { %4039 = vmatpush.bf16.msra.mxu0 %v8653_v46  ;;  %v8613_v63 = vor.u32 %v10133_v59, %v8612_v37  ;;  %v8821_v50 = vor.u32 %v10185_v45, %v8820_v25  ;;  %v8788_v59 = vld [vmem:[%s11765_s1 + $0x160] sm:$0xf]  ;;  %v10168_v25 = vld [vmem:[%s11765_s1 + $0x12c] sm:$0xf] }
 0x791   : > { %4011 = vmatpush.bf16.msrb.mxu2 %v8645_v24  ;;  %v10183_v24 = vld [vmem:[%s11765_s1 + $0x1a4] sm:$0xf]  ;;  %v8789_v53 = vor.u32 %v10177_v62, %v8788_v59 }
 0x792   : > { %v8825_v46 = vor.u32 %v10183_v24, %v8822_v51  ;;  %v8766_v24 = vld [vmem:[%s11765_s1 + $0x138] sm:$0xf0]  ;;  %v8740_v51 = vld [vmem:[%s11765_s1 + $0x100] sm:$0xf] }
 0x793   : > { %4049 = vmatpush.bf16.msra.mxu1 %v8721_v4  ;;  %4023 = vmatpush.bf16.msrb.mxu3 %v8681_v23  ;;  %v8630_v4 = vld [vmem:[%s11761_s28 + $0x130] sm:$0xf0]  ;;  %v8625_v23 = vor.u32 %v10132_v18, %v8622_v21  ;;  %v10176_v21 = vld [vmem:[%s11765_s1 + $0x16c] sm:$0xf] }
 0x794   : > { %v8633_v58 = vor.u32 %v10135_v60, %v8630_v4  ;;  %4040 = vmatpush.bf16.msra.mxu0 %v8637_v44  ;;  %v10181_v60 = vld [vmem:[%s11765_s1 + $0x18c] sm:$0xf0] }
 0x795   : > { %4012 = vmatpush.bf16.msrb.mxu2 %v8629_v10  ;;  %v10179_v10 = vld [vmem:[%s11765_s1 + $0x184] sm:$0xf]  ;;  %v8805_v4 = vor.u32 %v10181_v60, %v8804_v55  ;;  %v10164_v60 = vld [vmem:[%s11765_s1 + $0x10c] sm:$0xf] }
 0x796   : > { %v8809_v44 = vor.u32 %v10179_v10, %v8806_v29  ;;  %v8750_v10 = vld [vmem:[%s11765_s1 + $0x118] sm:$0xf0] }
 0x797   : > { %4050 = vmatpush.bf16.msra.mxu1 %v8705_v7  ;;  %4024 = vmatpush.bf16.msrb.mxu3 %v8665_v11  ;;  %v8620_v7 = vld [vmem:[%s11761_s28 + $0x108] sm:$0xf]  ;;  %v8865_v11 = vor.u32 %v10192_v40, %v8862_v32  ;;  %v10172_v32 = vld [vmem:[%s11765_s1 + $0x14c] sm:$0xf]  ;;  %v8753_v29 = vor.u32 %v10164_v60, %v8750_v10 }
 0x798   : > { %v8621_v13 = vor.u32 %v10134_v8, %v8620_v7  ;;  %v8790_v7 = vld [vmem:[%s11765_s1 + $0x170] sm:$0xf0]  ;;  %v8796_v8 = vld [vmem:[%s11765_s1 + $0x168] sm:$0xf] }
 0x799   : > { %4013 = vmatpush.bf16.msrb.mxu2 %v8613_v63  ;;  %v10175_v63 = vld [vmem:[%s11765_s1 + $0x164] sm:$0xf] }
 0x79a   : > { %4041 = vmatpush.bf16.msra.mxu0 %v8621_v13  ;;  %v8793_v13 = vor.u32 %v10175_v63, %v8790_v7 }
 0x79b   : > { %4051 = vmatpush.bf16.msra.mxu1 %v8689_v48  ;;  %4025 = vmatpush.bf16.msrb.mxu3 %v8649_v42  ;;  %v8857_v48 = vor.u32 %v10191_v35, %v8854_v16  ;;  %v10186_v42 = vld [vmem:[%s11765_s1 + $0x1b4] sm:$0xf0]  ;;  %v10173_v35 = vld [vmem:[%s11765_s1 + $0x14c] sm:$0xf0]  ;;  %v10171_v16 = vld [vmem:[%s11765_s1 + $0x144] sm:$0xf] }
 0x79c   : > { %v8829_v28 = vor.u32 %v10186_v42, %v8828_v33  ;;  %v10165_v33 = vld [vmem:[%s11765_s1 + $0x10c] sm:$0xf0]  ;;  %v10163_v42 = vld [vmem:[%s11765_s1 + $0x104] sm:$0xf] }
 0x79d   : > { %4231 = vmatpush.bf16.msra.mxu2 %v8853_v17  ;;  %v8773_v17 = vor.u32 %v10173_v35, %v8772_v1 }
 0x79e   : > { %4259 = vmatpush.bf16.msrb.mxu0 %v8861_v52  ;;  %v8781_v52 = vor.u32 %v10174_v61, %v8780_v2  ;;  %v10223_v2 = vld [vmem:[%s11769_s7 + $0x1e4] sm:$0xf]  ;;  %v8988_v61 = vld [vmem:[%s11769_s7 + $0x1e8] sm:$0xf] }
 0x79f   : > { %4052 = vmatpush.bf16.msra.mxu1 %v8673_v26  ;;  %4026 = vmatpush.bf16.msrb.mxu3 %v8633_v58  ;;  %v8838_v26 = vld [vmem:[%s11765_s1 + $0x1d0] sm:$0xf0]  ;;  %v10182_v58 = vld [vmem:[%s11765_s1 + $0x194] sm:$0xf0] }
 0x7a0   : > { %v8813_v56 = vor.u32 %v10182_v58, %v8812_v9 }
 0x7a3   : > { %4053 = vmatpush.bf16.msra.mxu1 %v8657_v22  ;;  %4027 = vmatpush.bf16.msrb.mxu3 %v8617_v27  ;;  %v8830_v22 = vld [vmem:[%s11765_s1 + $0x1b8] sm:$0xf0]  ;;  %v10178_v27 = vld [vmem:[%s11765_s1 + $0x174] sm:$0xf0] }
 0x7a4   : > { %v8833_v54 = vor.u32 %v10184_v5, %v8830_v22  ;;  %v8797_v18 = vor.u32 %v10178_v27, %v8796_v8  ;;  %v8748_v5 = vld [vmem:[%s11765_s1 + $0x108] sm:$0xf]  ;;  %v10166_v22 = vld [vmem:[%s11765_s1 + $0x114] sm:$0xf0] }
 0x7a5   : > { %v8749_v55 = vor.u32 %v10166_v22, %v8748_v5  ;;  %v8956_v5 = vld [vmem:[%s11769_s7 + $0x1a8] sm:$0xf]  ;;  %v10218_v22 = vld [vmem:[%s11769_s7 + $0x1b4] sm:$0xf0] }
 0x7a7   : > { %4054 = vmatpush.bf16.msra.mxu1 %v8641_v36  ;;  %4245 = vmatpush.bf16.msra.mxu3 %v8857_v48  ;;  %v8814_v36 = vld [vmem:[%s11765_s1 + $0x198] sm:$0xf0]  ;;  %v8774_v48 = vld [vmem:[%s11765_s1 + $0x150] sm:$0xf0] }
 0x7a8   : > { %v8817_v37 = vor.u32 %v10180_v57, %v8814_v36  ;;  %v8777_v40 = vor.u32 %v10171_v16, %v8774_v48  ;;  %v10225_v48 = vld [vmem:[%s11769_s7 + $0x1ec] sm:$0xf0] }
 0x7ab   : > { %4055 = vmatpush.bf16.msra.mxu1 %v8625_v23  ;;  %v8801_v23 = vor.u32 %v10176_v21, %v8798_v30 }
 0x7af   : > { %4273 = vmatpush.bf16.msrb.mxu1 %v8865_v11 }
 0x7f9   : > { %v3785_v41 = vpop.xlane.xlu2 %3784 }
 0x7fa   : > { %v3788_v19 = vmul.f32 0.03125, %v3785_v41  ;;  %v10189_v41 = vld [vmem:[%s11765_s1 + $0x1cc] sm:$0xf0] }
 0x7fb   : > { %v8837_v3 = vor.u32 %v10189_v41, %v8836_v6  ;;  %v8782_v6 = vld [vmem:[%s11765_s1 + $0x158] sm:$0xf0] }
 0x7fc   : > { %v3790_v12 = vsub.f32 %v12363_v20, %v3788_v19  ;;  %v10187_v19 = vld [vmem:[%s11765_s1 + $0x1c4] sm:$0xf]  ;;  %v8785_v11 = vor.u32 %v10172_v32, %v8782_v6  ;;  %v10226_v32 = vld [vmem:[%s11769_s7 + $0x1f4] sm:$0xf0] }
 0x7fd   : > { %4232 = vmatpush.bf16.msra.mxu2 %v8837_v3  ;;  %v10224_v6 = vld [vmem:[%s11769_s7 + $0x1ec] sm:$0xf] }
 0x7fe   : > { %v12413_v38 = vsel %vm1683_vm0, %v3790_v12, 0.0  ;;  %v8844_v12 = vld [vmem:[%s11765_s1 + $0x1c8] sm:$0xf] }
 0x7ff   : > { %v3794_v39 = vmul.f32 %v12413_v38, %v12413_v38 }
 0x801   : > { %v3787_v47 = vpop.xlane.xlu0 %3786  ;;  %3796 = vadd.xlane.f32.xlu1 %v3794_v39  ;;  %v8841_v39 = vor.u32 %v10187_v19, %v8838_v26  ;;  %4233 = vmatpush.bf16.msra.mxu2 %v8821_v50  ;;  %v8756_v19 = vld [vmem:[%s11765_s1 + $0x120] sm:$0xf]  ;;  %v10169_v26 = vld [vmem:[%s11765_s1 + $0x12c] sm:$0xf0]  ;;  %v8769_v50 = vor.u32 %v10168_v25, %v8766_v24  ;;  %v8974_v25 = vld [vmem:[%s11769_s7 + $0x1d8] sm:$0xf0] }
 0x802   : > { %v3789_v31 = vmul.f32 0.03125, %v3787_v47  ;;  %v10190_v47 = vld [vmem:[%s11765_s1 + $0x1d4] sm:$0xf0] }
 0x803   : > { %4246 = vmatpush.bf16.msra.mxu3 %v8841_v39  ;;  %v10167_v39 = vld [vmem:[%s11765_s1 + $0x124] sm:$0xf] }
 0x804   : > { %v3791_v0 = vsub.f32 %v12367_v14, %v3789_v31  ;;  %v10188_v31 = vld [vmem:[%s11765_s1 + $0x1cc] sm:$0xf] }
 0x805   : > { %4234 = vmatpush.bf16.msra.mxu2 %v8805_v4 }
 0x806   : > { %v12420_v49 = vsel %vm1683_vm0, %v3791_v0, 0.0  ;;  %v8846_v0 = vld [vmem:[%s11765_s1 + $0x1d8] sm:$0xf0] }
 0x807   : > { %v3795_v15 = vmul.f32 %v12420_v49, %v12420_v49  ;;  %v8849_v43 = vor.u32 %v10188_v31, %v8846_v0  ;;  %4247 = vmatpush.bf16.msra.mxu3 %v8825_v46  ;;  %v8764_v31 = vld [vmem:[%s11765_s1 + $0x128] sm:$0xf]  ;;  %v8741_v46 = vor.u32 %v10165_v33, %v8740_v51 }
 0x808   : > { %v10217_v51 = vld [vmem:[%s11769_s7 + $0x1ac] sm:$0xf0] }
 0x809   : > { %3798 = vadd.xlane.f32.xlu2 %v3795_v15  ;;  %v8845_v15 = vor.u32 %v10190_v47, %v8844_v12  ;;  %4274 = vmatpush.bf16.msrb.mxu1 %v8849_v43  ;;  %v8757_v12 = vor.u32 %v10169_v26, %v8756_v19  ;;  %v8758_v47 = vld [vmem:[%s11765_s1 + $0x130] sm:$0xf0]  ;;  %v10170_v43 = vld [vmem:[%s11765_s1 + $0x134] sm:$0xf0]  ;;  %v10221_v26 = vld [vmem:[%s11769_s7 + $0x1cc] sm:$0xf0] }
 0x80a   : > { %4235 = vmatpush.bf16.msra.mxu2 %v8789_v53  ;;  %v8765_v45 = vor.u32 %v10170_v43, %v8764_v31  ;;  %v8964_v19 = vld [vmem:[%s11769_s7 + $0x1c0] sm:$0xf]  ;;  %v8966_v31 = vld [vmem:[%s11769_s7 + $0x1d0] sm:$0xf0]  ;;  %v10220_v43 = vld [vmem:[%s11769_s7 + $0x1cc] sm:$0xf] }
 0x80b   : > { %4260 = vmatpush.bf16.msrb.mxu0 %v8845_v15  ;;  %4248 = vmatpush.bf16.msra.mxu3 %v8809_v44  ;;  %v8761_v15 = vor.u32 %v10167_v39, %v8758_v47  ;;  %v10219_v47 = vld [vmem:[%s11769_s7 + $0x1c4] sm:$0xf] }
 0x80c   : > { %v8969_v24 = vor.u32 %v10219_v47, %v8966_v31  ;;  %v10199_v47 = vld [vmem:[%s11769_s7 + $0x124] sm:$0xf]  ;;  %v8886_v31 = vld [vmem:[%s11769_s7 + $0x130] sm:$0xf0] }
 0x80d   : > { %4275 = vmatpush.bf16.msrb.mxu1 %v8833_v54 }
 0x80e   : > { %4236 = vmatpush.bf16.msra.mxu2 %v8773_v17  ;;  %v8980_v17 = vld [vmem:[%s11769_s7 + $0x1e0] sm:$0xf] }
 0x80f   : > { %4261 = vmatpush.bf16.msrb.mxu0 %v8829_v28  ;;  %4249 = vmatpush.bf16.msra.mxu3 %v8793_v13  ;;  %v8742_v28 = vld [vmem:[%s11765_s1 + $0x110] sm:$0xf0] }
 0x810   : > { %v8745_v54 = vor.u32 %v10163_v42, %v8742_v28  ;;  %v10589_v13 = vld [vmem:[%s11730_s5 + $0x1] ss:$0 sm:$0xff]  ;;  %v8977_v42 = vor.u32 %v10220_v43, %v8974_v25  ;;  %v8950_v28 = vld [vmem:[%s11769_s7 + $0x1b0] sm:$0xf0]  ;;  %v10200_v43 = vld [vmem:[%s11769_s7 + $0x12c] sm:$0xf] }
 0x811   : > { %4276 = vmatpush.bf16.msrb.mxu1 %v8817_v37  ;;  %v8894_v25 = vld [vmem:[%s11769_s7 + $0x138] sm:$0xf0] }
 0x812   : > { %4237 = vmatpush.bf16.msra.mxu2 %v8757_v12  ;;  %v8989_v12 = vor.u32 %v10226_v32, %v8988_v61  ;;  %v10203_v61 = vld [vmem:[%s11769_s7 + $0x144] sm:$0xf]  ;;  %v10206_v32 = vld [vmem:[%s11769_s7 + $0x154] sm:$0xf0] }
 0x813   : > { %4262 = vmatpush.bf16.msrb.mxu0 %v8813_v56  ;;  %4250 = vmatpush.bf16.msra.mxu3 %v8777_v40 }
 0x815   : > { %4277 = vmatpush.bf16.msrb.mxu1 %v8801_v23  ;;  %v10590_v23 = vld [vmem:[%s11757_s18 + $0x1] ss:$0 sm:$0xff] }
 0x816   : > { %4238 = vmatpush.bf16.msra.mxu2 %v8741_v46  ;;  %v10215_v46 = vld [vmem:[%s11769_s7 + $0x1a4] sm:$0xf] }
 0x817   : > { %4263 = vmatpush.bf16.msrb.mxu0 %v8797_v18  ;;  %4251 = vmatpush.bf16.msra.mxu3 %v8761_v15  ;;  %v10222_v15 = vld [vmem:[%s11769_s7 + $0x1d4] sm:$0xf0]  ;;  %v8953_v10 = vor.u32 %v10215_v46, %v8950_v28  ;;  %v10195_v46 = vld [vmem:[%s11769_s7 + $0x104] sm:$0xf]  ;;  %v8870_v28 = vld [vmem:[%s11769_s7 + $0x110] sm:$0xf0] }
 0x819   : > { %4278 = vmatpush.bf16.msrb.mxu1 %v8785_v11 }
 0x81b   : > { %4264 = vmatpush.bf16.msrb.mxu0 %v8781_v52  ;;  %4252 = vmatpush.bf16.msra.mxu3 %v8745_v54  ;;  %v10216_v54 = vld [vmem:[%s11769_s7 + $0x1ac] sm:$0xf] }
 0x81d   : > { %4279 = vmatpush.bf16.msrb.mxu1 %v8769_v50  ;;  %v8948_v50 = vld [vmem:[%s11769_s7 + $0x1a0] sm:$0xf] }
 0x81e   : > { %v8949_v60 = vor.u32 %v10217_v51, %v8948_v50  ;;  %v8868_v50 = vld [vmem:[%s11769_s7 + $0x100] sm:$0xf]  ;;  %v10197_v51 = vld [vmem:[%s11769_s7 + $0x10c] sm:$0xf0] }
 0x81f   : > { %4265 = vmatpush.bf16.msrb.mxu0 %v8765_v45  ;;  %v8965_v45 = vor.u32 %v10221_v26, %v8964_v19  ;;  %v8884_v19 = vld [vmem:[%s11769_s7 + $0x120] sm:$0xf]  ;;  %v10201_v26 = vld [vmem:[%s11769_s7 + $0x12c] sm:$0xf0] }
 0x821   : > { %4280 = vmatpush.bf16.msrb.mxu1 %v8753_v29  ;;  %v10213_v29 = vld [vmem:[%s11769_s7 + $0x18c] sm:$0xf0] }
 0x823   : > { %4266 = vmatpush.bf16.msrb.mxu0 %v8749_v55  ;;  %v8958_v55 = vld [vmem:[%s11769_s7 + $0x1b8] sm:$0xf0] }
 0x874   : > { %v3797_v41 = vpop.xlane.xlu1 %3796 }
 0x875   : > { %v3800_v3 = vmul.f32 0.03125, %v3797_v41  ;;  %v8990_v41 = vld [vmem:[%s11769_s7 + $0x1f8] sm:$0xf0] }
 0x876   : > { %v8993_v39 = vor.u32 %v10224_v6, %v8990_v41  ;;  %v10204_v6 = vld [vmem:[%s11769_s7 + $0x14c] sm:$0xf]  ;;  %v8910_v41 = vld [vmem:[%s11769_s7 + $0x158] sm:$0xf0] }
 0x877   : > { %v3802_v0 = vadd.f32 1e-05, %v3800_v3 }
 0x879   : > { %10659 = vrsqrt.f32 %v3802_v0  ;;  %vm3810_vm7 = vweird.f32 %v3802_v0 }
 0x87c   : > { %v3799_v4 = vpop.xlane.xlu2 %3798 }
 0x87d   : > { %v3801_v9 = vmul.f32 0.03125, %v3799_v4  ;;  %v8932_v4 = vld [vmem:[%s11769_s7 + $0x180] sm:$0xf] }
 0x87f   : > { %v10660_v58 = vpop.eup %10659  ;;  %v3803_v44 = vadd.f32 1e-05, %v3801_v9  ;;  %v8957_v9 = vor.u32 %v10218_v22, %v8956_v5  ;;  %v8876_v5 = vld [vmem:[%s11769_s7 + $0x108] sm:$0xf]  ;;  %v10198_v22 = vld [vmem:[%s11769_s7 + $0x114] sm:$0xf0] }
 0x880   : > { %v3805_v56 = vmul.f32 %v10660_v58, %v3802_v0  ;;  %vm3811_vm6 = vweird.f32 %v10660_v58  ;;  %v8972_v0 = vld [vmem:[%s11769_s7 + $0x1c8] sm:$0xf] }
 0x881   : > { %10661 = vrsqrt.f32 %v3803_v44  ;;  %vm3812_vm8 = vmor %vm3810_vm7, %vm3811_vm6  ;;  %vm3820_vm10 = vweird.f32 %v3803_v44  ;;  %v8973_v33 = vor.u32 %v10222_v15, %v8972_v0  ;;  %v8892_v0 = vld [vmem:[%s11769_s7 + $0x128] sm:$0xf]  ;;  %v10202_v15 = vld [vmem:[%s11769_s7 + $0x134] sm:$0xf0] }
 0x882   : > { %v3806_v57 = vmul.f32 %v10660_v58, %v3805_v56  ;;  %v8934_v56 = vld [vmem:[%s11769_s7 + $0x190] sm:$0xf0] }
 0x884   : > { %v3807_v36 = vmul.f32 0.5, %v3806_v57  ;;  %v8940_v57 = vld [vmem:[%s11769_s7 + $0x188] sm:$0xf] }
 0x886   : > { %v3808_v37 = vsub.f32 1.5, %v3807_v36  ;;  %v10214_v36 = vld [vmem:[%s11769_s7 + $0x194] sm:$0xf0] }
 0x887   : > { %v10662_v59 = vpop.eup %10661 }
 0x888   : > { %v3809_v62 = vmul.f32 %v10660_v58, %v3808_v37  ;;  %v3815_v63 = vmul.f32 %v10662_v59, %v3803_v44  ;;  %vm3821_vm9 = vweird.f32 %v10662_v59  ;;  %v10211_v44 = vld [vmem:[%s11769_s7 + $0x184] sm:$0xf]  ;;  %v10212_v37 = vld [vmem:[%s11769_s7 + $0x18c] sm:$0xf] }
 0x889   : > { %vm3822_vm11 = vmor %vm3820_vm10, %vm3821_vm9 }
 0x88a   : > { %v3816_v53 = vmul.f32 %v10662_v59, %v3815_v63  ;;  %v3813_v7 = vsel %vm3812_vm8, %v10660_v58, %v3809_v62  ;;  %v8961_v58 = vor.u32 %v10216_v54, %v8958_v55  ;;  %v8933_v62 = vor.u32 %v10213_v29, %v8932_v4  ;;  %v10196_v54 = vld [vmem:[%s11769_s7 + $0x10c] sm:$0xf]  ;;  %v8878_v55 = vld [vmem:[%s11769_s7 + $0x118] sm:$0xf0] }
 0x88b   : > { %v3824_v18 = vmul.f32 %v3813_v7, %v12413_v38  ;;  %v8982_v38 = vld [vmem:[%s11769_s7 + $0x1f0] sm:$0xf0]  ;;  %v8937_v63 = vor.u32 %v10211_v44, %v8934_v56  ;;  %v10209_v7 = vld [vmem:[%s11769_s7 + $0x16c] sm:$0xf0]  ;;  %v8877_v4 = vor.u32 %v10198_v22, %v8876_v5  ;;  %v8881_v29 = vor.u32 %v10196_v54, %v8878_v55 }
 0x88c   : > { %v3817_v8 = vmul.f32 0.5, %v3816_v53  ;;  %v8985_v3 = vor.u32 %v10223_v2, %v8982_v38  ;;  %v8916_v53 = vld [vmem:[%s11769_s7 + $0x160] sm:$0xf] }
 0x88d   : > { %v3829_v1 = vmul.f32 %v10589_v13, %v3824_v18  ;;  %v8918_v18 = vld [vmem:[%s11769_s7 + $0x170] sm:$0xf0] }
 0x88e   : > { %v3818_v27 = vsub.f32 1.5, %v3817_v8  ;;  %v8941_v8 = vor.u32 %v10214_v36, %v8940_v57 }
 0x88f   : > { %v3834_v40 = vadd.f32 %v10590_v23, %v3829_v1  ;;  %v8926_v1 = vld [vmem:[%s11769_s7 + $0x178] sm:$0xf0] }
 0x890   : > { %v3819_v21 = vmul.f32 %v10662_v59, %v3818_v27 }
 0x892   : > { %v3823_v30 = vsel %vm3822_vm11, %v10662_v59, %v3819_v21  ;;  %v8942_v59 = vld [vmem:[%s11769_s7 + $0x198] sm:$0xf0]  ;;  %v8924_v21 = vld [vmem:[%s11769_s7 + $0x168] sm:$0xf] }
 0x893   : > { %v3825_v35 = vmul.f32 %v3823_v30, %v12420_v49  ;;  %v8981_v49 = vor.u32 %v10225_v48, %v8980_v17  ;;  %v8945_v27 = vor.u32 %v10212_v37, %v8942_v59  ;;  %v10210_v30 = vld [vmem:[%s11769_s7 + $0x174] sm:$0xf0]  ;;  %v8900_v17 = vld [vmem:[%s11769_s7 + $0x140] sm:$0xf]  ;;  %v10205_v48 = vld [vmem:[%s11769_s7 + $0x14c] sm:$0xf0] }
 0x894   : > { %v8925_v2 = vor.u32 %v10210_v30, %v8924_v21 }
 0x895   : > { %v3830_v16 = vmul.f32 %v10589_v13, %v3825_v35  ;;  %v10207_v13 = vld [vmem:[%s11769_s7 + $0x164] sm:$0xf]  ;;  %v8917_v35 = vor.u32 %v10209_v7, %v8916_v53 }
 0x897   : > { %v3835_v52 = vadd.f32 %v10590_v23, %v3830_v16  ;;  %v10208_v23 = vld [vmem:[%s11769_s7 + $0x16c] sm:$0xf]  ;;  %v8921_v16 = vor.u32 %v10207_v13, %v8918_v18  ;;  %v12604_v13 = vld [vmem:[%s11763_s13 + $0x4] sm:$0xf] }
 0x898   : > { %v8929_v38 = vor.u32 %v10208_v23, %v8926_v1  ;;  %v3838_v18 = vperm.slane %v12604_v13, 0  ;;  %v3839_v21 = vperm.slane %v12604_v13, 1 }
 0x899   : > { %v12524_v11 = vpack.c.bf16 %v3835_v52, %v3834_v40  ;;  %v8902_v40 = vld [vmem:[%s11769_s7 + $0x150] sm:$0xf0]  ;;  %v8908_v52 = vld [vmem:[%s11769_s7 + $0x148] sm:$0xf] }
 0x89b   : > { %4014 = vmatmul.bf16.vlgmr.msrb.gmra.mxu2 %v12524_v11  ;;  %4028 = vmatmul.bf16.vlgmr.msrb.gmra.mxu3 %v12524_v11 }
 0x89c   : > { %4042 = vmatmul.bf16.vlgmr.msra.gmra.mxu0 %v12524_v11  ;;  %4056 = vmatmul.bf16.vlgmr.msra.gmra.mxu1 %v12524_v11 }
 0x89d   : > { %4456 = vmatpush.bf16.msrb.mxu2 %v8981_v49  ;;  %4470 = vmatpush.bf16.msrb.mxu3 %v8985_v3  ;;  %v8901_v49 = vor.u32 %v10205_v48, %v8900_v17  ;;  %v8905_v3 = vor.u32 %v10203_v61, %v8902_v40 }
 0x89e   : > { %4484 = vmatpush.bf16.msra.mxu0 %v8989_v12  ;;  %4498 = vmatpush.bf16.msra.mxu1 %v8993_v39  ;;  %v8909_v12 = vor.u32 %v10206_v32, %v8908_v52  ;;  %v8913_v39 = vor.u32 %v10204_v6, %v8910_v41  ;;  %v12609_v6 = vld [vmem:[%s11771_s3 + $0x4] sm:$0xf] }
 0x89f   : > { %v4289_v5 = vperm.slane %v12609_v6, 1 }
 0x8a1   : > { %4457 = vmatpush.bf16.msrb.mxu2 %v8965_v45  ;;  %4471 = vmatpush.bf16.msrb.mxu3 %v8969_v24  ;;  %v8885_v45 = vor.u32 %v10201_v26, %v8884_v19  ;;  %v8889_v24 = vor.u32 %v10199_v47, %v8886_v31 }
 0x8a2   : > { %4485 = vmatpush.bf16.msra.mxu0 %v8973_v33  ;;  %4499 = vmatpush.bf16.msra.mxu1 %v8977_v42  ;;  %v8893_v33 = vor.u32 %v10202_v15, %v8892_v0  ;;  %v8897_v42 = vor.u32 %v10200_v43, %v8894_v25 }
 0x8a5   : > { %4458 = vmatpush.bf16.msrb.mxu2 %v8949_v60  ;;  %4472 = vmatpush.bf16.msrb.mxu3 %v8953_v10  ;;  %v8869_v60 = vor.u32 %v10197_v51, %v8868_v50  ;;  %v8873_v10 = vor.u32 %v10195_v46, %v8870_v28  ;;  %v4288_v28 = vperm.slane %v12609_v6, 0 }
 0x8a6   : > { %4486 = vmatpush.bf16.msra.mxu0 %v8957_v9  ;;  %4500 = vmatpush.bf16.msra.mxu1 %v8961_v58 }
 0x8a9   : > { %4459 = vmatpush.bf16.msrb.mxu2 %v8933_v62  ;;  %4473 = vmatpush.bf16.msrb.mxu3 %v8937_v63  ;;  %v8603_v62 = vld [vmem:[%s11767_s26 + $0x4] sm:$0xf] }
 0x8aa   : > { %4487 = vmatpush.bf16.msra.mxu0 %v8941_v8  ;;  %4501 = vmatpush.bf16.msra.mxu1 %v8945_v27  ;;  %v4063_v7 = vperm.slane %v8603_v62, 0  ;;  %v4064_v8 = vperm.slane %v8603_v62, 1  ;;  %v4065_v27 = vperm.slane %v8603_v62, 2 }
 0x8ab   : > { %4239 = vmatmul.bf16.vlgmr.msra.gmra.mxu2 %v12524_v11  ;;  %4253 = vmatmul.bf16.vlgmr.msra.gmra.mxu3 %v12524_v11 }
 0x8ac   : > { %4267 = vmatmul.bf16.vlgmr.msrb.gmra.mxu0 %v12524_v11  ;;  %4281 = vmatmul.bf16.vlgmr.msrb.gmra.mxu1 %v12524_v11 }
 0x8ad   : > { %4460 = vmatpush.bf16.msrb.mxu2 %v8917_v35  ;;  %4474 = vmatpush.bf16.msrb.mxu3 %v8921_v16 }
 0x8ae   : > { %4488 = vmatpush.bf16.msra.mxu0 %v8925_v2  ;;  %4502 = vmatpush.bf16.msra.mxu1 %v8929_v38 }
 0x8b1   : > { %4461 = vmatpush.bf16.msrb.mxu2 %v8901_v49  ;;  %4475 = vmatpush.bf16.msrb.mxu3 %v8905_v3 }
 0x8b2   : > { %4489 = vmatpush.bf16.msra.mxu0 %v8909_v12  ;;  %4503 = vmatpush.bf16.msra.mxu1 %v8913_v39  ;;  %v4290_v12 = vperm.slane %v12609_v6, 2  ;;  %v4291_v39 = vperm.slane %v12609_v6, 3 }
 0x8b5   : > { %4462 = vmatpush.bf16.msrb.mxu2 %v8885_v45  ;;  %4476 = vmatpush.bf16.msrb.mxu3 %v8889_v24 }
 0x8b6   : > { %4490 = vmatpush.bf16.msra.mxu0 %v8893_v33  ;;  %4504 = vmatpush.bf16.msra.mxu1 %v8897_v42 }
 0x8b9   : > { %4463 = vmatpush.bf16.msrb.mxu2 %v8869_v60  ;;  %4477 = vmatpush.bf16.msrb.mxu3 %v8873_v10 }
 0x8ba   : > { %4491 = vmatpush.bf16.msra.mxu0 %v8877_v4  ;;  %4505 = vmatpush.bf16.msra.mxu1 %v8881_v29  ;;  %v3840_v29 = vperm.slane %v12604_v13, 2 }
 0x8bc   : > { %4464 = vmatmul.bf16.vlgmr.msrb.gmra.mxu2 %v12524_v11  ;;  %4478 = vmatmul.bf16.vlgmr.msrb.gmra.mxu3 %v12524_v11 }
 0x8bd   : > { %4492 = vmatmul.bf16.vlgmr.msra.gmra.mxu0 %v12524_v11  ;;  %4506 = vmatmul.bf16.vlgmr.msra.gmra.mxu1 %v12524_v11  ;;  %v4066_v11 = vperm.slane %v8603_v62, 3 }
 0x919   : > { %v12594_v9 = vpop.f32.mrf.mxu0  ;;  %v12596_v58 = vpop.f32.mrf.mxu1 }
 0x91e   : > { %v4015_v44 = vpop.f32.mrf.mxu2  ;;  %v4029_v56 = vpop.f32.mrf.mxu3 }
 0x91f   : > { %v4016_v61 = vadd.f32 %v4015_v44, %v3838_v18  ;;  %v4030_v40 = vadd.f32 %v4029_v56, %v3839_v21  ;;  %v3841_v44 = vperm.slane %v12604_v13, 3 }
 0x921   : > { %v12598_v57 = vpop.f32.mrf.mxu0  ;;  %v12600_v36 = vpop.f32.mrf.mxu1  ;;  %v4512_v41 = vpack.c.bf16 %v4030_v40, %v4016_v61 }
 0x923   : > { %v4619_v15 = vrot.slane %v4512_v41, 4 }
 0x926   : > { %v4017_v37 = vpop.f32.mrf.mxu2  ;;  %v4031_v59 = vpop.f32.mrf.mxu3 }
 0x927   : > { %v4018_v43 = vadd.f32 %v4017_v37, %v3838_v18  ;;  %v4032_v25 = vadd.f32 %v4031_v59, %v3839_v21 }
 0x929   : > { %v4268_v63 = vpop.f32.mrf.mxu0  ;;  %v4282_v53 = vpop.f32.mrf.mxu1  ;;  %v4514_v54 = vpack.c.bf16 %v4032_v25, %v4018_v43 }
 0x92a   : > { %v4269_v16 = vadd.f32 %v4268_v63, %v4065_v27  ;;  %v4283_v17 = vadd.f32 %v4282_v53, %v4066_v11  ;;  %v4044_v53 = vadd.f32 %v12594_v9, %v3840_v29  ;;  %v4060_v9 = vadd.f32 %v12600_v36, %v3841_v44 }
 0x92b   : > { %v4638_v56 = vrot.slane %v4514_v54, 4 }
 0x92c   : > { %v4517_v32 = vpack.c.bf16 %v4283_v17, %v4269_v16 }
 0x92e   : > { %v4240_v30 = vpop.f32.mrf.mxu2  ;;  %v4254_v23 = vpop.f32.mrf.mxu3  ;;  %v4822_v50 = vrot.slane %v4517_v32, 4 }
 0x92f   : > { %v4241_v1 = vadd.f32 %v4240_v30, %v4063_v7  ;;  %v4255_v35 = vadd.f32 %v4254_v23, %v4064_v8 }
 0x931   : > { %v4516_v48 = vpack.c.bf16 %v4255_v35, %v4241_v1  ;;  %v4270_v2 = vpop.f32.mrf.mxu0  ;;  %v4284_v38 = vpop.f32.mrf.mxu1  ;;  %v4046_v35 = vadd.f32 %v12598_v57, %v3840_v29 }
 0x932   : > { %v4271_v47 = vadd.f32 %v4270_v2, %v4065_v27  ;;  %v4285_v31 = vadd.f32 %v4284_v38, %v4066_v11 }
 0x933   : > { %v4622_v52 = vrot.slane %v4516_v48, 4  ;;  %4531 = vmatpush.bf16.xpose.msra.mxu2 %v4516_v48  ;;  %v4515_v16 = vpack.c.bf16 %v4060_v9, %v4046_v35 }
 0x934   : > { %v4519_v46 = vpack.c.bf16 %v4285_v31, %v4271_v47 }
 0x935   : > { %4631 = vmatpush.bf16.xpose.msrb.mxu0 %v4622_v52  ;;  %v4838_v48 = vrot.slane %v4515_v16, 4 }
 0x936   : > { %v4242_v49 = vpop.f32.mrf.mxu2  ;;  %v4256_v3 = vpop.f32.mrf.mxu3  ;;  %v4841_v59 = vrot.slane %v4519_v46, 4 }
 0x937   : > { %v4243_v19 = vadd.f32 %v4242_v49, %v4063_v7  ;;  %v4257_v26 = vadd.f32 %v4256_v3, %v4064_v8  ;;  %v4058_v7 = vadd.f32 %v12596_v58, %v3841_v44 }
 0x939   : > { %v4518_v0 = vpack.c.bf16 %v4257_v26, %v4243_v19  ;;  %v4513_v21 = vpack.c.bf16 %v4058_v7, %v4044_v53 }
 0x93a   : > { %v4493_v45 = vpop.f32.mrf.mxu0  ;;  %v4507_v24 = vpop.f32.mrf.mxu1  ;;  %4532 = vmatmul.bf16.vlgmr.msra.gmra.mxu2 %v4512_v41 }
 0x93b   : > { %v4641_v51 = vrot.slane %v4518_v0, 4  ;;  %v4494_v33 = vadd.f32 %v4493_v45, %v4290_v12  ;;  %v4508_v42 = vadd.f32 %v4507_v24, %v4291_v39  ;;  %4544 = vmatpush.bf16.xpose.msra.mxu3 %v4518_v0  ;;  %v4819_v17 = vrot.slane %v4513_v21, 4 }
 0x93c   : > { %4632 = vmatmul.bf16.vlgmr.msrb.gmra.mxu0 %v4619_v15 }
 0x93d   : > { %4733 = vmatpush.bf16.xpose.msra.mxu0 %v4517_v32  ;;  %v12619_v22 = vpack.c.bf16 %v4508_v42, %v4494_v33  ;;  %4650 = vmatpush.bf16.xpose.msrb.mxu1 %v4641_v51 }
 0x93f   : > { %v4465_v55 = vpop.f32.mrf.mxu2  ;;  %v4479_v60 = vpop.f32.mrf.mxu3 }
 0x940   : > { %v4466_v10 = vadd.f32 %v4465_v55, %v4288_v28  ;;  %v4480_v4 = vadd.f32 %v4479_v60, %v4289_v5 }
 0x942   : > { %v4520_v37 = vpack.c.bf16 %v4480_v4, %v4466_v10  ;;  %4545 = vmatmul.bf16.vlgmr.msra.gmra.mxu3 %v4514_v54  ;;  %v12631_v2 = vpop.f32.mrf.mxu0  ;;  %v12633_v38 = vpop.f32.mrf.mxu1 }
 0x944   : > { %v4683_v62 = vrot.slane %v4520_v37, 4  ;;  %v4582_v63 = vsel %vm4580_vm12, %v4520_v37, 0  ;;  %4651 = vmatmul.bf16.vlgmr.msrb.gmra.mxu1 %v4638_v56 }
 0x945   : > { %4831 = vmatpush.bf16.xpose.msrb.mxu0 %v4822_v50  ;;  %4746 = vmatpush.bf16.xpose.msra.mxu1 %v4519_v46 }
 0x946   : > { %4591 = vmatpush.bf16.msrb.mxu2 %v4582_v63  ;;  %v4688_v8 = vsel %vm4580_vm12, %v4683_v62, 0 }
 0x947   : > { %v4467_v27 = vpop.f32.mrf.mxu2  ;;  %v4481_v11 = vpop.f32.mrf.mxu3 }
 0x948   : > { %v4468_v13 = vadd.f32 %v4467_v27, %v4288_v28  ;;  %v4482_v18 = vadd.f32 %v4481_v11, %v4289_v5 }
 0x94a   : > { %4697 = vmatpush.bf16.msra.mxu2 %v4688_v8  ;;  %v4522_v30 = vpack.c.bf16 %v4482_v18, %v4468_v13 }
 0x94c   : > { %v4601_v23 = vsel %vm4580_vm12, %v4522_v30, 0  ;;  %4734 = vmatmul.bf16.vlgmr.msra.gmra.mxu0 %v4513_v21  ;;  %v4704_v1 = vrot.slane %v4522_v30, 4 }
 0x94d   : > { %4850 = vmatpush.bf16.xpose.msrb.mxu1 %v4841_v59  ;;  %4610 = vmatpush.bf16.msrb.mxu3 %v4601_v23 }
 0x94e   : > { %v4709_v58 = vsel %vm4580_vm12, %v4704_v1, 0 }
 0x951   : > { %4718 = vmatpush.bf16.msra.mxu3 %v4709_v58 }
 0x954   : > { %4747 = vmatmul.bf16.vlgmr.msra.gmra.mxu1 %v4515_v16 }
 0x95c   : > { %4832 = vmatmul.bf16.vlgmr.msrb.gmra.mxu0 %v4819_v17 }
 0x964   : > { %4851 = vmatmul.bf16.vlgmr.msrb.gmra.mxu1 %v4838_v48 }
 0x9b9   : > { %v4633_v61 = vpop.f32.mrf.mxu0 }
 0x9ba   : > { %v4656_v40 = vmul.f32 0.35355338, %v4633_v61 }
 0x9bc   : > { %v4658_v57 = vsel %vm4552_vm13, %v4656_v40, -inf }
 0x9bd   : > { %4659 = vmax.xlane.f32.xlu2 %v4658_v57  ;;  %v4533_v36 = vpop.f32.mrf.mxu2 }
 0x9be   : > { %v4550_v52 = vmul.f32 0.35355338, %v4533_v36 }
 0x9c0   : > { %v4553_v32 = vsel %vm4552_vm13, %v4550_v52, -inf }
 0x9c1   : > { %v4635_v41 = vpop.f32.mrf.mxu0  ;;  %v4652_v49 = vpop.f32.mrf.mxu1  ;;  %4554 = vmax.xlane.f32.xlu0 %v4553_v32 }
 0x9c2   : > { %v4657_v3 = vmul.f32 0.35355338, %v4652_v49 }
 0x9c4   : > { %v4661_v0 = vsel %vm4552_vm13, %v4657_v3, -inf }
 0x9c5   : > { %v4535_v19 = vpop.f32.mrf.mxu2  ;;  %v4546_v26 = vpop.f32.mrf.mxu3 }
 0x9c6   : > { %v4551_v47 = vmul.f32 0.35355338, %v4546_v26 }
 0x9c8   : > { %v4556_v31 = vsel %vm4552_vm13, %v4551_v47, -inf }
 0x9c9   : > { %v4654_v15 = vpop.f32.mrf.mxu1  ;;  %4557 = vmax.xlane.f32.xlu1 %v4556_v31  ;;  %v4735_v43 = vpop.f32.mrf.mxu0  ;;  %4662 = vmax.xlane.f32.xlu0 %v4661_v0 }
 0x9ca   : > { %v4752_v25 = vmul.f32 0.35355338, %v4735_v43 }
 0x9cc   : > { %v4754_v24 = vsel %vm4552_vm13, %v4752_v25, -inf }
 0x9cd   : > { %v4548_v45 = vpop.f32.mrf.mxu3 }
 0x9d1   : > { %v4748_v50 = vpop.f32.mrf.mxu1  ;;  %4755 = vmax.xlane.f32.xlu1 %v4754_v24  ;;  %v4737_v51 = vpop.f32.mrf.mxu0 }
 0x9d2   : > { %v4753_v33 = vmul.f32 0.35355338, %v4748_v50 }
 0x9d4   : > { %v4757_v42 = vsel %vm4552_vm13, %v4753_v33, -inf }
 0x9d5   : > { %4758 = vmax.xlane.f32.xlu2 %v4757_v42 }
 0x9d9   : > { %v4750_v46 = vpop.f32.mrf.mxu1  ;;  %v4833_v28 = vpop.f32.mrf.mxu0 }
 0x9da   : > { %v4856_v5 = vmul.f32 0.35355338, %v4833_v28  ;;  %v4496_v46 = vadd.f32 %v12631_v2, %v4290_v12  ;;  %v4510_v28 = vadd.f32 %v12633_v38, %v4291_v39  ;;  %v4883_v39 = vrot.slane %v12619_v22, 4 }
 0x9dc   : > { %v4858_v54 = vsel %vm4552_vm13, %v4856_v5, -inf }
 0x9dd   : > { %4859 = vmax.xlane.f32.xlu0 %v4858_v54 }
 0x9e1   : > { %v4835_v55 = vpop.f32.mrf.mxu0  ;;  %v4852_v60 = vpop.f32.mrf.mxu1 }
 0x9e2   : > { %v4857_v10 = vmul.f32 0.35355338, %v4852_v60  ;;  %v4523_v55 = vpack.c.bf16 %v4510_v28, %v4496_v46 }
 0x9e4   : > { %v4861_v4 = vsel %vm4552_vm13, %v4857_v10, -inf  ;;  %v4801_v12 = vsel %vm4580_vm12, %v4523_v55, 0 }
 0x9e5   : > { %4862 = vmax.xlane.f32.xlu1 %v4861_v4 }
 0x9e9   : > { %v4854_v29 = vpop.f32.mrf.mxu1 }
 0xa30   : > { %v4660_v44 = vpop.xlane.xlu2 %4659 }
 0xa31   : > { %v4664_v56 = vsub.f32 %v4656_v40, %v4660_v44 }
 0xa33   : > { %v4666_v37 = vmul.f32 1.442695, %v4664_v56  ;;  %v4888_v56 = vsel %vm4580_vm12, %v4883_v39, 0 }
 0xa34   : > { %v4555_v59 = vpop.xlane.xlu0 %4554 }
 0xa35   : > { %10663 = vpow2.f32 %v4666_v37  ;;  %v4559_v62 = vsub.f32 %v4550_v52, %v4555_v59  ;;  %v4904_v59 = vrot.slane %v4523_v55, 4 }
 0xa37   : > { %v4561_v63 = vmul.f32 1.442695, %v4559_v62 }
 0xa39   : > { %10665 = vpow2.f32 %v4561_v63 }
 0xa3b   : > { %v12643_v53 = vpop.eup %10663 }
 0xa3c   : > { %v4558_v7 = vpop.xlane.xlu1 %4557  ;;  %v4663_v8 = vpop.xlane.xlu0 %4662  ;;  %v4670_v27 = vsel %vm4552_vm13, %v12643_v53, 0.0 }
 0xa3d   : > { %v4560_v11 = vsub.f32 %v4551_v47, %v4558_v7  ;;  %v4665_v13 = vsub.f32 %v4657_v3, %v4663_v8  ;;  %4671 = vadd.xlane.f32.xlu1 %v4670_v27  ;;  %v10234_v7 = vld [vmem:[%s11773_s14 + $0x138] sm:$0xff]  ;;  %v10233_v27 = vld [vmem:[%s11773_s14 + $0x130] sm:$0xff] }
 0xa3e   : > { %5145 = vmatpush.bf16.msra.mxu0 %v10234_v7 }
 0xa3f   : > { %v10666_v18 = vpop.eup %10665  ;;  %v4563_v21 = vmul.f32 1.442695, %v4560_v11  ;;  %v4668_v30 = vmul.f32 1.442695, %v4665_v13 }
 0xa40   : > { %v4565_v23 = vsel %vm4552_vm13, %v10666_v18, 0.0 }
 0xa41   : > { %10667 = vpow2.f32 %v4563_v21  ;;  %4566 = vadd.xlane.f32.xlu2 %v4565_v23  ;;  %v10231_v23 = vld [vmem:[%s11773_s14 + $0x120] sm:$0xff] }
 0xa42   : > { %10669 = vpow2.f32 %v4668_v30  ;;  %5146 = vmatpush.bf16.msra.mxu0 %v10233_v27 }
 0xa44   : > { %v4756_v1 = vpop.xlane.xlu1 %4755 }
 0xa45   : > { %v4760_v35 = vsub.f32 %v4752_v25, %v4756_v1 }
 0xa47   : > { %v10668_v9 = vpop.eup %10667  ;;  %v4762_v58 = vmul.f32 1.442695, %v4760_v35 }
 0xa48   : > { %v12648_v16 = vpop.eup %10669  ;;  %v4759_v17 = vpop.xlane.xlu2 %4758  ;;  %v4568_v48 = vsel %vm4552_vm13, %v10668_v9, 0.0 }
 0xa49   : > { %10671 = vpow2.f32 %v4762_v58  ;;  %v4761_v61 = vsub.f32 %v4753_v33, %v4759_v17  ;;  %4569 = vadd.xlane.f32.xlu0 %v4568_v48  ;;  %v4673_v40 = vsel %vm4552_vm13, %v12648_v16, 0.0 }
 0xa4a   : > { %4674 = vadd.xlane.f32.xlu2 %v4673_v40  ;;  %v10230_v40 = vld [vmem:[%s11773_s14 + $0x118] sm:$0xff] }
 0xa4b   : > { %v4764_v57 = vmul.f32 1.442695, %v4761_v61 }
 0xa4d   : > { %10673 = vpow2.f32 %v4764_v57  ;;  %v10242_v57 = vld [vmem:[%s11773_s14 + $0x178] sm:$0xff] }
 0xa4e   : > { %5159 = vmatpush.bf16.msra.mxu1 %v10242_v57 }
 0xa4f   : > { %v12653_v36 = vpop.eup %10671 }
 0xa50   : > { %v4860_v52 = vpop.xlane.xlu0 %4859  ;;  %v4766_v32 = vsel %vm4552_vm13, %v12653_v36, 0.0 }
 0xa51   : > { %v4864_v41 = vsub.f32 %v4856_v5, %v4860_v52  ;;  %4767 = vadd.xlane.f32.xlu0 %v4766_v32  ;;  %v4782_v5 = vsel %vm4580_vm12, %v12619_v22, 0  ;;  %v4909_v22 = vsel %vm4580_vm12, %v4904_v59, 0  ;;  %v10241_v52 = vld [vmem:[%s11773_s14 + $0x170] sm:$0xff]  ;;  %v10228_v32 = vld [vmem:[%s11773_s14 + $0x108] sm:$0xff] }
 0xa52   : > { %5160 = vmatpush.bf16.msra.mxu1 %v10241_v52  ;;  %v10252_v59 = vld [vmem:[%s11773_s14 + $0x1c8] sm:$0xff] }
 0xa53   : > { %v12657_v49 = vpop.eup %10673  ;;  %v4866_v3 = vmul.f32 1.442695, %v4864_v41  ;;  %v10240_v41 = vld [vmem:[%s11773_s14 + $0x168] sm:$0xff] }
 0xa54   : > { %v4769_v19 = vsel %vm4552_vm13, %v12657_v49, 0.0 }
 0xa55   : > { %10675 = vpow2.f32 %v4866_v3  ;;  %4770 = vadd.xlane.f32.xlu1 %v4769_v19  ;;  %v10239_v3 = vld [vmem:[%s11773_s14 + $0x160] sm:$0xff]  ;;  %v10238_v19 = vld [vmem:[%s11773_s14 + $0x158] sm:$0xff] }
 0xa56   : > { %5161 = vmatpush.bf16.msra.mxu1 %v10240_v41 }
 0xa58   : > { %v4863_v26 = vpop.xlane.xlu1 %4862 }
 0xa59   : > { %v4865_v47 = vsub.f32 %v4857_v10, %v4863_v26  ;;  %v10250_v26 = vld [vmem:[%s11773_s14 + $0x1b8] sm:$0xff] }
 0xa5a   : > { %5162 = vmatpush.bf16.msra.mxu1 %v10239_v3 }
 0xa5b   : > { %v12661_v31 = vpop.eup %10675  ;;  %v4868_v0 = vmul.f32 1.442695, %v4865_v47  ;;  %v10237_v47 = vld [vmem:[%s11773_s14 + $0x150] sm:$0xff] }
 0xa5c   : > { %v4870_v15 = vsel %vm4552_vm13, %v12661_v31, 0.0 }
 0xa5d   : > { %10677 = vpow2.f32 %v4868_v0  ;;  %4871 = vadd.xlane.f32.xlu2 %v4870_v15  ;;  %v10236_v0 = vld [vmem:[%s11773_s14 + $0x148] sm:$0xff] }
 0xa5e   : > { %5163 = vmatpush.bf16.msra.mxu1 %v10238_v19  ;;  %v10248_v15 = vld [vmem:[%s11773_s14 + $0x1a8] sm:$0xff] }
 0xa62   : > { %5164 = vmatpush.bf16.msra.mxu1 %v10237_v47 }
 0xa63   : > { %v12665_v43 = vpop.eup %10677 }
 0xa64   : > { %v4873_v25 = vsel %vm4552_vm13, %v12665_v43, 0.0 }
 0xa65   : > { %4874 = vadd.xlane.f32.xlu0 %v4873_v25  ;;  %v10247_v25 = vld [vmem:[%s11773_s14 + $0x1a0] sm:$0xff] }
 0xa66   : > { %5165 = vmatpush.bf16.msra.mxu1 %v10236_v0 }
 0xab0   : > { %v4672_v33 = vpop.xlane.xlu1 %4671 }
 0xab4   : > { %v4567_v45 = vpop.xlane.xlu2 %4566 }
 0xab5   : > { %10679 = vrcp.f32 %v4567_v45 }
 0xabb   : > { %v10680_v24 = vpop.eup %10679 }
 0xabc   : > { %v4573_v50 = vmul.f32 %v10680_v24, %v10666_v18  ;;  %v4570_v51 = vpop.xlane.xlu0 %4569  ;;  %v10232_v18 = vld [vmem:[%s11773_s14 + $0x128] sm:$0xff]  ;;  %v10246_v24 = vld [vmem:[%s11773_s14 + $0x198] sm:$0xff] }
 0xabd   : > { %10681 = vrcp.f32 %v4570_v51  ;;  %v4675_v10 = vpop.xlane.xlu2 %4674  ;;  %5147 = vmatpush.bf16.msra.mxu0 %v10232_v18  ;;  %v10245_v51 = vld [vmem:[%s11773_s14 + $0x190] sm:$0xff] }
 0xabe   : > { %v4575_v42 = vpack.c.bf16 %v4573_v50, %v4573_v50  ;;  %10683 = vrcp.f32 %v4672_v33  ;;  %v10258_v50 = vld [vmem:[%s11773_s14 + $0x1f8] sm:$0xff]  ;;  %v10257_v33 = vld [vmem:[%s11773_s14 + $0x1f0] sm:$0xff] }
 0xabf   : > { %10685 = vrcp.f32 %v4675_v10 }
 0xac0   : > { %8994 = vmatmul.msk.bf16.vlgmr.msrb.gmra.mxu2 %vm4552_vm13, %v4575_v42 }
 0xac1   : > { %4791 = vmatpush.bf16.msrb.mxu2 %v4782_v5  ;;  %5148 = vmatpush.bf16.msra.mxu0 %v10231_v23  ;;  %v10244_v5 = vld [vmem:[%s11773_s14 + $0x188] sm:$0xff] }
 0xac3   : > { %v10682_v54 = vpop.eup %10681 }
 0xac4   : > { %v4574_v60 = vmul.f32 %v10682_v54, %v10668_v9  ;;  %v10684_v29 = vpop.eup %10683  ;;  %v4768_v38 = vpop.xlane.xlu0 %4767  ;;  %v10256_v54 = vld [vmem:[%s11773_s14 + $0x1e8] sm:$0xff] }
 0xac5   : > { %v4678_v6 = vmul.f32 %v10684_v29, %v12643_v53  ;;  %v10686_v44 = vpop.eup %10685  ;;  %10687 = vrcp.f32 %v4768_v38  ;;  %5149 = vmatpush.bf16.msra.mxu0 %v10230_v40  ;;  %v10255_v29 = vld [vmem:[%s11773_s14 + $0x1e0] sm:$0xff]  ;;  %v10253_v38 = vld [vmem:[%s11773_s14 + $0x1d0] sm:$0xff] }
 0xac6   : > { %v4576_v4 = vpack.c.bf16 %v4574_v60, %v4574_v60  ;;  %v4679_v37 = vmul.f32 %v10686_v44, %v12648_v16 }
 0xac7   : > { %v4680_v2 = vpack.c.bf16 %v4678_v6, %v4678_v6 }
 0xac8   : > { %8995 = vmatmul.msk.bf16.vlgmr.msrb.gmra.mxu3 %vm4552_vm13, %v4576_v4  ;;  %v4681_v62 = vpack.c.bf16 %v4679_v37, %v4679_v37  ;;  %v4771_v63 = vpop.xlane.xlu1 %4770  ;;  %v10243_v4 = vld [vmem:[%s11773_s14 + $0x180] sm:$0xff] }
 0xac9   : > { %4810 = vmatpush.bf16.msrb.mxu3 %v4801_v12  ;;  %10689 = vrcp.f32 %v4771_v63 }
 0xacb   : > { %v10688_v53 = vpop.eup %10687 }
 0xacc   : > { %v4774_v8 = vmul.f32 %v10688_v53, %v12653_v36  ;;  %v10229_v36 = vld [vmem:[%s11773_s14 + $0x110] sm:$0xff] }
 0xacd   : > { %5150 = vmatpush.bf16.msra.mxu0 %v10229_v36 }
 0xace   : > { %v4776_v11 = vpack.c.bf16 %v4774_v8, %v4774_v8 }
 0xacf   : > { %v10690_v21 = vpop.eup %10689 }
 0xad0   : > { %8996 = vmatmul.msk.bf16.vlgmr.msra.gmra.mxu2 %vm4552_vm13, %v4680_v2  ;;  %v4872_v13 = vpop.xlane.xlu2 %4871  ;;  %v4775_v30 = vmul.f32 %v10690_v21, %v12657_v49  ;;  %v10227_v49 = vld [vmem:[%s11773_s14 + $0x100] sm:$0xff]  ;;  %v10254_v2 = vld [vmem:[%s11773_s14 + $0x1d8] sm:$0xff] }
 0xad1   : > { %4897 = vmatpush.bf16.msra.mxu2 %v4888_v56  ;;  %10691 = vrcp.f32 %v4872_v13  ;;  %5151 = vmatpush.bf16.msra.mxu0 %v10228_v32  ;;  %v10591_v32 = vld [vmem:[%s11744_s2 + $0x1] ss:$0 sm:$0xff] }
 0xad2   : > { %v4777_v1 = vpack.c.bf16 %v4775_v30, %v4775_v30 }
 0xad5   : > { %5152 = vmatpush.bf16.msra.mxu0 %v10227_v49 }
 0xad7   : > { %v10692_v9 = vpop.eup %10691 }
 0xad8   : > { %8997 = vmatmul.msk.bf16.vlgmr.msra.gmra.mxu3 %vm4552_vm13, %v4681_v62  ;;  %v4875_v35 = vpop.xlane.xlu0 %4874  ;;  %v4878_v58 = vmul.f32 %v10692_v9, %v12661_v31  ;;  %v10249_v31 = vld [vmem:[%s11773_s14 + $0x1b0] sm:$0xff] }
 0xad9   : > { %4918 = vmatpush.bf16.msra.mxu3 %v4909_v22  ;;  %10693 = vrcp.f32 %v4875_v35  ;;  %v10251_v22 = vld [vmem:[%s11773_s14 + $0x1c0] sm:$0xff] }
 0xada   : > { %v4880_v16 = vpack.c.bf16 %v4878_v58, %v4878_v58 }
 0xadf   : > { %v10694_v17 = vpop.eup %10693 }
 0xae0   : > { %8998 = vmatmul.msk.bf16.vlgmr.msrb.gmra.mxu2 %vm4552_vm13, %v4776_v11  ;;  %v4879_v48 = vmul.f32 %v10694_v17, %v12665_v43  ;;  %v10235_v43 = vld [vmem:[%s11773_s14 + $0x140] sm:$0xff] }
 0xae1   : > { %5173 = vmatpush.bf16.msrb.mxu2 %v10250_v26  ;;  %5166 = vmatpush.bf16.msra.mxu1 %v10235_v43 }
 0xae2   : > { %v4881_v61 = vpack.c.bf16 %v4879_v48, %v4879_v48 }
 0xae5   : > { %5174 = vmatpush.bf16.msrb.mxu2 %v10249_v31 }
 0xae8   : > { %8999 = vmatmul.msk.bf16.vlgmr.msrb.gmra.mxu3 %vm4552_vm13, %v4777_v1 }
 0xae9   : > { %5175 = vmatpush.bf16.msrb.mxu2 %v10248_v15  ;;  %5187 = vmatpush.bf16.msrb.mxu3 %v10258_v50 }
 0xaed   : > { %5176 = vmatpush.bf16.msrb.mxu2 %v10247_v25  ;;  %5188 = vmatpush.bf16.msrb.mxu3 %v10257_v33 }
 0xaf0   : > { %9000 = vmatmul.msk.bf16.vlgmr.msra.gmra.mxu2 %vm4552_vm13, %v4880_v16 }
 0xaf1   : > { %5177 = vmatpush.bf16.msrb.mxu2 %v10246_v24  ;;  %5189 = vmatpush.bf16.msrb.mxu3 %v10256_v54 }
 0xaf5   : > { %5178 = vmatpush.bf16.msrb.mxu2 %v10245_v51  ;;  %5190 = vmatpush.bf16.msrb.mxu3 %v10255_v29  ;;  %v10266_v29 = vld [vmem:[%s11778_s6 + $0x78] sm:$0xff] }
 0xaf6   : > { %5311 = vmatpush.bf16.msrb.mxu0 %v10266_v29 }
 0xaf8   : > { %9001 = vmatmul.msk.bf16.vlgmr.msra.gmra.mxu3 %vm4552_vm13, %v4881_v61 }
 0xaf9   : > { %5179 = vmatpush.bf16.msrb.mxu2 %v10244_v5  ;;  %5191 = vmatpush.bf16.msrb.mxu3 %v10254_v2  ;;  %v10262_v2 = vld [vmem:[%s11778_s6 + $0x58] sm:$0xff] }
 0xafd   : > { %5180 = vmatpush.bf16.msrb.mxu2 %v10243_v4  ;;  %5192 = vmatpush.bf16.msrb.mxu3 %v10253_v38  ;;  %v10261_v38 = vld [vmem:[%s11778_s6 + $0x50] sm:$0xff] }
 0xb01   : > { %5193 = vmatpush.bf16.msrb.mxu3 %v10252_v59 }
 0xb05   : > { %5194 = vmatpush.bf16.msrb.mxu3 %v10251_v22 }
 0xb43   : > { %v4593_v45 = vpop.f32.mrf.mxu2 }
 0xb44   : > { %v4616_v42 = vpack.c.bf16 %v4593_v45, %v4593_v45 }
 0xb46   : > { %v4934_v60 = vunpack.c.l.b16 %v4616_v42 }
 0xb4b   : > { %v4595_v46 = vpop.f32.mrf.mxu2  ;;  %v4612_v28 = vpop.f32.mrf.mxu3 }
 0xb4c   : > { %v4617_v55 = vpack.c.bf16 %v4612_v28, %v4612_v28 }
 0xb4e   : > { %v4938_v10 = vunpack.c.l.b16 %v4617_v55 }
 0xb50   : > { %v4945_v12 = vpack.c.b16 %v4938_v10, %v4934_v60 }
 0xb52   : > { %5153 = vmatmul.bf16.vlgmr.msra.gmra.mxu0 %v4945_v12  ;;  %v10265_v12 = vld [vmem:[%s11778_s6 + $0x70] sm:$0xff] }
 0xb53   : > { %v4614_v6 = vpop.f32.mrf.mxu3  ;;  %v4699_v39 = vpop.f32.mrf.mxu2  ;;  %5312 = vmatpush.bf16.msrb.mxu0 %v10265_v12  ;;  %v10269_v12 = vld [vmem:[%s11783_s29 + $0x50] sm:$0xff] }
 0xb54   : > { %v4724_v44 = vpack.c.bf16 %v4699_v39, %v4699_v39  ;;  %v10264_v6 = vld [vmem:[%s11778_s6 + $0x68] sm:$0xff]  ;;  %v10263_v39 = vld [vmem:[%s11778_s6 + $0x60] sm:$0xff] }
 0xb56   : > { %v4935_v63 = vunpack.c.l.b16 %v4724_v44 }
 0xb57   : > { %5313 = vmatpush.bf16.msrb.mxu0 %v10264_v6 }
 0xb5b   : > { %v4701_v56 = vpop.f32.mrf.mxu2  ;;  %v4720_v37 = vpop.f32.mrf.mxu3  ;;  %5314 = vmatpush.bf16.msrb.mxu0 %v10263_v39 }
 0xb5c   : > { %v4725_v62 = vpack.c.bf16 %v4720_v37, %v4720_v37  ;;  %v10260_v56 = vld [vmem:[%s11778_s6 + $0x48] sm:$0xff] }
 0xb5e   : > { %v4939_v53 = vunpack.c.l.b16 %v4725_v62  ;;  %v10259_v62 = vld [vmem:[%s11778_s6 + $0x40] sm:$0xff] }
 0xb5f   : > { %5315 = vmatpush.bf16.msrb.mxu0 %v10262_v2 }
 0xb60   : > { %v4946_v7 = vpack.c.b16 %v4939_v53, %v4935_v63 }
 0xb62   : > { %5167 = vmatmul.bf16.vlgmr.msra.gmra.mxu1 %v4946_v7 }
 0xb63   : > { %v4722_v8 = vpop.f32.mrf.mxu3  ;;  %v4793_v27 = vpop.f32.mrf.mxu2  ;;  %5316 = vmatpush.bf16.msrb.mxu0 %v10261_v38 }
 0xb64   : > { %v4816_v11 = vpack.c.bf16 %v4793_v27, %v4793_v27 }
 0xb66   : > { %v4936_v30 = vunpack.c.l.b16 %v4816_v11 }
 0xb67   : > { %5317 = vmatpush.bf16.msrb.mxu0 %v10260_v56 }
 0xb6b   : > { %v4795_v13 = vpop.f32.mrf.mxu2  ;;  %v4812_v18 = vpop.f32.mrf.mxu3  ;;  %5318 = vmatpush.bf16.msrb.mxu0 %v10259_v62 }
 0xb6c   : > { %v4817_v21 = vpack.c.bf16 %v4812_v18, %v4812_v18 }
 0xb6e   : > { %v4940_v23 = vunpack.c.l.b16 %v4817_v21 }
 0xb70   : > { %v4947_v1 = vpack.c.b16 %v4940_v23, %v4936_v30 }
 0xb72   : > { %5181 = vmatmul.bf16.vlgmr.msrb.gmra.mxu2 %v4947_v1 }
 0xb73   : > { %v4814_v35 = vpop.f32.mrf.mxu3  ;;  %v4899_v9 = vpop.f32.mrf.mxu2 }
 0xb74   : > { %v4924_v58 = vpack.c.bf16 %v4899_v9, %v4899_v9 }
 0xb76   : > { %v4937_v61 = vunpack.c.l.b16 %v4924_v58  ;;  %v10592_v58 = vld [vmem:[%s11749_s25 + $0x1] ss:$0 sm:$0xff] }
 0xb7b   : > { %v4901_v16 = vpop.f32.mrf.mxu2  ;;  %v4920_v17 = vpop.f32.mrf.mxu3 }
 0xb7c   : > { %v4925_v48 = vpack.c.bf16 %v4920_v17, %v4920_v17 }
 0xb7e   : > { %v4941_v40 = vunpack.c.l.b16 %v4925_v48 }
 0xb80   : > { %v4948_v57 = vpack.c.b16 %v4941_v40, %v4937_v61  ;;  %v10593_v61 = vld [vmem:[%s11776_s4 + $0x1] ss:$0 sm:$0xff] }
 0xb82   : > { %5195 = vmatmul.bf16.vlgmr.msrb.gmra.mxu3 %v4948_v57 }
 0xb83   : > { %v4922_v36 = vpop.f32.mrf.mxu3 }
 0xbcf   : > { %v5154_v52 = vpop.f32.mrf.mxu0 }
 0xbd0   : > { %v5155_v3 = vadd.f32 %v10591_v32, %v5154_v52 }
 0xbd7   : > { %v5156_v47 = vpop.f32.mrf.mxu0 }
 0xbd8   : > { %v5157_v43 = vadd.f32 %v10591_v32, %v5156_v47  ;;  %v10274_v47 = vld [vmem:[%s11783_s29 + $0x78] sm:$0xff] }
 0xbd9   : > { %5457 = vmatpush.bf16.msrb.mxu1 %v10274_v47 }
 0xbdf   : > { %v5168_v41 = vpop.f32.mrf.mxu1 }
 0xbe0   : > { %v5169_v19 = vadd.f32 %v5168_v41, %v5155_v3 }
 0xbe7   : > { %v5170_v15 = vpop.f32.mrf.mxu1 }
 0xbe8   : > { %v5171_v24 = vadd.f32 %v5170_v15, %v5157_v43  ;;  %v10273_v43 = vld [vmem:[%s11783_s29 + $0x70] sm:$0xff] }
 0xbe9   : > { %5458 = vmatpush.bf16.msrb.mxu1 %v10273_v43 }
 0xbf5   : > { %v5182_v49 = vpop.f32.mrf.mxu2 }
 0xbf6   : > { %v5183_v26 = vadd.f32 %v5182_v49, %v5169_v19  ;;  %v10594_v49 = vld [vmem:[%s11781_s24 + $0x1] ss:$0 sm:$0xff] }
 0xbfd   : > { %v5184_v45 = vpop.f32.mrf.mxu2 }
 0xbfe   : > { %v5185_v50 = vadd.f32 %v5184_v45, %v5171_v24 }
 0xc05   : > { %v5196_v31 = vpop.f32.mrf.mxu3 }
 0xc06   : > { %v5197_v0 = vadd.f32 %v5196_v31, %v5183_v26 }
 0xc08   : > { %v12729_v25 = vadd.f32 %v5197_v0, %v12363_v20 }
 0xc0a   : > { %5207 = vadd.xlane.f32.xlu1 %v12729_v25 }
 0xc0d   : > { %v5198_v51 = vpop.f32.mrf.mxu3 }
 0xc0e   : > { %v5199_v33 = vadd.f32 %v5198_v51, %v5185_v50  ;;  %v10272_v51 = vld [vmem:[%s11783_s29 + $0x68] sm:$0xff] }
 0xc0f   : > { %5459 = vmatpush.bf16.msrb.mxu1 %v10272_v51 }
 0xc10   : > { %v12733_v42 = vadd.f32 %v5199_v33, %v12367_v14 }
 0xc12   : > { %5209 = vadd.xlane.f32.xlu2 %v12733_v42 }
 0xc7d   : > { %v5208_v46 = vpop.xlane.xlu1 %5207 }
 0xc7e   : > { %v5211_v28 = vmul.f32 0.03125, %v5208_v46 }
 0xc80   : > { %v5213_v20 = vsub.f32 %v12729_v25, %v5211_v28  ;;  %v10271_v28 = vld [vmem:[%s11783_s29 + $0x60] sm:$0xff] }
 0xc81   : > { %5460 = vmatpush.bf16.msrb.mxu1 %v10271_v28 }
 0xc82   : > { %v5215_v5 = vsel %vm1683_vm0, %v5213_v20, 0.0 }
 0xc83   : > { %v5217_v54 = vmul.f32 %v5215_v5, %v5215_v5 }
 0xc85   : > { %v5210_v55 = vpop.xlane.xlu2 %5209  ;;  %5219 = vadd.xlane.f32.xlu0 %v5217_v54 }
 0xc86   : > { %v5212_v60 = vmul.f32 0.03125, %v5210_v55 }
 0xc88   : > { %v5214_v14 = vsub.f32 %v12733_v42, %v5212_v60  ;;  %v10270_v60 = vld [vmem:[%s11783_s29 + $0x58] sm:$0xff] }
 0xc89   : > { %5461 = vmatpush.bf16.msrb.mxu1 %v10270_v60 }
 0xc8a   : > { %v5216_v10 = vsel %vm1683_vm0, %v5214_v14, 0.0 }
 0xc8b   : > { %v5218_v4 = vmul.f32 %v5216_v10, %v5216_v10 }
 0xc8d   : > { %5221 = vadd.xlane.f32.xlu1 %v5218_v4  ;;  %5462 = vmatpush.bf16.msrb.mxu1 %v10269_v12 }
 0xcf8   : > { %v5220_v44 = vpop.xlane.xlu0 %5219 }
 0xcf9   : > { %v5223_v37 = vmul.f32 0.03125, %v5220_v44 }
 0xcfb   : > { %v5225_v59 = vadd.f32 1e-05, %v5223_v37 }
 0xcfd   : > { %10695 = vrsqrt.f32 %v5225_v59  ;;  %vm5233_vm15 = vweird.f32 %v5225_v59 }
 0xd00   : > { %v5222_v63 = vpop.xlane.xlu1 %5221 }
 0xd01   : > { %v5224_v53 = vmul.f32 0.03125, %v5222_v63 }
 0xd03   : > { %v10696_v22 = vpop.eup %10695  ;;  %v5226_v7 = vadd.f32 1e-05, %v5224_v53 }
 0xd04   : > { %v5228_v8 = vmul.f32 %v10696_v22, %v5225_v59  ;;  %vm5234_vm14 = vweird.f32 %v10696_v22  ;;  %v10268_v59 = vld [vmem:[%s11783_s29 + $0x48] sm:$0xff] }
 0xd05   : > { %10697 = vrsqrt.f32 %v5226_v7  ;;  %vm5235_vm1 = vmor %vm5233_vm15, %vm5234_vm14  ;;  %vm5243_vm3 = vweird.f32 %v5226_v7  ;;  %5463 = vmatpush.bf16.msrb.mxu1 %v10268_v59  ;;  %v10306_v59 = vld [vmem:[%s11761_s28 + $0x2f4] sm:$0xf0] }
 0xd06   : > { %v5229_v27 = vmul.f32 %v10696_v22, %v5228_v8 }
 0xd08   : > { %v5230_v11 = vmul.f32 0.5, %v5229_v27 }
 0xd0a   : > { %v5231_v13 = vsub.f32 1.5, %v5230_v11  ;;  %v10267_v11 = vld [vmem:[%s11783_s29 + $0x40] sm:$0xff] }
 0xd0b   : > { %v10698_v18 = vpop.eup %10697  ;;  %5464 = vmatpush.bf16.msrb.mxu1 %v10267_v11  ;;  %v9496_v11 = vld [vmem:[%s11761_s28 + $0x2d0] sm:$0xf0] }
 0xd0c   : > { %v5232_v21 = vmul.f32 %v10696_v22, %v5231_v13  ;;  %v5238_v30 = vmul.f32 %v10698_v18, %v5226_v7  ;;  %vm5244_vm2 = vweird.f32 %v10698_v18 }
 0xd0d   : > { %vm5245_vm4 = vmor %vm5243_vm3, %vm5244_vm2 }
 0xd0e   : > { %v5239_v23 = vmul.f32 %v10698_v18, %v5238_v30  ;;  %v5236_v1 = vsel %vm5235_vm1, %v10696_v22, %v5232_v21 }
 0xd0f   : > { %v5247_v16 = vmul.f32 %v5236_v1, %v5215_v5 }
 0xd10   : > { %v5240_v35 = vmul.f32 0.5, %v5239_v23 }
 0xd11   : > { %v5252_v40 = vmul.f32 %v10592_v58, %v5247_v16 }
 0xd12   : > { %v5241_v9 = vsub.f32 1.5, %v5240_v35 }
 0xd13   : > { %v5257_v52 = vadd.f32 %v10593_v61, %v5252_v40 }
 0xd14   : > { %v5242_v17 = vmul.f32 %v10698_v18, %v5241_v9 }
 0xd16   : > { %v5246_v48 = vsel %vm5245_vm4, %v10698_v18, %v5242_v17 }
 0xd17   : > { %v5248_v57 = vmul.f32 %v5246_v48, %v5216_v10 }
 0xd19   : > { %v5253_v36 = vmul.f32 %v10592_v58, %v5248_v57 }
 0xd1b   : > { %v5258_v32 = vadd.f32 %v10593_v61, %v5253_v36 }
 0xd1d   : > { %v5259_v41 = vpack.c.bf16 %v5258_v32, %v5257_v52 }
 0xd1f   : > { %5319 = vmatmul.bf16.vlgmr.msrb.gmra.mxu0 %v5259_v41 }
 0xd9c   : > { %v5320_v3 = vpop.f32.mrf.mxu0 }
 0xd9d   : > { %v12753_v19 = vadd.f32 %v10594_v49, %v5320_v3 }
 0xd9f   : > { %v12756_v26 = vmul.f32 0.70710677, %v12753_v19 }
 0xda1   : > { %v5329_v31 = vand.u32 2147483647, %v12756_v26  ;;  %vm5395_vm15 = vcmp.ge.f32.partialorder %v12756_v26, 0.0  ;;  %v10595_v26 = vld [vmem:[%s11754_s21 + $0x1] ss:$0 sm:$0xff] }
 0xda3   : > { %v5331_v0 = vmul.f32 0.3275911, %v5329_v31  ;;  %v5383_v44 = vsub.f32 0.0, %v5329_v31 }
 0xda4   : > { %v5322_v15 = vpop.f32.mrf.mxu0 }
 0xda5   : > { %v5333_v45 = vadd.f32 1.0, %v5331_v0  ;;  %v12761_v24 = vadd.f32 %v10594_v49, %v5322_v15  ;;  %v5385_v22 = vmul.f32 %v5383_v44, %v5329_v31  ;;  %v10303_v44 = vld [vmem:[%s11761_s28 + $0x2e4] sm:$0xf] }
 0xda7   : > { %10699 = vrcp.f32 %v5333_v45  ;;  %v12764_v50 = vmul.f32 0.70710677, %v12761_v24  ;;  %v5346_v14 = vand.u32 2147483648, %v5333_v45  ;;  %v5344_v4 = vand.u32 2147483647, %v5333_v45 }
 0xda8   : > { %vm5340_vm6 = vweird.f32 %v5333_v45  ;;  %v5387_v30 = vmul.f32 1.442695, %v5385_v22  ;;  %v5326_v60 = vmul.f32 0.5, %v12761_v24  ;;  %v9494_v22 = vld [vmem:[%s11761_s28 + $0x2c0] sm:$0xf] }
 0xda9   : > { %v5330_v33 = vand.u32 2147483647, %v12764_v50  ;;  %v5347_v6 = vor.u32 1.1754944e-38, %v5346_v14  ;;  %vm5345_vm8 = vcmp.eq.f32.partialorder %v5344_v4, 8.507059e+37  ;;  %vm5396_vm1 = vcmp.ge.f32.partialorder %v12764_v50, 0.0 }
 0xdab   : > { %v5332_v46 = vmul.f32 0.3275911, %v5330_v33  ;;  %v5384_v9 = vsub.f32 0.0, %v5330_v33 }
 0xdad   : > { %v10700_v20 = vpop.eup %10699  ;;  %v5334_v54 = vadd.f32 1.0, %v5332_v46  ;;  %v5386_v61 = vmul.f32 %v5384_v9, %v5330_v33  ;;  %v9478_v9 = vld [vmem:[%s11761_s28 + $0x2a0] sm:$0xf] }
 0xdae   : > { %v5336_v5 = vmul.f32 %v10700_v20, %v5333_v45  ;;  %vm5341_vm5 = vweird.f32 %v10700_v20 }
 0xdaf   : > { %10701 = vrcp.f32 %v5334_v54  ;;  %vm5342_vm7 = vmor %vm5340_vm6, %vm5341_vm5  ;;  %v5361_v53 = vand.u32 2147483648, %v5334_v54  ;;  %v5359_v8 = vand.u32 2147483647, %v5334_v54  ;;  %vm5355_vm10 = vweird.f32 %v5334_v54 }
 0xdb0   : > { %v5337_v55 = vsub.f32 1.0, %v5336_v5  ;;  %10703 = vpow2.f32 %v5387_v30  ;;  %v5389_v32 = vmul.f32 1.442695, %v5386_v61  ;;  %v10302_v30 = vld [vmem:[%s11761_s28 + $0x2d4] sm:$0xf0] }
 0xdb1   : > { %v5362_v21 = vor.u32 1.1754944e-38, %v5361_v53  ;;  %vm5360_vm14 = vcmp.eq.f32.partialorder %v5359_v8, 8.507059e+37  ;;  %v10304_v53 = vld [vmem:[%s11761_s28 + $0x2ec] sm:$0xf]  ;;  %v10301_v8 = vld [vmem:[%s11761_s28 + $0x2cc] sm:$0xf0] }
 0xdb2   : > { %v5338_v10 = vmul.f32 %v10700_v20, %v5337_v55  ;;  %10705 = vpow2.f32 %v5389_v32  ;;  %v5325_v55 = vmul.f32 0.5, %v12753_v19  ;;  %v9486_v61 = vld [vmem:[%s11761_s28 + $0x2a8] sm:$0xf] }
 0xdb4   : > { %v5339_v29 = vadd.f32 %v10700_v20, %v5338_v10 }
 0xdb5   : > { %v10702_v39 = vpop.eup %10701 }
 0xdb6   : > { %v5343_v2 = vsel %vm5342_vm7, %v10700_v20, %v5339_v29  ;;  %v5351_v56 = vmul.f32 %v10702_v39, %v5334_v54  ;;  %vm5356_vm9 = vweird.f32 %v10702_v39  ;;  %v10704_v41 = vpop.eup %10703 }
 0xdb7   : > { %v5348_v38 = vsel %vm5345_vm8, %v5347_v6, %v5343_v2  ;;  %vm5357_vm11 = vmor %vm5355_vm10, %vm5356_vm9  ;;  %v9510_v2 = vld [vmem:[%s11761_s28 + $0x2e0] sm:$0xf] }
 0xdb8   : > { %v5365_v37 = vmul.f32 1.0614054, %v5348_v38  ;;  %v5352_v62 = vsub.f32 1.0, %v5351_v56  ;;  %v10706_v51 = vpop.eup %10705 }
 0xdba   : > { %v5367_v63 = vadd.f32 -1.4531521, %v5365_v37  ;;  %v5353_v7 = vmul.f32 %v10702_v39, %v5352_v62  ;;  %v9518_v37 = vld [vmem:[%s11761_s28 + $0x2e8] sm:$0xf] }
 0xdbc   : > { %v5369_v27 = vmul.f32 %v5367_v63, %v5348_v38  ;;  %v5354_v13 = vadd.f32 %v10702_v39, %v5353_v7  ;;  %v9519_v63 = vor.u32 %v10306_v59, %v9518_v37 }
 0xdbe   : > { %v5371_v18 = vadd.f32 1.4214138, %v5369_v27  ;;  %v5358_v23 = vsel %vm5357_vm11, %v10702_v39, %v5354_v13  ;;  %v10299_v27 = vld [vmem:[%s11761_s28 + $0x2c4] sm:$0xf]  ;;  %5941 = vmatpush.bf16.msra.mxu0 %v9519_v63  ;;  %v9495_v13 = vor.u32 %v10301_v8, %v9494_v22  ;;  %v9432_v8 = vld [vmem:[%s11761_s28 + $0x250] sm:$0xf0] }
 0xdbf   : > { %v5363_v35 = vsel %vm5360_vm14, %v5362_v21, %v5358_v23  ;;  %v9502_v21 = vld [vmem:[%s11761_s28 + $0x2c8] sm:$0xf]  ;;  %v10300_v23 = vld [vmem:[%s11761_s28 + $0x2cc] sm:$0xf]  ;;  %v10283_v22 = vld [vmem:[%s11761_s28 + $0x244] sm:$0xf] }
 0xdc0   : > { %v5373_v1 = vmul.f32 %v5371_v18, %v5348_v38  ;;  %v5366_v58 = vmul.f32 1.0614054, %v5363_v35  ;;  %v9499_v18 = vor.u32 %v10299_v27, %v9496_v11  ;;  %v9438_v27 = vld [vmem:[%s11761_s28 + $0x248] sm:$0xf]  ;;  %v10286_v11 = vld [vmem:[%s11761_s28 + $0x254] sm:$0xf0] }
 0xdc2   : > { %v5375_v16 = vadd.f32 -0.28449672, %v5373_v1  ;;  %v5368_v17 = vadd.f32 -1.4531521, %v5366_v58  ;;  %v9503_v1 = vor.u32 %v10302_v30, %v9502_v21  ;;  %v10297_v58 = vld [vmem:[%s11761_s28 + $0x2ac] sm:$0xf0] }
 0xdc3   : > { %v10284_v21 = vld [vmem:[%s11761_s28 + $0x24c] sm:$0xf]  ;;  %v9440_v30 = vld [vmem:[%s11761_s28 + $0x258] sm:$0xf0] }
 0xdc4   : > { %v5377_v48 = vmul.f32 %v5375_v16, %v5348_v38  ;;  %v5370_v40 = vmul.f32 %v5368_v17, %v5363_v35  ;;  %v10295_v17 = vld [vmem:[%s11761_s28 + $0x2a4] sm:$0xf]  ;;  %5942 = vmatpush.bf16.msra.mxu0 %v9503_v1  ;;  %v9414_v1 = vld [vmem:[%s11761_s28 + $0x220] sm:$0xf] }
 0xdc6   : > { %v5379_v57 = vadd.f32 0.2548296, %v5377_v48  ;;  %v5372_v36 = vadd.f32 1.4214138, %v5370_v40  ;;  %v9480_v48 = vld [vmem:[%s11761_s28 + $0x2b0] sm:$0xf0]  ;;  %v9479_v40 = vor.u32 %v10297_v58, %v9478_v9 }
 0xdc7   : > { %v9483_v32 = vor.u32 %v10295_v17, %v9480_v48  ;;  %v10279_v9 = vld [vmem:[%s11761_s28 + $0x224] sm:$0xf]  ;;  %v9422_v17 = vld [vmem:[%s11761_s28 + $0x228] sm:$0xf]  ;;  %v10282_v48 = vld [vmem:[%s11761_s28 + $0x234] sm:$0xf0] }
 0xdc8   : > { %v5381_v52 = vmul.f32 %v5379_v57, %v5348_v38  ;;  %v5374_v49 = vmul.f32 %v5372_v36, %v5363_v35  ;;  %v10305_v38 = vld [vmem:[%s11761_s28 + $0x2ec] sm:$0xf0]  ;;  %v10298_v57 = vld [vmem:[%s11761_s28 + $0x2b4] sm:$0xf0]  ;;  %v10296_v36 = vld [vmem:[%s11761_s28 + $0x2ac] sm:$0xf] }
 0xdc9   : > { %v9511_v56 = vor.u32 %v10305_v38, %v9510_v2 }
 0xdca   : > { %v5391_v3 = vmul.f32 %v10704_v41, %v5381_v52  ;;  %v5376_v47 = vadd.f32 -0.28449672, %v5374_v49  ;;  %v9488_v52 = vld [vmem:[%s11761_s28 + $0x2b8] sm:$0xf0]  ;;  %v9487_v41 = vor.u32 %v10298_v57, %v9486_v61  ;;  %v9462_v49 = vld [vmem:[%s11761_s28 + $0x280] sm:$0xf] }
 0xdcb   : > { %5913 = vmatpush.bf16.msra.mxu2 %v9511_v56  ;;  %v10280_v57 = vld [vmem:[%s11761_s28 + $0x22c] sm:$0xf] }
 0xdcc   : > { %v5393_v31 = vsub.f32 1.0, %v5391_v3  ;;  %v5378_v0 = vmul.f32 %v5376_v47, %v5363_v35  ;;  %v10293_v3 = vld [vmem:[%s11761_s28 + $0x28c] sm:$0xf0]  ;;  %v10291_v47 = vld [vmem:[%s11761_s28 + $0x284] sm:$0xf]  ;;  %5943 = vmatpush.bf16.msra.mxu0 %v9487_v41 }
 0xdcd   : > { %v10277_v41 = vld [vmem:[%s11761_s28 + $0x20c] sm:$0xf0] }
 0xdce   : > { %v5380_v15 = vadd.f32 0.2548296, %v5378_v0  ;;  %v5397_v43 = vsub.f32 0.0, %v5393_v31  ;;  %v9464_v0 = vld [vmem:[%s11761_s28 + $0x290] sm:$0xf0] }
 0xdcf   : > { %5914 = vmatpush.bf16.msra.mxu2 %v9495_v13  ;;  %v9435_v13 = vor.u32 %v10283_v22, %v9432_v8  ;;  %v10329_v22 = vld [vmem:[%s11765_s1 + $0x2ac] sm:$0xf0] }
 0xdd0   : > { %v5382_v45 = vmul.f32 %v5380_v15, %v5363_v35  ;;  %v5399_v33 = vsel %vm5395_vm15, %v5393_v31, %v5397_v43  ;;  %v9504_v35 = vld [vmem:[%s11761_s28 + $0x2d8] sm:$0xf0]  ;;  %v9491_v31 = vor.u32 %v10296_v36, %v9488_v52  ;;  %v9470_v15 = vld [vmem:[%s11761_s28 + $0x288] sm:$0xf]  ;;  %v10294_v43 = vld [vmem:[%s11761_s28 + $0x294] sm:$0xf0] }
 0xdd1   : > { %v5401_v5 = vadd.f32 1.0, %v5399_v33  ;;  %v9507_v16 = vor.u32 %v10300_v23, %v9504_v35  ;;  %v9467_v33 = vor.u32 %v10291_v47, %v9464_v0  ;;  %v9443_v23 = vor.u32 %v10284_v21, %v9440_v30  ;;  %v10281_v35 = vld [vmem:[%s11761_s28 + $0x22c] sm:$0xf0]  ;;  %v9424_v36 = vld [vmem:[%s11761_s28 + $0x238] sm:$0xf0] }
 0xdd2   : > { %v5392_v46 = vmul.f32 %v10706_v51, %v5382_v45  ;;  %v10292_v45 = vld [vmem:[%s11761_s28 + $0x28c] sm:$0xf]  ;;  %v9472_v51 = vld [vmem:[%s11761_s28 + $0x298] sm:$0xf0]  ;;  %v9415_v58 = vor.u32 %v10281_v35, %v9414_v1  ;;  %v9427_v52 = vor.u32 %v10280_v57, %v9424_v36  ;;  %v9400_v47 = vld [vmem:[%s11761_s28 + $0x210] sm:$0xf0] }
 0xdd3   : > { %v5403_v10 = vmul.f32 %v5401_v5, %v5325_v55  ;;  %5915 = vmatpush.bf16.msra.mxu2 %v9479_v40  ;;  %v10289_v5 = vld [vmem:[%s11761_s28 + $0x26c] sm:$0xf0]  ;;  %v9475_v55 = vor.u32 %v10292_v45, %v9472_v51  ;;  %v9423_v40 = vor.u32 %v10282_v48, %v9422_v17  ;;  %v10278_v0 = vld [vmem:[%s11761_s28 + $0x214] sm:$0xf0]  ;;  %v10276_v45 = vld [vmem:[%s11761_s28 + $0x20c] sm:$0xf] }
 0xdd4   : > { %v5394_v28 = vsub.f32 1.0, %v5392_v46  ;;  %v9463_v46 = vor.u32 %v10293_v3, %v9462_v49  ;;  %v10275_v49 = vld [vmem:[%s11761_s28 + $0x204] sm:$0xf]  ;;  %v9408_v51 = vld [vmem:[%s11761_s28 + $0x218] sm:$0xf0] }
 0xdd5   : > { %v10328_v30 = vld [vmem:[%s11765_s1 + $0x2ac] sm:$0xf]  ;;  %v9590_v35 = vld [vmem:[%s11765_s1 + $0x280] sm:$0xf]  ;;  %v9592_v17 = vld [vmem:[%s11765_s1 + $0x290] sm:$0xf0] }
 0xdd6   : > { %v5398_v20 = vsub.f32 0.0, %v5394_v28  ;;  %v9598_v48 = vld [vmem:[%s11765_s1 + $0x288] sm:$0xf]  ;;  %v10324_v36 = vld [vmem:[%s11765_s1 + $0x28c] sm:$0xf] }
 0xdd7   : > { %5916 = vmatpush.bf16.msra.mxu2 %v9463_v46  ;;  %v9638_v46 = vld [vmem:[%s11765_s1 + $0x2e0] sm:$0xf] }
 0xdd8   : > { %v5400_v54 = vsel %vm5396_vm1, %v5394_v28, %v5398_v20  ;;  %v9471_v28 = vor.u32 %v10294_v43, %v9470_v15  ;;  %v9446_v20 = vld [vmem:[%s11761_s28 + $0x260] sm:$0xf]  ;;  %v9403_v15 = vor.u32 %v10275_v49, %v9400_v47  ;;  %v10321_v49 = vld [vmem:[%s11765_s1 + $0x26c] sm:$0xf0] }
 0xdd9   : > { %v5402_v14 = vadd.f32 1.0, %v5400_v54  ;;  %v10287_v54 = vld [vmem:[%s11761_s28 + $0x264] sm:$0xf] }
 0xdda   : > { %5944 = vmatpush.bf16.msra.mxu0 %v9471_v28  ;;  %v10337_v28 = vld [vmem:[%s11765_s1 + $0x2ec] sm:$0xf0] }
 0xddb   : > { %v5404_v4 = vmul.f32 %v5402_v14, %v5326_v60  ;;  %v9448_v60 = vld [vmem:[%s11761_s28 + $0x270] sm:$0xf0]  ;;  %v9454_v14 = vld [vmem:[%s11761_s28 + $0x268] sm:$0xf] }
 0xddd   : > { %v5405_v29 = vpack.c.bf16 %v5404_v4, %v5403_v10  ;;  %v10290_v10 = vld [vmem:[%s11761_s28 + $0x274] sm:$0xf0]  ;;  %v10288_v4 = vld [vmem:[%s11761_s28 + $0x26c] sm:$0xf] }
 0xddf   : > { %5465 = vmatmul.bf16.vlgmr.msrb.gmra.mxu1 %v5405_v29  ;;  %v9456_v29 = vld [vmem:[%s11761_s28 + $0x278] sm:$0xf0] }
 0xde0   : > { %v9459_v2 = vor.u32 %v10288_v4, %v9456_v29  ;;  %v9648_v29 = vld [vmem:[%s11765_s1 + $0x2f8] sm:$0xf0] }
 0xe5c   : > { %v5466_v12 = vpop.f32.mrf.mxu1 }
 0xe5d   : > { %v5467_v6 = vadd.f32 %v10595_v26, %v5466_v12 }
 0xe5f   : > { %v12779_v50 = vadd.f32 %v5467_v6, %v12729_v25  ;;  %v9512_v25 = vld [vmem:[%s11761_s28 + $0x2f0] sm:$0xf0]  ;;  %v9451_v6 = vor.u32 %v10287_v54, %v9448_v60  ;;  %v9639_v54 = vor.u32 %v10337_v28, %v9638_v46  ;;  %v9646_v60 = vld [vmem:[%s11765_s1 + $0x2e8] sm:$0xf]  ;;  %v9558_v28 = vld [vmem:[%s11765_s1 + $0x240] sm:$0xf] }
 0xe60   : > { %v9515_v62 = vor.u32 %v10303_v44, %v9512_v25  ;;  %v9584_v46 = vld [vmem:[%s11765_s1 + $0x278] sm:$0xf0] }
 0xe61   : > { %5691 = vadd.xlane.f32.xlu2 %v12779_v50 }
 0xe62   : > { %5927 = vmatpush.bf16.msra.mxu3 %v9515_v62 }
 0xe64   : > { %v5468_v19 = vpop.f32.mrf.mxu1 }
 0xe65   : > { %v5469_v24 = vadd.f32 %v10595_v26, %v5468_v19  ;;  %v9447_v26 = vor.u32 %v10289_v5, %v9446_v20  ;;  %v9455_v19 = vor.u32 %v10290_v10, %v9454_v14  ;;  %v10335_v20 = vld [vmem:[%s11765_s1 + $0x2e4] sm:$0xf]  ;;  %v9640_v5 = vld [vmem:[%s11765_s1 + $0x2f0] sm:$0xf0]  ;;  %v10338_v14 = vld [vmem:[%s11765_s1 + $0x2f4] sm:$0xf0] }
 0xe66   : > { %5928 = vmatpush.bf16.msra.mxu3 %v9499_v18  ;;  %v9439_v18 = vor.u32 %v10286_v11, %v9438_v27  ;;  %v10336_v10 = vld [vmem:[%s11765_s1 + $0x2ec] sm:$0xf]  ;;  %v9647_v4 = vor.u32 %v10338_v14, %v9646_v60  ;;  %v9608_v27 = vld [vmem:[%s11765_s1 + $0x2b0] sm:$0xf0]  ;;  %v9614_v11 = vld [vmem:[%s11765_s1 + $0x2a8] sm:$0xf] }
 0xe67   : > { %v12783_v39 = vadd.f32 %v5469_v24, %v12733_v42  ;;  %v9520_v42 = vld [vmem:[%s11761_s28 + $0x2f8] sm:$0xf0]  ;;  %5917 = vmatpush.bf16.msra.mxu2 %v9447_v26  ;;  %5945 = vmatpush.bf16.msra.mxu0 %v9455_v19  ;;  %v9622_v26 = vld [vmem:[%s11765_s1 + $0x2c0] sm:$0xf]  ;;  %v9566_v60 = vld [vmem:[%s11765_s1 + $0x248] sm:$0xf] }
 0xe68   : > { %v9523_v7 = vor.u32 %v10304_v53, %v9520_v42  ;;  %v9430_v53 = vld [vmem:[%s11761_s28 + $0x240] sm:$0xf]  ;;  %v10285_v42 = vld [vmem:[%s11761_s28 + $0x24c] sm:$0xf0] }
 0xe69   : > { %5693 = vadd.xlane.f32.xlu0 %v12783_v39  ;;  %v10318_v14 = vld [vmem:[%s11765_s1 + $0x254] sm:$0xf0] }
 0xe6a   : > { %5955 = vmatpush.bf16.msra.mxu1 %v9523_v7  ;;  %5929 = vmatpush.bf16.msra.mxu3 %v9483_v32  ;;  %v9431_v7 = vor.u32 %v10285_v42, %v9430_v53  ;;  %v9398_v32 = vld [vmem:[%s11761_s28 + $0x200] sm:$0xf]  ;;  %v9606_v42 = vld [vmem:[%s11765_s1 + $0x2a0] sm:$0xf] }
 0xe6b   : > { %5946 = vmatpush.bf16.msra.mxu0 %v9439_v18  ;;  %v9399_v3 = vor.u32 %v10277_v41, %v9398_v32  ;;  %v9607_v8 = vor.u32 %v10329_v22, %v9606_v42  ;;  %v9574_v41 = vld [vmem:[%s11765_s1 + $0x260] sm:$0xf]  ;;  %v10312_v42 = vld [vmem:[%s11765_s1 + $0x22c] sm:$0xf] }
 0xe6c   : > { %5918 = vmatpush.bf16.msra.mxu2 %v9431_v7  ;;  %v10327_v7 = vld [vmem:[%s11765_s1 + $0x2a4] sm:$0xf]  ;;  %v9575_v47 = vor.u32 %v10321_v49, %v9574_v41 }
 0xe6d   : > { %v9611_v18 = vor.u32 %v10327_v7, %v9608_v27  ;;  %v9552_v7 = vld [vmem:[%s11765_s1 + $0x238] sm:$0xf0]  ;;  %v9526_v27 = vld [vmem:[%s11765_s1 + $0x200] sm:$0xf] }
 0xe6e   : > { %5956 = vmatpush.bf16.msra.mxu1 %v9507_v16  ;;  %5930 = vmatpush.bf16.msra.mxu3 %v9467_v33  ;;  %v9416_v16 = vld [vmem:[%s11761_s28 + $0x230] sm:$0xf0]  ;;  %v9411_v33 = vor.u32 %v10276_v45, %v9408_v51  ;;  %v10320_v51 = vld [vmem:[%s11765_s1 + $0x26c] sm:$0xf] }
 0xe6f   : > { %v9419_v61 = vor.u32 %v10279_v9, %v9416_v16  ;;  %5947 = vmatpush.bf16.msra.mxu0 %v9423_v40  ;;  %v10325_v9 = vld [vmem:[%s11765_s1 + $0x28c] sm:$0xf0] }
 0xe70   : > { %5919 = vmatpush.bf16.msra.mxu2 %v9415_v58  ;;  %v10323_v58 = vld [vmem:[%s11765_s1 + $0x284] sm:$0xf]  ;;  %v9591_v16 = vor.u32 %v10325_v9, %v9590_v35  ;;  %v10308_v9 = vld [vmem:[%s11765_s1 + $0x20c] sm:$0xf] }
 0xe71   : > { %v9595_v40 = vor.u32 %v10323_v58, %v9592_v17  ;;  %v9536_v58 = vld [vmem:[%s11765_s1 + $0x218] sm:$0xf0] }
 0xe72   : > { %5957 = vmatpush.bf16.msra.mxu1 %v9491_v31  ;;  %5931 = vmatpush.bf16.msra.mxu3 %v9451_v6  ;;  %v9406_v31 = vld [vmem:[%s11761_s28 + $0x208] sm:$0xf]  ;;  %v9651_v6 = vor.u32 %v10336_v10, %v9648_v29  ;;  %v10316_v29 = vld [vmem:[%s11765_s1 + $0x24c] sm:$0xf]  ;;  %v9539_v17 = vor.u32 %v10308_v9, %v9536_v58 }
 0xe73   : > { %v9407_v43 = vor.u32 %v10278_v0, %v9406_v31  ;;  %v9576_v31 = vld [vmem:[%s11765_s1 + $0x270] sm:$0xf0]  ;;  %v9582_v0 = vld [vmem:[%s11765_s1 + $0x268] sm:$0xf] }
 0xe74   : > { %5920 = vmatpush.bf16.msra.mxu2 %v9399_v3  ;;  %v10319_v3 = vld [vmem:[%s11765_s1 + $0x264] sm:$0xf] }
 0xe75   : > { %5948 = vmatpush.bf16.msra.mxu0 %v9407_v43  ;;  %v9579_v43 = vor.u32 %v10319_v3, %v9576_v31 }
 0xe76   : > { %5958 = vmatpush.bf16.msra.mxu1 %v9475_v55  ;;  %5932 = vmatpush.bf16.msra.mxu3 %v9435_v13  ;;  %v9643_v55 = vor.u32 %v10335_v20, %v9640_v5  ;;  %v10330_v13 = vld [vmem:[%s11765_s1 + $0x2b4] sm:$0xf0]  ;;  %v10317_v20 = vld [vmem:[%s11765_s1 + $0x24c] sm:$0xf0]  ;;  %v10315_v5 = vld [vmem:[%s11765_s1 + $0x244] sm:$0xf] }
 0xe77   : > { %v9615_v21 = vor.u32 %v10330_v13, %v9614_v11  ;;  %v10309_v11 = vld [vmem:[%s11765_s1 + $0x20c] sm:$0xf0]  ;;  %v10307_v13 = vld [vmem:[%s11765_s1 + $0x204] sm:$0xf] }
 0xe78   : > { %6138 = vmatpush.bf16.msrb.mxu2 %v9639_v54  ;;  %v9559_v54 = vor.u32 %v10317_v20, %v9558_v28 }
 0xe79   : > { %6166 = vmatpush.bf16.msrb.mxu0 %v9647_v4  ;;  %v9567_v4 = vor.u32 %v10318_v14, %v9566_v60  ;;  %v10367_v60 = vld [vmem:[%s11769_s7 + $0x2e4] sm:$0xf]  ;;  %v9774_v14 = vld [vmem:[%s11769_s7 + $0x2e8] sm:$0xf] }
 0xe7a   : > { %5959 = vmatpush.bf16.msra.mxu1 %v9459_v2  ;;  %5933 = vmatpush.bf16.msra.mxu3 %v9419_v61  ;;  %v9624_v2 = vld [vmem:[%s11765_s1 + $0x2d0] sm:$0xf0]  ;;  %v10326_v61 = vld [vmem:[%s11765_s1 + $0x294] sm:$0xf0] }
 0xe7b   : > { %v9599_v57 = vor.u32 %v10326_v61, %v9598_v48 }
 0xe7e   : > { %5960 = vmatpush.bf16.msra.mxu1 %v9443_v23  ;;  %5934 = vmatpush.bf16.msra.mxu3 %v9403_v15  ;;  %v9616_v23 = vld [vmem:[%s11765_s1 + $0x2b8] sm:$0xf0]  ;;  %v10322_v15 = vld [vmem:[%s11765_s1 + $0x274] sm:$0xf0] }
 0xe7f   : > { %v9619_v1 = vor.u32 %v10328_v30, %v9616_v23  ;;  %v9583_v45 = vor.u32 %v10322_v15, %v9582_v0  ;;  %v9534_v30 = vld [vmem:[%s11765_s1 + $0x208] sm:$0xf]  ;;  %v10310_v23 = vld [vmem:[%s11765_s1 + $0x214] sm:$0xf0] }
 0xe80   : > { %v9535_v35 = vor.u32 %v10310_v23, %v9534_v30  ;;  %v9742_v30 = vld [vmem:[%s11769_s7 + $0x2a8] sm:$0xf]  ;;  %v10362_v23 = vld [vmem:[%s11769_s7 + $0x2b4] sm:$0xf0] }
 0xe82   : > { %5961 = vmatpush.bf16.msra.mxu1 %v9427_v52  ;;  %6152 = vmatpush.bf16.msrb.mxu3 %v9643_v55  ;;  %v9600_v52 = vld [vmem:[%s11765_s1 + $0x298] sm:$0xf0]  ;;  %v9560_v55 = vld [vmem:[%s11765_s1 + $0x250] sm:$0xf0] }
 0xe83   : > { %v9603_v32 = vor.u32 %v10324_v36, %v9600_v52  ;;  %v9563_v10 = vor.u32 %v10315_v5, %v9560_v55  ;;  %v10369_v55 = vld [vmem:[%s11769_s7 + $0x2ec] sm:$0xf0] }
 0xe86   : > { %5962 = vmatpush.bf16.msra.mxu1 %v9411_v33  ;;  %v9587_v33 = vor.u32 %v10320_v51, %v9584_v46 }
 0xe8a   : > { %6180 = vmatpush.bf16.msrb.mxu1 %v9651_v6 }
 0xed4   : > { %v5692_v12 = vpop.xlane.xlu2 %5691 }
 0xed5   : > { %v5695_v24 = vmul.f32 0.03125, %v5692_v12  ;;  %v10333_v12 = vld [vmem:[%s11765_s1 + $0x2cc] sm:$0xf0] }
 0xed6   : > { %v9623_v19 = vor.u32 %v10333_v12, %v9622_v26  ;;  %v9568_v26 = vld [vmem:[%s11765_s1 + $0x258] sm:$0xf0] }
 0xed7   : > { %v5697_v38 = vsub.f32 %v12779_v50, %v5695_v24  ;;  %v10331_v24 = vld [vmem:[%s11765_s1 + $0x2c4] sm:$0xf]  ;;  %v9571_v6 = vor.u32 %v10316_v29, %v9568_v26  ;;  %v10370_v29 = vld [vmem:[%s11769_s7 + $0x2f4] sm:$0xf0] }
 0xed8   : > { %6139 = vmatpush.bf16.msrb.mxu2 %v9623_v19  ;;  %v10368_v26 = vld [vmem:[%s11769_s7 + $0x2ec] sm:$0xf] }
 0xed9   : > { %v12829_v44 = vsel %vm1683_vm0, %v5697_v38, 0.0  ;;  %v9630_v38 = vld [vmem:[%s11765_s1 + $0x2c8] sm:$0xf] }
 0xeda   : > { %v5701_v56 = vmul.f32 %v12829_v44, %v12829_v44 }
 0xedc   : > { %v5694_v25 = vpop.xlane.xlu0 %5693  ;;  %5703 = vadd.xlane.f32.xlu1 %v5701_v56  ;;  %v9627_v56 = vor.u32 %v10331_v24, %v9624_v2  ;;  %6140 = vmatpush.bf16.msrb.mxu2 %v9607_v8  ;;  %v9542_v24 = vld [vmem:[%s11765_s1 + $0x220] sm:$0xf]  ;;  %v10313_v2 = vld [vmem:[%s11765_s1 + $0x22c] sm:$0xf0]  ;;  %v9555_v8 = vor.u32 %v10312_v42, %v9552_v7  ;;  %v9760_v42 = vld [vmem:[%s11769_s7 + $0x2d8] sm:$0xf0] }
 0xedd   : > { %v5696_v37 = vmul.f32 0.03125, %v5694_v25  ;;  %v10334_v25 = vld [vmem:[%s11765_s1 + $0x2d4] sm:$0xf0] }
 0xede   : > { %6153 = vmatpush.bf16.msrb.mxu3 %v9627_v56  ;;  %v10311_v56 = vld [vmem:[%s11765_s1 + $0x224] sm:$0xf] }
 0xedf   : > { %v5698_v59 = vsub.f32 %v12783_v39, %v5696_v37  ;;  %v10332_v37 = vld [vmem:[%s11765_s1 + $0x2cc] sm:$0xf] }
 0xee0   : > { %6141 = vmatpush.bf16.msrb.mxu2 %v9591_v16 }
 0xee1   : > { %v12836_v62 = vsel %vm1683_vm0, %v5698_v59, 0.0  ;;  %v9632_v59 = vld [vmem:[%s11765_s1 + $0x2d8] sm:$0xf0] }
 0xee2   : > { %v5702_v63 = vmul.f32 %v12836_v62, %v12836_v62  ;;  %v9635_v53 = vor.u32 %v10332_v37, %v9632_v59  ;;  %6154 = vmatpush.bf16.msrb.mxu3 %v9611_v18  ;;  %v9550_v37 = vld [vmem:[%s11765_s1 + $0x228] sm:$0xf]  ;;  %v9527_v18 = vor.u32 %v10309_v11, %v9526_v27 }
 0xee3   : > { %v10361_v27 = vld [vmem:[%s11769_s7 + $0x2ac] sm:$0xf0] }
 0xee4   : > { %5705 = vadd.xlane.f32.xlu2 %v5702_v63  ;;  %v9631_v63 = vor.u32 %v10334_v25, %v9630_v38  ;;  %6181 = vmatpush.bf16.msrb.mxu1 %v9635_v53  ;;  %v9543_v38 = vor.u32 %v10313_v2, %v9542_v24  ;;  %v9544_v25 = vld [vmem:[%s11765_s1 + $0x230] sm:$0xf0]  ;;  %v10314_v53 = vld [vmem:[%s11765_s1 + $0x234] sm:$0xf0]  ;;  %v10365_v2 = vld [vmem:[%s11769_s7 + $0x2cc] sm:$0xf0] }
 0xee5   : > { %6142 = vmatpush.bf16.msrb.mxu2 %v9575_v47  ;;  %v9551_v22 = vor.u32 %v10314_v53, %v9550_v37  ;;  %v9750_v24 = vld [vmem:[%s11769_s7 + $0x2c0] sm:$0xf]  ;;  %v9752_v37 = vld [vmem:[%s11769_s7 + $0x2d0] sm:$0xf0]  ;;  %v10364_v53 = vld [vmem:[%s11769_s7 + $0x2cc] sm:$0xf] }
 0xee6   : > { %6167 = vmatpush.bf16.msrb.mxu0 %v9631_v63  ;;  %6155 = vmatpush.bf16.msrb.mxu3 %v9595_v40  ;;  %v9547_v63 = vor.u32 %v10311_v56, %v9544_v25  ;;  %v10363_v25 = vld [vmem:[%s11769_s7 + $0x2c4] sm:$0xf] }
 0xee7   : > { %v9755_v7 = vor.u32 %v10363_v25, %v9752_v37  ;;  %v10343_v25 = vld [vmem:[%s11769_s7 + $0x224] sm:$0xf]  ;;  %v9672_v37 = vld [vmem:[%s11769_s7 + $0x230] sm:$0xf0] }
 0xee8   : > { %6182 = vmatpush.bf16.msrb.mxu1 %v9619_v1 }
 0xee9   : > { %6143 = vmatpush.bf16.msrb.mxu2 %v9559_v54  ;;  %v9766_v54 = vld [vmem:[%s11769_s7 + $0x2e0] sm:$0xf] }
 0xeea   : > { %6168 = vmatpush.bf16.msrb.mxu0 %v9615_v21  ;;  %6156 = vmatpush.bf16.msrb.mxu3 %v9579_v43  ;;  %v9528_v21 = vld [vmem:[%s11765_s1 + $0x210] sm:$0xf0] }
 0xeeb   : > { %v9531_v1 = vor.u32 %v10307_v13, %v9528_v21  ;;  %v10596_v43 = vld [vmem:[%s11730_s5 + $0x2] ss:$0 sm:$0xff]  ;;  %v9763_v13 = vor.u32 %v10364_v53, %v9760_v42  ;;  %v9736_v21 = vld [vmem:[%s11769_s7 + $0x2b0] sm:$0xf0]  ;;  %v10344_v53 = vld [vmem:[%s11769_s7 + $0x22c] sm:$0xf] }
 0xeec   : > { %6183 = vmatpush.bf16.msrb.mxu1 %v9603_v32  ;;  %v9680_v42 = vld [vmem:[%s11769_s7 + $0x238] sm:$0xf0] }
 0xeed   : > { %6144 = vmatpush.bf16.msrb.mxu2 %v9543_v38  ;;  %v9775_v38 = vor.u32 %v10370_v29, %v9774_v14  ;;  %v10347_v14 = vld [vmem:[%s11769_s7 + $0x244] sm:$0xf]  ;;  %v10350_v29 = vld [vmem:[%s11769_s7 + $0x254] sm:$0xf0] }
 0xeee   : > { %6169 = vmatpush.bf16.msrb.mxu0 %v9599_v57  ;;  %6157 = vmatpush.bf16.msrb.mxu3 %v9563_v10 }
 0xef0   : > { %6184 = vmatpush.bf16.msrb.mxu1 %v9587_v33  ;;  %v10597_v33 = vld [vmem:[%s11757_s18 + $0x2] ss:$0 sm:$0xff] }
 0xef1   : > { %6145 = vmatpush.bf16.msrb.mxu2 %v9527_v18  ;;  %v10359_v18 = vld [vmem:[%s11769_s7 + $0x2a4] sm:$0xf] }
 0xef2   : > { %6170 = vmatpush.bf16.msrb.mxu0 %v9583_v45  ;;  %6158 = vmatpush.bf16.msrb.mxu3 %v9547_v63  ;;  %v10366_v63 = vld [vmem:[%s11769_s7 + $0x2d4] sm:$0xf0]  ;;  %v9739_v58 = vor.u32 %v10359_v18, %v9736_v21  ;;  %v10339_v18 = vld [vmem:[%s11769_s7 + $0x204] sm:$0xf]  ;;  %v9656_v21 = vld [vmem:[%s11769_s7 + $0x210] sm:$0xf0] }
 0xef4   : > { %6185 = vmatpush.bf16.msrb.mxu1 %v9571_v6 }
 0xef6   : > { %6171 = vmatpush.bf16.msrb.mxu0 %v9567_v4  ;;  %6159 = vmatpush.bf16.msrb.mxu3 %v9531_v1  ;;  %v10360_v1 = vld [vmem:[%s11769_s7 + $0x2ac] sm:$0xf] }
 0xef8   : > { %6186 = vmatpush.bf16.msrb.mxu1 %v9555_v8  ;;  %v9734_v8 = vld [vmem:[%s11769_s7 + $0x2a0] sm:$0xf] }
 0xef9   : > { %v9735_v9 = vor.u32 %v10361_v27, %v9734_v8  ;;  %v9654_v8 = vld [vmem:[%s11769_s7 + $0x200] sm:$0xf]  ;;  %v10341_v27 = vld [vmem:[%s11769_s7 + $0x20c] sm:$0xf0] }
 0xefa   : > { %6172 = vmatpush.bf16.msrb.mxu0 %v9551_v22  ;;  %v9751_v22 = vor.u32 %v10365_v2, %v9750_v24  ;;  %v9670_v24 = vld [vmem:[%s11769_s7 + $0x220] sm:$0xf]  ;;  %v10345_v2 = vld [vmem:[%s11769_s7 + $0x22c] sm:$0xf0] }
 0xefc   : > { %6187 = vmatpush.bf16.msrb.mxu1 %v9539_v17  ;;  %v10357_v17 = vld [vmem:[%s11769_s7 + $0x28c] sm:$0xf0] }
 0xefe   : > { %6173 = vmatpush.bf16.msrb.mxu0 %v9535_v35  ;;  %v9744_v35 = vld [vmem:[%s11769_s7 + $0x2b8] sm:$0xf0] }
 0xf4f   : > { %v5704_v12 = vpop.xlane.xlu1 %5703 }
 0xf50   : > { %v5707_v19 = vmul.f32 0.03125, %v5704_v12  ;;  %v9776_v12 = vld [vmem:[%s11769_s7 + $0x2f8] sm:$0xf0] }
 0xf51   : > { %v9779_v56 = vor.u32 %v10368_v26, %v9776_v12  ;;  %v10348_v26 = vld [vmem:[%s11769_s7 + $0x24c] sm:$0xf]  ;;  %v9696_v12 = vld [vmem:[%s11769_s7 + $0x258] sm:$0xf0] }
 0xf52   : > { %v5709_v59 = vadd.f32 1e-05, %v5707_v19 }
 0xf54   : > { %10707 = vrsqrt.f32 %v5709_v59  ;;  %vm5717_vm3 = vweird.f32 %v5709_v59 }
 0xf57   : > { %v5706_v16 = vpop.xlane.xlu2 %5705 }
 0xf58   : > { %v5708_v48 = vmul.f32 0.03125, %v5706_v16  ;;  %v9718_v16 = vld [vmem:[%s11769_s7 + $0x280] sm:$0xf] }
 0xf5a   : > { %v10708_v61 = vpop.eup %10707  ;;  %v5710_v40 = vadd.f32 1e-05, %v5708_v48  ;;  %v9743_v48 = vor.u32 %v10362_v23, %v9742_v30  ;;  %v9662_v30 = vld [vmem:[%s11769_s7 + $0x208] sm:$0xf]  ;;  %v10342_v23 = vld [vmem:[%s11769_s7 + $0x214] sm:$0xf0] }
 0xf5b   : > { %v5712_v57 = vmul.f32 %v10708_v61, %v5709_v59  ;;  %vm5718_vm2 = vweird.f32 %v10708_v61  ;;  %v9758_v59 = vld [vmem:[%s11769_s7 + $0x2c8] sm:$0xf] }
 0xf5c   : > { %10709 = vrsqrt.f32 %v5710_v40  ;;  %vm5719_vm4 = vmor %vm5717_vm3, %vm5718_vm2  ;;  %vm5727_vm6 = vweird.f32 %v5710_v40  ;;  %v9759_v11 = vor.u32 %v10366_v63, %v9758_v59  ;;  %v9678_v59 = vld [vmem:[%s11769_s7 + $0x228] sm:$0xf]  ;;  %v10346_v63 = vld [vmem:[%s11769_s7 + $0x234] sm:$0xf0] }
 0xf5d   : > { %v5713_v36 = vmul.f32 %v10708_v61, %v5712_v57  ;;  %v9720_v57 = vld [vmem:[%s11769_s7 + $0x290] sm:$0xf0] }
 0xf5f   : > { %v5714_v52 = vmul.f32 0.5, %v5713_v36  ;;  %v9726_v36 = vld [vmem:[%s11769_s7 + $0x288] sm:$0xf] }
 0xf61   : > { %v5715_v32 = vsub.f32 1.5, %v5714_v52  ;;  %v10358_v52 = vld [vmem:[%s11769_s7 + $0x294] sm:$0xf0] }
 0xf62   : > { %v10710_v41 = vpop.eup %10709 }
 0xf63   : > { %v5716_v49 = vmul.f32 %v10708_v61, %v5715_v32  ;;  %v5722_v3 = vmul.f32 %v10710_v41, %v5710_v40  ;;  %vm5728_vm5 = vweird.f32 %v10710_v41  ;;  %v10355_v40 = vld [vmem:[%s11769_s7 + $0x284] sm:$0xf]  ;;  %v10356_v32 = vld [vmem:[%s11769_s7 + $0x28c] sm:$0xf] }
 0xf64   : > { %vm5729_vm7 = vmor %vm5727_vm6, %vm5728_vm5 }
 0xf65   : > { %v5723_v47 = vmul.f32 %v10710_v41, %v5722_v3  ;;  %v5720_v31 = vsel %vm5719_vm4, %v10708_v61, %v5716_v49  ;;  %v9747_v61 = vor.u32 %v10360_v1, %v9744_v35  ;;  %v9719_v49 = vor.u32 %v10357_v17, %v9718_v16  ;;  %v10340_v1 = vld [vmem:[%s11769_s7 + $0x20c] sm:$0xf]  ;;  %v9664_v35 = vld [vmem:[%s11769_s7 + $0x218] sm:$0xf0] }
 0xf66   : > { %v5731_v45 = vmul.f32 %v5720_v31, %v12829_v44  ;;  %v9768_v44 = vld [vmem:[%s11769_s7 + $0x2f0] sm:$0xf0]  ;;  %v9723_v3 = vor.u32 %v10355_v40, %v9720_v57  ;;  %v10353_v31 = vld [vmem:[%s11769_s7 + $0x26c] sm:$0xf0]  ;;  %v9663_v16 = vor.u32 %v10342_v23, %v9662_v30  ;;  %v9667_v17 = vor.u32 %v10340_v1, %v9664_v35 }
 0xf67   : > { %v5724_v0 = vmul.f32 0.5, %v5723_v47  ;;  %v9771_v19 = vor.u32 %v10367_v60, %v9768_v44  ;;  %v9702_v47 = vld [vmem:[%s11769_s7 + $0x260] sm:$0xf] }
 0xf68   : > { %v5736_v28 = vmul.f32 %v10596_v43, %v5731_v45  ;;  %v9704_v45 = vld [vmem:[%s11769_s7 + $0x270] sm:$0xf0] }
 0xf69   : > { %v5725_v15 = vsub.f32 1.5, %v5724_v0  ;;  %v9727_v0 = vor.u32 %v10358_v52, %v9726_v36 }
 0xf6a   : > { %v5741_v10 = vadd.f32 %v10597_v33, %v5736_v28  ;;  %v9712_v28 = vld [vmem:[%s11769_s7 + $0x278] sm:$0xf0] }
 0xf6b   : > { %v5726_v51 = vmul.f32 %v10710_v41, %v5725_v15 }
 0xf6d   : > { %v5730_v46 = vsel %vm5729_vm7, %v10710_v41, %v5726_v51  ;;  %v9728_v41 = vld [vmem:[%s11769_s7 + $0x298] sm:$0xf0]  ;;  %v9710_v51 = vld [vmem:[%s11769_s7 + $0x268] sm:$0xf] }
 0xf6e   : > { %v5732_v20 = vmul.f32 %v5730_v46, %v12836_v62  ;;  %v9767_v62 = vor.u32 %v10369_v55, %v9766_v54  ;;  %v9731_v15 = vor.u32 %v10356_v32, %v9728_v41  ;;  %v10354_v46 = vld [vmem:[%s11769_s7 + $0x274] sm:$0xf0]  ;;  %v9686_v54 = vld [vmem:[%s11769_s7 + $0x240] sm:$0xf]  ;;  %v10349_v55 = vld [vmem:[%s11769_s7 + $0x24c] sm:$0xf0] }
 0xf6f   : > { %v9711_v60 = vor.u32 %v10354_v46, %v9710_v51 }
 0xf70   : > { %v5737_v5 = vmul.f32 %v10596_v43, %v5732_v20  ;;  %v10351_v43 = vld [vmem:[%s11769_s7 + $0x264] sm:$0xf]  ;;  %v9703_v20 = vor.u32 %v10353_v31, %v9702_v47 }
 0xf72   : > { %v5742_v4 = vadd.f32 %v10597_v33, %v5737_v5  ;;  %v10352_v33 = vld [vmem:[%s11769_s7 + $0x26c] sm:$0xf]  ;;  %v9707_v5 = vor.u32 %v10351_v43, %v9704_v45  ;;  %v13020_v43 = vld [vmem:[%s11763_s13 + $0x8] sm:$0xf] }
 0xf73   : > { %v9715_v44 = vor.u32 %v10352_v33, %v9712_v28  ;;  %v5745_v45 = vperm.slane %v13020_v43, 0  ;;  %v5746_v51 = vperm.slane %v13020_v43, 1 }
 0xf74   : > { %v12940_v6 = vpack.c.bf16 %v5742_v4, %v5741_v10  ;;  %v9688_v10 = vld [vmem:[%s11769_s7 + $0x250] sm:$0xf0]  ;;  %v9694_v4 = vld [vmem:[%s11769_s7 + $0x248] sm:$0xf] }
 0xf76   : > { %5921 = vmatmul.bf16.vlgmr.msra.gmra.mxu2 %v12940_v6  ;;  %5935 = vmatmul.bf16.vlgmr.msra.gmra.mxu3 %v12940_v6 }
 0xf77   : > { %5949 = vmatmul.bf16.vlgmr.msra.gmra.mxu0 %v12940_v6  ;;  %5963 = vmatmul.bf16.vlgmr.msra.gmra.mxu1 %v12940_v6 }
 0xf78   : > { %6363 = vmatpush.bf16.msra.mxu2 %v9767_v62  ;;  %6377 = vmatpush.bf16.msra.mxu3 %v9771_v19  ;;  %v9687_v62 = vor.u32 %v10349_v55, %v9686_v54  ;;  %v9691_v19 = vor.u32 %v10347_v14, %v9688_v10 }
 0xf79   : > { %6391 = vmatpush.bf16.msra.mxu0 %v9775_v38  ;;  %6405 = vmatpush.bf16.msra.mxu1 %v9779_v56  ;;  %v9695_v38 = vor.u32 %v10350_v29, %v9694_v4  ;;  %v9699_v56 = vor.u32 %v10348_v26, %v9696_v12  ;;  %v13025_v26 = vld [vmem:[%s11771_s3 + $0x8] sm:$0xf] }
 0xf7a   : > { %v6196_v30 = vperm.slane %v13025_v26, 1 }
 0xf7c   : > { %6364 = vmatpush.bf16.msra.mxu2 %v9751_v22  ;;  %6378 = vmatpush.bf16.msra.mxu3 %v9755_v7  ;;  %v9671_v22 = vor.u32 %v10345_v2, %v9670_v24  ;;  %v9675_v7 = vor.u32 %v10343_v25, %v9672_v37 }
 0xf7d   : > { %6392 = vmatpush.bf16.msra.mxu0 %v9759_v11  ;;  %6406 = vmatpush.bf16.msra.mxu1 %v9763_v13  ;;  %v9679_v11 = vor.u32 %v10346_v63, %v9678_v59  ;;  %v9683_v13 = vor.u32 %v10344_v53, %v9680_v42 }
 0xf80   : > { %6365 = vmatpush.bf16.msra.mxu2 %v9735_v9  ;;  %6379 = vmatpush.bf16.msra.mxu3 %v9739_v58  ;;  %v9655_v9 = vor.u32 %v10341_v27, %v9654_v8  ;;  %v9659_v58 = vor.u32 %v10339_v18, %v9656_v21  ;;  %v6195_v21 = vperm.slane %v13025_v26, 0 }
 0xf81   : > { %6393 = vmatpush.bf16.msra.mxu0 %v9743_v48  ;;  %6407 = vmatpush.bf16.msra.mxu1 %v9747_v61 }
 0xf84   : > { %6366 = vmatpush.bf16.msra.mxu2 %v9719_v49  ;;  %6380 = vmatpush.bf16.msra.mxu3 %v9723_v3  ;;  %v9389_v49 = vld [vmem:[%s11767_s26 + $0x8] sm:$0xf] }
 0xf85   : > { %6394 = vmatpush.bf16.msra.mxu0 %v9727_v0  ;;  %6408 = vmatpush.bf16.msra.mxu1 %v9731_v15  ;;  %v5970_v31 = vperm.slane %v9389_v49, 0  ;;  %v5971_v0 = vperm.slane %v9389_v49, 1  ;;  %v5972_v15 = vperm.slane %v9389_v49, 2 }
 0xf86   : > { %6146 = vmatmul.bf16.vlgmr.msrb.gmra.mxu2 %v12940_v6  ;;  %6160 = vmatmul.bf16.vlgmr.msrb.gmra.mxu3 %v12940_v6 }
 0xf87   : > { %6174 = vmatmul.bf16.vlgmr.msrb.gmra.mxu0 %v12940_v6  ;;  %6188 = vmatmul.bf16.vlgmr.msrb.gmra.mxu1 %v12940_v6 }
 0xf88   : > { %6367 = vmatpush.bf16.msra.mxu2 %v9703_v20  ;;  %6381 = vmatpush.bf16.msra.mxu3 %v9707_v5 }
 0xf89   : > { %6395 = vmatpush.bf16.msra.mxu0 %v9711_v60  ;;  %6409 = vmatpush.bf16.msra.mxu1 %v9715_v44 }
 0xf8c   : > { %6368 = vmatpush.bf16.msra.mxu2 %v9687_v62  ;;  %6382 = vmatpush.bf16.msra.mxu3 %v9691_v19 }
 0xf8d   : > { %6396 = vmatpush.bf16.msra.mxu0 %v9695_v38  ;;  %6410 = vmatpush.bf16.msra.mxu1 %v9699_v56  ;;  %v6197_v38 = vperm.slane %v13025_v26, 2  ;;  %v6198_v56 = vperm.slane %v13025_v26, 3 }
 0xf90   : > { %6369 = vmatpush.bf16.msra.mxu2 %v9671_v22  ;;  %6383 = vmatpush.bf16.msra.mxu3 %v9675_v7 }
 0xf91   : > { %6397 = vmatpush.bf16.msra.mxu0 %v9679_v11  ;;  %6411 = vmatpush.bf16.msra.mxu1 %v9683_v13 }
 0xf94   : > { %6370 = vmatpush.bf16.msra.mxu2 %v9655_v9  ;;  %6384 = vmatpush.bf16.msra.mxu3 %v9659_v58 }
 0xf95   : > { %6398 = vmatpush.bf16.msra.mxu0 %v9663_v16  ;;  %6412 = vmatpush.bf16.msra.mxu1 %v9667_v17  ;;  %v5747_v17 = vperm.slane %v13020_v43, 2 }
 0xf97   : > { %6371 = vmatmul.bf16.vlgmr.msra.gmra.mxu2 %v12940_v6  ;;  %6385 = vmatmul.bf16.vlgmr.msra.gmra.mxu3 %v12940_v6 }
 0xf98   : > { %6399 = vmatmul.bf16.vlgmr.msra.gmra.mxu0 %v12940_v6  ;;  %6413 = vmatmul.bf16.vlgmr.msra.gmra.mxu1 %v12940_v6  ;;  %v5973_v6 = vperm.slane %v9389_v49, 3 }
 0xff4   : > { %v13010_v48 = vpop.f32.mrf.mxu0  ;;  %v13012_v61 = vpop.f32.mrf.mxu1 }
 0xff9   : > { %v5922_v40 = vpop.f32.mrf.mxu2  ;;  %v5936_v57 = vpop.f32.mrf.mxu3 }
 0xffa   : > { %v5923_v14 = vadd.f32 %v5922_v40, %v5745_v45  ;;  %v5937_v10 = vadd.f32 %v5936_v57, %v5746_v51  ;;  %v5748_v40 = vperm.slane %v13020_v43, 3 }
 0xffc   : > { %v13014_v36 = vpop.f32.mrf.mxu0  ;;  %v13016_v52 = vpop.f32.mrf.mxu1  ;;  %v6419_v12 = vpack.c.bf16 %v5937_v10, %v5923_v14 }
 0xffe   : > { %v6524_v63 = vrot.slane %v6419_v12, 4 }
0x1001   : > { %v5924_v32 = vpop.f32.mrf.mxu2  ;;  %v5938_v41 = vpop.f32.mrf.mxu3 }
0x1002   : > { %v5925_v53 = vadd.f32 %v5924_v32, %v5745_v45  ;;  %v5939_v42 = vadd.f32 %v5938_v41, %v5746_v51 }
0x1004   : > { %v6175_v3 = vpop.f32.mrf.mxu0  ;;  %v6189_v47 = vpop.f32.mrf.mxu1  ;;  %v6421_v1 = vpack.c.bf16 %v5939_v42, %v5925_v53 }
0x1005   : > { %v6176_v5 = vadd.f32 %v6175_v3, %v5972_v15  ;;  %v6190_v54 = vadd.f32 %v6189_v47, %v5973_v6  ;;  %v5951_v47 = vadd.f32 %v13010_v48, %v5747_v17  ;;  %v5967_v48 = vadd.f32 %v13016_v52, %v5748_v40 }
0x1006   : > { %v6543_v57 = vrot.slane %v6421_v1, 4 }
0x1007   : > { %v6424_v29 = vpack.c.bf16 %v6190_v54, %v6176_v5 }
0x1009   : > { %v6147_v46 = vpop.f32.mrf.mxu2  ;;  %v6161_v33 = vpop.f32.mrf.mxu3  ;;  %v6727_v8 = vrot.slane %v6424_v29, 4 }
0x100a   : > { %v6148_v28 = vadd.f32 %v6147_v46, %v5970_v31  ;;  %v6162_v20 = vadd.f32 %v6161_v33, %v5971_v0 }
0x100c   : > { %v6423_v55 = vpack.c.bf16 %v6162_v20, %v6148_v28  ;;  %v6177_v60 = vpop.f32.mrf.mxu0  ;;  %v6191_v44 = vpop.f32.mrf.mxu1  ;;  %v5953_v20 = vadd.f32 %v13014_v36, %v5747_v17 }
0x100d   : > { %v6178_v25 = vadd.f32 %v6177_v60, %v5972_v15  ;;  %v6192_v37 = vadd.f32 %v6191_v44, %v5973_v6 }
0x100e   : > { %v6527_v4 = vrot.slane %v6423_v55, 4  ;;  %6438 = vmatpush.bf16.xpose.msrb.mxu2 %v6423_v55  ;;  %v6422_v5 = vpack.c.bf16 %v5967_v48, %v5953_v20 }
0x100f   : > { %v6426_v18 = vpack.c.bf16 %v6192_v37, %v6178_v25 }
0x1010   : > { %6536 = vmatpush.bf16.xpose.msrb.mxu0 %v6527_v4  ;;  %v6743_v55 = vrot.slane %v6422_v5, 4 }
0x1011   : > { %v6149_v62 = vpop.f32.mrf.mxu2  ;;  %v6163_v19 = vpop.f32.mrf.mxu3  ;;  %v6746_v41 = vrot.slane %v6426_v18, 4 }
0x1012   : > { %v6150_v24 = vadd.f32 %v6149_v62, %v5970_v31  ;;  %v6164_v2 = vadd.f32 %v6163_v19, %v5971_v0  ;;  %v5965_v31 = vadd.f32 %v13012_v61, %v5748_v40 }
0x1014   : > { %v6425_v59 = vpack.c.bf16 %v6164_v2, %v6150_v24  ;;  %v6420_v51 = vpack.c.bf16 %v5965_v31, %v5951_v47 }
0x1015   : > { %v6400_v22 = vpop.f32.mrf.mxu0  ;;  %v6414_v7 = vpop.f32.mrf.mxu1  ;;  %6439 = vmatmul.bf16.vlgmr.msrb.gmra.mxu2 %v6419_v12 }
0x1016   : > { %v6546_v27 = vrot.slane %v6425_v59, 4  ;;  %v6401_v11 = vadd.f32 %v6400_v22, %v6197_v38  ;;  %v6415_v13 = vadd.f32 %v6414_v7, %v6198_v56  ;;  %6451 = vmatpush.bf16.xpose.msrb.mxu3 %v6425_v59  ;;  %v6724_v54 = vrot.slane %v6420_v51, 4 }
0x1017   : > { %6537 = vmatmul.bf16.vlgmr.msrb.gmra.mxu0 %v6524_v63 }
0x1018   : > { %6638 = vmatpush.bf16.xpose.msra.mxu0 %v6424_v29  ;;  %v13035_v23 = vpack.c.bf16 %v6415_v13, %v6401_v11  ;;  %6555 = vmatpush.bf16.xpose.msrb.mxu1 %v6546_v27 }
0x101a   : > { %v6372_v35 = vpop.f32.mrf.mxu2  ;;  %v6386_v9 = vpop.f32.mrf.mxu3 }
0x101b   : > { %v6373_v58 = vadd.f32 %v6372_v35, %v6195_v21  ;;  %v6387_v16 = vadd.f32 %v6386_v9, %v6196_v30 }
0x101d   : > { %v6427_v32 = vpack.c.bf16 %v6387_v16, %v6373_v58  ;;  %6452 = vmatmul.bf16.vlgmr.msrb.gmra.mxu3 %v6421_v1  ;;  %v13047_v60 = vpop.f32.mrf.mxu0  ;;  %v13049_v44 = vpop.f32.mrf.mxu1 }
0x101f   : > { %v6588_v49 = vrot.slane %v6427_v32, 4  ;;  %v6487_v3 = vsel %vm4580_vm12, %v6427_v32, 0  ;;  %6556 = vmatmul.bf16.vlgmr.msrb.gmra.mxu1 %v6543_v57 }
0x1020   : > { %6736 = vmatpush.bf16.xpose.msrb.mxu0 %v6727_v8  ;;  %6651 = vmatpush.bf16.xpose.msra.mxu1 %v6426_v18 }
0x1021   : > { %6496 = vmatpush.bf16.msra.mxu2 %v6487_v3  ;;  %v6593_v0 = vsel %vm4580_vm12, %v6588_v49, 0 }
0x1022   : > { %v6374_v15 = vpop.f32.mrf.mxu2  ;;  %v6388_v6 = vpop.f32.mrf.mxu3 }
0x1023   : > { %v6375_v43 = vadd.f32 %v6374_v15, %v6195_v21  ;;  %v6389_v45 = vadd.f32 %v6388_v6, %v6196_v30 }
0x1025   : > { %6602 = vmatpush.bf16.msrb.mxu2 %v6593_v0  ;;  %v6429_v46 = vpack.c.bf16 %v6389_v45, %v6375_v43 }
0x1027   : > { %v6609_v33 = vrot.slane %v6429_v46, 4  ;;  %v6506_v28 = vsel %vm4580_vm12, %v6429_v46, 0  ;;  %6639 = vmatmul.bf16.vlgmr.msra.gmra.mxu0 %v6420_v51 }
0x1028   : > { %6755 = vmatpush.bf16.xpose.msrb.mxu1 %v6746_v41  ;;  %6515 = vmatpush.bf16.msra.mxu3 %v6506_v28 }
0x1029   : > { %v6614_v61 = vsel %vm4580_vm12, %v6609_v33, 0 }
0x102c   : > { %6623 = vmatpush.bf16.msrb.mxu3 %v6614_v61 }
0x102f   : > { %6652 = vmatmul.bf16.vlgmr.msra.gmra.mxu1 %v6422_v5 }
0x1037   : > { %6737 = vmatmul.bf16.vlgmr.msrb.gmra.mxu0 %v6724_v54 }
0x103f   : > { %6756 = vmatmul.bf16.vlgmr.msrb.gmra.mxu1 %v6743_v55 }
0x1094   : > { %v6538_v14 = vpop.f32.mrf.mxu0 }
0x1095   : > { %v6561_v10 = vmul.f32 0.35355338, %v6538_v14 }
0x1097   : > { %v6563_v4 = vsel %vm4552_vm13, %v6561_v10, -inf }
0x1098   : > { %6564 = vmax.xlane.f32.xlu2 %v6563_v4  ;;  %v6440_v36 = vpop.f32.mrf.mxu2 }
0x1099   : > { %v6457_v52 = vmul.f32 0.35355338, %v6440_v36 }
0x109b   : > { %v6459_v29 = vsel %vm4552_vm13, %v6457_v52, -inf }
0x109c   : > { %v6540_v12 = vpop.f32.mrf.mxu0  ;;  %v6557_v62 = vpop.f32.mrf.mxu1  ;;  %6460 = vmax.xlane.f32.xlu0 %v6459_v29 }
0x109d   : > { %v6562_v19 = vmul.f32 0.35355338, %v6557_v62 }
0x109f   : > { %v6566_v59 = vsel %vm4552_vm13, %v6562_v19, -inf }
0x10a0   : > { %v6442_v24 = vpop.f32.mrf.mxu2  ;;  %v6453_v2 = vpop.f32.mrf.mxu3 }
0x10a1   : > { %v6458_v25 = vmul.f32 0.35355338, %v6453_v2 }
0x10a3   : > { %v6462_v37 = vsel %vm4552_vm13, %v6458_v25, -inf }
0x10a4   : > { %v6559_v63 = vpop.f32.mrf.mxu1  ;;  %6463 = vmax.xlane.f32.xlu1 %v6462_v37  ;;  %v6640_v53 = vpop.f32.mrf.mxu0  ;;  %6567 = vmax.xlane.f32.xlu0 %v6566_v59 }
0x10a5   : > { %v6657_v42 = vmul.f32 0.35355338, %v6640_v53 }
0x10a7   : > { %v6659_v7 = vsel %vm4552_vm13, %v6657_v42, -inf }
0x10a8   : > { %v6455_v22 = vpop.f32.mrf.mxu3 }
0x10ac   : > { %v6653_v8 = vpop.f32.mrf.mxu1  ;;  %6660 = vmax.xlane.f32.xlu1 %v6659_v7  ;;  %v6642_v27 = vpop.f32.mrf.mxu0 }
0x10ad   : > { %v6658_v11 = vmul.f32 0.35355338, %v6653_v8 }
0x10af   : > { %v6662_v13 = vsel %vm4552_vm13, %v6658_v11, -inf }
0x10b0   : > { %6663 = vmax.xlane.f32.xlu2 %v6662_v13 }
0x10b4   : > { %v6655_v18 = vpop.f32.mrf.mxu1  ;;  %v6738_v21 = vpop.f32.mrf.mxu0 }
0x10b5   : > { %v6761_v30 = vmul.f32 0.35355338, %v6738_v21  ;;  %v6403_v18 = vadd.f32 %v13047_v60, %v6197_v38  ;;  %v6417_v21 = vadd.f32 %v13049_v44, %v6198_v56  ;;  %v6788_v56 = vrot.slane %v13035_v23, 4 }
0x10b7   : > { %v6763_v1 = vsel %vm4552_vm13, %v6761_v30, -inf }
0x10b8   : > { %6764 = vmax.xlane.f32.xlu0 %v6763_v1 }
0x10bc   : > { %v6740_v35 = vpop.f32.mrf.mxu0  ;;  %v6757_v9 = vpop.f32.mrf.mxu1 }
0x10bd   : > { %v6762_v58 = vmul.f32 0.35355338, %v6757_v9  ;;  %v6430_v35 = vpack.c.bf16 %v6417_v21, %v6403_v18 }
0x10bf   : > { %v6766_v16 = vsel %vm4552_vm13, %v6762_v58, -inf  ;;  %v6706_v38 = vsel %vm4580_vm12, %v6430_v35, 0 }
0x10c0   : > { %6767 = vmax.xlane.f32.xlu1 %v6766_v16 }
0x10c4   : > { %v6759_v17 = vpop.f32.mrf.mxu1 }
0x110b   : > { %v6565_v40 = vpop.xlane.xlu2 %6564 }
0x110c   : > { %v6569_v57 = vsub.f32 %v6561_v10, %v6565_v40 }
0x110e   : > { %v6571_v32 = vmul.f32 1.442695, %v6569_v57  ;;  %v6793_v57 = vsel %vm4580_vm12, %v6788_v56, 0 }
0x110f   : > { %v6461_v41 = vpop.xlane.xlu0 %6460 }
0x1110   : > { %10711 = vpow2.f32 %v6571_v32  ;;  %v6465_v49 = vsub.f32 %v6457_v52, %v6461_v41  ;;  %v6809_v41 = vrot.slane %v6430_v35, 4 }
0x1112   : > { %v6467_v3 = vmul.f32 1.442695, %v6465_v49 }
0x1114   : > { %10713 = vpow2.f32 %v6467_v3 }
0x1116   : > { %v13059_v47 = vpop.eup %10711 }
0x1117   : > { %v6464_v31 = vpop.xlane.xlu1 %6463  ;;  %v6568_v0 = vpop.xlane.xlu0 %6567  ;;  %v6575_v15 = vsel %vm4552_vm13, %v13059_v47, 0.0 }
0x1118   : > { %v6466_v6 = vsub.f32 %v6458_v25, %v6464_v31  ;;  %v6570_v43 = vsub.f32 %v6562_v19, %v6568_v0  ;;  %6576 = vadd.xlane.f32.xlu1 %v6575_v15  ;;  %v10378_v31 = vld [vmem:[%s11773_s14 + $0x238] sm:$0xff]  ;;  %v10377_v15 = vld [vmem:[%s11773_s14 + $0x230] sm:$0xff] }
0x1119   : > { %7050 = vmatpush.bf16.msra.mxu0 %v10378_v31 }
0x111a   : > { %v10714_v45 = vpop.eup %10713  ;;  %v6469_v51 = vmul.f32 1.442695, %v6466_v6  ;;  %v6573_v46 = vmul.f32 1.442695, %v6570_v43 }
0x111b   : > { %v6471_v33 = vsel %vm4552_vm13, %v10714_v45, 0.0 }
0x111c   : > { %10715 = vpow2.f32 %v6469_v51  ;;  %6472 = vadd.xlane.f32.xlu2 %v6471_v33  ;;  %v10375_v33 = vld [vmem:[%s11773_s14 + $0x220] sm:$0xff] }
0x111d   : > { %10717 = vpow2.f32 %v6573_v46  ;;  %7051 = vmatpush.bf16.msra.mxu0 %v10377_v15 }
0x111f   : > { %v6661_v28 = vpop.xlane.xlu1 %6660 }
0x1120   : > { %v6665_v20 = vsub.f32 %v6657_v42, %v6661_v28 }
0x1122   : > { %v10716_v48 = vpop.eup %10715  ;;  %v6667_v61 = vmul.f32 1.442695, %v6665_v20 }
0x1123   : > { %v13064_v5 = vpop.eup %10717  ;;  %v6664_v54 = vpop.xlane.xlu2 %6663  ;;  %v6474_v55 = vsel %vm4552_vm13, %v10716_v48, 0.0 }
0x1124   : > { %10719 = vpow2.f32 %v6667_v61  ;;  %v6666_v14 = vsub.f32 %v6658_v11, %v6664_v54  ;;  %6475 = vadd.xlane.f32.xlu0 %v6474_v55  ;;  %v6578_v10 = vsel %vm4552_vm13, %v13064_v5, 0.0 }
0x1125   : > { %6579 = vadd.xlane.f32.xlu2 %v6578_v10  ;;  %v10374_v10 = vld [vmem:[%s11773_s14 + $0x218] sm:$0xff] }
0x1126   : > { %v6669_v4 = vmul.f32 1.442695, %v6666_v14 }
0x1128   : > { %10721 = vpow2.f32 %v6669_v4  ;;  %v10386_v4 = vld [vmem:[%s11773_s14 + $0x278] sm:$0xff] }
0x1129   : > { %7064 = vmatpush.bf16.msra.mxu1 %v10386_v4 }
0x112a   : > { %v13069_v36 = vpop.eup %10719 }
0x112b   : > { %v6765_v52 = vpop.xlane.xlu0 %6764  ;;  %v6671_v29 = vsel %vm4552_vm13, %v13069_v36, 0.0 }
0x112c   : > { %v6769_v12 = vsub.f32 %v6761_v30, %v6765_v52  ;;  %6672 = vadd.xlane.f32.xlu0 %v6671_v29  ;;  %v6687_v30 = vsel %vm4580_vm12, %v13035_v23, 0  ;;  %v6814_v23 = vsel %vm4580_vm12, %v6809_v41, 0  ;;  %v10385_v52 = vld [vmem:[%s11773_s14 + $0x270] sm:$0xff]  ;;  %v10372_v29 = vld [vmem:[%s11773_s14 + $0x208] sm:$0xff] }
0x112d   : > { %7065 = vmatpush.bf16.msra.mxu1 %v10385_v52  ;;  %v10396_v41 = vld [vmem:[%s11773_s14 + $0x2c8] sm:$0xff] }
0x112e   : > { %v13073_v62 = vpop.eup %10721  ;;  %v6771_v19 = vmul.f32 1.442695, %v6769_v12  ;;  %v10384_v12 = vld [vmem:[%s11773_s14 + $0x268] sm:$0xff] }
0x112f   : > { %v6674_v24 = vsel %vm4552_vm13, %v13073_v62, 0.0 }
0x1130   : > { %10723 = vpow2.f32 %v6771_v19  ;;  %6675 = vadd.xlane.f32.xlu1 %v6674_v24  ;;  %v10383_v19 = vld [vmem:[%s11773_s14 + $0x260] sm:$0xff]  ;;  %v10382_v24 = vld [vmem:[%s11773_s14 + $0x258] sm:$0xff] }
0x1131   : > { %7066 = vmatpush.bf16.msra.mxu1 %v10384_v12 }
0x1133   : > { %v6768_v2 = vpop.xlane.xlu1 %6767 }
0x1134   : > { %v6770_v25 = vsub.f32 %v6762_v58, %v6768_v2  ;;  %v10394_v2 = vld [vmem:[%s11773_s14 + $0x2b8] sm:$0xff] }
0x1135   : > { %7067 = vmatpush.bf16.msra.mxu1 %v10383_v19 }
0x1136   : > { %v13077_v37 = vpop.eup %10723  ;;  %v6773_v59 = vmul.f32 1.442695, %v6770_v25  ;;  %v10381_v25 = vld [vmem:[%s11773_s14 + $0x250] sm:$0xff] }
0x1137   : > { %v6775_v63 = vsel %vm4552_vm13, %v13077_v37, 0.0 }
0x1138   : > { %10725 = vpow2.f32 %v6773_v59  ;;  %6776 = vadd.xlane.f32.xlu2 %v6775_v63  ;;  %v10380_v59 = vld [vmem:[%s11773_s14 + $0x248] sm:$0xff] }
0x1139   : > { %7068 = vmatpush.bf16.msra.mxu1 %v10382_v24  ;;  %v10392_v63 = vld [vmem:[%s11773_s14 + $0x2a8] sm:$0xff] }
0x113d   : > { %7069 = vmatpush.bf16.msra.mxu1 %v10381_v25 }
0x113e   : > { %v13081_v53 = vpop.eup %10725 }
0x113f   : > { %v6778_v42 = vsel %vm4552_vm13, %v13081_v53, 0.0 }
0x1140   : > { %6779 = vadd.xlane.f32.xlu0 %v6778_v42  ;;  %v10391_v42 = vld [vmem:[%s11773_s14 + $0x2a0] sm:$0xff] }
0x1141   : > { %7070 = vmatpush.bf16.msra.mxu1 %v10380_v59 }
0x118b   : > { %v6577_v11 = vpop.xlane.xlu1 %6576 }
0x118f   : > { %v6473_v22 = vpop.xlane.xlu2 %6472 }
0x1190   : > { %10727 = vrcp.f32 %v6473_v22 }
0x1196   : > { %v10728_v7 = vpop.eup %10727 }
0x1197   : > { %v6479_v8 = vmul.f32 %v10728_v7, %v10714_v45  ;;  %v6476_v27 = vpop.xlane.xlu0 %6475  ;;  %v10376_v45 = vld [vmem:[%s11773_s14 + $0x228] sm:$0xff]  ;;  %v10390_v7 = vld [vmem:[%s11773_s14 + $0x298] sm:$0xff] }
0x1198   : > { %10729 = vrcp.f32 %v6476_v27  ;;  %v6580_v58 = vpop.xlane.xlu2 %6579  ;;  %7052 = vmatpush.bf16.msra.mxu0 %v10376_v45  ;;  %v10389_v27 = vld [vmem:[%s11773_s14 + $0x290] sm:$0xff] }
0x1199   : > { %v6481_v13 = vpack.c.bf16 %v6479_v8, %v6479_v8  ;;  %10731 = vrcp.f32 %v6577_v11  ;;  %v10402_v8 = vld [vmem:[%s11773_s14 + $0x2f8] sm:$0xff]  ;;  %v10401_v11 = vld [vmem:[%s11773_s14 + $0x2f0] sm:$0xff] }
0x119a   : > { %10733 = vrcp.f32 %v6580_v58 }
0x119b   : > { %9780 = vmatmul.msk.bf16.vlgmr.msra.gmra.mxu2 %vm4552_vm13, %v6481_v13 }
0x119c   : > { %6696 = vmatpush.bf16.msra.mxu2 %v6687_v30  ;;  %7053 = vmatpush.bf16.msra.mxu0 %v10375_v33  ;;  %v10388_v30 = vld [vmem:[%s11773_s14 + $0x288] sm:$0xff] }
0x119e   : > { %v10730_v1 = vpop.eup %10729 }
0x119f   : > { %v6480_v9 = vmul.f32 %v10730_v1, %v10716_v48  ;;  %v10732_v17 = vpop.eup %10731  ;;  %v6673_v44 = vpop.xlane.xlu0 %6672  ;;  %v10400_v1 = vld [vmem:[%s11773_s14 + $0x2e8] sm:$0xff] }
0x11a0   : > { %v6583_v26 = vmul.f32 %v10732_v17, %v13059_v47  ;;  %v10734_v40 = vpop.eup %10733  ;;  %10735 = vrcp.f32 %v6673_v44  ;;  %7054 = vmatpush.bf16.msra.mxu0 %v10374_v10  ;;  %v10399_v17 = vld [vmem:[%s11773_s14 + $0x2e0] sm:$0xff]  ;;  %v10397_v44 = vld [vmem:[%s11773_s14 + $0x2d0] sm:$0xff] }
0x11a1   : > { %v6482_v16 = vpack.c.bf16 %v6480_v9, %v6480_v9  ;;  %v6584_v32 = vmul.f32 %v10734_v40, %v13064_v5 }
0x11a2   : > { %v6585_v60 = vpack.c.bf16 %v6583_v26, %v6583_v26 }
0x11a3   : > { %9781 = vmatmul.msk.bf16.vlgmr.msra.gmra.mxu3 %vm4552_vm13, %v6482_v16  ;;  %v6586_v49 = vpack.c.bf16 %v6584_v32, %v6584_v32  ;;  %v6676_v3 = vpop.xlane.xlu1 %6675  ;;  %v10387_v16 = vld [vmem:[%s11773_s14 + $0x280] sm:$0xff] }
0x11a4   : > { %6715 = vmatpush.bf16.msra.mxu3 %v6706_v38  ;;  %10737 = vrcp.f32 %v6676_v3 }
0x11a6   : > { %v10736_v47 = vpop.eup %10735 }
0x11a7   : > { %v6679_v0 = vmul.f32 %v10736_v47, %v13069_v36  ;;  %v10373_v36 = vld [vmem:[%s11773_s14 + $0x210] sm:$0xff] }
0x11a8   : > { %7055 = vmatpush.bf16.msra.mxu0 %v10373_v36 }
0x11a9   : > { %v6681_v6 = vpack.c.bf16 %v6679_v0, %v6679_v0 }
0x11aa   : > { %v10738_v51 = vpop.eup %10737 }
0x11ab   : > { %9782 = vmatmul.msk.bf16.vlgmr.msrb.gmra.mxu2 %vm4552_vm13, %v6585_v60  ;;  %v6777_v43 = vpop.xlane.xlu2 %6776  ;;  %v6680_v46 = vmul.f32 %v10738_v51, %v13073_v62  ;;  %v10371_v62 = vld [vmem:[%s11773_s14 + $0x200] sm:$0xff]  ;;  %v10398_v60 = vld [vmem:[%s11773_s14 + $0x2d8] sm:$0xff] }
0x11ac   : > { %6802 = vmatpush.bf16.msrb.mxu2 %v6793_v57  ;;  %10739 = vrcp.f32 %v6777_v43  ;;  %7056 = vmatpush.bf16.msra.mxu0 %v10372_v29  ;;  %v10598_v29 = vld [vmem:[%s11744_s2 + $0x2] ss:$0 sm:$0xff] }
0x11ad   : > { %v6682_v28 = vpack.c.bf16 %v6680_v46, %v6680_v46 }
0x11b0   : > { %7057 = vmatpush.bf16.msra.mxu0 %v10371_v62 }
0x11b2   : > { %v10740_v48 = vpop.eup %10739 }
0x11b3   : > { %9783 = vmatmul.msk.bf16.vlgmr.msrb.gmra.mxu3 %vm4552_vm13, %v6586_v49  ;;  %v6780_v20 = vpop.xlane.xlu0 %6779  ;;  %v6783_v61 = vmul.f32 %v10740_v48, %v13077_v37  ;;  %v10393_v37 = vld [vmem:[%s11773_s14 + $0x2b0] sm:$0xff] }
0x11b4   : > { %6823 = vmatpush.bf16.msrb.mxu3 %v6814_v23  ;;  %10741 = vrcp.f32 %v6780_v20  ;;  %v10395_v23 = vld [vmem:[%s11773_s14 + $0x2c0] sm:$0xff] }
0x11b5   : > { %v6785_v5 = vpack.c.bf16 %v6783_v61, %v6783_v61 }
0x11ba   : > { %v10742_v54 = vpop.eup %10741 }
0x11bb   : > { %9784 = vmatmul.msk.bf16.vlgmr.msra.gmra.mxu2 %vm4552_vm13, %v6681_v6  ;;  %v6784_v55 = vmul.f32 %v10742_v54, %v13081_v53  ;;  %v10379_v53 = vld [vmem:[%s11773_s14 + $0x240] sm:$0xff] }
0x11bc   : > { %7078 = vmatpush.bf16.msra.mxu2 %v10394_v2  ;;  %7071 = vmatpush.bf16.msra.mxu1 %v10379_v53 }
0x11bd   : > { %v6786_v14 = vpack.c.bf16 %v6784_v55, %v6784_v55 }
0x11c0   : > { %7079 = vmatpush.bf16.msra.mxu2 %v10393_v37 }
0x11c3   : > { %9785 = vmatmul.msk.bf16.vlgmr.msra.gmra.mxu3 %vm4552_vm13, %v6682_v28 }
0x11c4   : > { %7080 = vmatpush.bf16.msra.mxu2 %v10392_v63  ;;  %7092 = vmatpush.bf16.msra.mxu3 %v10402_v8 }
0x11c8   : > { %7081 = vmatpush.bf16.msra.mxu2 %v10391_v42  ;;  %7093 = vmatpush.bf16.msra.mxu3 %v10401_v11 }
0x11cb   : > { %9786 = vmatmul.msk.bf16.vlgmr.msrb.gmra.mxu2 %vm4552_vm13, %v6785_v5 }
0x11cc   : > { %7082 = vmatpush.bf16.msra.mxu2 %v10390_v7  ;;  %7094 = vmatpush.bf16.msra.mxu3 %v10400_v1 }
0x11d0   : > { %7083 = vmatpush.bf16.msra.mxu2 %v10389_v27  ;;  %7095 = vmatpush.bf16.msra.mxu3 %v10399_v17  ;;  %v10410_v17 = vld [vmem:[%s11778_s6 + $0xb8] sm:$0xff] }
0x11d1   : > { %7216 = vmatpush.bf16.msrb.mxu0 %v10410_v17  ;;  %v10413_v17 = vld [vmem:[%s11783_s29 + $0x90] sm:$0xff] }
0x11d3   : > { %9787 = vmatmul.msk.bf16.vlgmr.msrb.gmra.mxu3 %vm4552_vm13, %v6786_v14 }
0x11d4   : > { %7084 = vmatpush.bf16.msra.mxu2 %v10388_v30  ;;  %7096 = vmatpush.bf16.msra.mxu3 %v10398_v60  ;;  %v10406_v60 = vld [vmem:[%s11778_s6 + $0x98] sm:$0xff] }
0x11d8   : > { %7085 = vmatpush.bf16.msra.mxu2 %v10387_v16  ;;  %7097 = vmatpush.bf16.msra.mxu3 %v10397_v44  ;;  %v10405_v44 = vld [vmem:[%s11778_s6 + $0x90] sm:$0xff] }
0x11dc   : > { %7098 = vmatpush.bf16.msra.mxu3 %v10396_v41  ;;  %v10403_v41 = vld [vmem:[%s11778_s6 + $0x80] sm:$0xff] }
0x11e0   : > { %7099 = vmatpush.bf16.msra.mxu3 %v10395_v23 }
0x121e   : > { %v6498_v22 = vpop.f32.mrf.mxu2 }
0x121f   : > { %v6521_v13 = vpack.c.bf16 %v6498_v22, %v6498_v22 }
0x1221   : > { %v6839_v9 = vunpack.c.l.b16 %v6521_v13 }
0x1226   : > { %v6500_v18 = vpop.f32.mrf.mxu2  ;;  %v6517_v21 = vpop.f32.mrf.mxu3 }
0x1227   : > { %v6522_v35 = vpack.c.bf16 %v6517_v21, %v6517_v21 }
0x1229   : > { %v6843_v58 = vunpack.c.l.b16 %v6522_v35 }
0x122b   : > { %v6850_v38 = vpack.c.b16 %v6843_v58, %v6839_v9 }
0x122d   : > { %7058 = vmatmul.bf16.vlgmr.msra.gmra.mxu0 %v6850_v38  ;;  %v10409_v38 = vld [vmem:[%s11778_s6 + $0xb0] sm:$0xff] }
0x122e   : > { %v6519_v26 = vpop.f32.mrf.mxu3  ;;  %v6604_v56 = vpop.f32.mrf.mxu2  ;;  %7217 = vmatpush.bf16.msrb.mxu0 %v10409_v38 }
0x122f   : > { %v6629_v40 = vpack.c.bf16 %v6604_v56, %v6604_v56  ;;  %v10408_v26 = vld [vmem:[%s11778_s6 + $0xa8] sm:$0xff]  ;;  %v10407_v56 = vld [vmem:[%s11778_s6 + $0xa0] sm:$0xff] }
0x1231   : > { %v6840_v3 = vunpack.c.l.b16 %v6629_v40 }
0x1232   : > { %7218 = vmatpush.bf16.msrb.mxu0 %v10408_v26 }
0x1236   : > { %v6606_v57 = vpop.f32.mrf.mxu2  ;;  %v6625_v32 = vpop.f32.mrf.mxu3  ;;  %7219 = vmatpush.bf16.msrb.mxu0 %v10407_v56 }
0x1237   : > { %v6630_v49 = vpack.c.bf16 %v6625_v32, %v6625_v32  ;;  %v10404_v57 = vld [vmem:[%s11778_s6 + $0x88] sm:$0xff] }
0x1239   : > { %v6844_v47 = vunpack.c.l.b16 %v6630_v49 }
0x123a   : > { %7220 = vmatpush.bf16.msrb.mxu0 %v10406_v60 }
0x123b   : > { %v6851_v31 = vpack.c.b16 %v6844_v47, %v6840_v3 }
0x123d   : > { %7072 = vmatmul.bf16.vlgmr.msra.gmra.mxu1 %v6851_v31 }
0x123e   : > { %v6627_v0 = vpop.f32.mrf.mxu3  ;;  %v6698_v15 = vpop.f32.mrf.mxu2  ;;  %7221 = vmatpush.bf16.msrb.mxu0 %v10405_v44 }
0x123f   : > { %v6721_v6 = vpack.c.bf16 %v6698_v15, %v6698_v15 }
0x1241   : > { %v6841_v46 = vunpack.c.l.b16 %v6721_v6 }
0x1242   : > { %7222 = vmatpush.bf16.msrb.mxu0 %v10404_v57 }
0x1246   : > { %v6700_v43 = vpop.f32.mrf.mxu2  ;;  %v6717_v45 = vpop.f32.mrf.mxu3  ;;  %7223 = vmatpush.bf16.msrb.mxu0 %v10403_v41 }
0x1247   : > { %v6722_v51 = vpack.c.bf16 %v6717_v45, %v6717_v45 }
0x1249   : > { %v6845_v33 = vunpack.c.l.b16 %v6722_v51 }
0x124b   : > { %v6852_v28 = vpack.c.b16 %v6845_v33, %v6841_v46 }
0x124d   : > { %7086 = vmatmul.bf16.vlgmr.msra.gmra.mxu2 %v6852_v28 }
0x124e   : > { %v6719_v20 = vpop.f32.mrf.mxu3  ;;  %v6804_v48 = vpop.f32.mrf.mxu2 }
0x124f   : > { %v6829_v61 = vpack.c.bf16 %v6804_v48, %v6804_v48  ;;  %v10599_v48 = vld [vmem:[%s11749_s25 + $0x2] ss:$0 sm:$0xff] }
0x1251   : > { %v6842_v14 = vunpack.c.l.b16 %v6829_v61 }
0x1256   : > { %v6806_v5 = vpop.f32.mrf.mxu2  ;;  %v6825_v54 = vpop.f32.mrf.mxu3 }
0x1257   : > { %v6830_v55 = vpack.c.bf16 %v6825_v54, %v6825_v54 }
0x1259   : > { %v6846_v10 = vunpack.c.l.b16 %v6830_v55  ;;  %v10600_v55 = vld [vmem:[%s11776_s4 + $0x2] ss:$0 sm:$0xff] }
0x125b   : > { %v6853_v4 = vpack.c.b16 %v6846_v10, %v6842_v14 }
0x125d   : > { %7100 = vmatmul.bf16.vlgmr.msra.gmra.mxu3 %v6853_v4 }
0x125e   : > { %v6827_v36 = vpop.f32.mrf.mxu3 }
0x12aa   : > { %v7059_v52 = vpop.f32.mrf.mxu0 }
0x12ab   : > { %v7060_v19 = vadd.f32 %v10598_v29, %v7059_v52 }
0x12b2   : > { %v7061_v25 = vpop.f32.mrf.mxu0 }
0x12b3   : > { %v7062_v53 = vadd.f32 %v10598_v29, %v7061_v25 }
0x12ba   : > { %v7073_v12 = vpop.f32.mrf.mxu1 }
0x12bb   : > { %v7074_v24 = vadd.f32 %v7073_v12, %v7060_v19  ;;  %v10601_v12 = vld [vmem:[%s11781_s24 + $0x2] ss:$0 sm:$0xff] }
0x12c2   : > { %v7075_v63 = vpop.f32.mrf.mxu1 }
0x12c3   : > { %v7076_v7 = vadd.f32 %v7075_v63, %v7062_v53  ;;  %v10417_v63 = vld [vmem:[%s11783_s29 + $0xb0] sm:$0xff] }
0x12d0   : > { %v7087_v62 = vpop.f32.mrf.mxu2 }
0x12d1   : > { %v7088_v2 = vadd.f32 %v7087_v62, %v7074_v24 }
0x12d8   : > { %v7089_v22 = vpop.f32.mrf.mxu2 }
0x12d9   : > { %v7090_v8 = vadd.f32 %v7089_v22, %v7076_v7 }
0x12e0   : > { %v7101_v37 = vpop.f32.mrf.mxu3 }
0x12e1   : > { %v7102_v59 = vadd.f32 %v7101_v37, %v7088_v2  ;;  %v10418_v2 = vld [vmem:[%s11783_s29 + $0xb8] sm:$0xff] }
0x12e2   : > { %7362 = vmatpush.bf16.msrb.mxu1 %v10418_v2 }
0x12e3   : > { %v13145_v42 = vadd.f32 %v7102_v59, %v12779_v50 }
0x12e5   : > { %7112 = vadd.xlane.f32.xlu1 %v13145_v42 }
0x12e6   : > { %7363 = vmatpush.bf16.msrb.mxu1 %v10417_v63 }
0x12e8   : > { %v7103_v27 = vpop.f32.mrf.mxu3 }
0x12e9   : > { %v7104_v11 = vadd.f32 %v7103_v27, %v7090_v8  ;;  %v10416_v8 = vld [vmem:[%s11783_s29 + $0xa8] sm:$0xff] }
0x12ea   : > { %7364 = vmatpush.bf16.msrb.mxu1 %v10416_v8 }
0x12eb   : > { %v13149_v13 = vadd.f32 %v7104_v11, %v12783_v39 }
0x12ed   : > { %7114 = vadd.xlane.f32.xlu2 %v13149_v13 }
0x1358   : > { %v7113_v18 = vpop.xlane.xlu1 %7112 }
0x1359   : > { %v7116_v21 = vmul.f32 0.03125, %v7113_v18  ;;  %v10415_v18 = vld [vmem:[%s11783_s29 + $0xa0] sm:$0xff] }
0x135a   : > { %7365 = vmatpush.bf16.msrb.mxu1 %v10415_v18 }
0x135b   : > { %v7118_v50 = vsub.f32 %v13145_v42, %v7116_v21 }
0x135d   : > { %v7120_v30 = vsel %vm1683_vm0, %v7118_v50, 0.0 }
0x135e   : > { %v7122_v1 = vmul.f32 %v7120_v30, %v7120_v30 }
0x1360   : > { %v7115_v35 = vpop.xlane.xlu2 %7114  ;;  %7124 = vadd.xlane.f32.xlu0 %v7122_v1 }
0x1361   : > { %v7117_v9 = vmul.f32 0.03125, %v7115_v35  ;;  %v10414_v35 = vld [vmem:[%s11783_s29 + $0x98] sm:$0xff] }
0x1362   : > { %7366 = vmatpush.bf16.msrb.mxu1 %v10414_v35 }
0x1363   : > { %v7119_v39 = vsub.f32 %v13149_v13, %v7117_v9 }
0x1365   : > { %v7121_v58 = vsel %vm1683_vm0, %v7119_v39, 0.0 }
0x1366   : > { %v7123_v16 = vmul.f32 %v7121_v58, %v7121_v58  ;;  %7367 = vmatpush.bf16.msrb.mxu1 %v10413_v17 }
0x1368   : > { %7126 = vadd.xlane.f32.xlu1 %v7123_v16 }
0x13d3   : > { %v7125_v40 = vpop.xlane.xlu0 %7124 }
0x13d4   : > { %v7128_v34 = vmul.f32 0.03125, %v7125_v40 }
0x13d6   : > { %v7130_v32 = vadd.f32 1e-05, %v7128_v34  ;;  %v10412_v34 = vld [vmem:[%s11783_s29 + $0x88] sm:$0xff] }
0x13d7   : > { %7368 = vmatpush.bf16.msrb.mxu1 %v10412_v34 }
0x13d8   : > { %10743 = vrsqrt.f32 %v7130_v32  ;;  %vm7138_vm12 = vweird.f32 %v7130_v32 }
0x13db   : > { %v7127_v49 = vpop.xlane.xlu1 %7126 }
0x13dc   : > { %v7129_v3 = vmul.f32 0.03125, %v7127_v49 }
0x13de   : > { %v10744_v47 = vpop.eup %10743  ;;  %v7131_v23 = vadd.f32 1e-05, %v7129_v3 }
0x13df   : > { %v7133_v31 = vmul.f32 %v10744_v47, %v7130_v32  ;;  %vm7139_vm0 = vweird.f32 %v10744_v47 }
0x13e0   : > { %10745 = vrsqrt.f32 %v7131_v23  ;;  %vm7140_vm13 = vmor %vm7138_vm12, %vm7139_vm0  ;;  %vm7148_vm9 = vweird.f32 %v7131_v23 }
0x13e1   : > { %v7134_v0 = vmul.f32 %v10744_v47, %v7133_v31 }
0x13e3   : > { %v7135_v15 = vmul.f32 0.5, %v7134_v0  ;;  %v10411_v0 = vld [vmem:[%s11783_s29 + $0x80] sm:$0xff] }
0x13e4   : > { %7369 = vmatpush.bf16.msrb.mxu1 %v10411_v0 }
0x13e5   : > { %v7136_v6 = vsub.f32 1.5, %v7135_v15 }
0x13e6   : > { %v10746_v43 = vpop.eup %10745 }
0x13e7   : > { %v7137_v45 = vmul.f32 %v10744_v47, %v7136_v6  ;;  %v7143_v51 = vmul.f32 %v10746_v43, %v7131_v23  ;;  %vm7149_vm8 = vweird.f32 %v10746_v43 }
0x13e8   : > { %vm7150_vm10 = vmor %vm7148_vm9, %vm7149_vm8 }
0x13e9   : > { %v7144_v46 = vmul.f32 %v10746_v43, %v7143_v51  ;;  %v7141_v33 = vsel %vm7140_vm13, %v10744_v47, %v7137_v45 }
0x13ea   : > { %v7152_v61 = vmul.f32 %v7141_v33, %v7120_v30 }
0x13eb   : > { %v7145_v28 = vmul.f32 0.5, %v7144_v46 }
0x13ec   : > { %v7157_v14 = vmul.f32 %v10599_v48, %v7152_v61 }
0x13ed   : > { %v7146_v20 = vsub.f32 1.5, %v7145_v28 }
0x13ee   : > { %v7162_v36 = vadd.f32 %v10600_v55, %v7157_v14 }
0x13ef   : > { %v7147_v5 = vmul.f32 %v10746_v43, %v7146_v20 }
0x13f1   : > { %v7151_v54 = vsel %vm7150_vm10, %v10746_v43, %v7147_v5 }
0x13f2   : > { %v7153_v10 = vmul.f32 %v7151_v54, %v7121_v58 }
0x13f4   : > { %v7158_v4 = vmul.f32 %v10599_v48, %v7153_v10 }
0x13f6   : > { %v7163_v52 = vadd.f32 %v10600_v55, %v7158_v4 }
0x13f8   : > { %v7164_v29 = vpack.c.bf16 %v7163_v52, %v7162_v36 }
0x13fa   : > { %7224 = vmatmul.bf16.vlgmr.msrb.gmra.mxu0 %v7164_v29 }
0x1477   : > { %v7225_v62 = vpop.f32.mrf.mxu0 }
0x1478   : > { %v13169_v19 = vadd.f32 %v10601_v12, %v7225_v62 }
0x147a   : > { %v13172_v24 = vmul.f32 0.70710677, %v13169_v19 }
0x147c   : > { %v7234_v25 = vand.u32 2147483647, %v13172_v24  ;;  %vm7300_vm6 = vcmp.ge.f32.partialorder %v13172_v24, 0.0 }
0x147e   : > { %v7236_v37 = vmul.f32 0.3275911, %v7234_v25  ;;  %v7288_v44 = vsub.f32 0.0, %v7234_v25 }
0x147f   : > { %v7227_v59 = vpop.f32.mrf.mxu0 }
0x1480   : > { %v7238_v53 = vadd.f32 1.0, %v7236_v37  ;;  %v13177_v22 = vadd.f32 %v10601_v12, %v7227_v59  ;;  %v7290_v3 = vmul.f32 %v7288_v44, %v7234_v25 }
0x1482   : > { %10747 = vrcp.f32 %v7238_v53  ;;  %v13180_v7 = vmul.f32 0.70710677, %v13177_v22  ;;  %v7251_v9 = vand.u32 2147483648, %v7238_v53  ;;  %v7249_v58 = vand.u32 2147483647, %v7238_v53 }
0x1483   : > { %vm7245_vm14 = vweird.f32 %v7238_v53  ;;  %v7292_v45 = vmul.f32 1.442695, %v7290_v3 }
0x1484   : > { %v7235_v27 = vand.u32 2147483647, %v13180_v7  ;;  %v7252_v38 = vor.u32 1.1754944e-38, %v7251_v9  ;;  %vm7250_vm1 = vcmp.eq.f32.partialorder %v7249_v58, 8.507059e+37  ;;  %vm7301_vm7 = vcmp.ge.f32.partialorder %v13180_v7, 0.0 }
0x1486   : > { %v7237_v11 = vmul.f32 0.3275911, %v7235_v27  ;;  %v7289_v28 = vsub.f32 0.0, %v7235_v27 }
0x1488   : > { %v10748_v21 = vpop.eup %10747  ;;  %v7239_v30 = vadd.f32 1.0, %v7237_v11  ;;  %v7291_v54 = vmul.f32 %v7289_v28, %v7235_v27 }
0x1489   : > { %v7241_v50 = vmul.f32 %v10748_v21, %v7238_v53  ;;  %vm7246_vm11 = vweird.f32 %v10748_v21 }
0x148a   : > { %10749 = vrcp.f32 %v7239_v30  ;;  %vm7247_vm15 = vmor %vm7245_vm14, %vm7246_vm11  ;;  %v7266_v49 = vand.u32 2147483648, %v7239_v30  ;;  %v7264_v23 = vand.u32 2147483647, %v7239_v30  ;;  %vm7260_vm3 = vweird.f32 %v7239_v30 }
0x148b   : > { %v7242_v1 = vsub.f32 1.0, %v7241_v50  ;;  %10751 = vpow2.f32 %v7292_v45  ;;  %v7294_v36 = vmul.f32 1.442695, %v7291_v54 }
0x148c   : > { %v7267_v43 = vor.u32 1.1754944e-38, %v7266_v49  ;;  %vm7265_vm5 = vcmp.eq.f32.partialorder %v7264_v23, 8.507059e+37 }
0x148d   : > { %v7243_v39 = vmul.f32 %v10748_v21, %v7242_v1  ;;  %10753 = vpow2.f32 %v7294_v36  ;;  %v7231_v1 = vmul.f32 0.5, %v13177_v22 }
0x148f   : > { %v7244_v16 = vadd.f32 %v10748_v21, %v7243_v39 }
0x1490   : > { %v10750_v26 = vpop.eup %10749 }
0x1491   : > { %v7248_v56 = vsel %vm7247_vm15, %v10748_v21, %v7244_v16  ;;  %v7256_v40 = vmul.f32 %v10750_v26, %v7239_v30  ;;  %vm7261_vm2 = vweird.f32 %v10750_v26  ;;  %v10752_v52 = vpop.eup %10751  ;;  %v7230_v30 = vmul.f32 0.5, %v13169_v19  ;;  %v10602_v16 = vld [vmem:[%s11754_s21 + $0x2] ss:$0 sm:$0xff] }
0x1492   : > { %v7253_v60 = vsel %vm7250_vm1, %v7252_v38, %v7248_v56  ;;  %vm7262_vm4 = vmor %vm7260_vm3, %vm7261_vm2 }
0x1493   : > { %v7270_v57 = vmul.f32 1.0614054, %v7253_v60  ;;  %v7257_v32 = vsub.f32 1.0, %v7256_v40  ;;  %v10754_v53 = vpop.eup %10753 }
0x1495   : > { %v7272_v41 = vadd.f32 -1.4531521, %v7270_v57  ;;  %v7258_v47 = vmul.f32 %v10750_v26, %v7257_v32 }
0x1497   : > { %v7274_v31 = vmul.f32 %v7272_v41, %v7253_v60  ;;  %v7259_v15 = vadd.f32 %v10750_v26, %v7258_v47 }
0x1499   : > { %v7276_v6 = vadd.f32 1.4214138, %v7274_v31  ;;  %v7263_v51 = vsel %vm7262_vm4, %v10750_v26, %v7259_v15 }
0x149a   : > { %v7268_v33 = vsel %vm7265_vm5, %v7267_v43, %v7263_v51 }
0x149b   : > { %v7278_v46 = vmul.f32 %v7276_v6, %v7253_v60  ;;  %v7271_v20 = vmul.f32 1.0614054, %v7268_v33 }
0x149d   : > { %v7280_v48 = vadd.f32 -0.28449672, %v7278_v46  ;;  %v7273_v61 = vadd.f32 -1.4531521, %v7271_v20 }
0x149f   : > { %v7282_v5 = vmul.f32 %v7280_v48, %v7253_v60  ;;  %v7275_v55 = vmul.f32 %v7273_v61, %v7268_v33 }
0x14a1   : > { %v7284_v14 = vadd.f32 0.2548296, %v7282_v5  ;;  %v7277_v10 = vadd.f32 1.4214138, %v7275_v55 }
0x14a3   : > { %v7286_v4 = vmul.f32 %v7284_v14, %v7253_v60  ;;  %v7279_v29 = vmul.f32 %v7277_v10, %v7268_v33 }
0x14a5   : > { %v7296_v12 = vmul.f32 %v10752_v52, %v7286_v4  ;;  %v7281_v62 = vadd.f32 -0.28449672, %v7279_v29 }
0x14a7   : > { %v7298_v2 = vsub.f32 1.0, %v7296_v12  ;;  %v7283_v25 = vmul.f32 %v7281_v62, %v7268_v33 }
0x14a9   : > { %v7285_v37 = vadd.f32 0.2548296, %v7283_v25  ;;  %v7302_v59 = vsub.f32 0.0, %v7298_v2 }
0x14ab   : > { %v7287_v63 = vmul.f32 %v7285_v37, %v7268_v33  ;;  %v7304_v27 = vsel %vm7300_vm6, %v7298_v2, %v7302_v59 }
0x14ac   : > { %v7306_v21 = vadd.f32 1.0, %v7304_v27 }
0x14ad   : > { %v7297_v8 = vmul.f32 %v10754_v53, %v7287_v63 }
0x14ae   : > { %v7308_v9 = vmul.f32 %v7306_v21, %v7230_v30 }
0x14af   : > { %v7299_v11 = vsub.f32 1.0, %v7297_v8 }
0x14b1   : > { %v7303_v18 = vsub.f32 0.0, %v7299_v11 }
0x14b3   : > { %v7305_v50 = vsel %vm7301_vm7, %v7299_v11, %v7303_v18 }
0x14b4   : > { %v7307_v35 = vadd.f32 1.0, %v7305_v50 }
0x14b6   : > { %v7309_v39 = vmul.f32 %v7307_v35, %v7231_v1 }
0x14b8   : > { %v7310_v58 = vpack.c.bf16 %v7309_v39, %v7308_v9 }
0x14ba   : > { %7370 = vmatmul.bf16.vlgmr.msrb.gmra.mxu1 %v7310_v58 }
0x1537   : > { %v7371_v17 = vpop.f32.mrf.mxu1 }
0x1538   : > { %v7372_v38 = vadd.f32 %v10602_v16, %v7371_v17 }
0x153a   : > { %v7376_v24 = vadd.f32 %v7372_v38, %v13145_v42 }
0x153c   : > { %7378 = vst [vmem:[#allocation2] sm:$0xff] %v7376_v24 }
0x153f   : > { %v7373_v26 = vpop.f32.mrf.mxu1 }
0x1540   : > { %v7374_v56 = vadd.f32 %v10602_v16, %v7373_v26  ;;  %7383 = sbr.rel (%p9982_p4) target bundleno = 5453 (0x154d), region = 176 }
0x1542   : > { %v7377_v7 = vadd.f32 %v7374_v56, %v13149_v13 }
0x1544   : > { %7379 = vst [vmem:[#allocation2 + $0x8] sm:$0xff] %v7377_v7 }
0x1545   : > { %v7384_v19 = vld [vmem:[#allocation2] sm:$0xff] }
0x1546   : > { %7386 = vst [vmem:[#allocation23] sm:$0xff] %v7384_v19 }
0x154b   : > { %v7385_v22 = vld [vmem:[#allocation2 + $0x8] sm:$0xff] }
0x154c   : > { %7387 = vst [vmem:[#allocation23 + $0x8] sm:$0xff] %v7385_v22 }
0x154d PF: > { %s13309_s5 = sld [smem:[#allocation33_spill]]  ;;  %s11340_s2 = smov [#allocation23]  }
0x154e   : > { %s13310_s19 = sld [smem:[#allocation50_spill]]  ;;  %s7396_s25 = sshll.u32 %s11340_s2, 4  ;;  %s7397_s25 = int_to_ptr.vmem [resolvable:$true] %s7396_s25 }
0x154f   : > { %s11341_s21 = smov 128   ;;  %s11342_s18 = smov 8  }
0x1553   : > { %p10516_p5 = scmp.eq.s32.totalorder %s13309_s5, 1 }
0x1554   : > { %s7398_s30 = sshll.u32 %s13310_s19, 4  ;;  %s7399_s30 = int_to_ptr.hbm [resolvable:$true] %s7398_s30 }
0x1555   : > { %10502 = dma.vmem_to_hbm [thread:$0]  (%p10516_p5), %s7397_s25, 256, %s7399_s30, [#allocation5], %s11341_s21, %s11341_s21, %s11342_s18  }
0x1556   : > { %11302 = dma.done.wait (%p10516_p5), [#allocation5], 256  }
0x1557   : > { %11304 = vsyncadd (%p10516_p5), [#allocation5], 4294967040 }
0x1558 PF: > { %s13311_s27 = sld [smem:[#allocation32_spill]] }
0x1559   : > { %s13312_s1 = sld [smem:[#allocation28_spill]] }
0x155a   : > { %s13313_s22 = sld [smem:[#allocation29_spill]] }
0x155b   : > { %s13314_s23 = sld [smem:[#allocation36_spill]] }
0x155c   : > { %s13315_s24 = sld [smem:[#allocation31_spill]] }
0x155d   : > { %s13316_s2 = sld [smem:[#allocation34_spill]] }
0x155e   : > { %s33_s25 = sadd.s32 1, %s13311_s27  }
0x155f   : > { %p30_p6 = scmp.ge.s32.totalorder %s33_s25, 4  }
0x1561   :  { %32 = sbr.rel (!%p30_p6) target bundleno = 19 (0x13), region = 350 }
0x1566   :  { %7415 = vsyncpa [#allocation4], 1 }
0x1567   :  { %7417 = vsyncpa [#allocation4 + $0x1], 1 }
0x1568   :  { %7418 = vsyncpa [#allocation7], 1 }
0x1569   :  { %7419 = vsyncpa [#allocation5], 1 }
0x156a   :  { %7421 = vsyncpa [#allocation5 + $0x1], 1 }

</bundles_post_ra>
